<compile_context>
chip_gen: v7x
topology: tpu7x:2x2x1
jax: 0.10.0
libtpu: 0.0.40
codegen_flags: <defaults>
</compile_context>

<pallas_src>
import functools

import jax
import jax.numpy as jnp
from jax.experimental import pallas as pl
from jax.experimental.pallas import tpu as pltpu


def _apply_gates(gates, c, H):
    """PyTorch gate order (i, f, g, o) -> (h_new, c_new)."""
    i = jax.nn.sigmoid(gates[:, 0 * H:1 * H])
    f = jax.nn.sigmoid(gates[:, 1 * H:2 * H])
    g = jnp.tanh(gates[:, 2 * H:3 * H])
    o = jax.nn.sigmoid(gates[:, 3 * H:4 * H])
    c_new = f * c + i * g
    h_new = o * jnp.tanh(c_new)
    return h_new, c_new


def _fused_cell(inp, h, c, w_ref, b, H):
    """gates = [h | inp] @ [W_hh^T ; W_x] + b -- one MXU issue per cell."""
    hx = jnp.concatenate([h, inp], axis=-1)                 # [B, 2H]
    gates = jnp.dot(hx, w_ref[...], preferred_element_type=jnp.float32) + b
    return _apply_gates(gates, c, H)


def _leap_uncertainty_kernel(
    x_ref,                      # [T_in*B, Dp]  time-major, lane-padded
    e_w0x, e_b0, e_w0h,         # enc L0: x-path weight [Dp,4H], fused bias, h-path [H,4H]
    e_w1, e_b1,                 # enc L1: fused [2H,4H], bias
    d_w0x, d_b0,                # dec L0 step-0 x-path [Dp,4H] + plain bias
    d_w0f, d_b0f,               # dec L0 t>0: fused [W_hh^T ; W_mu-fold] [2H,4H], folded bias
    d_w1, d_b1,                 # dec L1: fused [2H,4H], bias
    w_head, b_head,             # fc head [H, 2*Dp], [1, 2*Dp]
    stats_ref,                  # [T_out*B, 2*Dp]
    *, T_in, T_out, H, B,
):
    # Recurrent state lives in registers (loop-carried values), not VMEM.
    h0 = jnp.zeros((B, H), jnp.float32)
    c0 = jnp.zeros((B, H), jnp.float32)
    h1 = jnp.zeros((B, H), jnp.float32)
    c1 = jnp.zeros((B, H), jnp.float32)

    x_all = x_ref[...]                                       # [T_in*B, Dp]

    # ---- encoder layer-0 x-path hoisted off the recurrence: one M=T_in*B matmul,
    #      layer-0 bias folded in.
    xw = jnp.dot(x_all, e_w0x[...], preferred_element_type=jnp.float32) + e_b0[...]

    be1 = e_b1[...]
    for t in range(T_in):                                    # fully unrolled (static, small)
        g0 = (jnp.dot(h0, e_w0h[...], preferred_element_type=jnp.float32)
              + xw[t * B:(t + 1) * B])
        h0, c0 = _apply_gates(g0, c0, H)
        h1, c1 = _fused_cell(h0, h1, c1, e_w1, be1, H)

    # ---- decoder ----
    bd0f = d_b0f[...]
    bd1 = d_b1[...]

    # step 0: input is x[T_in-1]; its x-path gate contribution (+ plain bias) is
    # precomputed off the serial chain.
    x_last = x_all[(T_in - 1) * B:T_in * B]
    gx0 = jnp.dot(x_last, d_w0x[...], preferred_element_type=jnp.float32) + d_b0[...]
    g0 = jnp.dot(h0, d_w0f[pl.ds(0, H), :],                  # W_hh_d0^T rows of fused weight
                 preferred_element_type=jnp.float32) + gx0
    h0, c0 = _apply_gates(g0, c0, H)
    h1, c1 = _fused_cell(h0, h1, c1, d_w1, bd1, H)
    h1_steps = [h1]

    # steps t>0: mu-feedback folded -> layer 0 consumes [h0 | h1_prev] directly.
    for _ in range(1, T_out):
        h1_prev = h1
        h0, c0 = _fused_cell(h1_prev, h0, c0, d_w0f, bd0f, H)
        h1, c1 = _fused_cell(h0, h1, c1, d_w1, bd1, H)
        h1_steps.append(h1)

    # ---- batched fc head: one M=T_out*B matmul + one lane-dense slab store ----
    h1_all = jnp.concatenate(h1_steps, axis=0)               # [T_out*B, H]
    stats = jnp.dot(h1_all, w_head[...], preferred_element_type=jnp.float32) + b_head[...]
    stats_ref[...] = stats


def _pack_params(params, D, Dp):
    """PyTorch-layout params -> fused / folded / transposed / lane-padded operands."""
    (e_wih0, e_whh0, e_bih0, e_bhh0, e_wih1, e_whh1, e_bih1, e_bhh1,
     d_wih0, d_whh0, d_bih0, d_bhh0, d_wih1, d_whh1, d_bih1, d_bhh1,
     fc_w, fc_b) = params
    hi = jax.lax.Precision.HIGHEST

    def pad_rows(w, rows):
        return jnp.pad(w, ((0, rows - w.shape[0]), (0, 0)))

    # encoder layer 0: x-path hoisted (bias folded there), h-path per step
    e_w0x = pad_rows(e_wih0.T, Dp)                            # [Dp, 4H]
    e_b0 = (e_bih0 + e_bhh0)[None, :]                         # [1, 4H]
    e_w0h = e_whh0.T                                          # [H, 4H]

    # encoder layer 1: fused [W_hh^T ; W_ih^T]
    e_w1 = jnp.concatenate([e_whh1.T, e_wih1.T], axis=0)      # [2H, 4H]
    e_b1 = (e_bih1 + e_bhh1)[None, :]

    # decoder layer 0, step 0 (input = x[T_in-1])
    d_w0x = pad_rows(d_wih0.T, Dp)                            # [Dp, 4H]
    d_b0 = (d_bih0 + d_bhh0)[None, :]

    # decoder layer 0, steps > 0: fold mu = h1 @ fc_w_mu^T + fc_b_mu into W_ih
    w_comp = jnp.dot(fc_w[:D].T, d_wih0.T, precision=hi)      # [H, 4H]
    b_comp = jnp.dot(fc_b[:D], d_wih0.T, precision=hi)        # [4H]
    d_w0f = jnp.concatenate([d_whh0.T, w_comp], axis=0)       # [2H, 4H]
    d_b0f = (d_bih0 + d_bhh0 + b_comp)[None, :]

    # decoder layer 1
    d_w1 = jnp.concatenate([d_whh1.T, d_wih1.T], axis=0)      # [2H, 4H]
    d_b1 = (d_bih1 + d_bhh1)[None, :]

    # fc head: (mu | logvar) halves, each lane-padded to Dp, one combined matmul
    w_head = jnp.concatenate(
        [jnp.pad(fc_w[:D].T, ((0, 0), (0, Dp - D))),
         jnp.pad(fc_w[D:].T, ((0, 0), (0, Dp - D)))], axis=1)  # [H, 2*Dp]
    b_head = jnp.concatenate(
        [jnp.pad(fc_b[:D], (0, Dp - D)),
         jnp.pad(fc_b[D:], (0, Dp - D))])[None, :]             # [1, 2*Dp]

    return (e_w0x, e_b0, e_w0h, e_w1, e_b1,
            d_w0x, d_b0, d_w0f, d_b0f, d_w1, d_b1,
            w_head, b_head)


def leap_uncertainty(x, params, *, T_out):
    """x: [B, T_in, D] -> (mu [B, T_out, D], logvar [B, T_out, D])."""
    B, T_in, D = x.shape
    H = params[1].shape[1]                                    # e_whh0: [4H, H]
    Dp = ((D + 127) // 128) * 128                             # lane-pad input dim

    packed = _pack_params(params, D, Dp)
    x_tm = jnp.transpose(x, (1, 0, 2)).reshape(T_in * B, D)   # time-major, flat
    x_tm = jnp.pad(x_tm, ((0, 0), (0, Dp - D)))               # [T_in*B, Dp]

    kernel = functools.partial(_leap_uncertainty_kernel,
                               T_in=T_in, T_out=T_out, H=H, B=B)
    vmem = pl.BlockSpec(memory_space=pltpu.MemorySpace.VMEM)

    stats = pl.pallas_call(
        kernel,
        out_shape=jax.ShapeDtypeStruct((T_out * B, 2 * Dp), jnp.float32),
        in_specs=[vmem] * (1 + len(packed)),
        out_specs=vmem,
    )(x_tm, *packed)

    mu = stats[:, :D].reshape(T_out, B, D).transpose(1, 0, 2)
    logvar = stats[:, Dp:Dp + D].reshape(T_out, B, D).transpose(1, 0, 2)
    return mu, logvar


def init_params(key, D, H):
    """Deterministic synthetic weights in PyTorch layout, U(-1/sqrt(H), 1/sqrt(H))."""
    bound = float(1.0 / (H ** 0.5))
    keys = jax.random.split(key, 18)

    def u(kk, shape):
        return jax.random.uniform(kk, shape, jnp.float32, -bound, bound)

    return (
        # encoder layer 0: w_ih [4H, D], w_hh [4H, H], b_ih [4H], b_hh [4H]
        u(keys[0], (4 * H, D)), u(keys[1], (4 * H, H)), u(keys[2], (4 * H,)), u(keys[3], (4 * H,)),
        # encoder layer 1
        u(keys[4], (4 * H, H)), u(keys[5], (4 * H, H)), u(keys[6], (4 * H,)), u(keys[7], (4 * H,)),
        # decoder layer 0
        u(keys[8], (4 * H, D)), u(keys[9], (4 * H, H)), u(keys[10], (4 * H,)), u(keys[11], (4 * H,)),
        # decoder layer 1
        u(keys[12], (4 * H, H)), u(keys[13], (4 * H, H)), u(keys[14], (4 * H,)), u(keys[15], (4 * H,)),
        # fc head: weight [2D, H], bias [2D]
        u(keys[16], (2 * D, H)), u(keys[17], (2 * D,)),
    )


def reference(x, params, T_out):
    """Pure-JAX reference mirroring the PyTorch forward pass (f32, HIGHEST precision)."""
    (e_wih0, e_whh0, e_bih0, e_bhh0, e_wih1, e_whh1, e_bih1, e_bhh1,
     d_wih0, d_whh0, d_bih0, d_bhh0, d_wih1, d_whh1, d_bih1, d_bhh1,
     fc_w, fc_b) = params
    B, T_in, D = x.shape
    H = e_whh0.shape[1]
    hi = jax.lax.Precision.HIGHEST

    def cell(xx, h, c, wih, whh, bih, bhh):
        gates = (jnp.dot(xx, wih.T, precision=hi)
                 + jnp.dot(h, whh.T, precision=hi) + bih + bhh)
        i = jax.nn.sigmoid(gates[:, :H])
        f = jax.nn.sigmoid(gates[:, H:2 * H])
        g = jnp.tanh(gates[:, 2 * H:3 * H])
        o = jax.nn.sigmoid(gates[:, 3 * H:])
        c = f * c + i * g
        return o * jnp.tanh(c), c

    h0 = c0 = h1 = c1 = jnp.zeros((B, H), jnp.float32)
    for t in range(T_in):
        h0, c0 = cell(x[:, t], h0, c0, e_wih0, e_whh0, e_bih0, e_bhh0)
        h1, c1 = cell(h0, h1, c1, e_wih1, e_whh1, e_bih1, e_bhh1)

    dec_in = x[:, -1]
    mus, lvs = [], []
    for _ in range(T_out):
        h0, c0 = cell(dec_in, h0, c0, d_wih0, d_whh0, d_bih0, d_bhh0)
        h1, c1 = cell(h0, h1, c1, d_wih1, d_whh1, d_bih1, d_bhh1)
        stats = jnp.dot(h1, fc_w.T, precision=hi) + fc_b
        mu, lv = stats[:, :D], stats[:, D:]
        mus.append(mu)
        lvs.append(lv)
        dec_in = mu
    return jnp.stack(mus, axis=1), jnp.stack(lvs, axis=1)


if __name__ == "__main__":
    B, T_in, T_out, D, H = 2, 8, 8, 3, 128   # small shapes; H = module default

    key = jax.random.PRNGKey(0)
    kx, kp = jax.random.split(key)
    x = jax.random.normal(kx, (B, T_in, D), jnp.float32)
    params = init_params(kp, D, H)

    run = jax.jit(functools.partial(leap_uncertainty, T_out=T_out))
    mu, logvar = run(x, params)
    jax.block_until_ready((mu, logvar))

    mu_ref, lv_ref = reference(x, params, T_out)
    assert mu.shape == (B, T_out, D) and logvar.shape == (B, T_out, D)
    assert jnp.allclose(mu, mu_ref, atol=5e-3, rtol=5e-3)
    assert jnp.allclose(logvar, lv_ref, atol=5e-3, rtol=5e-3)

    print("KERNEL_OK")
</pallas_src>

<mosaic_0001>
module attributes {stable_mosaic.version = 11 : i64} {
  func.func @_leap_uncertainty_kernel(%arg0: memref<16x128xf32, #tpu.memory_space<vmem>>, %arg1: memref<128x512xf32, #tpu.memory_space<vmem>>, %arg2: memref<1x512xf32, #tpu.memory_space<vmem>>, %arg3: memref<128x512xf32, #tpu.memory_space<vmem>>, %arg4: memref<256x512xf32, #tpu.memory_space<vmem>>, %arg5: memref<1x512xf32, #tpu.memory_space<vmem>>, %arg6: memref<128x512xf32, #tpu.memory_space<vmem>>, %arg7: memref<1x512xf32, #tpu.memory_space<vmem>>, %arg8: memref<256x512xf32, #tpu.memory_space<vmem>>, %arg9: memref<1x512xf32, #tpu.memory_space<vmem>>, %arg10: memref<256x512xf32, #tpu.memory_space<vmem>>, %arg11: memref<1x512xf32, #tpu.memory_space<vmem>>, %arg12: memref<128x256xf32, #tpu.memory_space<vmem>>, %arg13: memref<1x256xf32, #tpu.memory_space<vmem>>, %arg14: memref<16x256xf32, #tpu.memory_space<vmem>>) attributes {dimension_semantics = [], scalar_prefetch = 0 : i64, scratch_operands = 0 : i64, tpu.core_type = #tpu.core_type<tc>} {
    %cst = arith.constant 0.000000e+00 : f32
    %0 = vector.broadcast %cst : f32 to vector<2x128xf32>
    %cst_0 = arith.constant 0.000000e+00 : f32
    %1 = vector.broadcast %cst_0 : f32 to vector<2x128xf32>
    %cst_1 = arith.constant 0.000000e+00 : f32
    %2 = vector.broadcast %cst_1 : f32 to vector<2x128xf32>
    %cst_2 = arith.constant 0.000000e+00 : f32
    %3 = vector.broadcast %cst_2 : f32 to vector<2x128xf32>
    %c0 = arith.constant 0 : index
    %c0_3 = arith.constant 0 : index
    %4 = vector.load %arg0[%c0, %c0_3] : memref<16x128xf32, #tpu.memory_space<vmem>>, vector<16x128xf32>
    %c0_4 = arith.constant 0 : index
    %c0_5 = arith.constant 0 : index
    %5 = vector.load %arg1[%c0_4, %c0_5] : memref<128x512xf32, #tpu.memory_space<vmem>>, vector<128x512xf32>
    %cst_6 = arith.constant dense<0.000000e+00> : vector<16x512xf32>
    %6 = tpu.matmul %4, %5, %cst_6 {dimension_numbers = #tpu.dot_dimension_numbers<[1], [0], [0], [1], [0, 0, 1, 1], [], []>} : vector<16x128xf32>, vector<128x512xf32>, vector<16x512xf32> -> vector<16x512xf32>
    %c0_7 = arith.constant 0 : index
    %c0_8 = arith.constant 0 : index
    %7 = vector.load %arg2[%c0_7, %c0_8] : memref<1x512xf32, #tpu.memory_space<vmem>>, vector<1x512xf32>
    %8 = vector.broadcast %7 : vector<1x512xf32> to vector<16x512xf32>
    %9 = arith.addf %6, %8 : vector<16x512xf32>
    %c0_9 = arith.constant 0 : index
    %c0_10 = arith.constant 0 : index
    %10 = vector.load %arg5[%c0_9, %c0_10] : memref<1x512xf32, #tpu.memory_space<vmem>>, vector<1x512xf32>
    %c0_11 = arith.constant 0 : index
    %c0_12 = arith.constant 0 : index
    %11 = vector.load %arg3[%c0_11, %c0_12] : memref<128x512xf32, #tpu.memory_space<vmem>>, vector<128x512xf32>
    %cst_13 = arith.constant dense<0.000000e+00> : vector<2x512xf32>
    %12 = tpu.matmul %0, %11, %cst_13 {dimension_numbers = #tpu.dot_dimension_numbers<[1], [0], [0], [1], [0, 0, 1, 1], [], []>} : vector<2x128xf32>, vector<128x512xf32>, vector<2x512xf32> -> vector<2x512xf32>
    %13 = vector.extract_strided_slice %9 {offsets = [0, 0], sizes = [2, 512], strides = [1, 1]} : vector<16x512xf32> to vector<2x512xf32>
    %14 = arith.addf %12, %13 : vector<2x512xf32>
    %15 = vector.extract_strided_slice %14 {offsets = [0, 0], sizes = [2, 128], strides = [1, 1]} : vector<2x512xf32> to vector<2x128xf32>
    %16 = arith.negf %15 : vector<2x128xf32>
    %17 = math.exp %16 : vector<2x128xf32>
    %cst_14 = arith.constant 1.000000e+00 : f32
    %18 = vector.broadcast %cst_14 : f32 to vector<2x128xf32>
    %19 = arith.addf %18, %17 : vector<2x128xf32>
    %20 = arith.divf %18, %19 : vector<2x128xf32>
    %21 = vector.extract_strided_slice %14 {offsets = [0, 128], sizes = [2, 128], strides = [1, 1]} : vector<2x512xf32> to vector<2x128xf32>
    %22 = arith.negf %21 : vector<2x128xf32>
    %23 = math.exp %22 : vector<2x128xf32>
    %cst_15 = arith.constant 1.000000e+00 : f32
    %24 = vector.broadcast %cst_15 : f32 to vector<2x128xf32>
    %25 = arith.addf %24, %23 : vector<2x128xf32>
    %26 = arith.divf %24, %25 : vector<2x128xf32>
    %27 = vector.extract_strided_slice %14 {offsets = [0, 256], sizes = [2, 128], strides = [1, 1]} : vector<2x512xf32> to vector<2x128xf32>
    %28 = math.tanh %27 : vector<2x128xf32>
    %29 = vector.extract_strided_slice %14 {offsets = [0, 384], sizes = [2, 128], strides = [1, 1]} : vector<2x512xf32> to vector<2x128xf32>
    %30 = arith.negf %29 : vector<2x128xf32>
    %31 = math.exp %30 : vector<2x128xf32>
    %cst_16 = arith.constant 1.000000e+00 : f32
    %32 = vector.broadcast %cst_16 : f32 to vector<2x128xf32>
    %33 = arith.addf %32, %31 : vector<2x128xf32>
    %34 = arith.divf %32, %33 : vector<2x128xf32>
    %35 = arith.mulf %26, %1 : vector<2x128xf32>
    %36 = arith.mulf %20, %28 : vector<2x128xf32>
    %37 = arith.addf %35, %36 : vector<2x128xf32>
    %38 = math.tanh %37 : vector<2x128xf32>
    %39 = arith.mulf %34, %38 : vector<2x128xf32>
    %40 = tpu.concatenate %2, %39 in 1 : vector<2x128xf32>, vector<2x128xf32> -> vector<2x256xf32>
    %c0_17 = arith.constant 0 : index
    %c0_18 = arith.constant 0 : index
    %41 = vector.load %arg4[%c0_17, %c0_18] : memref<256x512xf32, #tpu.memory_space<vmem>>, vector<256x512xf32>
    %cst_19 = arith.constant dense<0.000000e+00> : vector<2x512xf32>
    %42 = tpu.matmul %40, %41, %cst_19 {dimension_numbers = #tpu.dot_dimension_numbers<[1], [0], [0], [1], [0, 0, 1, 1], [], []>} : vector<2x256xf32>, vector<256x512xf32>, vector<2x512xf32> -> vector<2x512xf32>
    %43 = vector.broadcast %10 : vector<1x512xf32> to vector<2x512xf32>
    %44 = arith.addf %42, %43 : vector<2x512xf32>
    %45 = vector.extract_strided_slice %44 {offsets = [0, 0], sizes = [2, 128], strides = [1, 1]} : vector<2x512xf32> to vector<2x128xf32>
    %46 = arith.negf %45 : vector<2x128xf32>
    %47 = math.exp %46 : vector<2x128xf32>
    %cst_20 = arith.constant 1.000000e+00 : f32
    %48 = vector.broadcast %cst_20 : f32 to vector<2x128xf32>
    %49 = arith.addf %48, %47 : vector<2x128xf32>
    %50 = arith.divf %48, %49 : vector<2x128xf32>
    %51 = vector.extract_strided_slice %44 {offsets = [0, 128], sizes = [2, 128], strides = [1, 1]} : vector<2x512xf32> to vector<2x128xf32>
    %52 = arith.negf %51 : vector<2x128xf32>
    %53 = math.exp %52 : vector<2x128xf32>
    %cst_21 = arith.constant 1.000000e+00 : f32
    %54 = vector.broadcast %cst_21 : f32 to vector<2x128xf32>
    %55 = arith.addf %54, %53 : vector<2x128xf32>
    %56 = arith.divf %54, %55 : vector<2x128xf32>
    %57 = vector.extract_strided_slice %44 {offsets = [0, 256], sizes = [2, 128], strides = [1, 1]} : vector<2x512xf32> to vector<2x128xf32>
    %58 = math.tanh %57 : vector<2x128xf32>
    %59 = vector.extract_strided_slice %44 {offsets = [0, 384], sizes = [2, 128], strides = [1, 1]} : vector<2x512xf32> to vector<2x128xf32>
    %60 = arith.negf %59 : vector<2x128xf32>
    %61 = math.exp %60 : vector<2x128xf32>
    %cst_22 = arith.constant 1.000000e+00 : f32
    %62 = vector.broadcast %cst_22 : f32 to vector<2x128xf32>
    %63 = arith.addf %62, %61 : vector<2x128xf32>
    %64 = arith.divf %62, %63 : vector<2x128xf32>
    %65 = arith.mulf %56, %3 : vector<2x128xf32>
    %66 = arith.mulf %50, %58 : vector<2x128xf32>
    %67 = arith.addf %65, %66 : vector<2x128xf32>
    %68 = math.tanh %67 : vector<2x128xf32>
    %69 = arith.mulf %64, %68 : vector<2x128xf32>
    %c0_23 = arith.constant 0 : index
    %c0_24 = arith.constant 0 : index
    %70 = vector.load %arg3[%c0_23, %c0_24] : memref<128x512xf32, #tpu.memory_space<vmem>>, vector<128x512xf32>
    %cst_25 = arith.constant dense<0.000000e+00> : vector<2x512xf32>
    %71 = tpu.matmul %39, %70, %cst_25 {dimension_numbers = #tpu.dot_dimension_numbers<[1], [0], [0], [1], [0, 0, 1, 1], [], []>} : vector<2x128xf32>, vector<128x512xf32>, vector<2x512xf32> -> vector<2x512xf32>
    %72 = vector.extract_strided_slice %9 {offsets = [2, 0], sizes = [2, 512], strides = [1, 1]} : vector<16x512xf32> to vector<2x512xf32>
    %73 = arith.addf %71, %72 : vector<2x512xf32>
    %74 = vector.extract_strided_slice %73 {offsets = [0, 0], sizes = [2, 128], strides = [1, 1]} : vector<2x512xf32> to vector<2x128xf32>
    %75 = arith.negf %74 : vector<2x128xf32>
    %76 = math.exp %75 : vector<2x128xf32>
    %cst_26 = arith.constant 1.000000e+00 : f32
    %77 = vector.broadcast %cst_26 : f32 to vector<2x128xf32>
    %78 = arith.addf %77, %76 : vector<2x128xf32>
    %79 = arith.divf %77, %78 : vector<2x128xf32>
    %80 = vector.extract_strided_slice %73 {offsets = [0, 128], sizes = [2, 128], strides = [1, 1]} : vector<2x512xf32> to vector<2x128xf32>
    %81 = arith.negf %80 : vector<2x128xf32>
    %82 = math.exp %81 : vector<2x128xf32>
    %cst_27 = arith.constant 1.000000e+00 : f32
    %83 = vector.broadcast %cst_27 : f32 to vector<2x128xf32>
    %84 = arith.addf %83, %82 : vector<2x128xf32>
    %85 = arith.divf %83, %84 : vector<2x128xf32>
    %86 = vector.extract_strided_slice %73 {offsets = [0, 256], sizes = [2, 128], strides = [1, 1]} : vector<2x512xf32> to vector<2x128xf32>
    %87 = math.tanh %86 : vector<2x128xf32>
    %88 = vector.extract_strided_slice %73 {offsets = [0, 384], sizes = [2, 128], strides = [1, 1]} : vector<2x512xf32> to vector<2x128xf32>
    %89 = arith.negf %88 : vector<2x128xf32>
    %90 = math.exp %89 : vector<2x128xf32>
    %cst_28 = arith.constant 1.000000e+00 : f32
    %91 = vector.broadcast %cst_28 : f32 to vector<2x128xf32>
    %92 = arith.addf %91, %90 : vector<2x128xf32>
    %93 = arith.divf %91, %92 : vector<2x128xf32>
    %94 = arith.mulf %85, %37 : vector<2x128xf32>
    %95 = arith.mulf %79, %87 : vector<2x128xf32>
    %96 = arith.addf %94, %95 : vector<2x128xf32>
    %97 = math.tanh %96 : vector<2x128xf32>
    %98 = arith.mulf %93, %97 : vector<2x128xf32>
    %99 = tpu.concatenate %69, %98 in 1 : vector<2x128xf32>, vector<2x128xf32> -> vector<2x256xf32>
    %c0_29 = arith.constant 0 : index
    %c0_30 = arith.constant 0 : index
    %100 = vector.load %arg4[%c0_29, %c0_30] : memref<256x512xf32, #tpu.memory_space<vmem>>, vector<256x512xf32>
    %cst_31 = arith.constant dense<0.000000e+00> : vector<2x512xf32>
    %101 = tpu.matmul %99, %100, %cst_31 {dimension_numbers = #tpu.dot_dimension_numbers<[1], [0], [0], [1], [0, 0, 1, 1], [], []>} : vector<2x256xf32>, vector<256x512xf32>, vector<2x512xf32> -> vector<2x512xf32>
    %102 = vector.broadcast %10 : vector<1x512xf32> to vector<2x512xf32>
    %103 = arith.addf %101, %102 : vector<2x512xf32>
    %104 = vector.extract_strided_slice %103 {offsets = [0, 0], sizes = [2, 128], strides = [1, 1]} : vector<2x512xf32> to vector<2x128xf32>
    %105 = arith.negf %104 : vector<2x128xf32>
    %106 = math.exp %105 : vector<2x128xf32>
    %cst_32 = arith.constant 1.000000e+00 : f32
    %107 = vector.broadcast %cst_32 : f32 to vector<2x128xf32>
    %108 = arith.addf %107, %106 : vector<2x128xf32>
    %109 = arith.divf %107, %108 : vector<2x128xf32>
    %110 = vector.extract_strided_slice %103 {offsets = [0, 128], sizes = [2, 128], strides = [1, 1]} : vector<2x512xf32> to vector<2x128xf32>
    %111 = arith.negf %110 : vector<2x128xf32>
    %112 = math.exp %111 : vector<2x128xf32>
    %cst_33 = arith.constant 1.000000e+00 : f32
    %113 = vector.broadcast %cst_33 : f32 to vector<2x128xf32>
    %114 = arith.addf %113, %112 : vector<2x128xf32>
    %115 = arith.divf %113, %114 : vector<2x128xf32>
    %116 = vector.extract_strided_slice %103 {offsets = [0, 256], sizes = [2, 128], strides = [1, 1]} : vector<2x512xf32> to vector<2x128xf32>
    %117 = math.tanh %116 : vector<2x128xf32>
    %118 = vector.extract_strided_slice %103 {offsets = [0, 384], sizes = [2, 128], strides = [1, 1]} : vector<2x512xf32> to vector<2x128xf32>
    %119 = arith.negf %118 : vector<2x128xf32>
    %120 = math.exp %119 : vector<2x128xf32>
    %cst_34 = arith.constant 1.000000e+00 : f32
    %121 = vector.broadcast %cst_34 : f32 to vector<2x128xf32>
    %122 = arith.addf %121, %120 : vector<2x128xf32>
    %123 = arith.divf %121, %122 : vector<2x128xf32>
    %124 = arith.mulf %115, %67 : vector<2x128xf32>
    %125 = arith.mulf %109, %117 : vector<2x128xf32>
    %126 = arith.addf %124, %125 : vector<2x128xf32>
    %127 = math.tanh %126 : vector<2x128xf32>
    %128 = arith.mulf %123, %127 : vector<2x128xf32>
    %c0_35 = arith.constant 0 : index
    %c0_36 = arith.constant 0 : index
    %129 = vector.load %arg3[%c0_35, %c0_36] : memref<128x512xf32, #tpu.memory_space<vmem>>, vector<128x512xf32>
    %cst_37 = arith.constant dense<0.000000e+00> : vector<2x512xf32>
    %130 = tpu.matmul %98, %129, %cst_37 {dimension_numbers = #tpu.dot_dimension_numbers<[1], [0], [0], [1], [0, 0, 1, 1], [], []>} : vector<2x128xf32>, vector<128x512xf32>, vector<2x512xf32> -> vector<2x512xf32>
    %131 = vector.extract_strided_slice %9 {offsets = [4, 0], sizes = [2, 512], strides = [1, 1]} : vector<16x512xf32> to vector<2x512xf32>
    %132 = arith.addf %130, %131 : vector<2x512xf32>
    %133 = vector.extract_strided_slice %132 {offsets = [0, 0], sizes = [2, 128], strides = [1, 1]} : vector<2x512xf32> to vector<2x128xf32>
    %134 = arith.negf %133 : vector<2x128xf32>
    %135 = math.exp %134 : vector<2x128xf32>
    %cst_38 = arith.constant 1.000000e+00 : f32
    %136 = vector.broadcast %cst_38 : f32 to vector<2x128xf32>
    %137 = arith.addf %136, %135 : vector<2x128xf32>
    %138 = arith.divf %136, %137 : vector<2x128xf32>
    %139 = vector.extract_strided_slice %132 {offsets = [0, 128], sizes = [2, 128], strides = [1, 1]} : vector<2x512xf32> to vector<2x128xf32>
    %140 = arith.negf %139 : vector<2x128xf32>
    %141 = math.exp %140 : vector<2x128xf32>
    %cst_39 = arith.constant 1.000000e+00 : f32
    %142 = vector.broadcast %cst_39 : f32 to vector<2x128xf32>
    %143 = arith.addf %142, %141 : vector<2x128xf32>
    %144 = arith.divf %142, %143 : vector<2x128xf32>
    %145 = vector.extract_strided_slice %132 {offsets = [0, 256], sizes = [2, 128], strides = [1, 1]} : vector<2x512xf32> to vector<2x128xf32>
    %146 = math.tanh %145 : vector<2x128xf32>
    %147 = vector.extract_strided_slice %132 {offsets = [0, 384], sizes = [2, 128], strides = [1, 1]} : vector<2x512xf32> to vector<2x128xf32>
    %148 = arith.negf %147 : vector<2x128xf32>
    %149 = math.exp %148 : vector<2x128xf32>
    %cst_40 = arith.constant 1.000000e+00 : f32
    %150 = vector.broadcast %cst_40 : f32 to vector<2x128xf32>
    %151 = arith.addf %150, %149 : vector<2x128xf32>
    %152 = arith.divf %150, %151 : vector<2x128xf32>
    %153 = arith.mulf %144, %96 : vector<2x128xf32>
    %154 = arith.mulf %138, %146 : vector<2x128xf32>
    %155 = arith.addf %153, %154 : vector<2x128xf32>
    %156 = math.tanh %155 : vector<2x128xf32>
    %157 = arith.mulf %152, %156 : vector<2x128xf32>
    %158 = tpu.concatenate %128, %157 in 1 : vector<2x128xf32>, vector<2x128xf32> -> vector<2x256xf32>
    %c0_41 = arith.constant 0 : index
    %c0_42 = arith.constant 0 : index
    %159 = vector.load %arg4[%c0_41, %c0_42] : memref<256x512xf32, #tpu.memory_space<vmem>>, vector<256x512xf32>
    %cst_43 = arith.constant dense<0.000000e+00> : vector<2x512xf32>
    %160 = tpu.matmul %158, %159, %cst_43 {dimension_numbers = #tpu.dot_dimension_numbers<[1], [0], [0], [1], [0, 0, 1, 1], [], []>} : vector<2x256xf32>, vector<256x512xf32>, vector<2x512xf32> -> vector<2x512xf32>
    %161 = vector.broadcast %10 : vector<1x512xf32> to vector<2x512xf32>
    %162 = arith.addf %160, %161 : vector<2x512xf32>
    %163 = vector.extract_strided_slice %162 {offsets = [0, 0], sizes = [2, 128], strides = [1, 1]} : vector<2x512xf32> to vector<2x128xf32>
    %164 = arith.negf %163 : vector<2x128xf32>
    %165 = math.exp %164 : vector<2x128xf32>
    %cst_44 = arith.constant 1.000000e+00 : f32
    %166 = vector.broadcast %cst_44 : f32 to vector<2x128xf32>
    %167 = arith.addf %166, %165 : vector<2x128xf32>
    %168 = arith.divf %166, %167 : vector<2x128xf32>
    %169 = vector.extract_strided_slice %162 {offsets = [0, 128], sizes = [2, 128], strides = [1, 1]} : vector<2x512xf32> to vector<2x128xf32>
    %170 = arith.negf %169 : vector<2x128xf32>
    %171 = math.exp %170 : vector<2x128xf32>
    %cst_45 = arith.constant 1.000000e+00 : f32
    %172 = vector.broadcast %cst_45 : f32 to vector<2x128xf32>
    %173 = arith.addf %172, %171 : vector<2x128xf32>
    %174 = arith.divf %172, %173 : vector<2x128xf32>
    %175 = vector.extract_strided_slice %162 {offsets = [0, 256], sizes = [2, 128], strides = [1, 1]} : vector<2x512xf32> to vector<2x128xf32>
    %176 = math.tanh %175 : vector<2x128xf32>
    %177 = vector.extract_strided_slice %162 {offsets = [0, 384], sizes = [2, 128], strides = [1, 1]} : vector<2x512xf32> to vector<2x128xf32>
    %178 = arith.negf %177 : vector<2x128xf32>
    %179 = math.exp %178 : vector<2x128xf32>
    %cst_46 = arith.constant 1.000000e+00 : f32
    %180 = vector.broadcast %cst_46 : f32 to vector<2x128xf32>
    %181 = arith.addf %180, %179 : vector<2x128xf32>
    %182 = arith.divf %180, %181 : vector<2x128xf32>
    %183 = arith.mulf %174, %126 : vector<2x128xf32>
    %184 = arith.mulf %168, %176 : vector<2x128xf32>
    %185 = arith.addf %183, %184 : vector<2x128xf32>
    %186 = math.tanh %185 : vector<2x128xf32>
    %187 = arith.mulf %182, %186 : vector<2x128xf32>
    %c0_47 = arith.constant 0 : index
    %c0_48 = arith.constant 0 : index
    %188 = vector.load %arg3[%c0_47, %c0_48] : memref<128x512xf32, #tpu.memory_space<vmem>>, vector<128x512xf32>
    %cst_49 = arith.constant dense<0.000000e+00> : vector<2x512xf32>
    %189 = tpu.matmul %157, %188, %cst_49 {dimension_numbers = #tpu.dot_dimension_numbers<[1], [0], [0], [1], [0, 0, 1, 1], [], []>} : vector<2x128xf32>, vector<128x512xf32>, vector<2x512xf32> -> vector<2x512xf32>
    %190 = vector.extract_strided_slice %9 {offsets = [6, 0], sizes = [2, 512], strides = [1, 1]} : vector<16x512xf32> to vector<2x512xf32>
    %191 = arith.addf %189, %190 : vector<2x512xf32>
    %192 = vector.extract_strided_slice %191 {offsets = [0, 0], sizes = [2, 128], strides = [1, 1]} : vector<2x512xf32> to vector<2x128xf32>
    %193 = arith.negf %192 : vector<2x128xf32>
    %194 = math.exp %193 : vector<2x128xf32>
    %cst_50 = arith.constant 1.000000e+00 : f32
    %195 = vector.broadcast %cst_50 : f32 to vector<2x128xf32>
    %196 = arith.addf %195, %194 : vector<2x128xf32>
    %197 = arith.divf %195, %196 : vector<2x128xf32>
    %198 = vector.extract_strided_slice %191 {offsets = [0, 128], sizes = [2, 128], strides = [1, 1]} : vector<2x512xf32> to vector<2x128xf32>
    %199 = arith.negf %198 : vector<2x128xf32>
    %200 = math.exp %199 : vector<2x128xf32>
    %cst_51 = arith.constant 1.000000e+00 : f32
    %201 = vector.broadcast %cst_51 : f32 to vector<2x128xf32>
    %202 = arith.addf %201, %200 : vector<2x128xf32>
    %203 = arith.divf %201, %202 : vector<2x128xf32>
    %204 = vector.extract_strided_slice %191 {offsets = [0, 256], sizes = [2, 128], strides = [1, 1]} : vector<2x512xf32> to vector<2x128xf32>
    %205 = math.tanh %204 : vector<2x128xf32>
    %206 = vector.extract_strided_slice %191 {offsets = [0, 384], sizes = [2, 128], strides = [1, 1]} : vector<2x512xf32> to vector<2x128xf32>
    %207 = arith.negf %206 : vector<2x128xf32>
    %208 = math.exp %207 : vector<2x128xf32>
    %cst_52 = arith.constant 1.000000e+00 : f32
    %209 = vector.broadcast %cst_52 : f32 to vector<2x128xf32>
    %210 = arith.addf %209, %208 : vector<2x128xf32>
    %211 = arith.divf %209, %210 : vector<2x128xf32>
    %212 = arith.mulf %203, %155 : vector<2x128xf32>
    %213 = arith.mulf %197, %205 : vector<2x128xf32>
    %214 = arith.addf %212, %213 : vector<2x128xf32>
    %215 = math.tanh %214 : vector<2x128xf32>
    %216 = arith.mulf %211, %215 : vector<2x128xf32>
    %217 = tpu.concatenate %187, %216 in 1 : vector<2x128xf32>, vector<2x128xf32> -> vector<2x256xf32>
    %c0_53 = arith.constant 0 : index
    %c0_54 = arith.constant 0 : index
    %218 = vector.load %arg4[%c0_53, %c0_54] : memref<256x512xf32, #tpu.memory_space<vmem>>, vector<256x512xf32>
    %cst_55 = arith.constant dense<0.000000e+00> : vector<2x512xf32>
    %219 = tpu.matmul %217, %218, %cst_55 {dimension_numbers = #tpu.dot_dimension_numbers<[1], [0], [0], [1], [0, 0, 1, 1], [], []>} : vector<2x256xf32>, vector<256x512xf32>, vector<2x512xf32> -> vector<2x512xf32>
    %220 = vector.broadcast %10 : vector<1x512xf32> to vector<2x512xf32>
    %221 = arith.addf %219, %220 : vector<2x512xf32>
    %222 = vector.extract_strided_slice %221 {offsets = [0, 0], sizes = [2, 128], strides = [1, 1]} : vector<2x512xf32> to vector<2x128xf32>
    %223 = arith.negf %222 : vector<2x128xf32>
    %224 = math.exp %223 : vector<2x128xf32>
    %cst_56 = arith.constant 1.000000e+00 : f32
    %225 = vector.broadcast %cst_56 : f32 to vector<2x128xf32>
    %226 = arith.addf %225, %224 : vector<2x128xf32>
    %227 = arith.divf %225, %226 : vector<2x128xf32>
    %228 = vector.extract_strided_slice %221 {offsets = [0, 128], sizes = [2, 128], strides = [1, 1]} : vector<2x512xf32> to vector<2x128xf32>
    %229 = arith.negf %228 : vector<2x128xf32>
    %230 = math.exp %229 : vector<2x128xf32>
    %cst_57 = arith.constant 1.000000e+00 : f32
    %231 = vector.broadcast %cst_57 : f32 to vector<2x128xf32>
    %232 = arith.addf %231, %230 : vector<2x128xf32>
    %233 = arith.divf %231, %232 : vector<2x128xf32>
    %234 = vector.extract_strided_slice %221 {offsets = [0, 256], sizes = [2, 128], strides = [1, 1]} : vector<2x512xf32> to vector<2x128xf32>
    %235 = math.tanh %234 : vector<2x128xf32>
    %236 = vector.extract_strided_slice %221 {offsets = [0, 384], sizes = [2, 128], strides = [1, 1]} : vector<2x512xf32> to vector<2x128xf32>
    %237 = arith.negf %236 : vector<2x128xf32>
    %238 = math.exp %237 : vector<2x128xf32>
    %cst_58 = arith.constant 1.000000e+00 : f32
    %239 = vector.broadcast %cst_58 : f32 to vector<2x128xf32>
    %240 = arith.addf %239, %238 : vector<2x128xf32>
    %241 = arith.divf %239, %240 : vector<2x128xf32>
    %242 = arith.mulf %233, %185 : vector<2x128xf32>
    %243 = arith.mulf %227, %235 : vector<2x128xf32>
    %244 = arith.addf %242, %243 : vector<2x128xf32>
    %245 = math.tanh %244 : vector<2x128xf32>
    %246 = arith.mulf %241, %245 : vector<2x128xf32>
    %c0_59 = arith.constant 0 : index
    %c0_60 = arith.constant 0 : index
    %247 = vector.load %arg3[%c0_59, %c0_60] : memref<128x512xf32, #tpu.memory_space<vmem>>, vector<128x512xf32>
    %cst_61 = arith.constant dense<0.000000e+00> : vector<2x512xf32>
    %248 = tpu.matmul %216, %247, %cst_61 {dimension_numbers = #tpu.dot_dimension_numbers<[1], [0], [0], [1], [0, 0, 1, 1], [], []>} : vector<2x128xf32>, vector<128x512xf32>, vector<2x512xf32> -> vector<2x512xf32>
    %249 = vector.extract_strided_slice %9 {offsets = [8, 0], sizes = [2, 512], strides = [1, 1]} : vector<16x512xf32> to vector<2x512xf32>
    %250 = arith.addf %248, %249 : vector<2x512xf32>
    %251 = vector.extract_strided_slice %250 {offsets = [0, 0], sizes = [2, 128], strides = [1, 1]} : vector<2x512xf32> to vector<2x128xf32>
    %252 = arith.negf %251 : vector<2x128xf32>
    %253 = math.exp %252 : vector<2x128xf32>
    %cst_62 = arith.constant 1.000000e+00 : f32
    %254 = vector.broadcast %cst_62 : f32 to vector<2x128xf32>
    %255 = arith.addf %254, %253 : vector<2x128xf32>
    %256 = arith.divf %254, %255 : vector<2x128xf32>
    %257 = vector.extract_strided_slice %250 {offsets = [0, 128], sizes = [2, 128], strides = [1, 1]} : vector<2x512xf32> to vector<2x128xf32>
    %258 = arith.negf %257 : vector<2x128xf32>
    %259 = math.exp %258 : vector<2x128xf32>
    %cst_63 = arith.constant 1.000000e+00 : f32
    %260 = vector.broadcast %cst_63 : f32 to vector<2x128xf32>
    %261 = arith.addf %260, %259 : vector<2x128xf32>
    %262 = arith.divf %260, %261 : vector<2x128xf32>
    %263 = vector.extract_strided_slice %250 {offsets = [0, 256], sizes = [2, 128], strides = [1, 1]} : vector<2x512xf32> to vector<2x128xf32>
    %264 = math.tanh %263 : vector<2x128xf32>
    %265 = vector.extract_strided_slice %250 {offsets = [0, 384], sizes = [2, 128], strides = [1, 1]} : vector<2x512xf32> to vector<2x128xf32>
    %266 = arith.negf %265 : vector<2x128xf32>
    %267 = math.exp %266 : vector<2x128xf32>
    %cst_64 = arith.constant 1.000000e+00 : f32
    %268 = vector.broadcast %cst_64 : f32 to vector<2x128xf32>
    %269 = arith.addf %268, %267 : vector<2x128xf32>
    %270 = arith.divf %268, %269 : vector<2x128xf32>
    %271 = arith.mulf %262, %214 : vector<2x128xf32>
    %272 = arith.mulf %256, %264 : vector<2x128xf32>
    %273 = arith.addf %271, %272 : vector<2x128xf32>
    %274 = math.tanh %273 : vector<2x128xf32>
    %275 = arith.mulf %270, %274 : vector<2x128xf32>
    %276 = tpu.concatenate %246, %275 in 1 : vector<2x128xf32>, vector<2x128xf32> -> vector<2x256xf32>
    %c0_65 = arith.constant 0 : index
    %c0_66 = arith.constant 0 : index
    %277 = vector.load %arg4[%c0_65, %c0_66] : memref<256x512xf32, #tpu.memory_space<vmem>>, vector<256x512xf32>
    %cst_67 = arith.constant dense<0.000000e+00> : vector<2x512xf32>
    %278 = tpu.matmul %276, %277, %cst_67 {dimension_numbers = #tpu.dot_dimension_numbers<[1], [0], [0], [1], [0, 0, 1, 1], [], []>} : vector<2x256xf32>, vector<256x512xf32>, vector<2x512xf32> -> vector<2x512xf32>
    %279 = vector.broadcast %10 : vector<1x512xf32> to vector<2x512xf32>
    %280 = arith.addf %278, %279 : vector<2x512xf32>
    %281 = vector.extract_strided_slice %280 {offsets = [0, 0], sizes = [2, 128], strides = [1, 1]} : vector<2x512xf32> to vector<2x128xf32>
    %282 = arith.negf %281 : vector<2x128xf32>
    %283 = math.exp %282 : vector<2x128xf32>
    %cst_68 = arith.constant 1.000000e+00 : f32
    %284 = vector.broadcast %cst_68 : f32 to vector<2x128xf32>
    %285 = arith.addf %284, %283 : vector<2x128xf32>
    %286 = arith.divf %284, %285 : vector<2x128xf32>
    %287 = vector.extract_strided_slice %280 {offsets = [0, 128], sizes = [2, 128], strides = [1, 1]} : vector<2x512xf32> to vector<2x128xf32>
    %288 = arith.negf %287 : vector<2x128xf32>
    %289 = math.exp %288 : vector<2x128xf32>
    %cst_69 = arith.constant 1.000000e+00 : f32
    %290 = vector.broadcast %cst_69 : f32 to vector<2x128xf32>
    %291 = arith.addf %290, %289 : vector<2x128xf32>
    %292 = arith.divf %290, %291 : vector<2x128xf32>
    %293 = vector.extract_strided_slice %280 {offsets = [0, 256], sizes = [2, 128], strides = [1, 1]} : vector<2x512xf32> to vector<2x128xf32>
    %294 = math.tanh %293 : vector<2x128xf32>
    %295 = vector.extract_strided_slice %280 {offsets = [0, 384], sizes = [2, 128], strides = [1, 1]} : vector<2x512xf32> to vector<2x128xf32>
    %296 = arith.negf %295 : vector<2x128xf32>
    %297 = math.exp %296 : vector<2x128xf32>
    %cst_70 = arith.constant 1.000000e+00 : f32
    %298 = vector.broadcast %cst_70 : f32 to vector<2x128xf32>
    %299 = arith.addf %298, %297 : vector<2x128xf32>
    %300 = arith.divf %298, %299 : vector<2x128xf32>
    %301 = arith.mulf %292, %244 : vector<2x128xf32>
    %302 = arith.mulf %286, %294 : vector<2x128xf32>
    %303 = arith.addf %301, %302 : vector<2x128xf32>
    %304 = math.tanh %303 : vector<2x128xf32>
    %305 = arith.mulf %300, %304 : vector<2x128xf32>
    %c0_71 = arith.constant 0 : index
    %c0_72 = arith.constant 0 : index
    %306 = vector.load %arg3[%c0_71, %c0_72] : memref<128x512xf32, #tpu.memory_space<vmem>>, vector<128x512xf32>
    %cst_73 = arith.constant dense<0.000000e+00> : vector<2x512xf32>
    %307 = tpu.matmul %275, %306, %cst_73 {dimension_numbers = #tpu.dot_dimension_numbers<[1], [0], [0], [1], [0, 0, 1, 1], [], []>} : vector<2x128xf32>, vector<128x512xf32>, vector<2x512xf32> -> vector<2x512xf32>
    %308 = vector.extract_strided_slice %9 {offsets = [10, 0], sizes = [2, 512], strides = [1, 1]} : vector<16x512xf32> to vector<2x512xf32>
    %309 = arith.addf %307, %308 : vector<2x512xf32>
    %310 = vector.extract_strided_slice %309 {offsets = [0, 0], sizes = [2, 128], strides = [1, 1]} : vector<2x512xf32> to vector<2x128xf32>
    %311 = arith.negf %310 : vector<2x128xf32>
    %312 = math.exp %311 : vector<2x128xf32>
    %cst_74 = arith.constant 1.000000e+00 : f32
    %313 = vector.broadcast %cst_74 : f32 to vector<2x128xf32>
    %314 = arith.addf %313, %312 : vector<2x128xf32>
    %315 = arith.divf %313, %314 : vector<2x128xf32>
    %316 = vector.extract_strided_slice %309 {offsets = [0, 128], sizes = [2, 128], strides = [1, 1]} : vector<2x512xf32> to vector<2x128xf32>
    %317 = arith.negf %316 : vector<2x128xf32>
    %318 = math.exp %317 : vector<2x128xf32>
    %cst_75 = arith.constant 1.000000e+00 : f32
    %319 = vector.broadcast %cst_75 : f32 to vector<2x128xf32>
    %320 = arith.addf %319, %318 : vector<2x128xf32>
    %321 = arith.divf %319, %320 : vector<2x128xf32>
    %322 = vector.extract_strided_slice %309 {offsets = [0, 256], sizes = [2, 128], strides = [1, 1]} : vector<2x512xf32> to vector<2x128xf32>
    %323 = math.tanh %322 : vector<2x128xf32>
    %324 = vector.extract_strided_slice %309 {offsets = [0, 384], sizes = [2, 128], strides = [1, 1]} : vector<2x512xf32> to vector<2x128xf32>
    %325 = arith.negf %324 : vector<2x128xf32>
    %326 = math.exp %325 : vector<2x128xf32>
    %cst_76 = arith.constant 1.000000e+00 : f32
    %327 = vector.broadcast %cst_76 : f32 to vector<2x128xf32>
    %328 = arith.addf %327, %326 : vector<2x128xf32>
    %329 = arith.divf %327, %328 : vector<2x128xf32>
    %330 = arith.mulf %321, %273 : vector<2x128xf32>
    %331 = arith.mulf %315, %323 : vector<2x128xf32>
    %332 = arith.addf %330, %331 : vector<2x128xf32>
    %333 = math.tanh %332 : vector<2x128xf32>
    %334 = arith.mulf %329, %333 : vector<2x128xf32>
    %335 = tpu.concatenate %305, %334 in 1 : vector<2x128xf32>, vector<2x128xf32> -> vector<2x256xf32>
    %c0_77 = arith.constant 0 : index
    %c0_78 = arith.constant 0 : index
    %336 = vector.load %arg4[%c0_77, %c0_78] : memref<256x512xf32, #tpu.memory_space<vmem>>, vector<256x512xf32>
    %cst_79 = arith.constant dense<0.000000e+00> : vector<2x512xf32>
    %337 = tpu.matmul %335, %336, %cst_79 {dimension_numbers = #tpu.dot_dimension_numbers<[1], [0], [0], [1], [0, 0, 1, 1], [], []>} : vector<2x256xf32>, vector<256x512xf32>, vector<2x512xf32> -> vector<2x512xf32>
    %338 = vector.broadcast %10 : vector<1x512xf32> to vector<2x512xf32>
    %339 = arith.addf %337, %338 : vector<2x512xf32>
    %340 = vector.extract_strided_slice %339 {offsets = [0, 0], sizes = [2, 128], strides = [1, 1]} : vector<2x512xf32> to vector<2x128xf32>
    %341 = arith.negf %340 : vector<2x128xf32>
    %342 = math.exp %341 : vector<2x128xf32>
    %cst_80 = arith.constant 1.000000e+00 : f32
    %343 = vector.broadcast %cst_80 : f32 to vector<2x128xf32>
    %344 = arith.addf %343, %342 : vector<2x128xf32>
    %345 = arith.divf %343, %344 : vector<2x128xf32>
    %346 = vector.extract_strided_slice %339 {offsets = [0, 128], sizes = [2, 128], strides = [1, 1]} : vector<2x512xf32> to vector<2x128xf32>
    %347 = arith.negf %346 : vector<2x128xf32>
    %348 = math.exp %347 : vector<2x128xf32>
    %cst_81 = arith.constant 1.000000e+00 : f32
    %349 = vector.broadcast %cst_81 : f32 to vector<2x128xf32>
    %350 = arith.addf %349, %348 : vector<2x128xf32>
    %351 = arith.divf %349, %350 : vector<2x128xf32>
    %352 = vector.extract_strided_slice %339 {offsets = [0, 256], sizes = [2, 128], strides = [1, 1]} : vector<2x512xf32> to vector<2x128xf32>
    %353 = math.tanh %352 : vector<2x128xf32>
    %354 = vector.extract_strided_slice %339 {offsets = [0, 384], sizes = [2, 128], strides = [1, 1]} : vector<2x512xf32> to vector<2x128xf32>
    %355 = arith.negf %354 : vector<2x128xf32>
    %356 = math.exp %355 : vector<2x128xf32>
    %cst_82 = arith.constant 1.000000e+00 : f32
    %357 = vector.broadcast %cst_82 : f32 to vector<2x128xf32>
    %358 = arith.addf %357, %356 : vector<2x128xf32>
    %359 = arith.divf %357, %358 : vector<2x128xf32>
    %360 = arith.mulf %351, %303 : vector<2x128xf32>
    %361 = arith.mulf %345, %353 : vector<2x128xf32>
    %362 = arith.addf %360, %361 : vector<2x128xf32>
    %363 = math.tanh %362 : vector<2x128xf32>
    %364 = arith.mulf %359, %363 : vector<2x128xf32>
    %c0_83 = arith.constant 0 : index
    %c0_84 = arith.constant 0 : index
    %365 = vector.load %arg3[%c0_83, %c0_84] : memref<128x512xf32, #tpu.memory_space<vmem>>, vector<128x512xf32>
    %cst_85 = arith.constant dense<0.000000e+00> : vector<2x512xf32>
    %366 = tpu.matmul %334, %365, %cst_85 {dimension_numbers = #tpu.dot_dimension_numbers<[1], [0], [0], [1], [0, 0, 1, 1], [], []>} : vector<2x128xf32>, vector<128x512xf32>, vector<2x512xf32> -> vector<2x512xf32>
    %367 = vector.extract_strided_slice %9 {offsets = [12, 0], sizes = [2, 512], strides = [1, 1]} : vector<16x512xf32> to vector<2x512xf32>
    %368 = arith.addf %366, %367 : vector<2x512xf32>
    %369 = vector.extract_strided_slice %368 {offsets = [0, 0], sizes = [2, 128], strides = [1, 1]} : vector<2x512xf32> to vector<2x128xf32>
    %370 = arith.negf %369 : vector<2x128xf32>
    %371 = math.exp %370 : vector<2x128xf32>
    %cst_86 = arith.constant 1.000000e+00 : f32
    %372 = vector.broadcast %cst_86 : f32 to vector<2x128xf32>
    %373 = arith.addf %372, %371 : vector<2x128xf32>
    %374 = arith.divf %372, %373 : vector<2x128xf32>
    %375 = vector.extract_strided_slice %368 {offsets = [0, 128], sizes = [2, 128], strides = [1, 1]} : vector<2x512xf32> to vector<2x128xf32>
    %376 = arith.negf %375 : vector<2x128xf32>
    %377 = math.exp %376 : vector<2x128xf32>
    %cst_87 = arith.constant 1.000000e+00 : f32
    %378 = vector.broadcast %cst_87 : f32 to vector<2x128xf32>
    %379 = arith.addf %378, %377 : vector<2x128xf32>
    %380 = arith.divf %378, %379 : vector<2x128xf32>
    %381 = vector.extract_strided_slice %368 {offsets = [0, 256], sizes = [2, 128], strides = [1, 1]} : vector<2x512xf32> to vector<2x128xf32>
    %382 = math.tanh %381 : vector<2x128xf32>
    %383 = vector.extract_strided_slice %368 {offsets = [0, 384], sizes = [2, 128], strides = [1, 1]} : vector<2x512xf32> to vector<2x128xf32>
    %384 = arith.negf %383 : vector<2x128xf32>
    %385 = math.exp %384 : vector<2x128xf32>
    %cst_88 = arith.constant 1.000000e+00 : f32
    %386 = vector.broadcast %cst_88 : f32 to vector<2x128xf32>
    %387 = arith.addf %386, %385 : vector<2x128xf32>
    %388 = arith.divf %386, %387 : vector<2x128xf32>
    %389 = arith.mulf %380, %332 : vector<2x128xf32>
    %390 = arith.mulf %374, %382 : vector<2x128xf32>
    %391 = arith.addf %389, %390 : vector<2x128xf32>
    %392 = math.tanh %391 : vector<2x128xf32>
    %393 = arith.mulf %388, %392 : vector<2x128xf32>
    %394 = tpu.concatenate %364, %393 in 1 : vector<2x128xf32>, vector<2x128xf32> -> vector<2x256xf32>
    %c0_89 = arith.constant 0 : index
    %c0_90 = arith.constant 0 : index
    %395 = vector.load %arg4[%c0_89, %c0_90] : memref<256x512xf32, #tpu.memory_space<vmem>>, vector<256x512xf32>
    %cst_91 = arith.constant dense<0.000000e+00> : vector<2x512xf32>
    %396 = tpu.matmul %394, %395, %cst_91 {dimension_numbers = #tpu.dot_dimension_numbers<[1], [0], [0], [1], [0, 0, 1, 1], [], []>} : vector<2x256xf32>, vector<256x512xf32>, vector<2x512xf32> -> vector<2x512xf32>
    %397 = vector.broadcast %10 : vector<1x512xf32> to vector<2x512xf32>
    %398 = arith.addf %396, %397 : vector<2x512xf32>
    %399 = vector.extract_strided_slice %398 {offsets = [0, 0], sizes = [2, 128], strides = [1, 1]} : vector<2x512xf32> to vector<2x128xf32>
    %400 = arith.negf %399 : vector<2x128xf32>
    %401 = math.exp %400 : vector<2x128xf32>
    %cst_92 = arith.constant 1.000000e+00 : f32
    %402 = vector.broadcast %cst_92 : f32 to vector<2x128xf32>
    %403 = arith.addf %402, %401 : vector<2x128xf32>
    %404 = arith.divf %402, %403 : vector<2x128xf32>
    %405 = vector.extract_strided_slice %398 {offsets = [0, 128], sizes = [2, 128], strides = [1, 1]} : vector<2x512xf32> to vector<2x128xf32>
    %406 = arith.negf %405 : vector<2x128xf32>
    %407 = math.exp %406 : vector<2x128xf32>
    %cst_93 = arith.constant 1.000000e+00 : f32
    %408 = vector.broadcast %cst_93 : f32 to vector<2x128xf32>
    %409 = arith.addf %408, %407 : vector<2x128xf32>
    %410 = arith.divf %408, %409 : vector<2x128xf32>
    %411 = vector.extract_strided_slice %398 {offsets = [0, 256], sizes = [2, 128], strides = [1, 1]} : vector<2x512xf32> to vector<2x128xf32>
    %412 = math.tanh %411 : vector<2x128xf32>
    %413 = vector.extract_strided_slice %398 {offsets = [0, 384], sizes = [2, 128], strides = [1, 1]} : vector<2x512xf32> to vector<2x128xf32>
    %414 = arith.negf %413 : vector<2x128xf32>
    %415 = math.exp %414 : vector<2x128xf32>
    %cst_94 = arith.constant 1.000000e+00 : f32
    %416 = vector.broadcast %cst_94 : f32 to vector<2x128xf32>
    %417 = arith.addf %416, %415 : vector<2x128xf32>
    %418 = arith.divf %416, %417 : vector<2x128xf32>
    %419 = arith.mulf %410, %362 : vector<2x128xf32>
    %420 = arith.mulf %404, %412 : vector<2x128xf32>
    %421 = arith.addf %419, %420 : vector<2x128xf32>
    %422 = math.tanh %421 : vector<2x128xf32>
    %423 = arith.mulf %418, %422 : vector<2x128xf32>
    %c0_95 = arith.constant 0 : index
    %c0_96 = arith.constant 0 : index
    %424 = vector.load %arg3[%c0_95, %c0_96] : memref<128x512xf32, #tpu.memory_space<vmem>>, vector<128x512xf32>
    %cst_97 = arith.constant dense<0.000000e+00> : vector<2x512xf32>
    %425 = tpu.matmul %393, %424, %cst_97 {dimension_numbers = #tpu.dot_dimension_numbers<[1], [0], [0], [1], [0, 0, 1, 1], [], []>} : vector<2x128xf32>, vector<128x512xf32>, vector<2x512xf32> -> vector<2x512xf32>
    %426 = vector.extract_strided_slice %9 {offsets = [14, 0], sizes = [2, 512], strides = [1, 1]} : vector<16x512xf32> to vector<2x512xf32>
    %427 = arith.addf %425, %426 : vector<2x512xf32>
    %428 = vector.extract_strided_slice %427 {offsets = [0, 0], sizes = [2, 128], strides = [1, 1]} : vector<2x512xf32> to vector<2x128xf32>
    %429 = arith.negf %428 : vector<2x128xf32>
    %430 = math.exp %429 : vector<2x128xf32>
    %cst_98 = arith.constant 1.000000e+00 : f32
    %431 = vector.broadcast %cst_98 : f32 to vector<2x128xf32>
    %432 = arith.addf %431, %430 : vector<2x128xf32>
    %433 = arith.divf %431, %432 : vector<2x128xf32>
    %434 = vector.extract_strided_slice %427 {offsets = [0, 128], sizes = [2, 128], strides = [1, 1]} : vector<2x512xf32> to vector<2x128xf32>
    %435 = arith.negf %434 : vector<2x128xf32>
    %436 = math.exp %435 : vector<2x128xf32>
    %cst_99 = arith.constant 1.000000e+00 : f32
    %437 = vector.broadcast %cst_99 : f32 to vector<2x128xf32>
    %438 = arith.addf %437, %436 : vector<2x128xf32>
    %439 = arith.divf %437, %438 : vector<2x128xf32>
    %440 = vector.extract_strided_slice %427 {offsets = [0, 256], sizes = [2, 128], strides = [1, 1]} : vector<2x512xf32> to vector<2x128xf32>
    %441 = math.tanh %440 : vector<2x128xf32>
    %442 = vector.extract_strided_slice %427 {offsets = [0, 384], sizes = [2, 128], strides = [1, 1]} : vector<2x512xf32> to vector<2x128xf32>
    %443 = arith.negf %442 : vector<2x128xf32>
    %444 = math.exp %443 : vector<2x128xf32>
    %cst_100 = arith.constant 1.000000e+00 : f32
    %445 = vector.broadcast %cst_100 : f32 to vector<2x128xf32>
    %446 = arith.addf %445, %444 : vector<2x128xf32>
    %447 = arith.divf %445, %446 : vector<2x128xf32>
    %448 = arith.mulf %439, %391 : vector<2x128xf32>
    %449 = arith.mulf %433, %441 : vector<2x128xf32>
    %450 = arith.addf %448, %449 : vector<2x128xf32>
    %451 = math.tanh %450 : vector<2x128xf32>
    %452 = arith.mulf %447, %451 : vector<2x128xf32>
    %453 = tpu.concatenate %423, %452 in 1 : vector<2x128xf32>, vector<2x128xf32> -> vector<2x256xf32>
    %c0_101 = arith.constant 0 : index
    %c0_102 = arith.constant 0 : index
    %454 = vector.load %arg4[%c0_101, %c0_102] : memref<256x512xf32, #tpu.memory_space<vmem>>, vector<256x512xf32>
    %cst_103 = arith.constant dense<0.000000e+00> : vector<2x512xf32>
    %455 = tpu.matmul %453, %454, %cst_103 {dimension_numbers = #tpu.dot_dimension_numbers<[1], [0], [0], [1], [0, 0, 1, 1], [], []>} : vector<2x256xf32>, vector<256x512xf32>, vector<2x512xf32> -> vector<2x512xf32>
    %456 = vector.broadcast %10 : vector<1x512xf32> to vector<2x512xf32>
    %457 = arith.addf %455, %456 : vector<2x512xf32>
    %458 = vector.extract_strided_slice %457 {offsets = [0, 0], sizes = [2, 128], strides = [1, 1]} : vector<2x512xf32> to vector<2x128xf32>
    %459 = arith.negf %458 : vector<2x128xf32>
    %460 = math.exp %459 : vector<2x128xf32>
    %cst_104 = arith.constant 1.000000e+00 : f32
    %461 = vector.broadcast %cst_104 : f32 to vector<2x128xf32>
    %462 = arith.addf %461, %460 : vector<2x128xf32>
    %463 = arith.divf %461, %462 : vector<2x128xf32>
    %464 = vector.extract_strided_slice %457 {offsets = [0, 128], sizes = [2, 128], strides = [1, 1]} : vector<2x512xf32> to vector<2x128xf32>
    %465 = arith.negf %464 : vector<2x128xf32>
    %466 = math.exp %465 : vector<2x128xf32>
    %cst_105 = arith.constant 1.000000e+00 : f32
    %467 = vector.broadcast %cst_105 : f32 to vector<2x128xf32>
    %468 = arith.addf %467, %466 : vector<2x128xf32>
    %469 = arith.divf %467, %468 : vector<2x128xf32>
    %470 = vector.extract_strided_slice %457 {offsets = [0, 256], sizes = [2, 128], strides = [1, 1]} : vector<2x512xf32> to vector<2x128xf32>
    %471 = math.tanh %470 : vector<2x128xf32>
    %472 = vector.extract_strided_slice %457 {offsets = [0, 384], sizes = [2, 128], strides = [1, 1]} : vector<2x512xf32> to vector<2x128xf32>
    %473 = arith.negf %472 : vector<2x128xf32>
    %474 = math.exp %473 : vector<2x128xf32>
    %cst_106 = arith.constant 1.000000e+00 : f32
    %475 = vector.broadcast %cst_106 : f32 to vector<2x128xf32>
    %476 = arith.addf %475, %474 : vector<2x128xf32>
    %477 = arith.divf %475, %476 : vector<2x128xf32>
    %478 = arith.mulf %469, %421 : vector<2x128xf32>
    %479 = arith.mulf %463, %471 : vector<2x128xf32>
    %480 = arith.addf %478, %479 : vector<2x128xf32>
    %481 = math.tanh %480 : vector<2x128xf32>
    %482 = arith.mulf %477, %481 : vector<2x128xf32>
    %c0_107 = arith.constant 0 : index
    %c0_108 = arith.constant 0 : index
    %483 = vector.load %arg9[%c0_107, %c0_108] : memref<1x512xf32, #tpu.memory_space<vmem>>, vector<1x512xf32>
    %c0_109 = arith.constant 0 : index
    %c0_110 = arith.constant 0 : index
    %484 = vector.load %arg11[%c0_109, %c0_110] : memref<1x512xf32, #tpu.memory_space<vmem>>, vector<1x512xf32>
    %485 = vector.extract_strided_slice %4 {offsets = [14, 0], sizes = [2, 128], strides = [1, 1]} : vector<16x128xf32> to vector<2x128xf32>
    %c0_111 = arith.constant 0 : index
    %c0_112 = arith.constant 0 : index
    %486 = vector.load %arg6[%c0_111, %c0_112] : memref<128x512xf32, #tpu.memory_space<vmem>>, vector<128x512xf32>
    %cst_113 = arith.constant dense<0.000000e+00> : vector<2x512xf32>
    %487 = tpu.matmul %485, %486, %cst_113 {dimension_numbers = #tpu.dot_dimension_numbers<[1], [0], [0], [1], [0, 0, 1, 1], [], []>} : vector<2x128xf32>, vector<128x512xf32>, vector<2x512xf32> -> vector<2x512xf32>
    %c0_114 = arith.constant 0 : index
    %c0_115 = arith.constant 0 : index
    %488 = vector.load %arg7[%c0_114, %c0_115] : memref<1x512xf32, #tpu.memory_space<vmem>>, vector<1x512xf32>
    %489 = vector.broadcast %488 : vector<1x512xf32> to vector<2x512xf32>
    %490 = arith.addf %487, %489 : vector<2x512xf32>
    %c0_116 = arith.constant 0 : index
    %c0_117 = arith.constant 0 : index
    %491 = vector.load %arg8[%c0_116, %c0_117] : memref<256x512xf32, #tpu.memory_space<vmem>>, vector<128x512xf32>
    %cst_118 = arith.constant dense<0.000000e+00> : vector<2x512xf32>
    %492 = tpu.matmul %452, %491, %cst_118 {dimension_numbers = #tpu.dot_dimension_numbers<[1], [0], [0], [1], [0, 0, 1, 1], [], []>} : vector<2x128xf32>, vector<128x512xf32>, vector<2x512xf32> -> vector<2x512xf32>
    %493 = arith.addf %492, %490 : vector<2x512xf32>
    %494 = vector.extract_strided_slice %493 {offsets = [0, 0], sizes = [2, 128], strides = [1, 1]} : vector<2x512xf32> to vector<2x128xf32>
    %495 = arith.negf %494 : vector<2x128xf32>
    %496 = math.exp %495 : vector<2x128xf32>
    %cst_119 = arith.constant 1.000000e+00 : f32
    %497 = vector.broadcast %cst_119 : f32 to vector<2x128xf32>
    %498 = arith.addf %497, %496 : vector<2x128xf32>
    %499 = arith.divf %497, %498 : vector<2x128xf32>
    %500 = vector.extract_strided_slice %493 {offsets = [0, 128], sizes = [2, 128], strides = [1, 1]} : vector<2x512xf32> to vector<2x128xf32>
    %501 = arith.negf %500 : vector<2x128xf32>
    %502 = math.exp %501 : vector<2x128xf32>
    %cst_120 = arith.constant 1.000000e+00 : f32
    %503 = vector.broadcast %cst_120 : f32 to vector<2x128xf32>
    %504 = arith.addf %503, %502 : vector<2x128xf32>
    %505 = arith.divf %503, %504 : vector<2x128xf32>
    %506 = vector.extract_strided_slice %493 {offsets = [0, 256], sizes = [2, 128], strides = [1, 1]} : vector<2x512xf32> to vector<2x128xf32>
    %507 = math.tanh %506 : vector<2x128xf32>
    %508 = vector.extract_strided_slice %493 {offsets = [0, 384], sizes = [2, 128], strides = [1, 1]} : vector<2x512xf32> to vector<2x128xf32>
    %509 = arith.negf %508 : vector<2x128xf32>
    %510 = math.exp %509 : vector<2x128xf32>
    %cst_121 = arith.constant 1.000000e+00 : f32
    %511 = vector.broadcast %cst_121 : f32 to vector<2x128xf32>
    %512 = arith.addf %511, %510 : vector<2x128xf32>
    %513 = arith.divf %511, %512 : vector<2x128xf32>
    %514 = arith.mulf %505, %450 : vector<2x128xf32>
    %515 = arith.mulf %499, %507 : vector<2x128xf32>
    %516 = arith.addf %514, %515 : vector<2x128xf32>
    %517 = math.tanh %516 : vector<2x128xf32>
    %518 = arith.mulf %513, %517 : vector<2x128xf32>
    %519 = tpu.concatenate %482, %518 in 1 : vector<2x128xf32>, vector<2x128xf32> -> vector<2x256xf32>
    %c0_122 = arith.constant 0 : index
    %c0_123 = arith.constant 0 : index
    %520 = vector.load %arg10[%c0_122, %c0_123] : memref<256x512xf32, #tpu.memory_space<vmem>>, vector<256x512xf32>
    %cst_124 = arith.constant dense<0.000000e+00> : vector<2x512xf32>
    %521 = tpu.matmul %519, %520, %cst_124 {dimension_numbers = #tpu.dot_dimension_numbers<[1], [0], [0], [1], [0, 0, 1, 1], [], []>} : vector<2x256xf32>, vector<256x512xf32>, vector<2x512xf32> -> vector<2x512xf32>
    %522 = vector.broadcast %484 : vector<1x512xf32> to vector<2x512xf32>
    %523 = arith.addf %521, %522 : vector<2x512xf32>
    %524 = vector.extract_strided_slice %523 {offsets = [0, 0], sizes = [2, 128], strides = [1, 1]} : vector<2x512xf32> to vector<2x128xf32>
    %525 = arith.negf %524 : vector<2x128xf32>
    %526 = math.exp %525 : vector<2x128xf32>
    %cst_125 = arith.constant 1.000000e+00 : f32
    %527 = vector.broadcast %cst_125 : f32 to vector<2x128xf32>
    %528 = arith.addf %527, %526 : vector<2x128xf32>
    %529 = arith.divf %527, %528 : vector<2x128xf32>
    %530 = vector.extract_strided_slice %523 {offsets = [0, 128], sizes = [2, 128], strides = [1, 1]} : vector<2x512xf32> to vector<2x128xf32>
    %531 = arith.negf %530 : vector<2x128xf32>
    %532 = math.exp %531 : vector<2x128xf32>
    %cst_126 = arith.constant 1.000000e+00 : f32
    %533 = vector.broadcast %cst_126 : f32 to vector<2x128xf32>
    %534 = arith.addf %533, %532 : vector<2x128xf32>
    %535 = arith.divf %533, %534 : vector<2x128xf32>
    %536 = vector.extract_strided_slice %523 {offsets = [0, 256], sizes = [2, 128], strides = [1, 1]} : vector<2x512xf32> to vector<2x128xf32>
    %537 = math.tanh %536 : vector<2x128xf32>
    %538 = vector.extract_strided_slice %523 {offsets = [0, 384], sizes = [2, 128], strides = [1, 1]} : vector<2x512xf32> to vector<2x128xf32>
    %539 = arith.negf %538 : vector<2x128xf32>
    %540 = math.exp %539 : vector<2x128xf32>
    %cst_127 = arith.constant 1.000000e+00 : f32
    %541 = vector.broadcast %cst_127 : f32 to vector<2x128xf32>
    %542 = arith.addf %541, %540 : vector<2x128xf32>
    %543 = arith.divf %541, %542 : vector<2x128xf32>
    %544 = arith.mulf %535, %480 : vector<2x128xf32>
    %545 = arith.mulf %529, %537 : vector<2x128xf32>
    %546 = arith.addf %544, %545 : vector<2x128xf32>
    %547 = math.tanh %546 : vector<2x128xf32>
    %548 = arith.mulf %543, %547 : vector<2x128xf32>
    %549 = tpu.concatenate %518, %548 in 1 : vector<2x128xf32>, vector<2x128xf32> -> vector<2x256xf32>
    %c0_128 = arith.constant 0 : index
    %c0_129 = arith.constant 0 : index
    %550 = vector.load %arg8[%c0_128, %c0_129] : memref<256x512xf32, #tpu.memory_space<vmem>>, vector<256x512xf32>
    %cst_130 = arith.constant dense<0.000000e+00> : vector<2x512xf32>
    %551 = tpu.matmul %549, %550, %cst_130 {dimension_numbers = #tpu.dot_dimension_numbers<[1], [0], [0], [1], [0, 0, 1, 1], [], []>} : vector<2x256xf32>, vector<256x512xf32>, vector<2x512xf32> -> vector<2x512xf32>
    %552 = vector.broadcast %483 : vector<1x512xf32> to vector<2x512xf32>
    %553 = arith.addf %551, %552 : vector<2x512xf32>
    %554 = vector.extract_strided_slice %553 {offsets = [0, 0], sizes = [2, 128], strides = [1, 1]} : vector<2x512xf32> to vector<2x128xf32>
    %555 = arith.negf %554 : vector<2x128xf32>
    %556 = math.exp %555 : vector<2x128xf32>
    %cst_131 = arith.constant 1.000000e+00 : f32
    %557 = vector.broadcast %cst_131 : f32 to vector<2x128xf32>
    %558 = arith.addf %557, %556 : vector<2x128xf32>
    %559 = arith.divf %557, %558 : vector<2x128xf32>
    %560 = vector.extract_strided_slice %553 {offsets = [0, 128], sizes = [2, 128], strides = [1, 1]} : vector<2x512xf32> to vector<2x128xf32>
    %561 = arith.negf %560 : vector<2x128xf32>
    %562 = math.exp %561 : vector<2x128xf32>
    %cst_132 = arith.constant 1.000000e+00 : f32
    %563 = vector.broadcast %cst_132 : f32 to vector<2x128xf32>
    %564 = arith.addf %563, %562 : vector<2x128xf32>
    %565 = arith.divf %563, %564 : vector<2x128xf32>
    %566 = vector.extract_strided_slice %553 {offsets = [0, 256], sizes = [2, 128], strides = [1, 1]} : vector<2x512xf32> to vector<2x128xf32>
    %567 = math.tanh %566 : vector<2x128xf32>
    %568 = vector.extract_strided_slice %553 {offsets = [0, 384], sizes = [2, 128], strides = [1, 1]} : vector<2x512xf32> to vector<2x128xf32>
    %569 = arith.negf %568 : vector<2x128xf32>
    %570 = math.exp %569 : vector<2x128xf32>
    %cst_133 = arith.constant 1.000000e+00 : f32
    %571 = vector.broadcast %cst_133 : f32 to vector<2x128xf32>
    %572 = arith.addf %571, %570 : vector<2x128xf32>
    %573 = arith.divf %571, %572 : vector<2x128xf32>
    %574 = arith.mulf %565, %516 : vector<2x128xf32>
    %575 = arith.mulf %559, %567 : vector<2x128xf32>
    %576 = arith.addf %574, %575 : vector<2x128xf32>
    %577 = math.tanh %576 : vector<2x128xf32>
    %578 = arith.mulf %573, %577 : vector<2x128xf32>
    %579 = tpu.concatenate %548, %578 in 1 : vector<2x128xf32>, vector<2x128xf32> -> vector<2x256xf32>
    %c0_134 = arith.constant 0 : index
    %c0_135 = arith.constant 0 : index
    %580 = vector.load %arg10[%c0_134, %c0_135] : memref<256x512xf32, #tpu.memory_space<vmem>>, vector<256x512xf32>
    %cst_136 = arith.constant dense<0.000000e+00> : vector<2x512xf32>
    %581 = tpu.matmul %579, %580, %cst_136 {dimension_numbers = #tpu.dot_dimension_numbers<[1], [0], [0], [1], [0, 0, 1, 1], [], []>} : vector<2x256xf32>, vector<256x512xf32>, vector<2x512xf32> -> vector<2x512xf32>
    %582 = vector.broadcast %484 : vector<1x512xf32> to vector<2x512xf32>
    %583 = arith.addf %581, %582 : vector<2x512xf32>
    %584 = vector.extract_strided_slice %583 {offsets = [0, 0], sizes = [2, 128], strides = [1, 1]} : vector<2x512xf32> to vector<2x128xf32>
    %585 = arith.negf %584 : vector<2x128xf32>
    %586 = math.exp %585 : vector<2x128xf32>
    %cst_137 = arith.constant 1.000000e+00 : f32
    %587 = vector.broadcast %cst_137 : f32 to vector<2x128xf32>
    %588 = arith.addf %587, %586 : vector<2x128xf32>
    %589 = arith.divf %587, %588 : vector<2x128xf32>
    %590 = vector.extract_strided_slice %583 {offsets = [0, 128], sizes = [2, 128], strides = [1, 1]} : vector<2x512xf32> to vector<2x128xf32>
    %591 = arith.negf %590 : vector<2x128xf32>
    %592 = math.exp %591 : vector<2x128xf32>
    %cst_138 = arith.constant 1.000000e+00 : f32
    %593 = vector.broadcast %cst_138 : f32 to vector<2x128xf32>
    %594 = arith.addf %593, %592 : vector<2x128xf32>
    %595 = arith.divf %593, %594 : vector<2x128xf32>
    %596 = vector.extract_strided_slice %583 {offsets = [0, 256], sizes = [2, 128], strides = [1, 1]} : vector<2x512xf32> to vector<2x128xf32>
    %597 = math.tanh %596 : vector<2x128xf32>
    %598 = vector.extract_strided_slice %583 {offsets = [0, 384], sizes = [2, 128], strides = [1, 1]} : vector<2x512xf32> to vector<2x128xf32>
    %599 = arith.negf %598 : vector<2x128xf32>
    %600 = math.exp %599 : vector<2x128xf32>
    %cst_139 = arith.constant 1.000000e+00 : f32
    %601 = vector.broadcast %cst_139 : f32 to vector<2x128xf32>
    %602 = arith.addf %601, %600 : vector<2x128xf32>
    %603 = arith.divf %601, %602 : vector<2x128xf32>
    %604 = arith.mulf %595, %546 : vector<2x128xf32>
    %605 = arith.mulf %589, %597 : vector<2x128xf32>
    %606 = arith.addf %604, %605 : vector<2x128xf32>
    %607 = math.tanh %606 : vector<2x128xf32>
    %608 = arith.mulf %603, %607 : vector<2x128xf32>
    %609 = tpu.concatenate %578, %608 in 1 : vector<2x128xf32>, vector<2x128xf32> -> vector<2x256xf32>
    %c0_140 = arith.constant 0 : index
    %c0_141 = arith.constant 0 : index
    %610 = vector.load %arg8[%c0_140, %c0_141] : memref<256x512xf32, #tpu.memory_space<vmem>>, vector<256x512xf32>
    %cst_142 = arith.constant dense<0.000000e+00> : vector<2x512xf32>
    %611 = tpu.matmul %609, %610, %cst_142 {dimension_numbers = #tpu.dot_dimension_numbers<[1], [0], [0], [1], [0, 0, 1, 1], [], []>} : vector<2x256xf32>, vector<256x512xf32>, vector<2x512xf32> -> vector<2x512xf32>
    %612 = vector.broadcast %483 : vector<1x512xf32> to vector<2x512xf32>
    %613 = arith.addf %611, %612 : vector<2x512xf32>
    %614 = vector.extract_strided_slice %613 {offsets = [0, 0], sizes = [2, 128], strides = [1, 1]} : vector<2x512xf32> to vector<2x128xf32>
    %615 = arith.negf %614 : vector<2x128xf32>
    %616 = math.exp %615 : vector<2x128xf32>
    %cst_143 = arith.constant 1.000000e+00 : f32
    %617 = vector.broadcast %cst_143 : f32 to vector<2x128xf32>
    %618 = arith.addf %617, %616 : vector<2x128xf32>
    %619 = arith.divf %617, %618 : vector<2x128xf32>
    %620 = vector.extract_strided_slice %613 {offsets = [0, 128], sizes = [2, 128], strides = [1, 1]} : vector<2x512xf32> to vector<2x128xf32>
    %621 = arith.negf %620 : vector<2x128xf32>
    %622 = math.exp %621 : vector<2x128xf32>
    %cst_144 = arith.constant 1.000000e+00 : f32
    %623 = vector.broadcast %cst_144 : f32 to vector<2x128xf32>
    %624 = arith.addf %623, %622 : vector<2x128xf32>
    %625 = arith.divf %623, %624 : vector<2x128xf32>
    %626 = vector.extract_strided_slice %613 {offsets = [0, 256], sizes = [2, 128], strides = [1, 1]} : vector<2x512xf32> to vector<2x128xf32>
    %627 = math.tanh %626 : vector<2x128xf32>
    %628 = vector.extract_strided_slice %613 {offsets = [0, 384], sizes = [2, 128], strides = [1, 1]} : vector<2x512xf32> to vector<2x128xf32>
    %629 = arith.negf %628 : vector<2x128xf32>
    %630 = math.exp %629 : vector<2x128xf32>
    %cst_145 = arith.constant 1.000000e+00 : f32
    %631 = vector.broadcast %cst_145 : f32 to vector<2x128xf32>
    %632 = arith.addf %631, %630 : vector<2x128xf32>
    %633 = arith.divf %631, %632 : vector<2x128xf32>
    %634 = arith.mulf %625, %576 : vector<2x128xf32>
    %635 = arith.mulf %619, %627 : vector<2x128xf32>
    %636 = arith.addf %634, %635 : vector<2x128xf32>
    %637 = math.tanh %636 : vector<2x128xf32>
    %638 = arith.mulf %633, %637 : vector<2x128xf32>
    %639 = tpu.concatenate %608, %638 in 1 : vector<2x128xf32>, vector<2x128xf32> -> vector<2x256xf32>
    %c0_146 = arith.constant 0 : index
    %c0_147 = arith.constant 0 : index
    %640 = vector.load %arg10[%c0_146, %c0_147] : memref<256x512xf32, #tpu.memory_space<vmem>>, vector<256x512xf32>
    %cst_148 = arith.constant dense<0.000000e+00> : vector<2x512xf32>
    %641 = tpu.matmul %639, %640, %cst_148 {dimension_numbers = #tpu.dot_dimension_numbers<[1], [0], [0], [1], [0, 0, 1, 1], [], []>} : vector<2x256xf32>, vector<256x512xf32>, vector<2x512xf32> -> vector<2x512xf32>
    %642 = vector.broadcast %484 : vector<1x512xf32> to vector<2x512xf32>
    %643 = arith.addf %641, %642 : vector<2x512xf32>
    %644 = vector.extract_strided_slice %643 {offsets = [0, 0], sizes = [2, 128], strides = [1, 1]} : vector<2x512xf32> to vector<2x128xf32>
    %645 = arith.negf %644 : vector<2x128xf32>
    %646 = math.exp %645 : vector<2x128xf32>
    %cst_149 = arith.constant 1.000000e+00 : f32
    %647 = vector.broadcast %cst_149 : f32 to vector<2x128xf32>
    %648 = arith.addf %647, %646 : vector<2x128xf32>
    %649 = arith.divf %647, %648 : vector<2x128xf32>
    %650 = vector.extract_strided_slice %643 {offsets = [0, 128], sizes = [2, 128], strides = [1, 1]} : vector<2x512xf32> to vector<2x128xf32>
    %651 = arith.negf %650 : vector<2x128xf32>
    %652 = math.exp %651 : vector<2x128xf32>
    %cst_150 = arith.constant 1.000000e+00 : f32
    %653 = vector.broadcast %cst_150 : f32 to vector<2x128xf32>
    %654 = arith.addf %653, %652 : vector<2x128xf32>
    %655 = arith.divf %653, %654 : vector<2x128xf32>
    %656 = vector.extract_strided_slice %643 {offsets = [0, 256], sizes = [2, 128], strides = [1, 1]} : vector<2x512xf32> to vector<2x128xf32>
    %657 = math.tanh %656 : vector<2x128xf32>
    %658 = vector.extract_strided_slice %643 {offsets = [0, 384], sizes = [2, 128], strides = [1, 1]} : vector<2x512xf32> to vector<2x128xf32>
    %659 = arith.negf %658 : vector<2x128xf32>
    %660 = math.exp %659 : vector<2x128xf32>
    %cst_151 = arith.constant 1.000000e+00 : f32
    %661 = vector.broadcast %cst_151 : f32 to vector<2x128xf32>
    %662 = arith.addf %661, %660 : vector<2x128xf32>
    %663 = arith.divf %661, %662 : vector<2x128xf32>
    %664 = arith.mulf %655, %606 : vector<2x128xf32>
    %665 = arith.mulf %649, %657 : vector<2x128xf32>
    %666 = arith.addf %664, %665 : vector<2x128xf32>
    %667 = math.tanh %666 : vector<2x128xf32>
    %668 = arith.mulf %663, %667 : vector<2x128xf32>
    %669 = tpu.concatenate %638, %668 in 1 : vector<2x128xf32>, vector<2x128xf32> -> vector<2x256xf32>
    %c0_152 = arith.constant 0 : index
    %c0_153 = arith.constant 0 : index
    %670 = vector.load %arg8[%c0_152, %c0_153] : memref<256x512xf32, #tpu.memory_space<vmem>>, vector<256x512xf32>
    %cst_154 = arith.constant dense<0.000000e+00> : vector<2x512xf32>
    %671 = tpu.matmul %669, %670, %cst_154 {dimension_numbers = #tpu.dot_dimension_numbers<[1], [0], [0], [1], [0, 0, 1, 1], [], []>} : vector<2x256xf32>, vector<256x512xf32>, vector<2x512xf32> -> vector<2x512xf32>
    %672 = vector.broadcast %483 : vector<1x512xf32> to vector<2x512xf32>
    %673 = arith.addf %671, %672 : vector<2x512xf32>
    %674 = vector.extract_strided_slice %673 {offsets = [0, 0], sizes = [2, 128], strides = [1, 1]} : vector<2x512xf32> to vector<2x128xf32>
    %675 = arith.negf %674 : vector<2x128xf32>
    %676 = math.exp %675 : vector<2x128xf32>
    %cst_155 = arith.constant 1.000000e+00 : f32
    %677 = vector.broadcast %cst_155 : f32 to vector<2x128xf32>
    %678 = arith.addf %677, %676 : vector<2x128xf32>
    %679 = arith.divf %677, %678 : vector<2x128xf32>
    %680 = vector.extract_strided_slice %673 {offsets = [0, 128], sizes = [2, 128], strides = [1, 1]} : vector<2x512xf32> to vector<2x128xf32>
    %681 = arith.negf %680 : vector<2x128xf32>
    %682 = math.exp %681 : vector<2x128xf32>
    %cst_156 = arith.constant 1.000000e+00 : f32
    %683 = vector.broadcast %cst_156 : f32 to vector<2x128xf32>
    %684 = arith.addf %683, %682 : vector<2x128xf32>
    %685 = arith.divf %683, %684 : vector<2x128xf32>
    %686 = vector.extract_strided_slice %673 {offsets = [0, 256], sizes = [2, 128], strides = [1, 1]} : vector<2x512xf32> to vector<2x128xf32>
    %687 = math.tanh %686 : vector<2x128xf32>
    %688 = vector.extract_strided_slice %673 {offsets = [0, 384], sizes = [2, 128], strides = [1, 1]} : vector<2x512xf32> to vector<2x128xf32>
    %689 = arith.negf %688 : vector<2x128xf32>
    %690 = math.exp %689 : vector<2x128xf32>
    %cst_157 = arith.constant 1.000000e+00 : f32
    %691 = vector.broadcast %cst_157 : f32 to vector<2x128xf32>
    %692 = arith.addf %691, %690 : vector<2x128xf32>
    %693 = arith.divf %691, %692 : vector<2x128xf32>
    %694 = arith.mulf %685, %636 : vector<2x128xf32>
    %695 = arith.mulf %679, %687 : vector<2x128xf32>
    %696 = arith.addf %694, %695 : vector<2x128xf32>
    %697 = math.tanh %696 : vector<2x128xf32>
    %698 = arith.mulf %693, %697 : vector<2x128xf32>
    %699 = tpu.concatenate %668, %698 in 1 : vector<2x128xf32>, vector<2x128xf32> -> vector<2x256xf32>
    %c0_158 = arith.constant 0 : index
    %c0_159 = arith.constant 0 : index
    %700 = vector.load %arg10[%c0_158, %c0_159] : memref<256x512xf32, #tpu.memory_space<vmem>>, vector<256x512xf32>
    %cst_160 = arith.constant dense<0.000000e+00> : vector<2x512xf32>
    %701 = tpu.matmul %699, %700, %cst_160 {dimension_numbers = #tpu.dot_dimension_numbers<[1], [0], [0], [1], [0, 0, 1, 1], [], []>} : vector<2x256xf32>, vector<256x512xf32>, vector<2x512xf32> -> vector<2x512xf32>
    %702 = vector.broadcast %484 : vector<1x512xf32> to vector<2x512xf32>
    %703 = arith.addf %701, %702 : vector<2x512xf32>
    %704 = vector.extract_strided_slice %703 {offsets = [0, 0], sizes = [2, 128], strides = [1, 1]} : vector<2x512xf32> to vector<2x128xf32>
    %705 = arith.negf %704 : vector<2x128xf32>
    %706 = math.exp %705 : vector<2x128xf32>
    %cst_161 = arith.constant 1.000000e+00 : f32
    %707 = vector.broadcast %cst_161 : f32 to vector<2x128xf32>
    %708 = arith.addf %707, %706 : vector<2x128xf32>
    %709 = arith.divf %707, %708 : vector<2x128xf32>
    %710 = vector.extract_strided_slice %703 {offsets = [0, 128], sizes = [2, 128], strides = [1, 1]} : vector<2x512xf32> to vector<2x128xf32>
    %711 = arith.negf %710 : vector<2x128xf32>
    %712 = math.exp %711 : vector<2x128xf32>
    %cst_162 = arith.constant 1.000000e+00 : f32
    %713 = vector.broadcast %cst_162 : f32 to vector<2x128xf32>
    %714 = arith.addf %713, %712 : vector<2x128xf32>
    %715 = arith.divf %713, %714 : vector<2x128xf32>
    %716 = vector.extract_strided_slice %703 {offsets = [0, 256], sizes = [2, 128], strides = [1, 1]} : vector<2x512xf32> to vector<2x128xf32>
    %717 = math.tanh %716 : vector<2x128xf32>
    %718 = vector.extract_strided_slice %703 {offsets = [0, 384], sizes = [2, 128], strides = [1, 1]} : vector<2x512xf32> to vector<2x128xf32>
    %719 = arith.negf %718 : vector<2x128xf32>
    %720 = math.exp %719 : vector<2x128xf32>
    %cst_163 = arith.constant 1.000000e+00 : f32
    %721 = vector.broadcast %cst_163 : f32 to vector<2x128xf32>
    %722 = arith.addf %721, %720 : vector<2x128xf32>
    %723 = arith.divf %721, %722 : vector<2x128xf32>
    %724 = arith.mulf %715, %666 : vector<2x128xf32>
    %725 = arith.mulf %709, %717 : vector<2x128xf32>
    %726 = arith.addf %724, %725 : vector<2x128xf32>
    %727 = math.tanh %726 : vector<2x128xf32>
    %728 = arith.mulf %723, %727 : vector<2x128xf32>
    %729 = tpu.concatenate %698, %728 in 1 : vector<2x128xf32>, vector<2x128xf32> -> vector<2x256xf32>
    %c0_164 = arith.constant 0 : index
    %c0_165 = arith.constant 0 : index
    %730 = vector.load %arg8[%c0_164, %c0_165] : memref<256x512xf32, #tpu.memory_space<vmem>>, vector<256x512xf32>
    %cst_166 = arith.constant dense<0.000000e+00> : vector<2x512xf32>
    %731 = tpu.matmul %729, %730, %cst_166 {dimension_numbers = #tpu.dot_dimension_numbers<[1], [0], [0], [1], [0, 0, 1, 1], [], []>} : vector<2x256xf32>, vector<256x512xf32>, vector<2x512xf32> -> vector<2x512xf32>
    %732 = vector.broadcast %483 : vector<1x512xf32> to vector<2x512xf32>
    %733 = arith.addf %731, %732 : vector<2x512xf32>
    %734 = vector.extract_strided_slice %733 {offsets = [0, 0], sizes = [2, 128], strides = [1, 1]} : vector<2x512xf32> to vector<2x128xf32>
    %735 = arith.negf %734 : vector<2x128xf32>
    %736 = math.exp %735 : vector<2x128xf32>
    %cst_167 = arith.constant 1.000000e+00 : f32
    %737 = vector.broadcast %cst_167 : f32 to vector<2x128xf32>
    %738 = arith.addf %737, %736 : vector<2x128xf32>
    %739 = arith.divf %737, %738 : vector<2x128xf32>
    %740 = vector.extract_strided_slice %733 {offsets = [0, 128], sizes = [2, 128], strides = [1, 1]} : vector<2x512xf32> to vector<2x128xf32>
    %741 = arith.negf %740 : vector<2x128xf32>
    %742 = math.exp %741 : vector<2x128xf32>
    %cst_168 = arith.constant 1.000000e+00 : f32
    %743 = vector.broadcast %cst_168 : f32 to vector<2x128xf32>
    %744 = arith.addf %743, %742 : vector<2x128xf32>
    %745 = arith.divf %743, %744 : vector<2x128xf32>
    %746 = vector.extract_strided_slice %733 {offsets = [0, 256], sizes = [2, 128], strides = [1, 1]} : vector<2x512xf32> to vector<2x128xf32>
    %747 = math.tanh %746 : vector<2x128xf32>
    %748 = vector.extract_strided_slice %733 {offsets = [0, 384], sizes = [2, 128], strides = [1, 1]} : vector<2x512xf32> to vector<2x128xf32>
    %749 = arith.negf %748 : vector<2x128xf32>
    %750 = math.exp %749 : vector<2x128xf32>
    %cst_169 = arith.constant 1.000000e+00 : f32
    %751 = vector.broadcast %cst_169 : f32 to vector<2x128xf32>
    %752 = arith.addf %751, %750 : vector<2x128xf32>
    %753 = arith.divf %751, %752 : vector<2x128xf32>
    %754 = arith.mulf %745, %696 : vector<2x128xf32>
    %755 = arith.mulf %739, %747 : vector<2x128xf32>
    %756 = arith.addf %754, %755 : vector<2x128xf32>
    %757 = math.tanh %756 : vector<2x128xf32>
    %758 = arith.mulf %753, %757 : vector<2x128xf32>
    %759 = tpu.concatenate %728, %758 in 1 : vector<2x128xf32>, vector<2x128xf32> -> vector<2x256xf32>
    %c0_170 = arith.constant 0 : index
    %c0_171 = arith.constant 0 : index
    %760 = vector.load %arg10[%c0_170, %c0_171] : memref<256x512xf32, #tpu.memory_space<vmem>>, vector<256x512xf32>
    %cst_172 = arith.constant dense<0.000000e+00> : vector<2x512xf32>
    %761 = tpu.matmul %759, %760, %cst_172 {dimension_numbers = #tpu.dot_dimension_numbers<[1], [0], [0], [1], [0, 0, 1, 1], [], []>} : vector<2x256xf32>, vector<256x512xf32>, vector<2x512xf32> -> vector<2x512xf32>
    %762 = vector.broadcast %484 : vector<1x512xf32> to vector<2x512xf32>
    %763 = arith.addf %761, %762 : vector<2x512xf32>
    %764 = vector.extract_strided_slice %763 {offsets = [0, 0], sizes = [2, 128], strides = [1, 1]} : vector<2x512xf32> to vector<2x128xf32>
    %765 = arith.negf %764 : vector<2x128xf32>
    %766 = math.exp %765 : vector<2x128xf32>
    %cst_173 = arith.constant 1.000000e+00 : f32
    %767 = vector.broadcast %cst_173 : f32 to vector<2x128xf32>
    %768 = arith.addf %767, %766 : vector<2x128xf32>
    %769 = arith.divf %767, %768 : vector<2x128xf32>
    %770 = vector.extract_strided_slice %763 {offsets = [0, 128], sizes = [2, 128], strides = [1, 1]} : vector<2x512xf32> to vector<2x128xf32>
    %771 = arith.negf %770 : vector<2x128xf32>
    %772 = math.exp %771 : vector<2x128xf32>
    %cst_174 = arith.constant 1.000000e+00 : f32
    %773 = vector.broadcast %cst_174 : f32 to vector<2x128xf32>
    %774 = arith.addf %773, %772 : vector<2x128xf32>
    %775 = arith.divf %773, %774 : vector<2x128xf32>
    %776 = vector.extract_strided_slice %763 {offsets = [0, 256], sizes = [2, 128], strides = [1, 1]} : vector<2x512xf32> to vector<2x128xf32>
    %777 = math.tanh %776 : vector<2x128xf32>
    %778 = vector.extract_strided_slice %763 {offsets = [0, 384], sizes = [2, 128], strides = [1, 1]} : vector<2x512xf32> to vector<2x128xf32>
    %779 = arith.negf %778 : vector<2x128xf32>
    %780 = math.exp %779 : vector<2x128xf32>
    %cst_175 = arith.constant 1.000000e+00 : f32
    %781 = vector.broadcast %cst_175 : f32 to vector<2x128xf32>
    %782 = arith.addf %781, %780 : vector<2x128xf32>
    %783 = arith.divf %781, %782 : vector<2x128xf32>
    %784 = arith.mulf %775, %726 : vector<2x128xf32>
    %785 = arith.mulf %769, %777 : vector<2x128xf32>
    %786 = arith.addf %784, %785 : vector<2x128xf32>
    %787 = math.tanh %786 : vector<2x128xf32>
    %788 = arith.mulf %783, %787 : vector<2x128xf32>
    %789 = tpu.concatenate %758, %788 in 1 : vector<2x128xf32>, vector<2x128xf32> -> vector<2x256xf32>
    %c0_176 = arith.constant 0 : index
    %c0_177 = arith.constant 0 : index
    %790 = vector.load %arg8[%c0_176, %c0_177] : memref<256x512xf32, #tpu.memory_space<vmem>>, vector<256x512xf32>
    %cst_178 = arith.constant dense<0.000000e+00> : vector<2x512xf32>
    %791 = tpu.matmul %789, %790, %cst_178 {dimension_numbers = #tpu.dot_dimension_numbers<[1], [0], [0], [1], [0, 0, 1, 1], [], []>} : vector<2x256xf32>, vector<256x512xf32>, vector<2x512xf32> -> vector<2x512xf32>
    %792 = vector.broadcast %483 : vector<1x512xf32> to vector<2x512xf32>
    %793 = arith.addf %791, %792 : vector<2x512xf32>
    %794 = vector.extract_strided_slice %793 {offsets = [0, 0], sizes = [2, 128], strides = [1, 1]} : vector<2x512xf32> to vector<2x128xf32>
    %795 = arith.negf %794 : vector<2x128xf32>
    %796 = math.exp %795 : vector<2x128xf32>
    %cst_179 = arith.constant 1.000000e+00 : f32
    %797 = vector.broadcast %cst_179 : f32 to vector<2x128xf32>
    %798 = arith.addf %797, %796 : vector<2x128xf32>
    %799 = arith.divf %797, %798 : vector<2x128xf32>
    %800 = vector.extract_strided_slice %793 {offsets = [0, 128], sizes = [2, 128], strides = [1, 1]} : vector<2x512xf32> to vector<2x128xf32>
    %801 = arith.negf %800 : vector<2x128xf32>
    %802 = math.exp %801 : vector<2x128xf32>
    %cst_180 = arith.constant 1.000000e+00 : f32
    %803 = vector.broadcast %cst_180 : f32 to vector<2x128xf32>
    %804 = arith.addf %803, %802 : vector<2x128xf32>
    %805 = arith.divf %803, %804 : vector<2x128xf32>
    %806 = vector.extract_strided_slice %793 {offsets = [0, 256], sizes = [2, 128], strides = [1, 1]} : vector<2x512xf32> to vector<2x128xf32>
    %807 = math.tanh %806 : vector<2x128xf32>
    %808 = vector.extract_strided_slice %793 {offsets = [0, 384], sizes = [2, 128], strides = [1, 1]} : vector<2x512xf32> to vector<2x128xf32>
    %809 = arith.negf %808 : vector<2x128xf32>
    %810 = math.exp %809 : vector<2x128xf32>
    %cst_181 = arith.constant 1.000000e+00 : f32
    %811 = vector.broadcast %cst_181 : f32 to vector<2x128xf32>
    %812 = arith.addf %811, %810 : vector<2x128xf32>
    %813 = arith.divf %811, %812 : vector<2x128xf32>
    %814 = arith.mulf %805, %756 : vector<2x128xf32>
    %815 = arith.mulf %799, %807 : vector<2x128xf32>
    %816 = arith.addf %814, %815 : vector<2x128xf32>
    %817 = math.tanh %816 : vector<2x128xf32>
    %818 = arith.mulf %813, %817 : vector<2x128xf32>
    %819 = tpu.concatenate %788, %818 in 1 : vector<2x128xf32>, vector<2x128xf32> -> vector<2x256xf32>
    %c0_182 = arith.constant 0 : index
    %c0_183 = arith.constant 0 : index
    %820 = vector.load %arg10[%c0_182, %c0_183] : memref<256x512xf32, #tpu.memory_space<vmem>>, vector<256x512xf32>
    %cst_184 = arith.constant dense<0.000000e+00> : vector<2x512xf32>
    %821 = tpu.matmul %819, %820, %cst_184 {dimension_numbers = #tpu.dot_dimension_numbers<[1], [0], [0], [1], [0, 0, 1, 1], [], []>} : vector<2x256xf32>, vector<256x512xf32>, vector<2x512xf32> -> vector<2x512xf32>
    %822 = vector.broadcast %484 : vector<1x512xf32> to vector<2x512xf32>
    %823 = arith.addf %821, %822 : vector<2x512xf32>
    %824 = vector.extract_strided_slice %823 {offsets = [0, 0], sizes = [2, 128], strides = [1, 1]} : vector<2x512xf32> to vector<2x128xf32>
    %825 = arith.negf %824 : vector<2x128xf32>
    %826 = math.exp %825 : vector<2x128xf32>
    %cst_185 = arith.constant 1.000000e+00 : f32
    %827 = vector.broadcast %cst_185 : f32 to vector<2x128xf32>
    %828 = arith.addf %827, %826 : vector<2x128xf32>
    %829 = arith.divf %827, %828 : vector<2x128xf32>
    %830 = vector.extract_strided_slice %823 {offsets = [0, 128], sizes = [2, 128], strides = [1, 1]} : vector<2x512xf32> to vector<2x128xf32>
    %831 = arith.negf %830 : vector<2x128xf32>
    %832 = math.exp %831 : vector<2x128xf32>
    %cst_186 = arith.constant 1.000000e+00 : f32
    %833 = vector.broadcast %cst_186 : f32 to vector<2x128xf32>
    %834 = arith.addf %833, %832 : vector<2x128xf32>
    %835 = arith.divf %833, %834 : vector<2x128xf32>
    %836 = vector.extract_strided_slice %823 {offsets = [0, 256], sizes = [2, 128], strides = [1, 1]} : vector<2x512xf32> to vector<2x128xf32>
    %837 = math.tanh %836 : vector<2x128xf32>
    %838 = vector.extract_strided_slice %823 {offsets = [0, 384], sizes = [2, 128], strides = [1, 1]} : vector<2x512xf32> to vector<2x128xf32>
    %839 = arith.negf %838 : vector<2x128xf32>
    %840 = math.exp %839 : vector<2x128xf32>
    %cst_187 = arith.constant 1.000000e+00 : f32
    %841 = vector.broadcast %cst_187 : f32 to vector<2x128xf32>
    %842 = arith.addf %841, %840 : vector<2x128xf32>
    %843 = arith.divf %841, %842 : vector<2x128xf32>
    %844 = arith.mulf %835, %786 : vector<2x128xf32>
    %845 = arith.mulf %829, %837 : vector<2x128xf32>
    %846 = arith.addf %844, %845 : vector<2x128xf32>
    %847 = math.tanh %846 : vector<2x128xf32>
    %848 = arith.mulf %843, %847 : vector<2x128xf32>
    %849 = tpu.concatenate %818, %848 in 1 : vector<2x128xf32>, vector<2x128xf32> -> vector<2x256xf32>
    %c0_188 = arith.constant 0 : index
    %c0_189 = arith.constant 0 : index
    %850 = vector.load %arg8[%c0_188, %c0_189] : memref<256x512xf32, #tpu.memory_space<vmem>>, vector<256x512xf32>
    %cst_190 = arith.constant dense<0.000000e+00> : vector<2x512xf32>
    %851 = tpu.matmul %849, %850, %cst_190 {dimension_numbers = #tpu.dot_dimension_numbers<[1], [0], [0], [1], [0, 0, 1, 1], [], []>} : vector<2x256xf32>, vector<256x512xf32>, vector<2x512xf32> -> vector<2x512xf32>
    %852 = vector.broadcast %483 : vector<1x512xf32> to vector<2x512xf32>
    %853 = arith.addf %851, %852 : vector<2x512xf32>
    %854 = vector.extract_strided_slice %853 {offsets = [0, 0], sizes = [2, 128], strides = [1, 1]} : vector<2x512xf32> to vector<2x128xf32>
    %855 = arith.negf %854 : vector<2x128xf32>
    %856 = math.exp %855 : vector<2x128xf32>
    %cst_191 = arith.constant 1.000000e+00 : f32
    %857 = vector.broadcast %cst_191 : f32 to vector<2x128xf32>
    %858 = arith.addf %857, %856 : vector<2x128xf32>
    %859 = arith.divf %857, %858 : vector<2x128xf32>
    %860 = vector.extract_strided_slice %853 {offsets = [0, 128], sizes = [2, 128], strides = [1, 1]} : vector<2x512xf32> to vector<2x128xf32>
    %861 = arith.negf %860 : vector<2x128xf32>
    %862 = math.exp %861 : vector<2x128xf32>
    %cst_192 = arith.constant 1.000000e+00 : f32
    %863 = vector.broadcast %cst_192 : f32 to vector<2x128xf32>
    %864 = arith.addf %863, %862 : vector<2x128xf32>
    %865 = arith.divf %863, %864 : vector<2x128xf32>
    %866 = vector.extract_strided_slice %853 {offsets = [0, 256], sizes = [2, 128], strides = [1, 1]} : vector<2x512xf32> to vector<2x128xf32>
    %867 = math.tanh %866 : vector<2x128xf32>
    %868 = vector.extract_strided_slice %853 {offsets = [0, 384], sizes = [2, 128], strides = [1, 1]} : vector<2x512xf32> to vector<2x128xf32>
    %869 = arith.negf %868 : vector<2x128xf32>
    %870 = math.exp %869 : vector<2x128xf32>
    %cst_193 = arith.constant 1.000000e+00 : f32
    %871 = vector.broadcast %cst_193 : f32 to vector<2x128xf32>
    %872 = arith.addf %871, %870 : vector<2x128xf32>
    %873 = arith.divf %871, %872 : vector<2x128xf32>
    %874 = arith.mulf %865, %816 : vector<2x128xf32>
    %875 = arith.mulf %859, %867 : vector<2x128xf32>
    %876 = arith.addf %874, %875 : vector<2x128xf32>
    %877 = math.tanh %876 : vector<2x128xf32>
    %878 = arith.mulf %873, %877 : vector<2x128xf32>
    %879 = tpu.concatenate %848, %878 in 1 : vector<2x128xf32>, vector<2x128xf32> -> vector<2x256xf32>
    %c0_194 = arith.constant 0 : index
    %c0_195 = arith.constant 0 : index
    %880 = vector.load %arg10[%c0_194, %c0_195] : memref<256x512xf32, #tpu.memory_space<vmem>>, vector<256x512xf32>
    %cst_196 = arith.constant dense<0.000000e+00> : vector<2x512xf32>
    %881 = tpu.matmul %879, %880, %cst_196 {dimension_numbers = #tpu.dot_dimension_numbers<[1], [0], [0], [1], [0, 0, 1, 1], [], []>} : vector<2x256xf32>, vector<256x512xf32>, vector<2x512xf32> -> vector<2x512xf32>
    %882 = vector.broadcast %484 : vector<1x512xf32> to vector<2x512xf32>
    %883 = arith.addf %881, %882 : vector<2x512xf32>
    %884 = vector.extract_strided_slice %883 {offsets = [0, 0], sizes = [2, 128], strides = [1, 1]} : vector<2x512xf32> to vector<2x128xf32>
    %885 = arith.negf %884 : vector<2x128xf32>
    %886 = math.exp %885 : vector<2x128xf32>
    %cst_197 = arith.constant 1.000000e+00 : f32
    %887 = vector.broadcast %cst_197 : f32 to vector<2x128xf32>
    %888 = arith.addf %887, %886 : vector<2x128xf32>
    %889 = arith.divf %887, %888 : vector<2x128xf32>
    %890 = vector.extract_strided_slice %883 {offsets = [0, 128], sizes = [2, 128], strides = [1, 1]} : vector<2x512xf32> to vector<2x128xf32>
    %891 = arith.negf %890 : vector<2x128xf32>
    %892 = math.exp %891 : vector<2x128xf32>
    %cst_198 = arith.constant 1.000000e+00 : f32
    %893 = vector.broadcast %cst_198 : f32 to vector<2x128xf32>
    %894 = arith.addf %893, %892 : vector<2x128xf32>
    %895 = arith.divf %893, %894 : vector<2x128xf32>
    %896 = vector.extract_strided_slice %883 {offsets = [0, 256], sizes = [2, 128], strides = [1, 1]} : vector<2x512xf32> to vector<2x128xf32>
    %897 = math.tanh %896 : vector<2x128xf32>
    %898 = vector.extract_strided_slice %883 {offsets = [0, 384], sizes = [2, 128], strides = [1, 1]} : vector<2x512xf32> to vector<2x128xf32>
    %899 = arith.negf %898 : vector<2x128xf32>
    %900 = math.exp %899 : vector<2x128xf32>
    %cst_199 = arith.constant 1.000000e+00 : f32
    %901 = vector.broadcast %cst_199 : f32 to vector<2x128xf32>
    %902 = arith.addf %901, %900 : vector<2x128xf32>
    %903 = arith.divf %901, %902 : vector<2x128xf32>
    %904 = arith.mulf %895, %846 : vector<2x128xf32>
    %905 = arith.mulf %889, %897 : vector<2x128xf32>
    %906 = arith.addf %904, %905 : vector<2x128xf32>
    %907 = math.tanh %906 : vector<2x128xf32>
    %908 = arith.mulf %903, %907 : vector<2x128xf32>
    %909 = tpu.concatenate %878, %908 in 1 : vector<2x128xf32>, vector<2x128xf32> -> vector<2x256xf32>
    %c0_200 = arith.constant 0 : index
    %c0_201 = arith.constant 0 : index
    %910 = vector.load %arg8[%c0_200, %c0_201] : memref<256x512xf32, #tpu.memory_space<vmem>>, vector<256x512xf32>
    %cst_202 = arith.constant dense<0.000000e+00> : vector<2x512xf32>
    %911 = tpu.matmul %909, %910, %cst_202 {dimension_numbers = #tpu.dot_dimension_numbers<[1], [0], [0], [1], [0, 0, 1, 1], [], []>} : vector<2x256xf32>, vector<256x512xf32>, vector<2x512xf32> -> vector<2x512xf32>
    %912 = vector.broadcast %483 : vector<1x512xf32> to vector<2x512xf32>
    %913 = arith.addf %911, %912 : vector<2x512xf32>
    %914 = vector.extract_strided_slice %913 {offsets = [0, 0], sizes = [2, 128], strides = [1, 1]} : vector<2x512xf32> to vector<2x128xf32>
    %915 = arith.negf %914 : vector<2x128xf32>
    %916 = math.exp %915 : vector<2x128xf32>
    %cst_203 = arith.constant 1.000000e+00 : f32
    %917 = vector.broadcast %cst_203 : f32 to vector<2x128xf32>
    %918 = arith.addf %917, %916 : vector<2x128xf32>
    %919 = arith.divf %917, %918 : vector<2x128xf32>
    %920 = vector.extract_strided_slice %913 {offsets = [0, 128], sizes = [2, 128], strides = [1, 1]} : vector<2x512xf32> to vector<2x128xf32>
    %921 = arith.negf %920 : vector<2x128xf32>
    %922 = math.exp %921 : vector<2x128xf32>
    %cst_204 = arith.constant 1.000000e+00 : f32
    %923 = vector.broadcast %cst_204 : f32 to vector<2x128xf32>
    %924 = arith.addf %923, %922 : vector<2x128xf32>
    %925 = arith.divf %923, %924 : vector<2x128xf32>
    %926 = vector.extract_strided_slice %913 {offsets = [0, 256], sizes = [2, 128], strides = [1, 1]} : vector<2x512xf32> to vector<2x128xf32>
    %927 = math.tanh %926 : vector<2x128xf32>
    %928 = vector.extract_strided_slice %913 {offsets = [0, 384], sizes = [2, 128], strides = [1, 1]} : vector<2x512xf32> to vector<2x128xf32>
    %929 = arith.negf %928 : vector<2x128xf32>
    %930 = math.exp %929 : vector<2x128xf32>
    %cst_205 = arith.constant 1.000000e+00 : f32
    %931 = vector.broadcast %cst_205 : f32 to vector<2x128xf32>
    %932 = arith.addf %931, %930 : vector<2x128xf32>
    %933 = arith.divf %931, %932 : vector<2x128xf32>
    %934 = arith.mulf %925, %876 : vector<2x128xf32>
    %935 = arith.mulf %919, %927 : vector<2x128xf32>
    %936 = arith.addf %934, %935 : vector<2x128xf32>
    %937 = math.tanh %936 : vector<2x128xf32>
    %938 = arith.mulf %933, %937 : vector<2x128xf32>
    %939 = tpu.concatenate %908, %938 in 1 : vector<2x128xf32>, vector<2x128xf32> -> vector<2x256xf32>
    %c0_206 = arith.constant 0 : index
    %c0_207 = arith.constant 0 : index
    %940 = vector.load %arg10[%c0_206, %c0_207] : memref<256x512xf32, #tpu.memory_space<vmem>>, vector<256x512xf32>
    %cst_208 = arith.constant dense<0.000000e+00> : vector<2x512xf32>
    %941 = tpu.matmul %939, %940, %cst_208 {dimension_numbers = #tpu.dot_dimension_numbers<[1], [0], [0], [1], [0, 0, 1, 1], [], []>} : vector<2x256xf32>, vector<256x512xf32>, vector<2x512xf32> -> vector<2x512xf32>
    %942 = vector.broadcast %484 : vector<1x512xf32> to vector<2x512xf32>
    %943 = arith.addf %941, %942 : vector<2x512xf32>
    %944 = vector.extract_strided_slice %943 {offsets = [0, 0], sizes = [2, 128], strides = [1, 1]} : vector<2x512xf32> to vector<2x128xf32>
    %945 = arith.negf %944 : vector<2x128xf32>
    %946 = math.exp %945 : vector<2x128xf32>
    %cst_209 = arith.constant 1.000000e+00 : f32
    %947 = vector.broadcast %cst_209 : f32 to vector<2x128xf32>
    %948 = arith.addf %947, %946 : vector<2x128xf32>
    %949 = arith.divf %947, %948 : vector<2x128xf32>
    %950 = vector.extract_strided_slice %943 {offsets = [0, 128], sizes = [2, 128], strides = [1, 1]} : vector<2x512xf32> to vector<2x128xf32>
    %951 = arith.negf %950 : vector<2x128xf32>
    %952 = math.exp %951 : vector<2x128xf32>
    %cst_210 = arith.constant 1.000000e+00 : f32
    %953 = vector.broadcast %cst_210 : f32 to vector<2x128xf32>
    %954 = arith.addf %953, %952 : vector<2x128xf32>
    %955 = arith.divf %953, %954 : vector<2x128xf32>
    %956 = vector.extract_strided_slice %943 {offsets = [0, 256], sizes = [2, 128], strides = [1, 1]} : vector<2x512xf32> to vector<2x128xf32>
    %957 = math.tanh %956 : vector<2x128xf32>
    %958 = vector.extract_strided_slice %943 {offsets = [0, 384], sizes = [2, 128], strides = [1, 1]} : vector<2x512xf32> to vector<2x128xf32>
    %959 = arith.negf %958 : vector<2x128xf32>
    %960 = math.exp %959 : vector<2x128xf32>
    %cst_211 = arith.constant 1.000000e+00 : f32
    %961 = vector.broadcast %cst_211 : f32 to vector<2x128xf32>
    %962 = arith.addf %961, %960 : vector<2x128xf32>
    %963 = arith.divf %961, %962 : vector<2x128xf32>
    %964 = arith.mulf %955, %906 : vector<2x128xf32>
    %965 = arith.mulf %949, %957 : vector<2x128xf32>
    %966 = arith.addf %964, %965 : vector<2x128xf32>
    %967 = math.tanh %966 : vector<2x128xf32>
    %968 = arith.mulf %963, %967 : vector<2x128xf32>
    %969 = tpu.concatenate %548, %608, %668, %728, %788, %848, %908, %968 in 0 : vector<2x128xf32>, vector<2x128xf32>, vector<2x128xf32>, vector<2x128xf32>, vector<2x128xf32>, vector<2x128xf32>, vector<2x128xf32>, vector<2x128xf32> -> vector<16x128xf32>
    %c0_212 = arith.constant 0 : index
    %c0_213 = arith.constant 0 : index
    %970 = vector.load %arg12[%c0_212, %c0_213] : memref<128x256xf32, #tpu.memory_space<vmem>>, vector<128x256xf32>
    %cst_214 = arith.constant dense<0.000000e+00> : vector<16x256xf32>
    %971 = tpu.matmul %969, %970, %cst_214 {dimension_numbers = #tpu.dot_dimension_numbers<[1], [0], [0], [1], [0, 0, 1, 1], [], []>} : vector<16x128xf32>, vector<128x256xf32>, vector<16x256xf32> -> vector<16x256xf32>
    %c0_215 = arith.constant 0 : index
    %c0_216 = arith.constant 0 : index
    %972 = vector.load %arg13[%c0_215, %c0_216] : memref<1x256xf32, #tpu.memory_space<vmem>>, vector<1x256xf32>
    %973 = vector.broadcast %972 : vector<1x256xf32> to vector<16x256xf32>
    %974 = arith.addf %971, %973 : vector<16x256xf32>
    %c0_217 = arith.constant 0 : index
    %c0_218 = arith.constant 0 : index
    %975 = vector.load %arg14[%c0_217, %c0_218] : memref<16x256xf32, #tpu.memory_space<vmem>>, vector<16x256xf32>
    tpu.vector_store %arg14[%c0_217, %c0_218], %974 {strides = array<i32>} : memref<16x256xf32, #tpu.memory_space<vmem>>, vector<16x256xf32>,
    return
  }
}

</mosaic_0001>

<bundles_post_ra>
// kernel: leap_uncertainty.1
= control target key start
LH: loop header
LB: loop body
LE: loop exit
PB: predicated region body
PF: predicated region fallthrough
CT: control target
= control target key end

     0   :  { %v15537_v3 = vmov 0.0   ;;  %vm6484_vm0 = vcmask 1041408   ;;  %vm6486_vm1 = vcmask 1043456   ;;  %vm6488_vm2 = vcmask 1045504   ;;  %s15522_s1 = inlined_call_operand.vmem [shape: f32[128,512], index: 1, kind: input, shape index: {}]   ;;  %s15523_s3 = inlined_call_operand.vmem [shape: f32[128,512], index: 3, kind: input, shape index: {}]   ;;  %s15524_s0 = inlined_call_operand.vmem [shape: f32[16,128], index: 0, kind: input, shape index: {}]   ;;  %s15525_s4 = inlined_call_operand.vmem [shape: f32[256,512], index: 4, kind: input, shape index: {}]   ;;  %s15526_s2 = inlined_call_operand.vmem [shape: f32[1,512], index: 2, kind: input, shape index: {}]   ;;  %s15527_s5 = inlined_call_operand.vmem [shape: f32[1,512], index: 5, kind: input, shape index: {}]   ;;  %s15528_s6 = inlined_call_operand.vmem [shape: f32[128,512], index: 6, kind: input, shape index: {}]   ;;  %s15529_s8 = inlined_call_operand.vmem [shape: f32[256,512], index: 8, kind: input, shape index: {}]   ;;  %s15530_s10 = inlined_call_operand.vmem [shape: f32[256,512], index: 10, kind: input, shape index: {}]   ;;  %s15531_s7 = inlined_call_operand.vmem [shape: f32[1,512], index: 7, kind: input, shape index: {}]   ;;  %s15532_s11 = inlined_call_operand.vmem [shape: f32[1,512], index: 11, kind: input, shape index: {}]   ;;  %s15533_s9 = inlined_call_operand.vmem [shape: f32[1,512], index: 9, kind: input, shape index: {}]   ;;  %s15534_s12 = inlined_call_operand.vmem [shape: f32[128,256], index: 12, kind: input, shape index: {}]   ;;  %s15535_s13 = inlined_call_operand.vmem [shape: f32[1,256], index: 13, kind: input, shape index: {}]   ;;  %s15536_s14 = inlined_call_operand.vmem [shape: f32[16,256], index: 14, kind: output, shape index: {}]  }
   0x1   :  { %v50_v0 = vld [vmem:[%s15522_s1 + $0x8] sm:$0xff]  ;;  %v49_v2 = vld [vmem:[%s15522_s1] sm:$0xff]  ;;  %199 = vmatprep.mubr.f32.mxu1 %v15537_v3  ;;  %418 = vmatprep.mubr.f32.mxu0 %v15537_v3 }
   0x2   :  { %v54_v1 = vld [vmem:[%s15522_s1 + $0x28] sm:$0xff]  ;;  %v53_v5 = vld [vmem:[%s15522_s1 + $0x20] sm:$0xff] }
   0x3   :  { %v6718_v4 = vpack.c.bf16 %v54_v1, %v50_v0  ;;  %v291_v6 = vld [vmem:[%s15523_s3 + $0x8] sm:$0xff]  ;;  %v6720_v8 = vpack.c.bf16 %v53_v5, %v49_v2  ;;  %v290_v10 = vld [vmem:[%s15523_s3] sm:$0xff] }
   0x4   :  { %v295_v7 = vld [vmem:[%s15523_s3 + $0x28] sm:$0xff]  ;;  %v294_v11 = vld [vmem:[%s15523_s3 + $0x20] sm:$0xff] }
   0x5   :  { %v11016_v9 = vpack.c.bf16 %v295_v7, %v291_v6  ;;  %v58_v12 = vld [vmem:[%s15522_s1 + $0x48] sm:$0xff]  ;;  %6719 = vmatprep.subr.bf16.mxu1 %v6718_v4  ;;  %v11027_v13 = vpack.c.bf16 %v294_v11, %v290_v10  ;;  %v57_v15 = vld [vmem:[%s15522_s1 + $0x40] sm:$0xff] }
   0x6   :  { %v62_v14 = vld [vmem:[%s15522_s1 + $0x68] sm:$0xff]  ;;  %v61_v16 = vld [vmem:[%s15522_s1 + $0x60] sm:$0xff]  ;;  %6721 = vmatpush1.bf16.msra.mxu1 %v6720_v8 }
   0x7   :  { %15879 = vst [vmem:[#allocation2_spill] sm:$0xff] %v11016_v9  ;;  %6783 = vmatprep.subr.bf16.mxu0 %v11016_v9  ;;  %v6722_v17 = vpack.c.bf16 %v62_v14, %v58_v12  ;;  %v6724_v18 = vpack.c.bf16 %v61_v16, %v57_v15  ;;  %v299_v19 = vld [vmem:[%s15523_s3 + $0x48] sm:$0xff]  ;;  %v298_v21 = vld [vmem:[%s15523_s3 + $0x40] sm:$0xff] }
   0x8   :  { %v303_v20 = vld [vmem:[%s15523_s3 + $0x68] sm:$0xff]  ;;  %6785 = vmatpush1.bf16.msra.mxu0 %v11027_v13  ;;  %v302_v23 = vld [vmem:[%s15523_s3 + $0x60] sm:$0xff] }
   0x9   :  { %v11049_v22 = vpack.c.bf16 %v303_v20, %v299_v19  ;;  %v66_v24 = vld [vmem:[%s15522_s1 + $0x88] sm:$0xff]  ;;  %6723 = vmatprep.subr.bf16.mxu1 %v6722_v17  ;;  %v11060_v26 = vpack.c.bf16 %v302_v23, %v298_v21  ;;  %v65_v28 = vld [vmem:[%s15522_s1 + $0x80] sm:$0xff] }
   0xa   :  { %v70_v25 = vld [vmem:[%s15522_s1 + $0xa8] sm:$0xff]  ;;  %v69_v29 = vld [vmem:[%s15522_s1 + $0xa0] sm:$0xff]  ;;  %6725 = vmatpush1.bf16.msra.mxu1 %v6724_v18 }
   0xb   :  { %v6726_v27 = vpack.c.bf16 %v70_v25, %v66_v24  ;;  %v307_v30 = vld [vmem:[%s15523_s3 + $0x88] sm:$0xff]  ;;  %6787 = vmatprep.subr.bf16.mxu0 %v11049_v22  ;;  %v306_v32 = vld [vmem:[%s15523_s3 + $0x80] sm:$0xff]  ;;  %v6728_v34 = vpack.c.bf16 %v69_v29, %v65_v28 }
   0xc   :  { %v311_v31 = vld [vmem:[%s15523_s3 + $0xa8] sm:$0xff]  ;;  %v310_v33 = vld [vmem:[%s15523_s3 + $0xa0] sm:$0xff]  ;;  %6789 = vmatpush1.bf16.msra.mxu0 %v11060_v26 }
   0xd   :  { %v11081_v35 = vpack.c.bf16 %v311_v31, %v307_v30  ;;  %v74_v36 = vld [vmem:[%s15522_s1 + $0xc8] sm:$0xff]  ;;  %v73_v38 = vld [vmem:[%s15522_s1 + $0xc0] sm:$0xff]  ;;  %6727 = vmatprep.subr.bf16.mxu1 %v6726_v27  ;;  %v11093_v39 = vpack.c.bf16 %v310_v33, %v306_v32 }
   0xe   :  { %v78_v37 = vld [vmem:[%s15522_s1 + $0xe8] sm:$0xff]  ;;  %v77_v41 = vld [vmem:[%s15522_s1 + $0xe0] sm:$0xff]  ;;  %6729 = vmatpush1.bf16.msra.mxu1 %v6728_v34 }
   0xf   :  { %v6730_v40 = vpack.c.bf16 %v78_v37, %v74_v36  ;;  %v315_v42 = vld [vmem:[%s15523_s3 + $0xc8] sm:$0xff]  ;;  %6791 = vmatprep.subr.bf16.mxu0 %v11081_v35  ;;  %v314_v45 = vld [vmem:[%s15523_s3 + $0xc0] sm:$0xff]  ;;  %v6732_v49 = vpack.c.bf16 %v77_v41, %v73_v38  ;;  %v52_v37 = vld [vmem:[%s15522_s1 + $0x18] sm:$0xff] }
  0x10   :  { %v319_v43 = vld [vmem:[%s15523_s3 + $0xe8] sm:$0xff]  ;;  %v318_v46 = vld [vmem:[%s15523_s3 + $0xe0] sm:$0xff]  ;;  %6793 = vmatpush1.bf16.msra.mxu0 %v11093_v39  ;;  %v56_v38 = vld [vmem:[%s15522_s1 + $0x38] sm:$0xff] }
  0x11   :  { %v11105_v44 = vpack.c.bf16 %v319_v43, %v315_v42  ;;  %v82_v47 = vld [vmem:[%s15522_s1 + $0x108] sm:$0xff]  ;;  %6731 = vmatprep.subr.bf16.mxu1 %v6730_v40  ;;  %v11126_v52 = vpack.c.bf16 %v318_v46, %v314_v45  ;;  %v81_v54 = vld [vmem:[%s15522_s1 + $0x100] sm:$0xff]  ;;  %v6750_v42 = vpack.c.bf16 %v56_v38, %v52_v37  ;;  %v51_v43 = vld [vmem:[%s15522_s1 + $0x10] sm:$0xff] }
  0x12   :  { %v86_v48 = vld [vmem:[%s15522_s1 + $0x128] sm:$0xff]  ;;  %v85_v55 = vld [vmem:[%s15522_s1 + $0x120] sm:$0xff]  ;;  %6733 = vmatpush1.bf16.msra.mxu1 %v6732_v49  ;;  %v55_v45 = vld [vmem:[%s15522_s1 + $0x30] sm:$0xff] }
  0x13   :  { %v323_v50 = vld [vmem:[%s15523_s3 + $0x108] sm:$0xff]  ;;  %v6734_v53 = vpack.c.bf16 %v86_v48, %v82_v47  ;;  %v322_v56 = vld [vmem:[%s15523_s3 + $0x100] sm:$0xff]  ;;  %6795 = vmatprep.subr.bf16.mxu0 %v11105_v44  ;;  %v6736_v63 = vpack.c.bf16 %v85_v55, %v81_v54  ;;  %v60_v46 = vld [vmem:[%s15522_s1 + $0x58] sm:$0xff]  ;;  %v6752_v49 = vpack.c.bf16 %v55_v45, %v51_v43 }
  0x14   :  { %v327_v51 = vld [vmem:[%s15523_s3 + $0x128] sm:$0xff]  ;;  %v326_v58 = vld [vmem:[%s15523_s3 + $0x120] sm:$0xff]  ;;  %6797 = vmatpush1.bf16.msra.mxu0 %v11126_v52  ;;  %v64_v47 = vld [vmem:[%s15522_s1 + $0x78] sm:$0xff] }
  0x15   :  { %v11138_v57 = vpack.c.bf16 %v327_v51, %v323_v50  ;;  %v90_v59 = vld [vmem:[%s15522_s1 + $0x148] sm:$0xff]  ;;  %6735 = vmatprep.subr.bf16.mxu1 %v6734_v53  ;;  %v11156_v0 = vpack.c.bf16 %v326_v58, %v322_v56  ;;  %v89_v2 = vld [vmem:[%s15522_s1 + $0x140] sm:$0xff]  ;;  %v6754_v50 = vpack.c.bf16 %v64_v47, %v60_v46  ;;  %v59_v51 = vld [vmem:[%s15522_s1 + $0x50] sm:$0xff] }
  0x16   :  { %v94_v60 = vld [vmem:[%s15522_s1 + $0x168] sm:$0xff]  ;;  %v93_v4 = vld [vmem:[%s15522_s1 + $0x160] sm:$0xff]  ;;  %6737 = vmatpush1.bf16.msra.mxu1 %v6736_v63  ;;  %v63_v53 = vld [vmem:[%s15522_s1 + $0x70] sm:$0xff] }
  0x17   :  { %v331_v61 = vld [vmem:[%s15523_s3 + $0x148] sm:$0xff]  ;;  %v6738_v1 = vpack.c.bf16 %v94_v60, %v90_v59  ;;  %v330_v5 = vld [vmem:[%s15523_s3 + $0x140] sm:$0xff]  ;;  %6799 = vmatprep.subr.bf16.mxu0 %v11138_v57  ;;  %v6740_v14 = vpack.c.bf16 %v93_v4, %v89_v2  ;;  %v68_v54 = vld [vmem:[%s15522_s1 + $0x98] sm:$0xff]  ;;  %v6756_v56 = vpack.c.bf16 %v63_v53, %v59_v51 }
  0x18   :  { %v335_v62 = vld [vmem:[%s15523_s3 + $0x168] sm:$0xff]  ;;  %v334_v7 = vld [vmem:[%s15523_s3 + $0x160] sm:$0xff]  ;;  %6801 = vmatpush1.bf16.msra.mxu0 %v11156_v0  ;;  %v72_v55 = vld [vmem:[%s15522_s1 + $0xb8] sm:$0xff] }
  0x19   :  { %v11168_v6 = vpack.c.bf16 %v335_v62, %v331_v61  ;;  %v98_v8 = vld [vmem:[%s15522_s1 + $0x188] sm:$0xff]  ;;  %6739 = vmatprep.subr.bf16.mxu1 %v6738_v1  ;;  %v11186_v15 = vpack.c.bf16 %v334_v7, %v330_v5  ;;  %v97_v17 = vld [vmem:[%s15522_s1 + $0x180] sm:$0xff]  ;;  %v6758_v59 = vpack.c.bf16 %v72_v55, %v68_v54  ;;  %v67_v60 = vld [vmem:[%s15522_s1 + $0x90] sm:$0xff] }
  0x1a   :  { %v102_v10 = vld [vmem:[%s15522_s1 + $0x1a8] sm:$0xff]  ;;  %v101_v18 = vld [vmem:[%s15522_s1 + $0x1a0] sm:$0xff]  ;;  %6741 = vmatpush1.bf16.msra.mxu1 %v6740_v14  ;;  %v71_v61 = vld [vmem:[%s15522_s1 + $0xb0] sm:$0xff] }
  0x1b   :  { %v339_v11 = vld [vmem:[%s15523_s3 + $0x188] sm:$0xff]  ;;  %v6742_v16 = vpack.c.bf16 %v102_v10, %v98_v8  ;;  %v338_v19 = vld [vmem:[%s15523_s3 + $0x180] sm:$0xff]  ;;  %6803 = vmatprep.subr.bf16.mxu0 %v11168_v6  ;;  %v6744_v28 = vpack.c.bf16 %v101_v18, %v97_v17  ;;  %v76_v62 = vld [vmem:[%s15522_s1 + $0xd8] sm:$0xff]  ;;  %v6760_v1 = vpack.c.bf16 %v71_v61, %v67_v60 }
  0x1c   :  { %v343_v12 = vld [vmem:[%s15523_s3 + $0x1a8] sm:$0xff]  ;;  %v342_v21 = vld [vmem:[%s15523_s3 + $0x1a0] sm:$0xff]  ;;  %6805 = vmatpush1.bf16.msra.mxu0 %v11186_v15  ;;  %v80_v63 = vld [vmem:[%s15522_s1 + $0xf8] sm:$0xff] }
  0x1d   :  { %v11198_v20 = vpack.c.bf16 %v343_v12, %v339_v11  ;;  %v106_v23 = vld [vmem:[%s15522_s1 + $0x1c8] sm:$0xff]  ;;  %6743 = vmatprep.subr.bf16.mxu1 %v6742_v16  ;;  %v11216_v29 = vpack.c.bf16 %v342_v21, %v338_v19  ;;  %v105_v31 = vld [vmem:[%s15522_s1 + $0x1c0] sm:$0xff]  ;;  %v6762_v2 = vpack.c.bf16 %v80_v63, %v76_v62  ;;  %v75_v4 = vld [vmem:[%s15522_s1 + $0xd0] sm:$0xff] }
  0x1e   :  { %v110_v24 = vld [vmem:[%s15522_s1 + $0x1e8] sm:$0xff]  ;;  %v109_v32 = vld [vmem:[%s15522_s1 + $0x1e0] sm:$0xff]  ;;  %6745 = vmatpush1.bf16.msra.mxu1 %v6744_v28  ;;  %v79_v5 = vld [vmem:[%s15522_s1 + $0xf0] sm:$0xff] }
  0x1f   :  { %v347_v25 = vld [vmem:[%s15523_s3 + $0x1c8] sm:$0xff]  ;;  %v6746_v30 = vpack.c.bf16 %v110_v24, %v106_v23  ;;  %v346_v33 = vld [vmem:[%s15523_s3 + $0x1c0] sm:$0xff]  ;;  %6807 = vmatprep.subr.bf16.mxu0 %v11198_v20  ;;  %v6748_v40 = vpack.c.bf16 %v109_v32, %v105_v31  ;;  %v84_v7 = vld [vmem:[%s15522_s1 + $0x118] sm:$0xff]  ;;  %v6764_v10 = vpack.c.bf16 %v79_v5, %v75_v4 }
  0x20   :  { %v351_v27 = vld [vmem:[%s15523_s3 + $0x1e8] sm:$0xff]  ;;  %v350_v36 = vld [vmem:[%s15523_s3 + $0x1e0] sm:$0xff]  ;;  %6809 = vmatpush1.bf16.msra.mxu0 %v11216_v29  ;;  %v88_v8 = vld [vmem:[%s15522_s1 + $0x138] sm:$0xff] }
  0x21   :  { %v11228_v34 = vpack.c.bf16 %v351_v27, %v347_v25  ;;  %6747 = vmatprep.subr.bf16.mxu1 %v6746_v30  ;;  %v11240_v41 = vpack.c.bf16 %v350_v36, %v346_v33  ;;  %v11258_v48 = vld [vmem:[%s15524_s0] sm:$0xff]  ;;  %v11278_v58 = vld [vmem:[%s15524_s0 + $0x8] sm:$0xff]  ;;  %v6766_v11 = vpack.c.bf16 %v88_v8, %v84_v7  ;;  %v83_v12 = vld [vmem:[%s15522_s1 + $0x110] sm:$0xff] }
  0x22   :  { %6749 = vmatpush1.bf16.msra.mxu1 %v6748_v40  ;;  %v87_v14 = vld [vmem:[%s15522_s1 + $0x130] sm:$0xff]  ;;  %v92_v16 = vld [vmem:[%s15522_s1 + $0x158] sm:$0xff] }
  0x23   :  { %6811 = vmatprep.subr.bf16.mxu0 %v11228_v34  ;;  %6751 = vmatprep.subr.bf16.mxu1 %v6750_v42  ;;  %v96_v17 = vld [vmem:[%s15522_s1 + $0x178] sm:$0xff]  ;;  %v6768_v18 = vpack.c.bf16 %v87_v14, %v83_v12  ;;  %v91_v21 = vld [vmem:[%s15522_s1 + $0x150] sm:$0xff] }
  0x24   :  { %6813 = vmatpush1.bf16.msra.mxu0 %v11240_v41  ;;  %v6770_v19 = vpack.c.bf16 %v96_v17, %v92_v16  ;;  %v95_v23 = vld [vmem:[%s15522_s1 + $0x170] sm:$0xff]  ;;  %v100_v24 = vld [vmem:[%s15522_s1 + $0x198] sm:$0xff] }
  0x25   :  { %200 = vmatmul.mubr.f32.vlgmr.msra.gmra.mrb[0].mxu1 %v11258_v48  ;;  %v104_v25 = vld [vmem:[%s15522_s1 + $0x1b8] sm:$0xff]  ;;  %v6772_v27 = vpack.c.bf16 %v95_v23, %v91_v21  ;;  %v99_v30 = vld [vmem:[%s15522_s1 + $0x190] sm:$0xff] }
  0x26   :  { %6753 = vmatpush1.bf16.msra.mxu1 %v6752_v49  ;;  %205 = vmatprep.mubr.f32.mxu1 %v15537_v3  ;;  %v6774_v28 = vpack.c.bf16 %v104_v25, %v100_v24  ;;  %v103_v31 = vld [vmem:[%s15522_s1 + $0x1b0] sm:$0xff]  ;;  %v108_v32 = vld [vmem:[%s15522_s1 + $0x1d8] sm:$0xff] }
  0x27   :  { %419 = vmatmul.mubr.f32.vlgmr.msra.gmra.mrb[0].mxu0 %v15537_v3  ;;  %6755 = vmatprep.subr.bf16.mxu1 %v6754_v50  ;;  %v112_v33 = vld [vmem:[%s15522_s1 + $0x1f8] sm:$0xff]  ;;  %v6776_v36 = vpack.c.bf16 %v103_v31, %v99_v30  ;;  %v107_v38 = vld [vmem:[%s15522_s1 + $0x1d0] sm:$0xff] }
  0x28   :  { %v6778_v37 = vpack.c.bf16 %v112_v33, %v108_v32  ;;  %v111_v40 = vld [vmem:[%s15522_s1 + $0x1f0] sm:$0xff]  ;;  %v293_v42 = vld [vmem:[%s15523_s3 + $0x18] sm:$0xff] }
  0x29   :  { %206 = vmatmul.mubr.f32.gmra.mrb[2].mxu1 %v11278_v58  ;;  %v297_v43 = vld [vmem:[%s15523_s3 + $0x38] sm:$0xff]  ;;  %v6780_v45 = vpack.c.bf16 %v111_v40, %v107_v38  ;;  %v292_v47 = vld [vmem:[%s15523_s3 + $0x10] sm:$0xff] }
  0x2a   :  { %6757 = vmatpush1.bf16.msra.mxu1 %v6756_v56  ;;  %276 = vmatprep.mubr.f32.mxu1 %v15537_v3  ;;  %v11355_v46 = vpack.c.bf16 %v297_v43, %v293_v42  ;;  %v296_v49 = vld [vmem:[%s15523_s3 + $0x30] sm:$0xff]  ;;  %v301_v50 = vld [vmem:[%s15523_s3 + $0x58] sm:$0xff] }
  0x2b   :  { %6759 = vmatprep.subr.bf16.mxu1 %v6758_v59  ;;  %v305_v51 = vld [vmem:[%s15523_s3 + $0x78] sm:$0xff]  ;;  %v11369_v53 = vpack.c.bf16 %v296_v49, %v292_v47  ;;  %v300_v55 = vld [vmem:[%s15523_s3 + $0x50] sm:$0xff]  ;;  %v525_v47 = vld [vmem:[%s15525_s4 + $0x28] sm:$0xff] }
  0x2c   :  { %15880 = vst [vmem:[#allocation3_spill] sm:$0xff] %v11355_v46  ;;  %v11372_v54 = vpack.c.bf16 %v305_v51, %v301_v50  ;;  %v304_v56 = vld [vmem:[%s15523_s3 + $0x70] sm:$0xff]  ;;  %v309_v59 = vld [vmem:[%s15523_s3 + $0x98] sm:$0xff] }
  0x2d   :  { %v313_v60 = vld [vmem:[%s15523_s3 + $0xb8] sm:$0xff]  ;;  %v11388_v61 = vpack.c.bf16 %v304_v56, %v300_v55  ;;  %v308_v63 = vld [vmem:[%s15523_s3 + $0x90] sm:$0xff]  ;;  %v520_v55 = vld [vmem:[%s15525_s4] sm:$0xff] }
  0x2e   :  { %6761 = vmatpush1.bf16.msra.mxu1 %v6760_v1  ;;  %v11392_v62 = vpack.c.bf16 %v313_v60, %v309_v59  ;;  %v312_v1 = vld [vmem:[%s15523_s3 + $0xb0] sm:$0xff]  ;;  %v333_v17 = vld [vmem:[%s15523_s3 + $0x158] sm:$0xff]  ;;  %v524_v56 = vld [vmem:[%s15525_s4 + $0x20] sm:$0xff] }
  0x2f   :  { %6763 = vmatprep.subr.bf16.mxu1 %v6762_v2  ;;  %v321_v2 = vld [vmem:[%s15523_s3 + $0xf8] sm:$0xff]  ;;  %v11408_v4 = vpack.c.bf16 %v312_v1, %v308_v63  ;;  %v316_v7 = vld [vmem:[%s15523_s3 + $0xd0] sm:$0xff]  ;;  %v11520_v60 = vpack.c.bf16 %v524_v56, %v520_v55  ;;  %v545_v56 = vld [vmem:[%s15525_s4 + $0xc8] sm:$0xff] }
  0x30   :  { %v320_v8 = vld [vmem:[%s15523_s3 + $0xf0] sm:$0xff]  ;;  %v341_v25 = vld [vmem:[%s15523_s3 + $0x198] sm:$0xff] }
  0x31   :  { %v324_v14 = vld [vmem:[%s15523_s3 + $0x110] sm:$0xff]  ;;  %v349_v33 = vld [vmem:[%s15523_s3 + $0x1d8] sm:$0xff] }
  0x32   :  { %6765 = vmatpush1.bf16.msra.mxu1 %v6764_v10  ;;  %v329_v10 = vld [vmem:[%s15523_s3 + $0x138] sm:$0xff]  ;;  %v328_v16 = vld [vmem:[%s15523_s3 + $0x130] sm:$0xff] }
  0x33   :  { %6767 = vmatprep.subr.bf16.mxu1 %v6766_v11  ;;  %v11427_v11 = vpack.c.bf16 %v320_v8, %v316_v7  ;;  %v332_v23 = vld [vmem:[%s15523_s3 + $0x150] sm:$0xff]  ;;  %v523_v49 = vld [vmem:[%s15525_s4 + $0x18] sm:$0xff]  ;;  %v533_v7 = vld [vmem:[%s15525_s4 + $0x68] sm:$0xff] }
  0x34   :  { %v336_v24 = vld [vmem:[%s15523_s3 + $0x170] sm:$0xff]  ;;  %v527_v51 = vld [vmem:[%s15525_s4 + $0x38] sm:$0xff] }
  0x35   :  { %v340_v31 = vld [vmem:[%s15523_s3 + $0x190] sm:$0xff]  ;;  %v11518_v59 = vpack.c.bf16 %v527_v51, %v523_v49  ;;  %v531_v8 = vld [vmem:[%s15525_s4 + $0x58] sm:$0xff] }
  0x36   :  { %6769 = vmatpush1.bf16.msra.mxu1 %v6768_v18  ;;  %v337_v18 = vld [vmem:[%s15523_s3 + $0x178] sm:$0xff]  ;;  %v344_v32 = vld [vmem:[%s15523_s3 + $0x1b0] sm:$0xff] }
  0x37   :  { %6771 = vmatprep.subr.bf16.mxu1 %v6770_v19  ;;  %v11445_v19 = vpack.c.bf16 %v328_v16, %v324_v14  ;;  %v11448_v21 = vpack.c.bf16 %v337_v18, %v333_v17  ;;  %v348_v40 = vld [vmem:[%s15523_s3 + $0x1d0] sm:$0xff]  ;;  %v528_v16 = vld [vmem:[%s15525_s4 + $0x40] sm:$0xff] }
  0x38   :  { %v352_v42 = vld [vmem:[%s15523_s3 + $0x1f0] sm:$0xff]  ;;  %v532_v17 = vld [vmem:[%s15525_s4 + $0x60] sm:$0xff] }
  0x39   :  { %v11493_v43 = vpack.c.bf16 %v352_v42, %v348_v40  ;;  %v522_v63 = vld [vmem:[%s15525_s4 + $0x10] sm:$0xff]  ;;  %v536_v40 = vld [vmem:[%s15525_s4 + $0x80] sm:$0xff] }
  0x3a   :  { %6773 = vmatpush1.bf16.msra.mxu1 %v6772_v27  ;;  %v345_v27 = vld [vmem:[%s15523_s3 + $0x1b8] sm:$0xff]  ;;  %v526_v1 = vld [vmem:[%s15525_s4 + $0x30] sm:$0xff] }
  0x3b   :  { %6775 = vmatprep.subr.bf16.mxu1 %v6774_v28  ;;  %v11463_v28 = vpack.c.bf16 %v336_v24, %v332_v23  ;;  %v11466_v30 = vpack.c.bf16 %v345_v27, %v341_v25  ;;  %v530_v18 = vld [vmem:[%s15525_s4 + $0x50] sm:$0xff]  ;;  %v11559_v23 = vpack.c.bf16 %v532_v17, %v528_v16  ;;  %v537_v25 = vld [vmem:[%s15525_s4 + $0x88] sm:$0xff] }
  0x3c   :  { %v534_v24 = vld [vmem:[%s15525_s4 + $0x70] sm:$0xff]  ;;  %v541_v27 = vld [vmem:[%s15525_s4 + $0xa8] sm:$0xff] }
  0x3d   :  { %v542_v49 = vld [vmem:[%s15525_s4 + $0xb0] sm:$0xff] }
  0x3e   :  { %6777 = vmatpush1.bf16.msra.mxu1 %v6776_v36  ;;  %v353_v36 = vld [vmem:[%s15523_s3 + $0x1f8] sm:$0xff]  ;;  %v546_v17 = vld [vmem:[%s15525_s4 + $0xd0] sm:$0xff] }
  0x3f   :  { %6779 = vmatprep.subr.bf16.mxu1 %v6778_v37  ;;  %v11481_v37 = vpack.c.bf16 %v344_v32, %v340_v31  ;;  %v11484_v38 = vpack.c.bf16 %v353_v36, %v349_v33  ;;  %v11572_v31 = vpack.c.bf16 %v534_v24, %v530_v18  ;;  %v11574_v32 = vpack.c.bf16 %v541_v27, %v537_v25  ;;  %v539_v33 = vld [vmem:[%s15525_s4 + $0x98] sm:$0xff]  ;;  %v550_v18 = vld [vmem:[%s15525_s4 + $0xf0] sm:$0xff]  ;;  %v553_v24 = vld [vmem:[%s15525_s4 + $0x108] sm:$0xff] }
  0x40   :  { %v543_v36 = vld [vmem:[%s15525_s4 + $0xb8] sm:$0xff]  ;;  %v557_v27 = vld [vmem:[%s15525_s4 + $0x128] sm:$0xff] }
  0x41   :  { %15881 = vst [vmem:[#allocation4_spill] sm:$0xff] %v11574_v32  ;;  %v11586_v42 = vpack.c.bf16 %v543_v36, %v539_v33  ;;  %v555_v33 = vld [vmem:[%s15525_s4 + $0x118] sm:$0xff] }
  0x42   :  { %6781 = vmatpush1.bf16.msra.mxu1 %v6780_v45  ;;  %v521_v45 = vld [vmem:[%s15525_s4 + $0x8] sm:$0xff]  ;;  %v559_v36 = vld [vmem:[%s15525_s4 + $0x138] sm:$0xff] }
  0x43   :  { %6815 = vmatprep.subr.bf16.mxu1 %v11355_v46  ;;  %v11507_v50 = vpack.c.bf16 %v525_v47, %v521_v45  ;;  %15882 = vst [vmem:[#allocation5_spill] sm:$0xff] %v11586_v42  ;;  %v540_v45 = vld [vmem:[%s15525_s4 + $0xa0] sm:$0xff]  ;;  %v538_v47 = vld [vmem:[%s15525_s4 + $0x90] sm:$0xff] }
  0x44   :  { %v11599_v51 = vpack.c.bf16 %v540_v45, %v536_v40  ;;  %v11601_v55 = vpack.c.bf16 %v542_v49, %v538_v47  ;;  %v11649_v40 = vpack.c.bf16 %v550_v18, %v546_v17  ;;  %v11651_v45 = vpack.c.bf16 %v557_v27, %v553_v24  ;;  %v552_v47 = vld [vmem:[%s15525_s4 + $0x100] sm:$0xff]  ;;  %v567_v17 = vld [vmem:[%s15525_s4 + $0x178] sm:$0xff] }
  0x45   :  { %277 = vmatmul.mubr.f32.vlgmr.msra.gmra.mrb[4].mxu1 %v11258_v48  ;;  %v317_v48 = vld [vmem:[%s15523_s3 + $0xd8] sm:$0xff]  ;;  %6847 = vmatprep.subr.bf16.mxu0 %v11507_v50  ;;  %v556_v49 = vld [vmem:[%s15525_s4 + $0x120] sm:$0xff] }
  0x46   :  { %6817 = vmatpush1.bf16.msra.mxu1 %v11369_v53  ;;  %282 = vmatprep.mubr.f32.mxu1 %v15537_v3  ;;  %v11412_v5 = vpack.c.bf16 %v321_v2, %v317_v48  ;;  %v11529_v48 = vpack.c.bf16 %v526_v1, %v522_v63  ;;  %v529_v2 = vld [vmem:[%s15525_s4 + $0x48] sm:$0xff]  ;;  %15883 = vst [vmem:[#allocation6_spill] sm:$0xff] %v11599_v51  ;;  %15884 = vst [vmem:[#allocation7_spill] sm:$0xff] %v11601_v55  ;;  %v547_v1 = vld [vmem:[%s15525_s4 + $0xd8] sm:$0xff] }
  0x47   :  { %6819 = vmatprep.subr.bf16.mxu1 %v11372_v54  ;;  %6849 = vmatpush1.bf16.msra.mxu0 %v11520_v60  ;;  %v549_v63 = vld [vmem:[%s15525_s4 + $0xe8] sm:$0xff]  ;;  %15888 = vst [vmem:[#allocation11_spill] sm:$0xff] %v11649_v40  ;;  %15889 = vst [vmem:[#allocation12_spill] sm:$0xff] %v11651_v45  ;;  %v11681_v18 = vpack.c.bf16 %v556_v49, %v552_v47  ;;  %v562_v47 = vld [vmem:[%s15525_s4 + $0x150] sm:$0xff] }
  0x49   :  { %283 = vmatmul.mubr.f32.gmra.mrb[6].mxu1 %v11278_v58  ;;  %v325_v58 = vld [vmem:[%s15523_s3 + $0x118] sm:$0xff]  ;;  %15891 = vst [vmem:[#allocation14_spill] sm:$0xff] %v11681_v18 }
  0x4a   :  { %6821 = vmatpush1.bf16.msra.mxu1 %v11388_v61  ;;  %489 = vmatprep.mubr.f32.mxu1 %v15537_v3  ;;  %v11430_v12 = vpack.c.bf16 %v329_v10, %v325_v58  ;;  %v535_v58 = vld [vmem:[%s15525_s4 + $0x78] sm:$0xff]  ;;  %v11546_v10 = vpack.c.bf16 %v533_v7, %v529_v2  ;;  %v11613_v2 = vpack.c.bf16 %v549_v63, %v545_v56  ;;  %v554_v56 = vld [vmem:[%s15525_s4 + $0x110] sm:$0xff] }
  0x4b   :  { %6823 = vmatprep.subr.bf16.mxu1 %v11392_v62  ;;  %v11548_v14 = vpack.c.bf16 %v535_v58, %v531_v8  ;;  %v551_v7 = vld [vmem:[%s15525_s4 + $0xf8] sm:$0xff]  ;;  %v544_v8 = vld [vmem:[%s15525_s4 + $0xc0] sm:$0xff]  ;;  %v11663_v63 = vpack.c.bf16 %v559_v36, %v555_v33 }
  0x4c   :  { %6851 = vmatprep.subr.bf16.mxu0 %v11546_v10  ;;  %15885 = vst [vmem:[#allocation8_spill] sm:$0xff] %v11613_v2  ;;  %v548_v58 = vld [vmem:[%s15525_s4 + $0xe0] sm:$0xff]  ;;  %v11624_v16 = vpack.c.bf16 %v551_v7, %v547_v1  ;;  %v558_v1 = vld [vmem:[%s15525_s4 + $0x130] sm:$0xff]  ;;  %v561_v7 = vld [vmem:[%s15525_s4 + $0x148] sm:$0xff] }
  0x4d   :  { %6853 = vmatpush1.bf16.msra.mxu0 %v11559_v23  ;;  %v11636_v25 = vpack.c.bf16 %v548_v58, %v544_v8  ;;  %15890 = vst [vmem:[#allocation13_spill] sm:$0xff] %v11663_v63  ;;  %v565_v8 = vld [vmem:[%s15525_s4 + $0x168] sm:$0xff]  ;;  %v563_v58 = vld [vmem:[%s15525_s4 + $0x158] sm:$0xff]  ;;  %v11685_v24 = vpack.c.bf16 %v558_v1, %v554_v56  ;;  %v560_v33 = vld [vmem:[%s15525_s4 + $0x140] sm:$0xff] }
  0x4e   :  { %6825 = vmatpush1.bf16.msra.mxu1 %v11408_v4  ;;  %6855 = vmatprep.subr.bf16.mxu0 %v11574_v32  ;;  %15886 = vst [vmem:[#allocation9_spill] sm:$0xff] %v11624_v16  ;;  %v11687_v27 = vpack.c.bf16 %v565_v8, %v561_v7  ;;  %v564_v36 = vld [vmem:[%s15525_s4 + $0x160] sm:$0xff]  ;;  %v11699_v49 = vpack.c.bf16 %v567_v17, %v563_v58  ;;  %v566_v56 = vld [vmem:[%s15525_s4 + $0x170] sm:$0xff]  ;;  %v569_v1 = vld [vmem:[%s15525_s4 + $0x188] sm:$0xff] }
  0x4f   :  { %6827 = vmatprep.subr.bf16.mxu1 %v11412_v5  ;;  %15887 = vst [vmem:[#allocation10_spill] sm:$0xff] %v11636_v25  ;;  %15892 = vst [vmem:[#allocation15_spill] sm:$0xff] %v11685_v24  ;;  %v573_v7 = vld [vmem:[%s15525_s4 + $0x1a8] sm:$0xff]  ;;  %v571_v8 = vld [vmem:[%s15525_s4 + $0x198] sm:$0xff]  ;;  %v11717_v17 = vpack.c.bf16 %v564_v36, %v560_v33 }
  0x50   :  { %15893 = vst [vmem:[#allocation16_spill] sm:$0xff] %v11687_v27  ;;  %15894 = vst [vmem:[#allocation17_spill] sm:$0xff] %v11699_v49  ;;  %v575_v58 = vld [vmem:[%s15525_s4 + $0x1b8] sm:$0xff]  ;;  %v570_v33 = vld [vmem:[%s15525_s4 + $0x190] sm:$0xff] }
  0x51   :  { %6857 = vmatpush1.bf16.msra.mxu0 %v11599_v51  ;;  %15895 = vst [vmem:[#allocation18_spill] sm:$0xff] %v11717_v17  ;;  %v11735_v36 = vpack.c.bf16 %v575_v58, %v571_v8  ;;  %v583_v8 = vld [vmem:[%s15525_s4 + $0x1f8] sm:$0xff] }
  0x52   :  { %6829 = vmatpush1.bf16.msra.mxu1 %v11427_v11  ;;  %6859 = vmatprep.subr.bf16.mxu0 %v11613_v2 }
  0x53   :  { %6831 = vmatprep.subr.bf16.mxu1 %v11430_v12  ;;  %15898 = vst [vmem:[#allocation21_spill] sm:$0xff] %v11735_v36 }
  0x55   :  { %6861 = vmatpush1.bf16.msra.mxu0 %v11636_v25 }
  0x56   :  { %6833 = vmatpush1.bf16.msra.mxu1 %v11445_v19  ;;  %6863 = vmatprep.subr.bf16.mxu0 %v11651_v45  ;;  %v568_v45 = vld [vmem:[%s15525_s4 + $0x180] sm:$0xff] }
  0x57   :  { %6835 = vmatprep.subr.bf16.mxu1 %v11448_v21 }
  0x59   :  { %6865 = vmatpush1.bf16.msra.mxu0 %v11681_v18  ;;  %v580_v18 = vld [vmem:[%s15525_s4 + $0x1e0] sm:$0xff] }
  0x5a   :  { %6837 = vmatpush1.bf16.msra.mxu1 %v11463_v28  ;;  %6867 = vmatprep.subr.bf16.mxu0 %v11687_v27 }
  0x5b   :  { %6839 = vmatprep.subr.bf16.mxu1 %v11466_v30 }
  0x5d   :  { %6869 = vmatpush1.bf16.msra.mxu0 %v11717_v17 }
  0x5e   :  { %6841 = vmatpush1.bf16.msra.mxu1 %v11481_v37 }
  0x5f   :  { %6843 = vmatprep.subr.bf16.mxu1 %v11484_v38 }
  0x62   :  { %6845 = vmatpush1.bf16.msra.mxu1 %v11493_v43 }
  0x63   :  { %6911 = vmatprep.subr.bf16.mxu1 %v11518_v59 }
  0x65   :  { %490 = vmatmul.mubr.f32.vlgmr.msra.gmra.mrb[8].mxu1 %v15537_v3  ;;  %v11721_v3 = vpack.c.bf16 %v566_v56, %v562_v47  ;;  %v574_v47 = vld [vmem:[%s15525_s4 + $0x1b0] sm:$0xff]  ;;  %v577_v56 = vld [vmem:[%s15525_s4 + $0x1c8] sm:$0xff] }
  0x66   :  { %6913 = vmatpush1.bf16.msra.mxu1 %v11529_v48 }
  0x67   :  { %6915 = vmatprep.subr.bf16.mxu1 %v11548_v14  ;;  %15896 = vst [vmem:[#allocation19_spill] sm:$0xff] %v11721_v3 }
  0x6a   :  { %6917 = vmatpush1.bf16.msra.mxu1 %v11572_v31 }
  0x6b   :  { %6919 = vmatprep.subr.bf16.mxu1 %v11586_v42 }
  0x6e   :  { %6921 = vmatpush1.bf16.msra.mxu1 %v11601_v55 }
  0x6f   :  { %6923 = vmatprep.subr.bf16.mxu1 %v11624_v16 }
  0x72   :  { %6925 = vmatpush1.bf16.msra.mxu1 %v11649_v40  ;;  %v572_v40 = vld [vmem:[%s15525_s4 + $0x1a0] sm:$0xff] }
  0x73   :  { %6927 = vmatprep.subr.bf16.mxu1 %v11663_v63  ;;  %v11723_v63 = vpack.c.bf16 %v573_v7, %v569_v1  ;;  %v581_v1 = vld [vmem:[%s15525_s4 + $0x1e8] sm:$0xff]  ;;  %v579_v7 = vld [vmem:[%s15525_s4 + $0x1d8] sm:$0xff]  ;;  %v11753_v58 = vpack.c.bf16 %v572_v40, %v568_v45  ;;  %v578_v45 = vld [vmem:[%s15525_s4 + $0x1d0] sm:$0xff] }
  0x74   :  { %v11759_v27 = vpack.c.bf16 %v581_v1, %v577_v56  ;;  %v11768_v40 = vpack.c.bf16 %v583_v8, %v579_v7  ;;  %v585_v1 = vld [vmem:[%s15525_s4 + $0x208] sm:$0xff]  ;;  %v591_v8 = vld [vmem:[%s15525_s4 + $0x238] sm:$0xff] }
  0x75   :  { %15897 = vst [vmem:[#allocation20_spill] sm:$0xff] %v11723_v63  ;;  %15899 = vst [vmem:[#allocation22_spill] sm:$0xff] %v11753_v58  ;;  %6871 = vmatprep.subr.bf16.mxu0 %v11723_v63  ;;  %v589_v7 = vld [vmem:[%s15525_s4 + $0x228] sm:$0xff] }
  0x76   :  { %6929 = vmatpush1.bf16.msra.mxu1 %v11685_v24  ;;  %15901 = vst [vmem:[#allocation24_spill] sm:$0xff] %v11759_v27  ;;  %v576_v24 = vld [vmem:[%s15525_s4 + $0x1c0] sm:$0xff]  ;;  %15902 = vst [vmem:[#allocation25_spill] sm:$0xff] %v11768_v40  ;;  %6873 = vmatpush1.bf16.msra.mxu0 %v11753_v58 }
  0x77   :  { %6931 = vmatprep.subr.bf16.mxu1 %v11699_v49  ;;  %v11757_v49 = vpack.c.bf16 %v574_v47, %v570_v33  ;;  %v582_v33 = vld [vmem:[%s15525_s4 + $0x1f0] sm:$0xff]  ;;  %v11777_v47 = vpack.c.bf16 %v580_v18, %v576_v24  ;;  %6875 = vmatprep.subr.bf16.mxu0 %v11759_v27  ;;  %v587_v18 = vld [vmem:[%s15525_s4 + $0x218] sm:$0xff]  ;;  %v11794_v24 = vpack.c.bf16 %v589_v7, %v585_v1 }
  0x78   :  { %v11781_v56 = vpack.c.bf16 %v582_v33, %v578_v45  ;;  %v584_v45 = vld [vmem:[%s15525_s4 + $0x200] sm:$0xff]  ;;  %v586_v1 = vld [vmem:[%s15525_s4 + $0x210] sm:$0xff] }
  0x79   :  { %15900 = vst [vmem:[#allocation23_spill] sm:$0xff] %v11757_v49  ;;  %15903 = vst [vmem:[#allocation26_spill] sm:$0xff] %v11777_v47  ;;  %v588_v33 = vld [vmem:[%s15525_s4 + $0x220] sm:$0xff]  ;;  %v590_v7 = vld [vmem:[%s15525_s4 + $0x230] sm:$0xff] }
  0x7a   :  { %6933 = vmatpush1.bf16.msra.mxu1 %v11721_v3  ;;  %15904 = vst [vmem:[#allocation27_spill] sm:$0xff] %v11781_v56  ;;  %6877 = vmatpush1.bf16.msra.mxu0 %v11777_v47  ;;  %15905 = vst [vmem:[#allocation28_spill] sm:$0xff] %v11794_v24  ;;  %v11808_v27 = vpack.c.bf16 %v588_v33, %v584_v45  ;;  %v11817_v47 = vpack.c.bf16 %v590_v7, %v586_v1  ;;  %v595_v45 = vld [vmem:[%s15525_s4 + $0x258] sm:$0xff]  ;;  %v592_v7 = vld [vmem:[%s15525_s4 + $0x240] sm:$0xff] }
  0x7b   :  { %6935 = vmatprep.subr.bf16.mxu1 %v11735_v36  ;;  %6879 = vmatprep.subr.bf16.mxu0 %v11794_v24  ;;  %v599_v1 = vld [vmem:[%s15525_s4 + $0x278] sm:$0xff] }
  0x7c   :  { %15907 = vst [vmem:[#allocation30_spill] sm:$0xff] %v11808_v27  ;;  %15908 = vst [vmem:[#allocation31_spill] sm:$0xff] %v11817_v47  ;;  %v11842_v24 = vpack.c.bf16 %v599_v1, %v595_v45  ;;  %v601_v45 = vld [vmem:[%s15525_s4 + $0x288] sm:$0xff]  ;;  %v603_v1 = vld [vmem:[%s15525_s4 + $0x298] sm:$0xff] }
  0x7e   :  { %6937 = vmatpush1.bf16.msra.mxu1 %v11757_v49  ;;  %6881 = vmatpush1.bf16.msra.mxu0 %v11808_v27  ;;  %15910 = vst [vmem:[#allocation33_spill] sm:$0xff] %v11842_v24 }
  0x7f   :  { %6939 = vmatprep.subr.bf16.mxu1 %v11768_v40  ;;  %v11806_v40 = vpack.c.bf16 %v591_v8, %v587_v18  ;;  %v593_v18 = vld [vmem:[%s15525_s4 + $0x248] sm:$0xff] }
  0x80   :  { %v597_v8 = vld [vmem:[%s15525_s4 + $0x268] sm:$0xff] }
  0x81   :  { %15906 = vst [vmem:[#allocation29_spill] sm:$0xff] %v11806_v40  ;;  %v11830_v33 = vpack.c.bf16 %v597_v8, %v593_v18  ;;  %v594_v18 = vld [vmem:[%s15525_s4 + $0x250] sm:$0xff] }
  0x82   :  { %6941 = vmatpush1.bf16.msra.mxu1 %v11781_v56  ;;  %v598_v8 = vld [vmem:[%s15525_s4 + $0x270] sm:$0xff] }
  0x83   :  { %6943 = vmatprep.subr.bf16.mxu1 %v11806_v40  ;;  %15909 = vst [vmem:[#allocation32_spill] sm:$0xff] %v11830_v33  ;;  %v596_v40 = vld [vmem:[%s15525_s4 + $0x260] sm:$0xff]  ;;  %6883 = vmatprep.subr.bf16.mxu0 %v11830_v33  ;;  %v11853_v27 = vpack.c.bf16 %v598_v8, %v594_v18  ;;  %v607_v18 = vld [vmem:[%s15525_s4 + $0x2b8] sm:$0xff] }
  0x84   :  { %v11844_v56 = vpack.c.bf16 %v596_v40, %v592_v7  ;;  %v605_v40 = vld [vmem:[%s15525_s4 + $0x2a8] sm:$0xff]  ;;  %v600_v8 = vld [vmem:[%s15525_s4 + $0x280] sm:$0xff]  ;;  %v11878_v33 = vpack.c.bf16 %v607_v18, %v603_v1  ;;  %v611_v18 = vld [vmem:[%s15525_s4 + $0x2d8] sm:$0xff] }
  0x85   :  { %15912 = vst [vmem:[#allocation35_spill] sm:$0xff] %v11853_v27  ;;  %v11866_v7 = vpack.c.bf16 %v605_v40, %v601_v45  ;;  %v602_v45 = vld [vmem:[%s15525_s4 + $0x290] sm:$0xff]  ;;  %v609_v1 = vld [vmem:[%s15525_s4 + $0x2c8] sm:$0xff] }
  0x86   :  { %6945 = vmatpush1.bf16.msra.mxu1 %v11817_v47  ;;  %15911 = vst [vmem:[#allocation34_spill] sm:$0xff] %v11844_v56  ;;  %6885 = vmatpush1.bf16.msra.mxu0 %v11844_v56  ;;  %15914 = vst [vmem:[#allocation37_spill] sm:$0xff] %v11878_v33  ;;  %v606_v40 = vld [vmem:[%s15525_s4 + $0x2b0] sm:$0xff] }
  0x87   :  { %6947 = vmatprep.subr.bf16.mxu1 %v11842_v24  ;;  %15913 = vst [vmem:[#allocation36_spill] sm:$0xff] %v11866_v7  ;;  %v604_v24 = vld [vmem:[%s15525_s4 + $0x2a0] sm:$0xff]  ;;  %6887 = vmatprep.subr.bf16.mxu0 %v11866_v7  ;;  %v11889_v56 = vpack.c.bf16 %v606_v40, %v602_v45  ;;  %v615_v45 = vld [vmem:[%s15525_s4 + $0x2f8] sm:$0xff] }
  0x88   :  { %v11880_v47 = vpack.c.bf16 %v604_v24, %v600_v8  ;;  %v613_v24 = vld [vmem:[%s15525_s4 + $0x2e8] sm:$0xff]  ;;  %v608_v40 = vld [vmem:[%s15525_s4 + $0x2c0] sm:$0xff]  ;;  %v11914_v7 = vpack.c.bf16 %v615_v45, %v611_v18  ;;  %v619_v45 = vld [vmem:[%s15525_s4 + $0x318] sm:$0xff] }
  0x89   :  { %15916 = vst [vmem:[#allocation39_spill] sm:$0xff] %v11889_v56  ;;  %v11902_v8 = vpack.c.bf16 %v613_v24, %v609_v1  ;;  %v610_v1 = vld [vmem:[%s15525_s4 + $0x2d0] sm:$0xff]  ;;  %v617_v18 = vld [vmem:[%s15525_s4 + $0x308] sm:$0xff] }
  0x8a   :  { %6949 = vmatpush1.bf16.msra.mxu1 %v11853_v27  ;;  %15915 = vst [vmem:[#allocation38_spill] sm:$0xff] %v11880_v47  ;;  %6889 = vmatpush1.bf16.msra.mxu0 %v11880_v47  ;;  %15918 = vst [vmem:[#allocation41_spill] sm:$0xff] %v11914_v7  ;;  %v614_v24 = vld [vmem:[%s15525_s4 + $0x2f0] sm:$0xff] }
  0x8b   :  { %6951 = vmatprep.subr.bf16.mxu1 %v11878_v33  ;;  %15917 = vst [vmem:[#allocation40_spill] sm:$0xff] %v11902_v8  ;;  %v612_v33 = vld [vmem:[%s15525_s4 + $0x2e0] sm:$0xff]  ;;  %6891 = vmatprep.subr.bf16.mxu0 %v11902_v8  ;;  %v11925_v47 = vpack.c.bf16 %v614_v24, %v610_v1  ;;  %v623_v1 = vld [vmem:[%s15525_s4 + $0x338] sm:$0xff] }
  0x8c   :  { %v11916_v27 = vpack.c.bf16 %v612_v33, %v608_v40  ;;  %v621_v33 = vld [vmem:[%s15525_s4 + $0x328] sm:$0xff]  ;;  %v616_v24 = vld [vmem:[%s15525_s4 + $0x300] sm:$0xff]  ;;  %v11950_v8 = vpack.c.bf16 %v623_v1, %v619_v45  ;;  %v627_v1 = vld [vmem:[%s15525_s4 + $0x358] sm:$0xff] }
  0x8d   :  { %15920 = vst [vmem:[#allocation43_spill] sm:$0xff] %v11925_v47  ;;  %v11938_v40 = vpack.c.bf16 %v621_v33, %v617_v18  ;;  %v618_v18 = vld [vmem:[%s15525_s4 + $0x310] sm:$0xff]  ;;  %v625_v45 = vld [vmem:[%s15525_s4 + $0x348] sm:$0xff] }
  0x8e   :  { %6953 = vmatpush1.bf16.msra.mxu1 %v11889_v56  ;;  %15919 = vst [vmem:[#allocation42_spill] sm:$0xff] %v11916_v27  ;;  %6893 = vmatpush1.bf16.msra.mxu0 %v11916_v27  ;;  %15922 = vst [vmem:[#allocation45_spill] sm:$0xff] %v11950_v8  ;;  %v622_v33 = vld [vmem:[%s15525_s4 + $0x330] sm:$0xff] }
  0x8f   :  { %6955 = vmatprep.subr.bf16.mxu1 %v11914_v7  ;;  %15921 = vst [vmem:[#allocation44_spill] sm:$0xff] %v11938_v40  ;;  %v620_v7 = vld [vmem:[%s15525_s4 + $0x320] sm:$0xff]  ;;  %6895 = vmatprep.subr.bf16.mxu0 %v11938_v40  ;;  %v11961_v27 = vpack.c.bf16 %v622_v33, %v618_v18  ;;  %v631_v18 = vld [vmem:[%s15525_s4 + $0x378] sm:$0xff] }
  0x90   :  { %v11952_v56 = vpack.c.bf16 %v620_v7, %v616_v24  ;;  %v629_v7 = vld [vmem:[%s15525_s4 + $0x368] sm:$0xff]  ;;  %v624_v33 = vld [vmem:[%s15525_s4 + $0x340] sm:$0xff]  ;;  %v11986_v40 = vpack.c.bf16 %v631_v18, %v627_v1  ;;  %v635_v1 = vld [vmem:[%s15525_s4 + $0x398] sm:$0xff] }
  0x91   :  { %15924 = vst [vmem:[#allocation47_spill] sm:$0xff] %v11961_v27  ;;  %v11974_v24 = vpack.c.bf16 %v629_v7, %v625_v45  ;;  %v626_v45 = vld [vmem:[%s15525_s4 + $0x350] sm:$0xff]  ;;  %v639_v18 = vld [vmem:[%s15525_s4 + $0x3b8] sm:$0xff] }
  0x92   :  { %6957 = vmatpush1.bf16.msra.mxu1 %v11925_v47  ;;  %15923 = vst [vmem:[#allocation46_spill] sm:$0xff] %v11952_v56  ;;  %6897 = vmatpush1.bf16.msra.mxu0 %v11952_v56  ;;  %15926 = vst [vmem:[#allocation49_spill] sm:$0xff] %v11986_v40  ;;  %v630_v7 = vld [vmem:[%s15525_s4 + $0x370] sm:$0xff]  ;;  %v633_v56 = vld [vmem:[%s15525_s4 + $0x388] sm:$0xff] }
  0x93   :  { %6959 = vmatprep.subr.bf16.mxu1 %v11950_v8  ;;  %15925 = vst [vmem:[#allocation48_spill] sm:$0xff] %v11974_v24  ;;  %v628_v8 = vld [vmem:[%s15525_s4 + $0x360] sm:$0xff]  ;;  %6899 = vmatprep.subr.bf16.mxu0 %v11974_v24  ;;  %v12000_v49 = vpack.c.bf16 %v630_v7, %v626_v45  ;;  %v634_v24 = vld [vmem:[%s15525_s4 + $0x390] sm:$0xff] }
  0x94   :  { %v11988_v47 = vpack.c.bf16 %v628_v8, %v624_v33  ;;  %v637_v8 = vld [vmem:[%s15525_s4 + $0x3a8] sm:$0xff]  ;;  %v632_v45 = vld [vmem:[%s15525_s4 + $0x380] sm:$0xff] }
  0x95   :  { %15928 = vst [vmem:[#allocation51_spill] sm:$0xff] %v12000_v49  ;;  %v12012_v33 = vpack.c.bf16 %v637_v8, %v633_v56  ;;  %v636_v7 = vld [vmem:[%s15525_s4 + $0x3a0] sm:$0xff]  ;;  %v638_v56 = vld [vmem:[%s15525_s4 + $0x3b0] sm:$0xff]  ;;  %v641_v8 = vld [vmem:[%s15525_s4 + $0x3c8] sm:$0xff] }
  0x96   :  { %6961 = vmatpush1.bf16.msra.mxu1 %v11961_v27  ;;  %15927 = vst [vmem:[#allocation50_spill] sm:$0xff] %v11988_v47  ;;  %v12014_v27 = vpack.c.bf16 %v639_v18, %v635_v1  ;;  %6901 = vmatpush1.bf16.msra.mxu0 %v11988_v47  ;;  %v12026_v58 = vpack.c.bf16 %v636_v7, %v632_v45  ;;  %v645_v1 = vld [vmem:[%s15525_s4 + $0x3e8] sm:$0xff]  ;;  %v643_v7 = vld [vmem:[%s15525_s4 + $0x3d8] sm:$0xff] }
  0x97   :  { %6963 = vmatprep.subr.bf16.mxu1 %v11986_v40  ;;  %15929 = vst [vmem:[#allocation52_spill] sm:$0xff] %v12012_v33  ;;  %6903 = vmatprep.subr.bf16.mxu0 %v12012_v33  ;;  %v12039_v18 = vpack.c.bf16 %v638_v56, %v634_v24  ;;  %v12041_v45 = vpack.c.bf16 %v645_v1, %v641_v8  ;;  %v647_v47 = vld [vmem:[%s15525_s4 + $0x3f8] sm:$0xff]  ;;  %v640_v40 = vld [vmem:[%s15525_s4 + $0x3c0] sm:$0xff]  ;;  %v642_v56 = vld [vmem:[%s15525_s4 + $0x3d0] sm:$0xff] }
  0x98   :  { %15930 = vst [vmem:[#allocation53_spill] sm:$0xff] %v12014_v27  ;;  %15931 = vst [vmem:[#allocation54_spill] sm:$0xff] %v12026_v58  ;;  %v644_v24 = vld [vmem:[%s15525_s4 + $0x3e0] sm:$0xff]  ;;  %v646_v8 = vld [vmem:[%s15525_s4 + $0x3f0] sm:$0xff] }
  0x99   :  { %15932 = vst [vmem:[#allocation55_spill] sm:$0xff] %v12039_v18  ;;  %15933 = vst [vmem:[#allocation56_spill] sm:$0xff] %v12041_v45  ;;  %v12065_v1 = vpack.c.bf16 %v644_v24, %v640_v40  ;;  %v113_v24 = vld [vmem:[%s15526_s2] sm:$0xf] }
  0x9a   :  { %6965 = vmatpush1.bf16.msra.mxu1 %v12000_v49  ;;  %v12053_v49 = vpack.c.bf16 %v647_v47, %v643_v7  ;;  %6905 = vmatpush1.bf16.msra.mxu0 %v12026_v58  ;;  %v12069_v47 = vpack.c.bf16 %v646_v8, %v642_v56  ;;  %v115_v7 = vlaneseq }
  0x9b   :  { %6967 = vmatprep.subr.bf16.mxu1 %v12014_v27  ;;  %15935 = vst [vmem:[#allocation58_spill] sm:$0xff] %v12065_v1  ;;  %6907 = vmatprep.subr.bf16.mxu0 %v12041_v45 }
  0x9c   :  { %15934 = vst [vmem:[#allocation57_spill] sm:$0xff] %v12053_v49  ;;  %15936 = vst [vmem:[#allocation59_spill] sm:$0xff] %v12069_v47  ;;  %v116_v58 = vshrl.u32 %v115_v7, 7 }
  0x9e   :  { %6969 = vmatpush1.bf16.msra.mxu1 %v12039_v18  ;;  %6909 = vmatpush1.bf16.msra.mxu0 %v12065_v1  ;;  %v12076_v40 = vsub.s32 0, %v116_v58  ;;  %v12081_v56 = vsub.s32 1, %v116_v58 }
  0x9f   :  { %6971 = vmatprep.subr.bf16.mxu1 %v12053_v49  ;;  %6975 = vmatprep.subr.bf16.mxu0 %v11016_v9 }
  0xa0   :  { %15937 = vst [vmem:[#allocation60_spill] sm:$0xff] %v12076_v40  ;;  %15938 = vst [vmem:[#allocation61_spill] sm:$0xff] %v12081_v56  ;;  %v118_v8 = vrot.slane %v113_v24, %v12076_v40  ;;  %v122_v1 = vrot.slane %v113_v24, %v12081_v56  ;;  %v12095_v40 = vsub.s32 2, %v116_v58 }
  0xa2   :  { %6973 = vmatpush1.bf16.msra.mxu1 %v12069_v47  ;;  %15943 = vst [vmem:[#allocation66_spill] sm:$0xff] %v12095_v40 }
  0xa3   :  { %7007 = vmatprep.subr.bf16.mxu1 %v11355_v46 }
  0xf8   :  { %v201_v49 = vpop.f32.mrb[0].mxu1 }
  0xf9   :  { %v12085_v47 = vadd.f32 %v201_v49, %v118_v8  ;;  %v203_v9 = vpop.f32.mrb[1].mxu1  ;;  %v12097_v49 = vsub.s32 3, %v116_v58 }
  0xfa   :  { %v420_v45 = vpop.f32.mrb[0].mxu0  ;;  %v12087_v46 = vadd.f32 %v203_v9, %v122_v1  ;;  %v126_v9 = vrot.slane %v113_v24, %v12095_v40 }
  0xfb   :  { %15939 = vst [vmem:[#allocation62_spill] sm:$0xff] %v12085_v47  ;;  %v422_v7 = vpop.f32.mrb[1].mxu0  ;;  %v421_v18 = vadd.f32 %v420_v45, %v12085_v47  ;;  %15944 = vst [vmem:[#allocation67_spill] sm:$0xff] %v12097_v49  ;;  %v130_v25 = vrot.slane %v113_v24, %v12097_v49 }
  0xfc   :  { %15940 = vst [vmem:[#allocation63_spill] sm:$0xff] %v12087_v46  ;;  %v423_v27 = vadd.f32 %v422_v7, %v12087_v46  ;;  %v207_v33 = vpop.f32.mrb[2].mxu1 }
  0xfd   :  { %v12091_v36 = vadd.f32 %v207_v33, %v118_v8  ;;  %v209_v63 = vpop.f32.mrb[3].mxu1  ;;  %v6622_v8 = vmul.f32 -1.442695, %v421_v18 }
  0xfe   :  { %v12093_v3 = vadd.f32 %v209_v63, %v122_v1  ;;  %v6623_v33 = vmul.f32 -1.442695, %v423_v27 }
  0xff   :  { %15941 = vst [vmem:[#allocation64_spill] sm:$0xff] %v12091_v36 }
 0x100   :  { %15942 = vst [vmem:[#allocation65_spill] sm:$0xff] %v12093_v3  ;;  %10407 = vpow2.f32 %v6623_v33 }
 0x101   :  { %10409 = vpow2.f32 %v6622_v8 }
 0x10a   :  { %v10408_v63 = vpop.eup %10407 }
 0x10b   :  { %v10410_v1 = vpop.eup %10409  ;;  %v505_v3 = vadd.f32 1.0, %v10408_v63 }
 0x10c   :  { %v499_v58 = vadd.f32 1.0, %v10410_v1 }
 0x10d   :  { %10411 = vrcp.f32 %v505_v3 }
 0x10e   :  { %10413 = vrcp.f32 %v499_v58  ;;  %v15949_v58 = vmov 0.0  }
 0x117   :  { %v10412_v18 = vpop.eup %10411 }
 0x118   :  { %v278_v56 = vpop.f32.mrb[4].mxu1  ;;  %v10414_v33 = vpop.eup %10413  ;;  %v515_v63 = vmul.f32 0.0, %v10412_v18  ;;  %v15954_v18 = vld [vmem:[#allocation13_spill] sm:$0xff] }
 0x119   :  { %v280_v17 = vpop.f32.mrb[5].mxu1  ;;  %v12105_v36 = vadd.f32 %v278_v56, %v126_v9 }
 0x11a   :  { %v12107_v47 = vadd.f32 %v280_v17, %v130_v25 }
 0x11b   :  { %15947 = vst [vmem:[#allocation70_spill] sm:$0xff] %v12105_v36 }
 0x11c   :  { %v284_v16 = vpop.f32.mrb[6].mxu1  ;;  %15948 = vst [vmem:[#allocation71_spill] sm:$0xff] %v12107_v47 }
 0x11d   :  { %v12101_v45 = vadd.f32 %v284_v16, %v126_v9  ;;  %v286_v7 = vpop.f32.mrb[7].mxu1 }
 0x11e   :  { %v12103_v46 = vadd.f32 %v286_v7, %v130_v25 }
 0x11f   :  { %15945 = vst [vmem:[#allocation68_spill] sm:$0xff] %v12101_v45  ;;  %v15964_v45 = vld [vmem:[#allocation23_spill] sm:$0xff] }
 0x120   :  { %15946 = vst [vmem:[#allocation69_spill] sm:$0xff] %v12103_v46  ;;  %v15965_v46 = vld [vmem:[#allocation24_spill] sm:$0xff] }
 0x138   :  { %v491_v40 = vpop.f32.mrb[8].mxu1 }
 0x139   :  { %v492_v16 = vadd.f32 %v491_v40, %v12105_v36  ;;  %v493_v24 = vpop.f32.mrb[9].mxu1 }
 0x13a   :  { %v494_v7 = vadd.f32 %v493_v24, %v12107_v47  ;;  %v15951_v24 = vld [vmem:[#allocation10_spill] sm:$0xff] }
 0x13b   :  { %10415 = vtanh.f32 %v492_v16  ;;  %v15950_v16 = vld [vmem:[#allocation9_spill] sm:$0xff] }
 0x13c   :  { %v6624_v27 = vmul.f32 -1.442695, %v494_v7  ;;  %v15952_v7 = vld [vmem:[#allocation11_spill] sm:$0xff] }
 0x13e   :  { %10417 = vpow2.f32 %v6624_v27  ;;  %v15953_v27 = vld [vmem:[#allocation12_spill] sm:$0xff] }
 0x145   :  { %v10416_v8 = vpop.eup %10415 }
 0x146   :  { %v516_v1 = vmul.f32 %v10416_v8, %v10414_v33  ;;  %v15955_v33 = vld [vmem:[#allocation14_spill] sm:$0xff]  ;;  %v15956_v8 = vld [vmem:[#allocation15_spill] sm:$0xff] }
 0x148   :  { %v10418_v56 = vpop.eup %10417  ;;  %v12111_v9 = vadd.f32 %v516_v1, %v515_v63  ;;  %v15957_v63 = vld [vmem:[#allocation16_spill] sm:$0xff]  ;;  %v15958_v1 = vld [vmem:[#allocation17_spill] sm:$0xff] }
 0x149   :  { %v512_v25 = vadd.f32 1.0, %v10418_v56  ;;  %v15959_v56 = vld [vmem:[#allocation18_spill] sm:$0xff] }
 0x14a   :  { %10419 = vtanh.f32 %v12111_v9 }
 0x14b   :  { %10421 = vrcp.f32 %v512_v25  ;;  %v15960_v25 = vld [vmem:[#allocation19_spill] sm:$0xff] }
 0x154   :  { %v10420_v3 = vpop.eup %10419 }
 0x155   :  { %v10422_v17 = vpop.eup %10421 }
 0x156   :  { %v519_v40 = vmul.f32 %v10422_v17, %v10420_v3  ;;  %v15961_v3 = vld [vmem:[#allocation20_spill] sm:$0xff]  ;;  %v15962_v17 = vld [vmem:[#allocation21_spill] sm:$0xff] }
 0x158   :  { %733 = vmatprep.mubr.f32.mxu0 %v519_v40  ;;  %804 = vmatprep.mubr.f32.mxu1 %v519_v40 }
 0x159   :  { %734 = vmatmul.mubr.f32.vlgmr.msra.gmra.mrb[2].mxu0 %v15949_v58  ;;  %805 = vmatmul.mubr.f32.vlgmr.msra.gmra.mrb[10].mxu1 %v15949_v58 }
 0x15a   :  { %6977 = vmatpush1.bf16.msra.mxu0 %v11027_v13  ;;  %7009 = vmatpush1.bf16.msra.mxu1 %v11369_v53 }
 0x15b   :  { %6979 = vmatprep.subr.bf16.mxu0 %v11049_v22  ;;  %7011 = vmatprep.subr.bf16.mxu1 %v11372_v54 }
 0x15c   :  { %911 = vmatprep.mubr.f32.mxu0 %v15949_v58  ;;  %982 = vmatprep.mubr.f32.mxu1 %v15949_v58 }
 0x15e   :  { %6981 = vmatpush1.bf16.msra.mxu0 %v11060_v26  ;;  %7013 = vmatpush1.bf16.msra.mxu1 %v11388_v61 }
 0x15f   :  { %6983 = vmatprep.subr.bf16.mxu0 %v11081_v35  ;;  %7015 = vmatprep.subr.bf16.mxu1 %v11392_v62 }
 0x162   :  { %6985 = vmatpush1.bf16.msra.mxu0 %v11093_v39  ;;  %7017 = vmatpush1.bf16.msra.mxu1 %v11408_v4 }
 0x163   :  { %6987 = vmatprep.subr.bf16.mxu0 %v11105_v44  ;;  %7019 = vmatprep.subr.bf16.mxu1 %v11412_v5 }
 0x166   :  { %6989 = vmatpush1.bf16.msra.mxu0 %v11126_v52  ;;  %7021 = vmatpush1.bf16.msra.mxu1 %v11427_v11 }
 0x167   :  { %6991 = vmatprep.subr.bf16.mxu0 %v11138_v57  ;;  %7023 = vmatprep.subr.bf16.mxu1 %v11430_v12 }
 0x16a   :  { %6993 = vmatpush1.bf16.msra.mxu0 %v11156_v0  ;;  %7025 = vmatpush1.bf16.msra.mxu1 %v11445_v19 }
 0x16b   :  { %6995 = vmatprep.subr.bf16.mxu0 %v11168_v6  ;;  %7027 = vmatprep.subr.bf16.mxu1 %v11448_v21 }
 0x16e   :  { %6997 = vmatpush1.bf16.msra.mxu0 %v11186_v15  ;;  %7029 = vmatpush1.bf16.msra.mxu1 %v11463_v28 }
 0x16f   :  { %6999 = vmatprep.subr.bf16.mxu0 %v11198_v20  ;;  %7031 = vmatprep.subr.bf16.mxu1 %v11466_v30 }
 0x172   :  { %7001 = vmatpush1.bf16.msra.mxu0 %v11216_v29  ;;  %7033 = vmatpush1.bf16.msra.mxu1 %v11481_v37 }
 0x173   :  { %7003 = vmatprep.subr.bf16.mxu0 %v11228_v34  ;;  %7035 = vmatprep.subr.bf16.mxu1 %v11484_v38 }
 0x176   :  { %7005 = vmatpush1.bf16.msra.mxu0 %v11240_v41  ;;  %7037 = vmatpush1.bf16.msra.mxu1 %v11493_v43 }
 0x177   :  { %7039 = vmatprep.subr.bf16.mxu0 %v11507_v50  ;;  %7103 = vmatprep.subr.bf16.mxu1 %v11518_v59 }
 0x179   :  { %912 = vmatmul.mubr.f32.vlgmr.msra.gmra.mrb[4].mxu0 %v519_v40  ;;  %983 = vmatmul.mubr.f32.vlgmr.msra.gmra.mrb[12].mxu1 %v519_v40  ;;  %v15963_v40 = vld [vmem:[#allocation22_spill] sm:$0xff] }
 0x17a   :  { %7041 = vmatpush1.bf16.msra.mxu0 %v11520_v60  ;;  %7105 = vmatpush1.bf16.msra.mxu1 %v11529_v48 }
 0x17b   :  { %7043 = vmatprep.subr.bf16.mxu0 %v11546_v10  ;;  %7107 = vmatprep.subr.bf16.mxu1 %v11548_v14 }
 0x17e   :  { %7045 = vmatpush1.bf16.msra.mxu0 %v11559_v23  ;;  %7109 = vmatpush1.bf16.msra.mxu1 %v11572_v31 }
 0x17f   :  { %7047 = vmatprep.subr.bf16.mxu0 %v11574_v32  ;;  %7111 = vmatprep.subr.bf16.mxu1 %v11586_v42 }
 0x182   :  { %7049 = vmatpush1.bf16.msra.mxu0 %v11599_v51  ;;  %7113 = vmatpush1.bf16.msra.mxu1 %v11601_v55 }
 0x183   :  { %7051 = vmatprep.subr.bf16.mxu0 %v11613_v2  ;;  %7115 = vmatprep.subr.bf16.mxu1 %v15950_v16 }
 0x186   :  { %7053 = vmatpush1.bf16.msra.mxu0 %v15951_v24  ;;  %7117 = vmatpush1.bf16.msra.mxu1 %v15952_v7  ;;  %v16007_v7 = vld [vmem:[#allocation66_spill] sm:$0xff] }
 0x187   :  { %7055 = vmatprep.subr.bf16.mxu0 %v15953_v27  ;;  %7119 = vmatprep.subr.bf16.mxu1 %v15954_v18 }
 0x18a   :  { %7057 = vmatpush1.bf16.msra.mxu0 %v15955_v33  ;;  %7121 = vmatpush1.bf16.msra.mxu1 %v15956_v8  ;;  %v15966_v33 = vld [vmem:[#allocation25_spill] sm:$0xff]  ;;  %v15967_v8 = vld [vmem:[#allocation26_spill] sm:$0xff] }
 0x18b   :  { %7059 = vmatprep.subr.bf16.mxu0 %v15957_v63  ;;  %7123 = vmatprep.subr.bf16.mxu1 %v15958_v1  ;;  %v15968_v63 = vld [vmem:[#allocation27_spill] sm:$0xff]  ;;  %v15969_v1 = vld [vmem:[#allocation28_spill] sm:$0xff] }
 0x18e   :  { %7061 = vmatpush1.bf16.msra.mxu0 %v15959_v56  ;;  %7125 = vmatpush1.bf16.msra.mxu1 %v15960_v25  ;;  %v15970_v56 = vld [vmem:[#allocation29_spill] sm:$0xff]  ;;  %v15971_v25 = vld [vmem:[#allocation30_spill] sm:$0xff] }
 0x18f   :  { %7063 = vmatprep.subr.bf16.mxu0 %v15961_v3  ;;  %7127 = vmatprep.subr.bf16.mxu1 %v15962_v17  ;;  %v15972_v3 = vld [vmem:[#allocation31_spill] sm:$0xff]  ;;  %v15973_v17 = vld [vmem:[#allocation32_spill] sm:$0xff] }
 0x192   :  { %7065 = vmatpush1.bf16.msra.mxu0 %v15963_v40  ;;  %7129 = vmatpush1.bf16.msra.mxu1 %v15964_v45  ;;  %v15974_v40 = vld [vmem:[#allocation33_spill] sm:$0xff]  ;;  %v15975_v45 = vld [vmem:[#allocation34_spill] sm:$0xff] }
 0x193   :  { %7067 = vmatprep.subr.bf16.mxu0 %v15965_v46  ;;  %7131 = vmatprep.subr.bf16.mxu1 %v15966_v33  ;;  %v15976_v46 = vld [vmem:[#allocation35_spill] sm:$0xff]  ;;  %v15977_v33 = vld [vmem:[#allocation36_spill] sm:$0xff] }
 0x196   :  { %7069 = vmatpush1.bf16.msra.mxu0 %v15967_v8  ;;  %7133 = vmatpush1.bf16.msra.mxu1 %v15968_v63  ;;  %v15978_v8 = vld [vmem:[#allocation37_spill] sm:$0xff]  ;;  %v15979_v63 = vld [vmem:[#allocation38_spill] sm:$0xff] }
 0x197   :  { %7071 = vmatprep.subr.bf16.mxu0 %v15969_v1  ;;  %7135 = vmatprep.subr.bf16.mxu1 %v15970_v56  ;;  %v15980_v1 = vld [vmem:[#allocation39_spill] sm:$0xff]  ;;  %v15981_v56 = vld [vmem:[#allocation40_spill] sm:$0xff] }
 0x19a   :  { %7073 = vmatpush1.bf16.msra.mxu0 %v15971_v25  ;;  %7137 = vmatpush1.bf16.msra.mxu1 %v15972_v3  ;;  %v15982_v25 = vld [vmem:[#allocation41_spill] sm:$0xff]  ;;  %v15983_v3 = vld [vmem:[#allocation42_spill] sm:$0xff] }
 0x19b   :  { %7075 = vmatprep.subr.bf16.mxu0 %v15973_v17  ;;  %7139 = vmatprep.subr.bf16.mxu1 %v15974_v40  ;;  %v15984_v17 = vld [vmem:[#allocation43_spill] sm:$0xff]  ;;  %v15985_v40 = vld [vmem:[#allocation44_spill] sm:$0xff] }
 0x19e   :  { %7077 = vmatpush1.bf16.msra.mxu0 %v15975_v45  ;;  %7141 = vmatpush1.bf16.msra.mxu1 %v15976_v46  ;;  %v15986_v45 = vld [vmem:[#allocation45_spill] sm:$0xff]  ;;  %v15987_v46 = vld [vmem:[#allocation46_spill] sm:$0xff] }
 0x19f   :  { %7079 = vmatprep.subr.bf16.mxu0 %v15977_v33  ;;  %7143 = vmatprep.subr.bf16.mxu1 %v15978_v8  ;;  %v15988_v33 = vld [vmem:[#allocation47_spill] sm:$0xff]  ;;  %v15989_v8 = vld [vmem:[#allocation48_spill] sm:$0xff] }
 0x1a2   :  { %7081 = vmatpush1.bf16.msra.mxu0 %v15979_v63  ;;  %7145 = vmatpush1.bf16.msra.mxu1 %v15980_v1  ;;  %v15990_v63 = vld [vmem:[#allocation49_spill] sm:$0xff]  ;;  %v15991_v1 = vld [vmem:[#allocation50_spill] sm:$0xff] }
 0x1a3   :  { %7083 = vmatprep.subr.bf16.mxu0 %v15981_v56  ;;  %7147 = vmatprep.subr.bf16.mxu1 %v15982_v25  ;;  %v15992_v56 = vld [vmem:[#allocation51_spill] sm:$0xff]  ;;  %v15993_v25 = vld [vmem:[#allocation52_spill] sm:$0xff] }
 0x1a6   :  { %7085 = vmatpush1.bf16.msra.mxu0 %v15983_v3  ;;  %7149 = vmatpush1.bf16.msra.mxu1 %v15984_v17  ;;  %v15994_v3 = vld [vmem:[#allocation53_spill] sm:$0xff]  ;;  %v15995_v17 = vld [vmem:[#allocation54_spill] sm:$0xff] }
 0x1a7   :  { %7087 = vmatprep.subr.bf16.mxu0 %v15985_v40  ;;  %7151 = vmatprep.subr.bf16.mxu1 %v15986_v45  ;;  %v15996_v40 = vld [vmem:[#allocation55_spill] sm:$0xff]  ;;  %v15997_v45 = vld [vmem:[#allocation56_spill] sm:$0xff] }
 0x1aa   :  { %7089 = vmatpush1.bf16.msra.mxu0 %v15987_v46  ;;  %7153 = vmatpush1.bf16.msra.mxu1 %v15988_v33  ;;  %v15998_v46 = vld [vmem:[#allocation57_spill] sm:$0xff]  ;;  %v15999_v33 = vld [vmem:[#allocation58_spill] sm:$0xff] }
 0x1ab   :  { %7091 = vmatprep.subr.bf16.mxu0 %v15989_v8  ;;  %7155 = vmatprep.subr.bf16.mxu1 %v15990_v63  ;;  %v16000_v8 = vld [vmem:[#allocation59_spill] sm:$0xff]  ;;  %v16001_v63 = vld [vmem:[#allocation2_spill] sm:$0xff] }
 0x1ae   :  { %7093 = vmatpush1.bf16.msra.mxu0 %v15991_v1  ;;  %7157 = vmatpush1.bf16.msra.mxu1 %v15992_v56  ;;  %v16002_v1 = vld [vmem:[#allocation3_spill] sm:$0xff] }
 0x1af   :  { %7095 = vmatprep.subr.bf16.mxu0 %v15993_v25  ;;  %7159 = vmatprep.subr.bf16.mxu1 %v15994_v3  ;;  %v289_v3 = vld [vmem:[%s15527_s5] sm:$0xf]  ;;  %v16003_v25 = vld [vmem:[#allocation60_spill] sm:$0xff] }
 0x1b0   :  { %v12226_v24 = vrot.slane %v289_v3, %v16007_v7  ;;  %v12236_v32 = vrot.slane %v289_v3, %v12097_v49  ;;  %v16032_v49 = vld [vmem:[#allocation25_spill] sm:$0xff] }
 0x1b2   :  { %7097 = vmatpush1.bf16.msra.mxu0 %v15995_v17  ;;  %7161 = vmatpush1.bf16.msra.mxu1 %v15996_v40  ;;  %v12218_v17 = vrot.slane %v289_v3, %v16003_v25  ;;  %v16005_v40 = vld [vmem:[#allocation61_spill] sm:$0xff]  ;;  %16008 = vst [vmem:[#allocation74_spill] sm:$0xff] %v12226_v24 }
 0x1b3   :  { %7099 = vmatprep.subr.bf16.mxu0 %v15997_v45  ;;  %7163 = vmatprep.subr.bf16.mxu1 %v15998_v46  ;;  %v12221_v56 = vrot.slane %v289_v3, %v16005_v40 }
 0x1b4   :  { %16004 = vst [vmem:[#allocation72_spill] sm:$0xff] %v12218_v17 }
 0x1b5   :  { %16006 = vst [vmem:[#allocation73_spill] sm:$0xff] %v12221_v56 }
 0x1b6   :  { %7101 = vmatpush1.bf16.msra.mxu0 %v15999_v33  ;;  %7165 = vmatpush1.bf16.msra.mxu1 %v16000_v8 }
 0x1b7   :  { %7167 = vmatprep.subr.bf16.mxu0 %v16001_v63  ;;  %7199 = vmatprep.subr.bf16.mxu1 %v16002_v1 }
 0x22c   :  { %v735_v45 = vpop.f32.mrb[2].mxu0  ;;  %v806_v46 = vpop.f32.mrb[10].mxu1 }
 0x22d   :  { %v736_v33 = vadd.f32 %v735_v45, %v12218_v17  ;;  %v737_v18 = vpop.f32.mrb[3].mxu0  ;;  %v808_v8 = vpop.f32.mrb[11].mxu1  ;;  %v807_v25 = vadd.f32 %v806_v46, %v12226_v24  ;;  %v16010_v24 = vld [vmem:[#allocation63_spill] sm:$0xff] }
 0x22e   :  { %v738_v63 = vadd.f32 %v737_v18, %v12221_v56  ;;  %v840_v42 = vrot.slane %v16010_v24, 2 }
 0x22f   :  { %v6625_v27 = vmul.f32 -1.442695, %v736_v33 }
 0x230   :  { %v6626_v1 = vmul.f32 -1.442695, %v738_v63  ;;  %v16009_v63 = vld [vmem:[#allocation62_spill] sm:$0xff] }
 0x231   :  { %10423 = vpow2.f32 %v6625_v27  ;;  %v839_v27 = vrot.slane %v16009_v63, 2 }
 0x232   :  { %10425 = vpow2.f32 %v6626_v1  ;;  %v841_v1 = vrot.slane %v12105_v36, 2 }
 0x233   :  { %10427 = vtanh.f32 %v807_v25 }
 0x23b   :  { %v10424_v16 = vpop.eup %10423 }
 0x23c   :  { %v10426_v40 = vpop.eup %10425  ;;  %v814_v2 = vadd.f32 1.0, %v10424_v16  ;;  %v842_v16 = vrot.slane %v12107_v47, 2 }
 0x23d   :  { %v820_v55 = vadd.f32 1.0, %v10426_v40  ;;  %v10428_v45 = vpop.eup %10427 }
 0x23e   :  { %10429 = vrcp.f32 %v814_v2 }
 0x23f   :  { %10431 = vrcp.f32 %v820_v55 }
 0x248   :  { %v10430_v17 = vpop.eup %10429 }
 0x249   :  { %v10432_v51 = vpop.eup %10431  ;;  %v831_v18 = vmul.f32 %v10430_v17, %v10428_v45 }
 0x24a   :  { %v830_v33 = vmul.f32 0.0, %v10432_v51 }
 0x24c   :  { %v12231_v7 = vadd.f32 %v831_v18, %v830_v33  ;;  %v913_v56 = vpop.f32.mrb[4].mxu0  ;;  %v984_v46 = vpop.f32.mrb[12].mxu1  ;;  %v809_v18 = vadd.f32 %v808_v8, %v12236_v32 }
 0x24d   :  { %v914_v25 = vadd.f32 %v913_v56, %v839_v27  ;;  %v985_v2 = vadd.f32 %v984_v46, %v841_v1  ;;  %v915_v55 = vpop.f32.mrb[5].mxu0  ;;  %v986_v40 = vpop.f32.mrb[13].mxu1 }
 0x24e   :  { %v916_v51 = vadd.f32 %v915_v55, %v840_v42  ;;  %v987_v17 = vadd.f32 %v986_v40, %v842_v16  ;;  %v6627_v33 = vmul.f32 -1.442695, %v809_v18  ;;  %v16013_v18 = vld [vmem:[#allocation6_spill] sm:$0xff] }
 0x24f   :  { %v6628_v45 = vmul.f32 -1.442695, %v914_v25 }
 0x250   :  { %v6629_v63 = vmul.f32 -1.442695, %v916_v51  ;;  %v6630_v36 = vmul.f32 -1.442695, %v987_v17 }
 0x251   :  { %10433 = vpow2.f32 %v6628_v45  ;;  %v16012_v45 = vld [vmem:[#allocation5_spill] sm:$0xff] }
 0x252   :  { %10435 = vpow2.f32 %v6629_v63 }
 0x253   :  { %10437 = vpow2.f32 %v6627_v33  ;;  %v16014_v33 = vld [vmem:[#allocation7_spill] sm:$0xff] }
 0x254   :  { %10439 = vpow2.f32 %v6630_v36 }
 0x255   :  { %10441 = vtanh.f32 %v985_v2 }
 0x25b   :  { %v10434_v24 = vpop.eup %10433 }
 0x25c   :  { %v10436_v47 = vpop.eup %10435  ;;  %v992_v56 = vadd.f32 1.0, %v10434_v24 }
 0x25d   :  { %v998_v27 = vadd.f32 1.0, %v10436_v47  ;;  %v10438_v3 = vpop.eup %10437 }
 0x25e   :  { %10443 = vrcp.f32 %v992_v56  ;;  %v10440_v42 = vpop.eup %10439  ;;  %v827_v46 = vadd.f32 1.0, %v10438_v3  ;;  %v16015_v56 = vld [vmem:[#allocation8_spill] sm:$0xff]  ;;  %v16017_v3 = vld [vmem:[#allocation10_spill] sm:$0xff] }
 0x25f   :  { %10445 = vrcp.f32 %v998_v27  ;;  %v10442_v1 = vpop.eup %10441  ;;  %v1005_v8 = vadd.f32 1.0, %v10440_v42  ;;  %v16016_v27 = vld [vmem:[#allocation9_spill] sm:$0xff]  ;;  %v16018_v42 = vld [vmem:[#allocation11_spill] sm:$0xff] }
 0x260   :  { %10447 = vrcp.f32 %v827_v46  ;;  %v16020_v46 = vld [vmem:[#allocation13_spill] sm:$0xff] }
 0x261   :  { %10449 = vtanh.f32 %v12231_v7 }
 0x262   :  { %10451 = vrcp.f32 %v1005_v8  ;;  %v16024_v8 = vld [vmem:[#allocation17_spill] sm:$0xff] }
 0x268   :  { %v10444_v16 = vpop.eup %10443 }
 0x269   :  { %v10446_v25 = vpop.eup %10445  ;;  %v1009_v55 = vmul.f32 %v10444_v16, %v10442_v1  ;;  %v16019_v1 = vld [vmem:[#allocation12_spill] sm:$0xff]  ;;  %v16021_v16 = vld [vmem:[#allocation14_spill] sm:$0xff] }
 0x26a   :  { %v1008_v63 = vmul.f32 %v10446_v25, %v12111_v9  ;;  %v10448_v36 = vpop.eup %10447  ;;  %v16011_v9 = vld [vmem:[#allocation4_spill] sm:$0xff]  ;;  %v16022_v25 = vld [vmem:[#allocation15_spill] sm:$0xff] }
 0x26b   :  { %v10450_v47 = vpop.eup %10449 }
 0x26c   :  { %v12241_v40 = vadd.f32 %v1009_v55, %v1008_v63  ;;  %v10452_v24 = vpop.eup %10451  ;;  %v834_v17 = vmul.f32 %v10450_v47, %v10448_v36  ;;  %v16023_v55 = vld [vmem:[#allocation16_spill] sm:$0xff]  ;;  %v16025_v63 = vld [vmem:[#allocation18_spill] sm:$0xff]  ;;  %v16026_v36 = vld [vmem:[#allocation19_spill] sm:$0xff] }
 0x26d   :  { %v16027_v47 = vld [vmem:[#allocation20_spill] sm:$0xff] }
 0x26e   :  { %10453 = vtanh.f32 %v12241_v40 }
 0x278   :  { %v10454_v2 = vpop.eup %10453 }
 0x279   :  { %v1012_v51 = vmul.f32 %v10454_v2, %v10452_v24  ;;  %v16028_v24 = vld [vmem:[#allocation21_spill] sm:$0xff]  ;;  %v16029_v2 = vld [vmem:[#allocation22_spill] sm:$0xff] }
 0x27b   :  { %1077 = vmatprep.mubr.f32.mxu0 %v1012_v51  ;;  %1148 = vmatprep.mubr.f32.mxu1 %v1012_v51 }
 0x27c   :  { %1078 = vmatmul.mubr.f32.vlgmr.msra.gmra.mrb[6].mxu0 %v834_v17  ;;  %1149 = vmatmul.mubr.f32.vlgmr.msra.gmra.mrb[14].mxu1 %v834_v17  ;;  %v16031_v17 = vld [vmem:[#allocation24_spill] sm:$0xff] }
 0x27d   :  { %7169 = vmatpush1.bf16.msra.mxu0 %v11027_v13  ;;  %7201 = vmatpush1.bf16.msra.mxu1 %v11369_v53 }
 0x27e   :  { %7171 = vmatprep.subr.bf16.mxu0 %v11049_v22  ;;  %7203 = vmatprep.subr.bf16.mxu1 %v11372_v54 }
 0x27f   :  { %1251 = vmatprep.mubr.f32.mxu0 %v15949_v58  ;;  %1322 = vmatprep.mubr.f32.mxu1 %v15949_v58 }
 0x281   :  { %7173 = vmatpush1.bf16.msra.mxu0 %v11060_v26  ;;  %7205 = vmatpush1.bf16.msra.mxu1 %v11388_v61 }
 0x282   :  { %7175 = vmatprep.subr.bf16.mxu0 %v11081_v35  ;;  %7207 = vmatprep.subr.bf16.mxu1 %v11392_v62 }
 0x285   :  { %7177 = vmatpush1.bf16.msra.mxu0 %v11093_v39  ;;  %7209 = vmatpush1.bf16.msra.mxu1 %v11408_v4 }
 0x286   :  { %7179 = vmatprep.subr.bf16.mxu0 %v11105_v44  ;;  %7211 = vmatprep.subr.bf16.mxu1 %v11412_v5 }
 0x289   :  { %7181 = vmatpush1.bf16.msra.mxu0 %v11126_v52  ;;  %7213 = vmatpush1.bf16.msra.mxu1 %v11427_v11 }
 0x28a   :  { %7183 = vmatprep.subr.bf16.mxu0 %v11138_v57  ;;  %7215 = vmatprep.subr.bf16.mxu1 %v11430_v12 }
 0x28d   :  { %7185 = vmatpush1.bf16.msra.mxu0 %v11156_v0  ;;  %7217 = vmatpush1.bf16.msra.mxu1 %v11445_v19 }
 0x28e   :  { %7187 = vmatprep.subr.bf16.mxu0 %v11168_v6  ;;  %7219 = vmatprep.subr.bf16.mxu1 %v11448_v21 }
 0x291   :  { %7189 = vmatpush1.bf16.msra.mxu0 %v11186_v15  ;;  %7221 = vmatpush1.bf16.msra.mxu1 %v11463_v28 }
 0x292   :  { %7191 = vmatprep.subr.bf16.mxu0 %v11198_v20  ;;  %7223 = vmatprep.subr.bf16.mxu1 %v11466_v30 }
 0x295   :  { %7193 = vmatpush1.bf16.msra.mxu0 %v11216_v29  ;;  %7225 = vmatpush1.bf16.msra.mxu1 %v11481_v37 }
 0x296   :  { %7195 = vmatprep.subr.bf16.mxu0 %v11228_v34  ;;  %7227 = vmatprep.subr.bf16.mxu1 %v11484_v38 }
 0x299   :  { %7197 = vmatpush1.bf16.msra.mxu0 %v11240_v41  ;;  %7229 = vmatpush1.bf16.msra.mxu1 %v11493_v43 }
 0x29a   :  { %7231 = vmatprep.subr.bf16.mxu0 %v11507_v50  ;;  %7295 = vmatprep.subr.bf16.mxu1 %v11518_v59 }
 0x29c   :  { %1252 = vmatmul.mubr.f32.vlgmr.msra.gmra.mrb[8].mxu0 %v1012_v51  ;;  %1323 = vmatmul.mubr.f32.vlgmr.msra.gmra.mrb[16].mxu1 %v1012_v51  ;;  %v16030_v51 = vld [vmem:[#allocation23_spill] sm:$0xff] }
 0x29d   :  { %7233 = vmatpush1.bf16.msra.mxu0 %v11520_v60  ;;  %7297 = vmatpush1.bf16.msra.mxu1 %v11529_v48 }
 0x29e   :  { %7235 = vmatprep.subr.bf16.mxu0 %v11546_v10  ;;  %7299 = vmatprep.subr.bf16.mxu1 %v11548_v14 }
 0x2a1   :  { %7237 = vmatpush1.bf16.msra.mxu0 %v11559_v23  ;;  %7301 = vmatpush1.bf16.msra.mxu1 %v11572_v31 }
 0x2a2   :  { %7239 = vmatprep.subr.bf16.mxu0 %v16011_v9  ;;  %7303 = vmatprep.subr.bf16.mxu1 %v16012_v45 }
 0x2a5   :  { %7241 = vmatpush1.bf16.msra.mxu0 %v16013_v18  ;;  %7305 = vmatpush1.bf16.msra.mxu1 %v16014_v33 }
 0x2a6   :  { %7243 = vmatprep.subr.bf16.mxu0 %v16015_v56  ;;  %7307 = vmatprep.subr.bf16.mxu1 %v16016_v27 }
 0x2a9   :  { %7245 = vmatpush1.bf16.msra.mxu0 %v16017_v3  ;;  %7309 = vmatpush1.bf16.msra.mxu1 %v16018_v42 }
 0x2aa   :  { %7247 = vmatprep.subr.bf16.mxu0 %v16019_v1  ;;  %7311 = vmatprep.subr.bf16.mxu1 %v16020_v46  ;;  %v16070_v1 = vld [vmem:[#allocation73_spill] sm:$0xff] }
 0x2ad   :  { %7249 = vmatpush1.bf16.msra.mxu0 %v16021_v16  ;;  %7313 = vmatpush1.bf16.msra.mxu1 %v16022_v25  ;;  %v16033_v25 = vld [vmem:[#allocation26_spill] sm:$0xff]  ;;  %v16069_v16 = vld [vmem:[#allocation72_spill] sm:$0xff] }
 0x2ae   :  { %7251 = vmatprep.subr.bf16.mxu0 %v16023_v55  ;;  %7315 = vmatprep.subr.bf16.mxu1 %v16024_v8  ;;  %v16034_v55 = vld [vmem:[#allocation27_spill] sm:$0xff]  ;;  %v16035_v8 = vld [vmem:[#allocation28_spill] sm:$0xff] }
 0x2b1   :  { %7253 = vmatpush1.bf16.msra.mxu0 %v16025_v63  ;;  %7317 = vmatpush1.bf16.msra.mxu1 %v16026_v36  ;;  %v16036_v63 = vld [vmem:[#allocation29_spill] sm:$0xff]  ;;  %v16037_v36 = vld [vmem:[#allocation30_spill] sm:$0xff] }
 0x2b2   :  { %7255 = vmatprep.subr.bf16.mxu0 %v16027_v47  ;;  %7319 = vmatprep.subr.bf16.mxu1 %v16028_v24  ;;  %v16038_v47 = vld [vmem:[#allocation31_spill] sm:$0xff]  ;;  %v16039_v24 = vld [vmem:[#allocation32_spill] sm:$0xff] }
 0x2b5   :  { %7257 = vmatpush1.bf16.msra.mxu0 %v16029_v2  ;;  %7321 = vmatpush1.bf16.msra.mxu1 %v16030_v51  ;;  %v16040_v2 = vld [vmem:[#allocation33_spill] sm:$0xff]  ;;  %v16041_v51 = vld [vmem:[#allocation34_spill] sm:$0xff] }
 0x2b6   :  { %7259 = vmatprep.subr.bf16.mxu0 %v16031_v17  ;;  %7323 = vmatprep.subr.bf16.mxu1 %v16032_v49  ;;  %v16042_v17 = vld [vmem:[#allocation35_spill] sm:$0xff]  ;;  %v16043_v49 = vld [vmem:[#allocation36_spill] sm:$0xff] }
 0x2b9   :  { %7261 = vmatpush1.bf16.msra.mxu0 %v16033_v25  ;;  %7325 = vmatpush1.bf16.msra.mxu1 %v16034_v55  ;;  %v16044_v25 = vld [vmem:[#allocation37_spill] sm:$0xff]  ;;  %v16045_v55 = vld [vmem:[#allocation38_spill] sm:$0xff] }
 0x2ba   :  { %7263 = vmatprep.subr.bf16.mxu0 %v16035_v8  ;;  %7327 = vmatprep.subr.bf16.mxu1 %v16036_v63  ;;  %v16046_v8 = vld [vmem:[#allocation39_spill] sm:$0xff]  ;;  %v16047_v63 = vld [vmem:[#allocation40_spill] sm:$0xff] }
 0x2bd   :  { %7265 = vmatpush1.bf16.msra.mxu0 %v16037_v36  ;;  %7329 = vmatpush1.bf16.msra.mxu1 %v16038_v47  ;;  %v16048_v36 = vld [vmem:[#allocation41_spill] sm:$0xff]  ;;  %v16049_v47 = vld [vmem:[#allocation42_spill] sm:$0xff] }
 0x2be   :  { %7267 = vmatprep.subr.bf16.mxu0 %v16039_v24  ;;  %7331 = vmatprep.subr.bf16.mxu1 %v16040_v2  ;;  %v16050_v24 = vld [vmem:[#allocation43_spill] sm:$0xff]  ;;  %v16051_v2 = vld [vmem:[#allocation44_spill] sm:$0xff] }
 0x2c1   :  { %7269 = vmatpush1.bf16.msra.mxu0 %v16041_v51  ;;  %7333 = vmatpush1.bf16.msra.mxu1 %v16042_v17  ;;  %v16052_v51 = vld [vmem:[#allocation45_spill] sm:$0xff]  ;;  %v16053_v17 = vld [vmem:[#allocation46_spill] sm:$0xff] }
 0x2c2   :  { %7271 = vmatprep.subr.bf16.mxu0 %v16043_v49  ;;  %7335 = vmatprep.subr.bf16.mxu1 %v16044_v25  ;;  %v16054_v49 = vld [vmem:[#allocation47_spill] sm:$0xff]  ;;  %v16055_v25 = vld [vmem:[#allocation48_spill] sm:$0xff] }
 0x2c5   :  { %7273 = vmatpush1.bf16.msra.mxu0 %v16045_v55  ;;  %7337 = vmatpush1.bf16.msra.mxu1 %v16046_v8  ;;  %v16056_v55 = vld [vmem:[#allocation49_spill] sm:$0xff]  ;;  %v16057_v8 = vld [vmem:[#allocation50_spill] sm:$0xff] }
 0x2c6   :  { %7275 = vmatprep.subr.bf16.mxu0 %v16047_v63  ;;  %7339 = vmatprep.subr.bf16.mxu1 %v16048_v36  ;;  %v16058_v63 = vld [vmem:[#allocation51_spill] sm:$0xff]  ;;  %v16059_v36 = vld [vmem:[#allocation52_spill] sm:$0xff] }
 0x2c9   :  { %7277 = vmatpush1.bf16.msra.mxu0 %v16049_v47  ;;  %7341 = vmatpush1.bf16.msra.mxu1 %v16050_v24  ;;  %v16060_v47 = vld [vmem:[#allocation53_spill] sm:$0xff]  ;;  %v16061_v24 = vld [vmem:[#allocation54_spill] sm:$0xff] }
 0x2ca   :  { %7279 = vmatprep.subr.bf16.mxu0 %v16051_v2  ;;  %7343 = vmatprep.subr.bf16.mxu1 %v16052_v51  ;;  %v16062_v2 = vld [vmem:[#allocation55_spill] sm:$0xff]  ;;  %v16063_v51 = vld [vmem:[#allocation56_spill] sm:$0xff] }
 0x2cd   :  { %7281 = vmatpush1.bf16.msra.mxu0 %v16053_v17  ;;  %7345 = vmatpush1.bf16.msra.mxu1 %v16054_v49  ;;  %v16064_v17 = vld [vmem:[#allocation57_spill] sm:$0xff]  ;;  %v16065_v49 = vld [vmem:[#allocation58_spill] sm:$0xff] }
 0x2ce   :  { %7283 = vmatprep.subr.bf16.mxu0 %v16055_v25  ;;  %7347 = vmatprep.subr.bf16.mxu1 %v16056_v55  ;;  %v16066_v25 = vld [vmem:[#allocation59_spill] sm:$0xff]  ;;  %v16067_v55 = vld [vmem:[#allocation2_spill] sm:$0xff] }
 0x2d1   :  { %7285 = vmatpush1.bf16.msra.mxu0 %v16057_v8  ;;  %7349 = vmatpush1.bf16.msra.mxu1 %v16058_v63  ;;  %v16068_v8 = vld [vmem:[#allocation3_spill] sm:$0xff] }
 0x2d2   :  { %7287 = vmatprep.subr.bf16.mxu0 %v16059_v36  ;;  %7351 = vmatprep.subr.bf16.mxu1 %v16060_v47 }
 0x2d5   :  { %7289 = vmatpush1.bf16.msra.mxu0 %v16061_v24  ;;  %7353 = vmatpush1.bf16.msra.mxu1 %v16062_v2 }
 0x2d6   :  { %7291 = vmatprep.subr.bf16.mxu0 %v16063_v51  ;;  %7355 = vmatprep.subr.bf16.mxu1 %v16064_v17  ;;  %v16071_v17 = vld [vmem:[#allocation74_spill] sm:$0xff] }
 0x2d9   :  { %7293 = vmatpush1.bf16.msra.mxu0 %v16065_v49  ;;  %7357 = vmatpush1.bf16.msra.mxu1 %v16066_v25 }
 0x2da   :  { %7359 = vmatprep.subr.bf16.mxu0 %v16067_v55  ;;  %7391 = vmatprep.subr.bf16.mxu1 %v16068_v8 }
 0x34f   :  { %v1079_v63 = vpop.f32.mrb[6].mxu0  ;;  %v1150_v36 = vpop.f32.mrb[14].mxu1 }
 0x350   :  { %v1080_v47 = vadd.f32 %v1079_v63, %v16069_v16  ;;  %v1081_v46 = vpop.f32.mrb[7].mxu0  ;;  %v1152_v24 = vpop.f32.mrb[15].mxu1  ;;  %v1151_v49 = vadd.f32 %v1150_v36, %v16071_v17 }
 0x351   :  { %v1082_v2 = vadd.f32 %v1081_v46, %v16070_v1  ;;  %v16072_v46 = vld [vmem:[#allocation62_spill] sm:$0xff]  ;;  %v16074_v1 = vld [vmem:[#allocation63_spill] sm:$0xff] }
 0x352   :  { %v6631_v42 = vmul.f32 -1.442695, %v1080_v47  ;;  %v1179_v47 = vrot.slane %v16072_v46, 4 }
 0x353   :  { %v6632_v51 = vmul.f32 -1.442695, %v1082_v2  ;;  %v16073_v2 = vld [vmem:[#allocation70_spill] sm:$0xff] }
 0x354   :  { %10455 = vpow2.f32 %v6631_v42  ;;  %v1181_v42 = vrot.slane %v16073_v2, 4 }
 0x355   :  { %10457 = vpow2.f32 %v6632_v51 }
 0x356   :  { %10459 = vtanh.f32 %v1151_v49  ;;  %v16075_v49 = vld [vmem:[#allocation71_spill] sm:$0xff] }
 0x35e   :  { %v10456_v3 = vpop.eup %10455 }
 0x35f   :  { %v10458_v25 = vpop.eup %10457  ;;  %v1158_v27 = vadd.f32 1.0, %v10456_v3  ;;  %v1180_v3 = vrot.slane %v16074_v1, 4 }
 0x360   :  { %v1164_v55 = vadd.f32 1.0, %v10458_v25  ;;  %v10460_v8 = vpop.eup %10459  ;;  %v1182_v25 = vrot.slane %v16075_v49, 4 }
 0x361   :  { %10461 = vrcp.f32 %v1158_v27 }
 0x362   :  { %10463 = vrcp.f32 %v1164_v55 }
 0x36b   :  { %v10462_v56 = vpop.eup %10461 }
 0x36c   :  { %v10464_v63 = vpop.eup %10463  ;;  %v1175_v16 = vmul.f32 %v10462_v56, %v10460_v8 }
 0x36d   :  { %v1174_v33 = vmul.f32 %v10464_v63, %v12231_v7  ;;  %v1153_v63 = vadd.f32 %v1152_v24, %v12236_v32 }
 0x36f   :  { %v12348_v51 = vadd.f32 %v1175_v16, %v1174_v33  ;;  %v1253_v36 = vpop.f32.mrb[8].mxu0  ;;  %v1324_v17 = vpop.f32.mrb[16].mxu1  ;;  %v6633_v33 = vmul.f32 -1.442695, %v1153_v63  ;;  %v16078_v63 = vld [vmem:[#allocation6_spill] sm:$0xff] }
 0x370   :  { %v1254_v27 = vadd.f32 %v1253_v36, %v1179_v47  ;;  %v1325_v55 = vadd.f32 %v1324_v17, %v1181_v42  ;;  %v1255_v18 = vpop.f32.mrb[9].mxu0  ;;  %v1326_v45 = vpop.f32.mrb[17].mxu1 }
 0x371   :  { %v1256_v9 = vadd.f32 %v1255_v18, %v1180_v3  ;;  %v1327_v56 = vadd.f32 %v1326_v45, %v1182_v25 }
 0x372   :  { %v6634_v8 = vmul.f32 -1.442695, %v1254_v27 }
 0x373   :  { %v6635_v7 = vmul.f32 -1.442695, %v1256_v9  ;;  %v6636_v16 = vmul.f32 -1.442695, %v1327_v56 }
 0x374   :  { %10465 = vpow2.f32 %v6634_v8 }
 0x375   :  { %10467 = vpow2.f32 %v6635_v7  ;;  %v16077_v7 = vld [vmem:[#allocation5_spill] sm:$0xff] }
 0x376   :  { %10469 = vpow2.f32 %v6633_v33  ;;  %v16079_v33 = vld [vmem:[#allocation7_spill] sm:$0xff] }
 0x377   :  { %10471 = vpow2.f32 %v6636_v16  ;;  %v16080_v16 = vld [vmem:[#allocation8_spill] sm:$0xff] }
 0x378   :  { %10473 = vtanh.f32 %v1325_v55 }
 0x37e   :  { %v10466_v2 = vpop.eup %10465 }
 0x37f   :  { %v10468_v46 = vpop.eup %10467  ;;  %v1332_v1 = vadd.f32 1.0, %v10466_v2 }
 0x380   :  { %v1338_v47 = vadd.f32 1.0, %v10468_v46  ;;  %v10470_v17 = vpop.eup %10469 }
 0x381   :  { %10475 = vrcp.f32 %v1332_v1  ;;  %v10472_v18 = vpop.eup %10471  ;;  %v1171_v25 = vadd.f32 1.0, %v10470_v17  ;;  %v16082_v17 = vld [vmem:[#allocation10_spill] sm:$0xff] }
 0x382   :  { %10477 = vrcp.f32 %v1338_v47  ;;  %v10474_v45 = vpop.eup %10473  ;;  %v1345_v3 = vadd.f32 1.0, %v10472_v18  ;;  %v16081_v47 = vld [vmem:[#allocation9_spill] sm:$0xff]  ;;  %v16083_v18 = vld [vmem:[#allocation11_spill] sm:$0xff] }
 0x383   :  { %10479 = vtanh.f32 %v12348_v51 }
 0x384   :  { %10481 = vrcp.f32 %v1345_v3  ;;  %v16088_v3 = vld [vmem:[#allocation16_spill] sm:$0xff] }
 0x38b   :  { %v10476_v42 = vpop.eup %10475 }
 0x38c   :  { %v10478_v9 = vpop.eup %10477  ;;  %v1349_v36 = vmul.f32 %v10476_v42, %v10474_v45  ;;  %v16084_v45 = vld [vmem:[#allocation12_spill] sm:$0xff]  ;;  %v16085_v42 = vld [vmem:[#allocation13_spill] sm:$0xff] }
 0x38d   :  { %v1348_v24 = vmul.f32 %v10478_v9, %v12241_v40  ;;  %v10480_v1 = vpop.eup %10479  ;;  %v16076_v40 = vld [vmem:[#allocation4_spill] sm:$0xff]  ;;  %v16086_v9 = vld [vmem:[#allocation14_spill] sm:$0xff] }
 0x38e   :  { %v10482_v46 = vpop.eup %10481 }
 0x38f   :  { %v12354_v27 = vadd.f32 %v1349_v36, %v1348_v24  ;;  %v16087_v36 = vld [vmem:[#allocation15_spill] sm:$0xff]  ;;  %v16089_v24 = vld [vmem:[#allocation17_spill] sm:$0xff] }
 0x391   :  { %10483 = vtanh.f32 %v12354_v27 }
 0x392   :  { %10485 = vrcp.f32 %v1171_v25  ;;  %v16090_v25 = vld [vmem:[#allocation18_spill] sm:$0xff] }
 0x39b   :  { %v10484_v2 = vpop.eup %10483 }
 0x39c   :  { %v10486_v55 = vpop.eup %10485  ;;  %v1352_v56 = vmul.f32 %v10484_v2, %v10482_v46  ;;  %v16092_v46 = vld [vmem:[#allocation20_spill] sm:$0xff]  ;;  %v16093_v2 = vld [vmem:[#allocation21_spill] sm:$0xff] }
 0x39d   :  { %v1178_v8 = vmul.f32 %v10486_v55, %v10480_v1  ;;  %v16091_v1 = vld [vmem:[#allocation19_spill] sm:$0xff]  ;;  %v16094_v55 = vld [vmem:[#allocation22_spill] sm:$0xff] }
 0x39e   :  { %1417 = vmatprep.mubr.f32.mxu0 %v1352_v56  ;;  %1488 = vmatprep.mubr.f32.mxu1 %v1352_v56 }
 0x39f   :  { %1418 = vmatmul.mubr.f32.vlgmr.msra.gmra.mrb[10].mxu0 %v1178_v8  ;;  %1489 = vmatmul.mubr.f32.vlgmr.msra.gmra.mrb[18].mxu1 %v1178_v8  ;;  %v16096_v8 = vld [vmem:[#allocation24_spill] sm:$0xff] }
 0x3a0   :  { %7361 = vmatpush1.bf16.msra.mxu0 %v11027_v13  ;;  %7393 = vmatpush1.bf16.msra.mxu1 %v11369_v53 }
 0x3a1   :  { %7363 = vmatprep.subr.bf16.mxu0 %v11049_v22  ;;  %7395 = vmatprep.subr.bf16.mxu1 %v11372_v54 }
 0x3a2   :  { %1591 = vmatprep.mubr.f32.mxu0 %v15949_v58  ;;  %1662 = vmatprep.mubr.f32.mxu1 %v15949_v58 }
 0x3a4   :  { %7365 = vmatpush1.bf16.msra.mxu0 %v11060_v26  ;;  %7397 = vmatpush1.bf16.msra.mxu1 %v11388_v61 }
 0x3a5   :  { %7367 = vmatprep.subr.bf16.mxu0 %v11081_v35  ;;  %7399 = vmatprep.subr.bf16.mxu1 %v11392_v62 }
 0x3a8   :  { %7369 = vmatpush1.bf16.msra.mxu0 %v11093_v39  ;;  %7401 = vmatpush1.bf16.msra.mxu1 %v11408_v4 }
 0x3a9   :  { %7371 = vmatprep.subr.bf16.mxu0 %v11105_v44  ;;  %7403 = vmatprep.subr.bf16.mxu1 %v11412_v5 }
 0x3ac   :  { %7373 = vmatpush1.bf16.msra.mxu0 %v11126_v52  ;;  %7405 = vmatpush1.bf16.msra.mxu1 %v11427_v11 }
 0x3ad   :  { %7375 = vmatprep.subr.bf16.mxu0 %v11138_v57  ;;  %7407 = vmatprep.subr.bf16.mxu1 %v11430_v12 }
 0x3b0   :  { %7377 = vmatpush1.bf16.msra.mxu0 %v11156_v0  ;;  %7409 = vmatpush1.bf16.msra.mxu1 %v11445_v19 }
 0x3b1   :  { %7379 = vmatprep.subr.bf16.mxu0 %v11168_v6  ;;  %7411 = vmatprep.subr.bf16.mxu1 %v11448_v21 }
 0x3b4   :  { %7381 = vmatpush1.bf16.msra.mxu0 %v11186_v15  ;;  %7413 = vmatpush1.bf16.msra.mxu1 %v11463_v28 }
 0x3b5   :  { %7383 = vmatprep.subr.bf16.mxu0 %v11198_v20  ;;  %7415 = vmatprep.subr.bf16.mxu1 %v11466_v30 }
 0x3b8   :  { %7385 = vmatpush1.bf16.msra.mxu0 %v11216_v29  ;;  %7417 = vmatpush1.bf16.msra.mxu1 %v11481_v37 }
 0x3b9   :  { %7387 = vmatprep.subr.bf16.mxu0 %v11228_v34  ;;  %7419 = vmatprep.subr.bf16.mxu1 %v11484_v38 }
 0x3bc   :  { %7389 = vmatpush1.bf16.msra.mxu0 %v11240_v41  ;;  %7421 = vmatpush1.bf16.msra.mxu1 %v11493_v43 }
 0x3bd   :  { %7423 = vmatprep.subr.bf16.mxu0 %v11507_v50  ;;  %7487 = vmatprep.subr.bf16.mxu1 %v11518_v59 }
 0x3bf   :  { %1592 = vmatmul.mubr.f32.vlgmr.msra.gmra.mrb[12].mxu0 %v1352_v56  ;;  %1663 = vmatmul.mubr.f32.vlgmr.msra.gmra.mrb[20].mxu1 %v1352_v56  ;;  %v16095_v56 = vld [vmem:[#allocation23_spill] sm:$0xff] }
 0x3c0   :  { %7425 = vmatpush1.bf16.msra.mxu0 %v11520_v60  ;;  %7489 = vmatpush1.bf16.msra.mxu1 %v11529_v48 }
 0x3c1   :  { %7427 = vmatprep.subr.bf16.mxu0 %v11546_v10  ;;  %7491 = vmatprep.subr.bf16.mxu1 %v11548_v14 }
 0x3c4   :  { %7429 = vmatpush1.bf16.msra.mxu0 %v11559_v23  ;;  %7493 = vmatpush1.bf16.msra.mxu1 %v11572_v31 }
 0x3c5   :  { %7431 = vmatprep.subr.bf16.mxu0 %v16076_v40  ;;  %7495 = vmatprep.subr.bf16.mxu1 %v16077_v7 }
 0x3c8   :  { %7433 = vmatpush1.bf16.msra.mxu0 %v16078_v63  ;;  %7497 = vmatpush1.bf16.msra.mxu1 %v16079_v33 }
 0x3c9   :  { %7435 = vmatprep.subr.bf16.mxu0 %v16080_v16  ;;  %7499 = vmatprep.subr.bf16.mxu1 %v16081_v47 }
 0x3cc   :  { %7437 = vmatpush1.bf16.msra.mxu0 %v16082_v17  ;;  %7501 = vmatpush1.bf16.msra.mxu1 %v16083_v18  ;;  %v16135_v18 = vld [vmem:[#allocation73_spill] sm:$0xff] }
 0x3cd   :  { %7439 = vmatprep.subr.bf16.mxu0 %v16084_v45  ;;  %7503 = vmatprep.subr.bf16.mxu1 %v16085_v42  ;;  %v16134_v42 = vld [vmem:[#allocation72_spill] sm:$0xff] }
 0x3d0   :  { %7441 = vmatpush1.bf16.msra.mxu0 %v16086_v9  ;;  %7505 = vmatpush1.bf16.msra.mxu1 %v16087_v36  ;;  %v16097_v9 = vld [vmem:[#allocation25_spill] sm:$0xff]  ;;  %v16098_v36 = vld [vmem:[#allocation26_spill] sm:$0xff] }
 0x3d1   :  { %7443 = vmatprep.subr.bf16.mxu0 %v16088_v3  ;;  %7507 = vmatprep.subr.bf16.mxu1 %v16089_v24  ;;  %v16099_v3 = vld [vmem:[#allocation27_spill] sm:$0xff]  ;;  %v16100_v24 = vld [vmem:[#allocation28_spill] sm:$0xff] }
 0x3d4   :  { %7445 = vmatpush1.bf16.msra.mxu0 %v16090_v25  ;;  %7509 = vmatpush1.bf16.msra.mxu1 %v16091_v1  ;;  %v16101_v25 = vld [vmem:[#allocation29_spill] sm:$0xff]  ;;  %v16102_v1 = vld [vmem:[#allocation30_spill] sm:$0xff] }
 0x3d5   :  { %7447 = vmatprep.subr.bf16.mxu0 %v16092_v46  ;;  %7511 = vmatprep.subr.bf16.mxu1 %v16093_v2  ;;  %v16103_v46 = vld [vmem:[#allocation31_spill] sm:$0xff]  ;;  %v16104_v2 = vld [vmem:[#allocation32_spill] sm:$0xff] }
 0x3d8   :  { %7449 = vmatpush1.bf16.msra.mxu0 %v16094_v55  ;;  %7513 = vmatpush1.bf16.msra.mxu1 %v16095_v56  ;;  %v16105_v55 = vld [vmem:[#allocation33_spill] sm:$0xff]  ;;  %v16106_v56 = vld [vmem:[#allocation34_spill] sm:$0xff] }
 0x3d9   :  { %7451 = vmatprep.subr.bf16.mxu0 %v16096_v8  ;;  %7515 = vmatprep.subr.bf16.mxu1 %v16097_v9  ;;  %v16107_v8 = vld [vmem:[#allocation35_spill] sm:$0xff]  ;;  %v16108_v9 = vld [vmem:[#allocation36_spill] sm:$0xff] }
 0x3dc   :  { %7453 = vmatpush1.bf16.msra.mxu0 %v16098_v36  ;;  %7517 = vmatpush1.bf16.msra.mxu1 %v16099_v3  ;;  %v16109_v36 = vld [vmem:[#allocation37_spill] sm:$0xff]  ;;  %v16110_v3 = vld [vmem:[#allocation38_spill] sm:$0xff] }
 0x3dd   :  { %7455 = vmatprep.subr.bf16.mxu0 %v16100_v24  ;;  %7519 = vmatprep.subr.bf16.mxu1 %v16101_v25  ;;  %v16111_v24 = vld [vmem:[#allocation39_spill] sm:$0xff]  ;;  %v16112_v25 = vld [vmem:[#allocation40_spill] sm:$0xff] }
 0x3e0   :  { %7457 = vmatpush1.bf16.msra.mxu0 %v16102_v1  ;;  %7521 = vmatpush1.bf16.msra.mxu1 %v16103_v46  ;;  %v16113_v1 = vld [vmem:[#allocation41_spill] sm:$0xff]  ;;  %v16114_v46 = vld [vmem:[#allocation42_spill] sm:$0xff] }
 0x3e1   :  { %7459 = vmatprep.subr.bf16.mxu0 %v16104_v2  ;;  %7523 = vmatprep.subr.bf16.mxu1 %v16105_v55  ;;  %v16115_v2 = vld [vmem:[#allocation43_spill] sm:$0xff]  ;;  %v16116_v55 = vld [vmem:[#allocation44_spill] sm:$0xff] }
 0x3e4   :  { %7461 = vmatpush1.bf16.msra.mxu0 %v16106_v56  ;;  %7525 = vmatpush1.bf16.msra.mxu1 %v16107_v8  ;;  %v16117_v56 = vld [vmem:[#allocation45_spill] sm:$0xff]  ;;  %v16118_v8 = vld [vmem:[#allocation46_spill] sm:$0xff] }
 0x3e5   :  { %7463 = vmatprep.subr.bf16.mxu0 %v16108_v9  ;;  %7527 = vmatprep.subr.bf16.mxu1 %v16109_v36  ;;  %v16119_v9 = vld [vmem:[#allocation47_spill] sm:$0xff]  ;;  %v16120_v36 = vld [vmem:[#allocation48_spill] sm:$0xff] }
 0x3e8   :  { %7465 = vmatpush1.bf16.msra.mxu0 %v16110_v3  ;;  %7529 = vmatpush1.bf16.msra.mxu1 %v16111_v24  ;;  %v16121_v3 = vld [vmem:[#allocation49_spill] sm:$0xff]  ;;  %v16122_v24 = vld [vmem:[#allocation50_spill] sm:$0xff] }
 0x3e9   :  { %7467 = vmatprep.subr.bf16.mxu0 %v16112_v25  ;;  %7531 = vmatprep.subr.bf16.mxu1 %v16113_v1  ;;  %v16123_v25 = vld [vmem:[#allocation51_spill] sm:$0xff]  ;;  %v16124_v1 = vld [vmem:[#allocation52_spill] sm:$0xff] }
 0x3ec   :  { %7469 = vmatpush1.bf16.msra.mxu0 %v16114_v46  ;;  %7533 = vmatpush1.bf16.msra.mxu1 %v16115_v2  ;;  %v16125_v46 = vld [vmem:[#allocation53_spill] sm:$0xff]  ;;  %v16126_v2 = vld [vmem:[#allocation54_spill] sm:$0xff] }
 0x3ed   :  { %7471 = vmatprep.subr.bf16.mxu0 %v16116_v55  ;;  %7535 = vmatprep.subr.bf16.mxu1 %v16117_v56  ;;  %v16127_v55 = vld [vmem:[#allocation55_spill] sm:$0xff]  ;;  %v16128_v56 = vld [vmem:[#allocation56_spill] sm:$0xff] }
 0x3f0   :  { %7473 = vmatpush1.bf16.msra.mxu0 %v16118_v8  ;;  %7537 = vmatpush1.bf16.msra.mxu1 %v16119_v9  ;;  %v16129_v8 = vld [vmem:[#allocation57_spill] sm:$0xff]  ;;  %v16130_v9 = vld [vmem:[#allocation58_spill] sm:$0xff] }
 0x3f1   :  { %7475 = vmatprep.subr.bf16.mxu0 %v16120_v36  ;;  %7539 = vmatprep.subr.bf16.mxu1 %v16121_v3  ;;  %v16131_v36 = vld [vmem:[#allocation59_spill] sm:$0xff]  ;;  %v16132_v3 = vld [vmem:[#allocation2_spill] sm:$0xff] }
 0x3f4   :  { %7477 = vmatpush1.bf16.msra.mxu0 %v16122_v24  ;;  %7541 = vmatpush1.bf16.msra.mxu1 %v16123_v25  ;;  %v16133_v24 = vld [vmem:[#allocation3_spill] sm:$0xff] }
 0x3f5   :  { %7479 = vmatprep.subr.bf16.mxu0 %v16124_v1  ;;  %7543 = vmatprep.subr.bf16.mxu1 %v16125_v46 }
 0x3f8   :  { %7481 = vmatpush1.bf16.msra.mxu0 %v16126_v2  ;;  %7545 = vmatpush1.bf16.msra.mxu1 %v16127_v55 }
 0x3f9   :  { %7483 = vmatprep.subr.bf16.mxu0 %v16128_v56  ;;  %7547 = vmatprep.subr.bf16.mxu1 %v16129_v8  ;;  %v16136_v8 = vld [vmem:[#allocation74_spill] sm:$0xff] }
 0x3fc   :  { %7485 = vmatpush1.bf16.msra.mxu0 %v16130_v9  ;;  %7549 = vmatpush1.bf16.msra.mxu1 %v16131_v36 }
 0x3fd   :  { %7551 = vmatprep.subr.bf16.mxu0 %v16132_v3  ;;  %7583 = vmatprep.subr.bf16.mxu1 %v16133_v24 }
 0x472   :  { %v1419_v25 = vpop.f32.mrb[10].mxu0  ;;  %v1490_v1 = vpop.f32.mrb[18].mxu1 }
 0x473   :  { %v1420_v46 = vadd.f32 %v1419_v25, %v16134_v42  ;;  %v1421_v45 = vpop.f32.mrb[11].mxu0  ;;  %v1492_v2 = vpop.f32.mrb[19].mxu1  ;;  %v1491_v9 = vadd.f32 %v1490_v1, %v16136_v8 }
 0x474   :  { %v1422_v55 = vadd.f32 %v1421_v45, %v16135_v18  ;;  %v16137_v45 = vld [vmem:[#allocation62_spill] sm:$0xff]  ;;  %v16139_v18 = vld [vmem:[#allocation63_spill] sm:$0xff] }
 0x475   :  { %v6637_v17 = vmul.f32 -1.442695, %v1420_v46  ;;  %v1519_v46 = vrot.slane %v16137_v45, 6 }
 0x476   :  { %v6638_v56 = vmul.f32 -1.442695, %v1422_v55  ;;  %v16138_v55 = vld [vmem:[#allocation70_spill] sm:$0xff] }
 0x477   :  { %10487 = vpow2.f32 %v6637_v17  ;;  %v1521_v17 = vrot.slane %v16138_v55, 6 }
 0x478   :  { %10489 = vpow2.f32 %v6638_v56 }
 0x479   :  { %10491 = vtanh.f32 %v1491_v9  ;;  %v1522_v9 = vrot.slane %v16075_v49, 6 }
 0x481   :  { %v10488_v47 = vpop.eup %10487 }
 0x482   :  { %v10490_v36 = vpop.eup %10489  ;;  %v1498_v16 = vadd.f32 1.0, %v10488_v47  ;;  %v1520_v47 = vrot.slane %v16139_v18, 6 }
 0x483   :  { %v1504_v3 = vadd.f32 1.0, %v10490_v36  ;;  %v10492_v24 = vpop.eup %10491 }
 0x484   :  { %10493 = vrcp.f32 %v1498_v16 }
 0x485   :  { %10495 = vrcp.f32 %v1504_v3 }
 0x48e   :  { %v10494_v33 = vpop.eup %10493 }
 0x48f   :  { %v10496_v25 = vpop.eup %10495  ;;  %v1515_v42 = vmul.f32 %v10494_v33, %v10492_v24 }
 0x490   :  { %v1514_v63 = vmul.f32 %v10496_v25, %v12348_v51  ;;  %v1493_v25 = vadd.f32 %v1492_v2, %v12236_v32 }
 0x492   :  { %v12462_v56 = vadd.f32 %v1515_v42, %v1514_v63  ;;  %v1593_v1 = vpop.f32.mrb[12].mxu0  ;;  %v1664_v8 = vpop.f32.mrb[20].mxu1  ;;  %v6639_v63 = vmul.f32 -1.442695, %v1493_v25 }
 0x493   :  { %v1594_v16 = vadd.f32 %v1593_v1, %v1519_v46  ;;  %v1665_v36 = vadd.f32 %v1664_v8, %v1521_v17  ;;  %v1595_v3 = vpop.f32.mrb[13].mxu0  ;;  %v1666_v7 = vpop.f32.mrb[21].mxu1 }
 0x494   :  { %v1596_v40 = vadd.f32 %v1595_v3, %v1520_v47  ;;  %v1667_v33 = vadd.f32 %v1666_v7, %v1522_v9 }
 0x495   :  { %v6640_v24 = vmul.f32 -1.442695, %v1594_v16 }
 0x496   :  { %v6641_v51 = vmul.f32 -1.442695, %v1596_v40  ;;  %v6642_v42 = vmul.f32 -1.442695, %v1667_v33 }
 0x497   :  { %10497 = vpow2.f32 %v6640_v24 }
 0x498   :  { %10499 = vpow2.f32 %v6641_v51 }
 0x499   :  { %10501 = vpow2.f32 %v6639_v63  ;;  %v16141_v63 = vld [vmem:[#allocation5_spill] sm:$0xff] }
 0x49a   :  { %10503 = vpow2.f32 %v6642_v42  ;;  %v16142_v42 = vld [vmem:[#allocation6_spill] sm:$0xff] }
 0x49b   :  { %10505 = vtanh.f32 %v1665_v36 }
 0x4a1   :  { %v10498_v45 = vpop.eup %10497 }
 0x4a2   :  { %v10500_v55 = vpop.eup %10499  ;;  %v1672_v18 = vadd.f32 1.0, %v10498_v45  ;;  %v16143_v45 = vld [vmem:[#allocation7_spill] sm:$0xff] }
 0x4a3   :  { %v1678_v49 = vadd.f32 1.0, %v10500_v55  ;;  %v10502_v8 = vpop.eup %10501  ;;  %v16144_v55 = vld [vmem:[#allocation8_spill] sm:$0xff] }
 0x4a4   :  { %10507 = vrcp.f32 %v1672_v18  ;;  %v10504_v46 = vpop.eup %10503  ;;  %v1511_v9 = vadd.f32 1.0, %v10502_v8  ;;  %v16145_v18 = vld [vmem:[#allocation9_spill] sm:$0xff]  ;;  %v16147_v8 = vld [vmem:[#allocation11_spill] sm:$0xff] }
 0x4a5   :  { %10509 = vrcp.f32 %v1678_v49  ;;  %v10506_v7 = vpop.eup %10505  ;;  %v1685_v47 = vadd.f32 1.0, %v10504_v46  ;;  %v16146_v49 = vld [vmem:[#allocation10_spill] sm:$0xff]  ;;  %v16148_v46 = vld [vmem:[#allocation12_spill] sm:$0xff] }
 0x4a6   :  { %10511 = vtanh.f32 %v12462_v56 }
 0x4a7   :  { %10513 = vrcp.f32 %v1685_v47  ;;  %v16153_v47 = vld [vmem:[#allocation17_spill] sm:$0xff] }
 0x4ae   :  { %v10508_v17 = vpop.eup %10507 }
 0x4af   :  { %v10510_v40 = vpop.eup %10509  ;;  %v1689_v1 = vmul.f32 %v10508_v17, %v10506_v7  ;;  %v16149_v7 = vld [vmem:[#allocation13_spill] sm:$0xff]  ;;  %v16150_v17 = vld [vmem:[#allocation14_spill] sm:$0xff] }
 0x4b0   :  { %v1688_v2 = vmul.f32 %v10510_v40, %v12354_v27  ;;  %v10512_v36 = vpop.eup %10511  ;;  %v16140_v27 = vld [vmem:[#allocation4_spill] sm:$0xff]  ;;  %v16151_v40 = vld [vmem:[#allocation15_spill] sm:$0xff] }
 0x4b1   :  { %v10514_v3 = vpop.eup %10513 }
 0x4b2   :  { %v12468_v16 = vadd.f32 %v1689_v1, %v1688_v2  ;;  %v16152_v1 = vld [vmem:[#allocation16_spill] sm:$0xff]  ;;  %v16154_v2 = vld [vmem:[#allocation18_spill] sm:$0xff] }
 0x4b4   :  { %10515 = vtanh.f32 %v12468_v16 }
 0x4b5   :  { %10517 = vrcp.f32 %v1511_v9  ;;  %v16155_v9 = vld [vmem:[#allocation19_spill] sm:$0xff] }
 0x4be   :  { %v10516_v33 = vpop.eup %10515 }
 0x4bf   :  { %v10518_v24 = vpop.eup %10517  ;;  %v1692_v51 = vmul.f32 %v10516_v33, %v10514_v3  ;;  %v16157_v3 = vld [vmem:[#allocation21_spill] sm:$0xff]  ;;  %v16158_v33 = vld [vmem:[#allocation22_spill] sm:$0xff] }
 0x4c0   :  { %v1518_v25 = vmul.f32 %v10518_v24, %v10512_v36  ;;  %v16156_v36 = vld [vmem:[#allocation20_spill] sm:$0xff]  ;;  %v16159_v24 = vld [vmem:[#allocation23_spill] sm:$0xff] }
 0x4c1   :  { %1757 = vmatprep.mubr.f32.mxu0 %v1692_v51  ;;  %1828 = vmatprep.mubr.f32.mxu1 %v1692_v51 }
 0x4c2   :  { %1758 = vmatmul.mubr.f32.vlgmr.msra.gmra.mrb[14].mxu0 %v1518_v25  ;;  %1829 = vmatmul.mubr.f32.vlgmr.msra.gmra.mrb[22].mxu1 %v1518_v25  ;;  %v16161_v25 = vld [vmem:[#allocation25_spill] sm:$0xff] }
 0x4c3   :  { %7553 = vmatpush1.bf16.msra.mxu0 %v11027_v13  ;;  %7585 = vmatpush1.bf16.msra.mxu1 %v11369_v53 }
 0x4c4   :  { %7555 = vmatprep.subr.bf16.mxu0 %v11049_v22  ;;  %7587 = vmatprep.subr.bf16.mxu1 %v11372_v54 }
 0x4c5   :  { %1923 = vmatprep.mubr.f32.mxu0 %v15949_v58  ;;  %1994 = vmatprep.mubr.f32.mxu1 %v15949_v58 }
 0x4c7   :  { %7557 = vmatpush1.bf16.msra.mxu0 %v11060_v26  ;;  %7589 = vmatpush1.bf16.msra.mxu1 %v11388_v61 }
 0x4c8   :  { %7559 = vmatprep.subr.bf16.mxu0 %v11081_v35  ;;  %7591 = vmatprep.subr.bf16.mxu1 %v11392_v62 }
 0x4cb   :  { %7561 = vmatpush1.bf16.msra.mxu0 %v11093_v39  ;;  %7593 = vmatpush1.bf16.msra.mxu1 %v11408_v4 }
 0x4cc   :  { %7563 = vmatprep.subr.bf16.mxu0 %v11105_v44  ;;  %7595 = vmatprep.subr.bf16.mxu1 %v11412_v5 }
 0x4cf   :  { %7565 = vmatpush1.bf16.msra.mxu0 %v11126_v52  ;;  %7597 = vmatpush1.bf16.msra.mxu1 %v11427_v11 }
 0x4d0   :  { %7567 = vmatprep.subr.bf16.mxu0 %v11138_v57  ;;  %7599 = vmatprep.subr.bf16.mxu1 %v11430_v12 }
 0x4d3   :  { %7569 = vmatpush1.bf16.msra.mxu0 %v11156_v0  ;;  %7601 = vmatpush1.bf16.msra.mxu1 %v11445_v19 }
 0x4d4   :  { %7571 = vmatprep.subr.bf16.mxu0 %v11168_v6  ;;  %7603 = vmatprep.subr.bf16.mxu1 %v11448_v21 }
 0x4d7   :  { %7573 = vmatpush1.bf16.msra.mxu0 %v11186_v15  ;;  %7605 = vmatpush1.bf16.msra.mxu1 %v11463_v28 }
 0x4d8   :  { %7575 = vmatprep.subr.bf16.mxu0 %v11198_v20  ;;  %7607 = vmatprep.subr.bf16.mxu1 %v11466_v30 }
 0x4db   :  { %7577 = vmatpush1.bf16.msra.mxu0 %v11216_v29  ;;  %7609 = vmatpush1.bf16.msra.mxu1 %v11481_v37 }
 0x4dc   :  { %7579 = vmatprep.subr.bf16.mxu0 %v11228_v34  ;;  %7611 = vmatprep.subr.bf16.mxu1 %v11484_v38 }
 0x4df   :  { %7581 = vmatpush1.bf16.msra.mxu0 %v11240_v41  ;;  %7613 = vmatpush1.bf16.msra.mxu1 %v11493_v43 }
 0x4e0   :  { %7615 = vmatprep.subr.bf16.mxu0 %v11507_v50  ;;  %7679 = vmatprep.subr.bf16.mxu1 %v11518_v59 }
 0x4e2   :  { %1924 = vmatmul.mubr.f32.vlgmr.msra.gmra.mrb[16].mxu0 %v1692_v51  ;;  %1995 = vmatmul.mubr.f32.vlgmr.msra.gmra.mrb[24].mxu1 %v1692_v51  ;;  %v16160_v51 = vld [vmem:[#allocation24_spill] sm:$0xff] }
 0x4e3   :  { %7617 = vmatpush1.bf16.msra.mxu0 %v11520_v60  ;;  %7681 = vmatpush1.bf16.msra.mxu1 %v11529_v48 }
 0x4e4   :  { %7619 = vmatprep.subr.bf16.mxu0 %v11546_v10  ;;  %7683 = vmatprep.subr.bf16.mxu1 %v11548_v14 }
 0x4e7   :  { %7621 = vmatpush1.bf16.msra.mxu0 %v11559_v23  ;;  %7685 = vmatpush1.bf16.msra.mxu1 %v11572_v31 }
 0x4e8   :  { %7623 = vmatprep.subr.bf16.mxu0 %v16140_v27  ;;  %7687 = vmatprep.subr.bf16.mxu1 %v16141_v63 }
 0x4eb   :  { %7625 = vmatpush1.bf16.msra.mxu0 %v16142_v42  ;;  %7689 = vmatpush1.bf16.msra.mxu1 %v16143_v45 }
 0x4ec   :  { %7627 = vmatprep.subr.bf16.mxu0 %v16144_v55  ;;  %7691 = vmatprep.subr.bf16.mxu1 %v16145_v18 }
 0x4ef   :  { %7629 = vmatpush1.bf16.msra.mxu0 %v16146_v49  ;;  %7693 = vmatpush1.bf16.msra.mxu1 %v16147_v8 }
 0x4f0   :  { %7631 = vmatprep.subr.bf16.mxu0 %v16148_v46  ;;  %7695 = vmatprep.subr.bf16.mxu1 %v16149_v7  ;;  %v16199_v46 = vld [vmem:[#allocation73_spill] sm:$0xff] }
 0x4f3   :  { %7633 = vmatpush1.bf16.msra.mxu0 %v16150_v17  ;;  %7697 = vmatpush1.bf16.msra.mxu1 %v16151_v40  ;;  %v16162_v40 = vld [vmem:[#allocation26_spill] sm:$0xff]  ;;  %v16198_v17 = vld [vmem:[#allocation72_spill] sm:$0xff] }
 0x4f4   :  { %7635 = vmatprep.subr.bf16.mxu0 %v16152_v1  ;;  %7699 = vmatprep.subr.bf16.mxu1 %v16153_v47  ;;  %v16163_v1 = vld [vmem:[#allocation27_spill] sm:$0xff]  ;;  %v16164_v47 = vld [vmem:[#allocation28_spill] sm:$0xff] }
 0x4f7   :  { %7637 = vmatpush1.bf16.msra.mxu0 %v16154_v2  ;;  %7701 = vmatpush1.bf16.msra.mxu1 %v16155_v9  ;;  %v16165_v2 = vld [vmem:[#allocation29_spill] sm:$0xff]  ;;  %v16166_v9 = vld [vmem:[#allocation30_spill] sm:$0xff] }
 0x4f8   :  { %7639 = vmatprep.subr.bf16.mxu0 %v16156_v36  ;;  %7703 = vmatprep.subr.bf16.mxu1 %v16157_v3  ;;  %v16167_v36 = vld [vmem:[#allocation31_spill] sm:$0xff]  ;;  %v16168_v3 = vld [vmem:[#allocation32_spill] sm:$0xff] }
 0x4fb   :  { %7641 = vmatpush1.bf16.msra.mxu0 %v16158_v33  ;;  %7705 = vmatpush1.bf16.msra.mxu1 %v16159_v24  ;;  %v16169_v33 = vld [vmem:[#allocation33_spill] sm:$0xff]  ;;  %v16170_v24 = vld [vmem:[#allocation34_spill] sm:$0xff] }
 0x4fc   :  { %7643 = vmatprep.subr.bf16.mxu0 %v16160_v51  ;;  %7707 = vmatprep.subr.bf16.mxu1 %v16161_v25  ;;  %v16171_v51 = vld [vmem:[#allocation35_spill] sm:$0xff]  ;;  %v16172_v25 = vld [vmem:[#allocation36_spill] sm:$0xff] }
 0x4ff   :  { %7645 = vmatpush1.bf16.msra.mxu0 %v16162_v40  ;;  %7709 = vmatpush1.bf16.msra.mxu1 %v16163_v1  ;;  %v16173_v40 = vld [vmem:[#allocation37_spill] sm:$0xff]  ;;  %v16174_v1 = vld [vmem:[#allocation38_spill] sm:$0xff] }
 0x500   :  { %7647 = vmatprep.subr.bf16.mxu0 %v16164_v47  ;;  %7711 = vmatprep.subr.bf16.mxu1 %v16165_v2  ;;  %v16175_v47 = vld [vmem:[#allocation39_spill] sm:$0xff]  ;;  %v16176_v2 = vld [vmem:[#allocation40_spill] sm:$0xff] }
 0x503   :  { %7649 = vmatpush1.bf16.msra.mxu0 %v16166_v9  ;;  %7713 = vmatpush1.bf16.msra.mxu1 %v16167_v36  ;;  %v16177_v9 = vld [vmem:[#allocation41_spill] sm:$0xff]  ;;  %v16178_v36 = vld [vmem:[#allocation42_spill] sm:$0xff] }
 0x504   :  { %7651 = vmatprep.subr.bf16.mxu0 %v16168_v3  ;;  %7715 = vmatprep.subr.bf16.mxu1 %v16169_v33  ;;  %v16179_v3 = vld [vmem:[#allocation43_spill] sm:$0xff]  ;;  %v16180_v33 = vld [vmem:[#allocation44_spill] sm:$0xff] }
 0x507   :  { %7653 = vmatpush1.bf16.msra.mxu0 %v16170_v24  ;;  %7717 = vmatpush1.bf16.msra.mxu1 %v16171_v51  ;;  %v16181_v24 = vld [vmem:[#allocation45_spill] sm:$0xff]  ;;  %v16182_v51 = vld [vmem:[#allocation46_spill] sm:$0xff] }
 0x508   :  { %7655 = vmatprep.subr.bf16.mxu0 %v16172_v25  ;;  %7719 = vmatprep.subr.bf16.mxu1 %v16173_v40  ;;  %v16183_v25 = vld [vmem:[#allocation47_spill] sm:$0xff]  ;;  %v16184_v40 = vld [vmem:[#allocation48_spill] sm:$0xff] }
 0x50b   :  { %7657 = vmatpush1.bf16.msra.mxu0 %v16174_v1  ;;  %7721 = vmatpush1.bf16.msra.mxu1 %v16175_v47  ;;  %v16185_v1 = vld [vmem:[#allocation49_spill] sm:$0xff]  ;;  %v16186_v47 = vld [vmem:[#allocation50_spill] sm:$0xff] }
 0x50c   :  { %7659 = vmatprep.subr.bf16.mxu0 %v16176_v2  ;;  %7723 = vmatprep.subr.bf16.mxu1 %v16177_v9  ;;  %v16187_v2 = vld [vmem:[#allocation51_spill] sm:$0xff]  ;;  %v16188_v9 = vld [vmem:[#allocation52_spill] sm:$0xff] }
 0x50f   :  { %7661 = vmatpush1.bf16.msra.mxu0 %v16178_v36  ;;  %7725 = vmatpush1.bf16.msra.mxu1 %v16179_v3  ;;  %v16189_v36 = vld [vmem:[#allocation53_spill] sm:$0xff]  ;;  %v16190_v3 = vld [vmem:[#allocation54_spill] sm:$0xff] }
 0x510   :  { %7663 = vmatprep.subr.bf16.mxu0 %v16180_v33  ;;  %7727 = vmatprep.subr.bf16.mxu1 %v16181_v24  ;;  %v16191_v33 = vld [vmem:[#allocation55_spill] sm:$0xff]  ;;  %v16192_v24 = vld [vmem:[#allocation56_spill] sm:$0xff] }
 0x513   :  { %7665 = vmatpush1.bf16.msra.mxu0 %v16182_v51  ;;  %7729 = vmatpush1.bf16.msra.mxu1 %v16183_v25  ;;  %v16193_v51 = vld [vmem:[#allocation57_spill] sm:$0xff]  ;;  %v16194_v25 = vld [vmem:[#allocation58_spill] sm:$0xff] }
 0x514   :  { %7667 = vmatprep.subr.bf16.mxu0 %v16184_v40  ;;  %7731 = vmatprep.subr.bf16.mxu1 %v16185_v1  ;;  %v16195_v40 = vld [vmem:[#allocation59_spill] sm:$0xff]  ;;  %v16196_v1 = vld [vmem:[#allocation2_spill] sm:$0xff] }
 0x517   :  { %7669 = vmatpush1.bf16.msra.mxu0 %v16186_v47  ;;  %7733 = vmatpush1.bf16.msra.mxu1 %v16187_v2  ;;  %v16197_v47 = vld [vmem:[#allocation3_spill] sm:$0xff] }
 0x518   :  { %7671 = vmatprep.subr.bf16.mxu0 %v16188_v9  ;;  %7735 = vmatprep.subr.bf16.mxu1 %v16189_v36 }
 0x51b   :  { %7673 = vmatpush1.bf16.msra.mxu0 %v16190_v3  ;;  %7737 = vmatpush1.bf16.msra.mxu1 %v16191_v33 }
 0x51c   :  { %7675 = vmatprep.subr.bf16.mxu0 %v16192_v24  ;;  %7739 = vmatprep.subr.bf16.mxu1 %v16193_v51  ;;  %v16200_v51 = vld [vmem:[#allocation74_spill] sm:$0xff] }
 0x51f   :  { %7677 = vmatpush1.bf16.msra.mxu0 %v16194_v25  ;;  %7741 = vmatpush1.bf16.msra.mxu1 %v16195_v40 }
 0x520   :  { %7743 = vmatprep.subr.bf16.mxu0 %v16196_v1  ;;  %7775 = vmatprep.subr.bf16.mxu1 %v16197_v47 }
 0x595   :  { %v1759_v2 = vpop.f32.mrb[14].mxu0  ;;  %v1830_v9 = vpop.f32.mrb[22].mxu1 }
 0x596   :  { %v1760_v36 = vadd.f32 %v1759_v2, %v16198_v17  ;;  %v1761_v7 = vpop.f32.mrb[15].mxu0  ;;  %v1832_v3 = vpop.f32.mrb[23].mxu1  ;;  %v1831_v25 = vadd.f32 %v1830_v9, %v16200_v51 }
 0x597   :  { %v1762_v33 = vadd.f32 %v1761_v7, %v16199_v46  ;;  %v16202_v46 = vld [vmem:[#allocation65_spill] sm:$0xff] }
 0x598   :  { %v6643_v8 = vmul.f32 -1.442695, %v1760_v36 }
 0x599   :  { %v6644_v24 = vmul.f32 -1.442695, %v1762_v33  ;;  %v16201_v33 = vld [vmem:[#allocation64_spill] sm:$0xff] }
 0x59a   :  { %10519 = vpow2.f32 %v6643_v8 }
 0x59b   :  { %10521 = vpow2.f32 %v6644_v24 }
 0x59c   :  { %10523 = vtanh.f32 %v1831_v25 }
 0x5a4   :  { %v10520_v49 = vpop.eup %10519 }
 0x5a5   :  { %v10522_v40 = vpop.eup %10521  ;;  %v1838_v18 = vadd.f32 1.0, %v10520_v49 }
 0x5a6   :  { %v1844_v1 = vadd.f32 1.0, %v10522_v40  ;;  %v10524_v47 = vpop.eup %10523 }
 0x5a7   :  { %10525 = vrcp.f32 %v1838_v18  ;;  %v1833_v18 = vadd.f32 %v1832_v3, %v12236_v32 }
 0x5a8   :  { %10527 = vrcp.f32 %v1844_v1  ;;  %v16203_v1 = vld [vmem:[#allocation69_spill] sm:$0xff] }
 0x5b1   :  { %v10526_v55 = vpop.eup %10525 }
 0x5b2   :  { %v10528_v2 = vpop.eup %10527  ;;  %v1855_v17 = vmul.f32 %v10526_v55, %v10524_v47  ;;  %v6645_v47 = vmul.f32 -1.442695, %v1833_v18 }
 0x5b3   :  { %v1854_v45 = vmul.f32 %v10528_v2, %v12462_v56 }
 0x5b5   :  { %v12574_v7 = vadd.f32 %v1855_v17, %v1854_v45  ;;  %v1925_v36 = vpop.f32.mrb[16].mxu0  ;;  %v1996_v8 = vpop.f32.mrb[24].mxu1  ;;  %v16204_v45 = vld [vmem:[#allocation68_spill] sm:$0xff] }
 0x5b6   :  { %v1926_v24 = vadd.f32 %v1925_v36, %v16201_v33  ;;  %v1927_v9 = vpop.f32.mrb[17].mxu0  ;;  %v1998_v51 = vpop.f32.mrb[25].mxu1  ;;  %v1997_v17 = vadd.f32 %v1996_v8, %v16204_v45 }
 0x5b7   :  { %v1928_v49 = vadd.f32 %v1927_v9, %v16202_v46  ;;  %v1999_v55 = vadd.f32 %v1998_v51, %v16203_v1 }
 0x5b8   :  { %v6646_v25 = vmul.f32 -1.442695, %v1926_v24 }
 0x5b9   :  { %v6647_v40 = vmul.f32 -1.442695, %v1928_v49  ;;  %v6648_v56 = vmul.f32 -1.442695, %v1999_v55 }
 0x5ba   :  { %10529 = vpow2.f32 %v6646_v25 }
 0x5bb   :  { %10531 = vpow2.f32 %v6647_v40 }
 0x5bc   :  { %10533 = vpow2.f32 %v6645_v47 }
 0x5bd   :  { %10535 = vpow2.f32 %v6648_v56 }
 0x5be   :  { %10537 = vtanh.f32 %v1997_v17 }
 0x5c4   :  { %v10530_v2 = vpop.eup %10529 }
 0x5c5   :  { %v10532_v42 = vpop.eup %10531  ;;  %v2004_v36 = vadd.f32 1.0, %v10530_v2 }
 0x5c6   :  { %v2010_v33 = vadd.f32 1.0, %v10532_v42  ;;  %v10534_v24 = vpop.eup %10533 }
 0x5c7   :  { %10539 = vrcp.f32 %v2004_v36  ;;  %v10536_v9 = vpop.eup %10535  ;;  %v1851_v55 = vadd.f32 1.0, %v10534_v24  ;;  %v16206_v36 = vld [vmem:[#allocation7_spill] sm:$0xff]  ;;  %v16207_v24 = vld [vmem:[#allocation8_spill] sm:$0xff] }
 0x5c8   :  { %10541 = vrcp.f32 %v2010_v33  ;;  %v10538_v49 = vpop.eup %10537  ;;  %v2017_v51 = vadd.f32 1.0, %v10536_v9  ;;  %v16208_v9 = vld [vmem:[#allocation9_spill] sm:$0xff] }
 0x5c9   :  { %10543 = vtanh.f32 %v12574_v7 }
 0x5ca   :  { %10545 = vrcp.f32 %v2017_v51  ;;  %v16213_v51 = vld [vmem:[#allocation14_spill] sm:$0xff] }
 0x5d1   :  { %v10540_v25 = vpop.eup %10539 }
 0x5d2   :  { %v10542_v3 = vpop.eup %10541  ;;  %v2021_v40 = vmul.f32 %v10540_v25, %v10538_v49  ;;  %v16209_v49 = vld [vmem:[#allocation10_spill] sm:$0xff]  ;;  %v16210_v25 = vld [vmem:[#allocation11_spill] sm:$0xff] }
 0x5d3   :  { %v2020_v18 = vmul.f32 %v10542_v3, %v12468_v16  ;;  %v10544_v42 = vpop.eup %10543  ;;  %v16205_v16 = vld [vmem:[#allocation6_spill] sm:$0xff]  ;;  %v16211_v3 = vld [vmem:[#allocation12_spill] sm:$0xff] }
 0x5d4   :  { %v10546_v33 = vpop.eup %10545 }
 0x5d5   :  { %v12582_v8 = vadd.f32 %v2021_v40, %v2020_v18  ;;  %v16212_v40 = vld [vmem:[#allocation13_spill] sm:$0xff]  ;;  %v16214_v18 = vld [vmem:[#allocation15_spill] sm:$0xff] }
 0x5d7   :  { %10547 = vtanh.f32 %v12582_v8 }
 0x5d8   :  { %10549 = vrcp.f32 %v1851_v55  ;;  %v16215_v55 = vld [vmem:[#allocation16_spill] sm:$0xff] }
 0x5e1   :  { %v10548_v47 = vpop.eup %10547 }
 0x5e2   :  { %v10550_v56 = vpop.eup %10549  ;;  %v2024_v17 = vmul.f32 %v10548_v47, %v10546_v33  ;;  %v16217_v33 = vld [vmem:[#allocation18_spill] sm:$0xff]  ;;  %v16218_v47 = vld [vmem:[#allocation19_spill] sm:$0xff] }
 0x5e3   :  { %v1858_v2 = vmul.f32 %v10550_v56, %v10544_v42  ;;  %v16216_v42 = vld [vmem:[#allocation17_spill] sm:$0xff]  ;;  %v16219_v56 = vld [vmem:[#allocation20_spill] sm:$0xff] }
 0x5e4   :  { %2089 = vmatprep.mubr.f32.mxu0 %v2024_v17  ;;  %2160 = vmatprep.mubr.f32.mxu1 %v2024_v17 }
 0x5e5   :  { %2090 = vmatmul.mubr.f32.vlgmr.msra.gmra.mrb[18].mxu0 %v1858_v2  ;;  %2161 = vmatmul.mubr.f32.vlgmr.msra.gmra.mrb[26].mxu1 %v1858_v2  ;;  %v16221_v2 = vld [vmem:[#allocation22_spill] sm:$0xff] }
 0x5e6   :  { %7745 = vmatpush1.bf16.msra.mxu0 %v11027_v13  ;;  %7777 = vmatpush1.bf16.msra.mxu1 %v11369_v53 }
 0x5e7   :  { %7747 = vmatprep.subr.bf16.mxu0 %v11049_v22  ;;  %7779 = vmatprep.subr.bf16.mxu1 %v11372_v54 }
 0x5e8   :  { %2267 = vmatprep.mubr.f32.mxu0 %v15949_v58  ;;  %2338 = vmatprep.mubr.f32.mxu1 %v15949_v58 }
 0x5ea   :  { %7749 = vmatpush1.bf16.msra.mxu0 %v11060_v26  ;;  %7781 = vmatpush1.bf16.msra.mxu1 %v11388_v61 }
 0x5eb   :  { %7751 = vmatprep.subr.bf16.mxu0 %v11081_v35  ;;  %7783 = vmatprep.subr.bf16.mxu1 %v11392_v62 }
 0x5ee   :  { %7753 = vmatpush1.bf16.msra.mxu0 %v11093_v39  ;;  %7785 = vmatpush1.bf16.msra.mxu1 %v11408_v4 }
 0x5ef   :  { %7755 = vmatprep.subr.bf16.mxu0 %v11105_v44  ;;  %7787 = vmatprep.subr.bf16.mxu1 %v11412_v5 }
 0x5f2   :  { %7757 = vmatpush1.bf16.msra.mxu0 %v11126_v52  ;;  %7789 = vmatpush1.bf16.msra.mxu1 %v11427_v11 }
 0x5f3   :  { %7759 = vmatprep.subr.bf16.mxu0 %v11138_v57  ;;  %7791 = vmatprep.subr.bf16.mxu1 %v11430_v12 }
 0x5f6   :  { %7761 = vmatpush1.bf16.msra.mxu0 %v11156_v0  ;;  %7793 = vmatpush1.bf16.msra.mxu1 %v11445_v19 }
 0x5f7   :  { %7763 = vmatprep.subr.bf16.mxu0 %v11168_v6  ;;  %7795 = vmatprep.subr.bf16.mxu1 %v11448_v21 }
 0x5fa   :  { %7765 = vmatpush1.bf16.msra.mxu0 %v11186_v15  ;;  %7797 = vmatpush1.bf16.msra.mxu1 %v11463_v28 }
 0x5fb   :  { %7767 = vmatprep.subr.bf16.mxu0 %v11198_v20  ;;  %7799 = vmatprep.subr.bf16.mxu1 %v11466_v30 }
 0x5fe   :  { %7769 = vmatpush1.bf16.msra.mxu0 %v11216_v29  ;;  %7801 = vmatpush1.bf16.msra.mxu1 %v11481_v37 }
 0x5ff   :  { %7771 = vmatprep.subr.bf16.mxu0 %v11228_v34  ;;  %7803 = vmatprep.subr.bf16.mxu1 %v11484_v38 }
 0x602   :  { %7773 = vmatpush1.bf16.msra.mxu0 %v11240_v41  ;;  %7805 = vmatpush1.bf16.msra.mxu1 %v11493_v43 }
 0x603   :  { %7807 = vmatprep.subr.bf16.mxu0 %v11507_v50  ;;  %7871 = vmatprep.subr.bf16.mxu1 %v11518_v59 }
 0x605   :  { %2268 = vmatmul.mubr.f32.vlgmr.msra.gmra.mrb[20].mxu0 %v2024_v17  ;;  %2339 = vmatmul.mubr.f32.vlgmr.msra.gmra.mrb[28].mxu1 %v2024_v17  ;;  %v16220_v17 = vld [vmem:[#allocation21_spill] sm:$0xff] }
 0x606   :  { %7809 = vmatpush1.bf16.msra.mxu0 %v11520_v60  ;;  %7873 = vmatpush1.bf16.msra.mxu1 %v11529_v48 }
 0x607   :  { %7811 = vmatprep.subr.bf16.mxu0 %v11546_v10  ;;  %7875 = vmatprep.subr.bf16.mxu1 %v11548_v14 }
 0x60a   :  { %7813 = vmatpush1.bf16.msra.mxu0 %v11559_v23  ;;  %7877 = vmatpush1.bf16.msra.mxu1 %v11572_v31 }
 0x60b   :  { %7815 = vmatprep.subr.bf16.mxu0 %v16140_v27  ;;  %7879 = vmatprep.subr.bf16.mxu1 %v16141_v63 }
 0x60e   :  { %7817 = vmatpush1.bf16.msra.mxu0 %v16205_v16  ;;  %7881 = vmatpush1.bf16.msra.mxu1 %v16206_v36 }
 0x60f   :  { %7819 = vmatprep.subr.bf16.mxu0 %v16207_v24  ;;  %7883 = vmatprep.subr.bf16.mxu1 %v16208_v9  ;;  %v16262_v9 = vld [vmem:[#allocation73_spill] sm:$0xff] }
 0x612   :  { %7821 = vmatpush1.bf16.msra.mxu0 %v16209_v49  ;;  %7885 = vmatpush1.bf16.msra.mxu1 %v16210_v25  ;;  %v16261_v25 = vld [vmem:[#allocation72_spill] sm:$0xff] }
 0x613   :  { %7823 = vmatprep.subr.bf16.mxu0 %v16211_v3  ;;  %7887 = vmatprep.subr.bf16.mxu1 %v16212_v40  ;;  %v16222_v3 = vld [vmem:[#allocation23_spill] sm:$0xff]  ;;  %v16223_v40 = vld [vmem:[#allocation24_spill] sm:$0xff] }
 0x616   :  { %7825 = vmatpush1.bf16.msra.mxu0 %v16213_v51  ;;  %7889 = vmatpush1.bf16.msra.mxu1 %v16214_v18  ;;  %v16224_v51 = vld [vmem:[#allocation25_spill] sm:$0xff]  ;;  %v16225_v18 = vld [vmem:[#allocation26_spill] sm:$0xff] }
 0x617   :  { %7827 = vmatprep.subr.bf16.mxu0 %v16215_v55  ;;  %7891 = vmatprep.subr.bf16.mxu1 %v16216_v42  ;;  %v16226_v55 = vld [vmem:[#allocation27_spill] sm:$0xff]  ;;  %v16227_v42 = vld [vmem:[#allocation28_spill] sm:$0xff] }
 0x61a   :  { %7829 = vmatpush1.bf16.msra.mxu0 %v16217_v33  ;;  %7893 = vmatpush1.bf16.msra.mxu1 %v16218_v47  ;;  %v16228_v33 = vld [vmem:[#allocation29_spill] sm:$0xff]  ;;  %v16229_v47 = vld [vmem:[#allocation30_spill] sm:$0xff] }
 0x61b   :  { %7831 = vmatprep.subr.bf16.mxu0 %v16219_v56  ;;  %7895 = vmatprep.subr.bf16.mxu1 %v16220_v17  ;;  %v16230_v56 = vld [vmem:[#allocation31_spill] sm:$0xff]  ;;  %v16231_v17 = vld [vmem:[#allocation32_spill] sm:$0xff] }
 0x61e   :  { %7833 = vmatpush1.bf16.msra.mxu0 %v16221_v2  ;;  %7897 = vmatpush1.bf16.msra.mxu1 %v16222_v3  ;;  %v16232_v2 = vld [vmem:[#allocation33_spill] sm:$0xff]  ;;  %v16233_v3 = vld [vmem:[#allocation34_spill] sm:$0xff] }
 0x61f   :  { %7835 = vmatprep.subr.bf16.mxu0 %v16223_v40  ;;  %7899 = vmatprep.subr.bf16.mxu1 %v16224_v51  ;;  %v16234_v40 = vld [vmem:[#allocation35_spill] sm:$0xff]  ;;  %v16235_v51 = vld [vmem:[#allocation36_spill] sm:$0xff] }
 0x622   :  { %7837 = vmatpush1.bf16.msra.mxu0 %v16225_v18  ;;  %7901 = vmatpush1.bf16.msra.mxu1 %v16226_v55  ;;  %v16236_v18 = vld [vmem:[#allocation37_spill] sm:$0xff]  ;;  %v16237_v55 = vld [vmem:[#allocation38_spill] sm:$0xff] }
 0x623   :  { %7839 = vmatprep.subr.bf16.mxu0 %v16227_v42  ;;  %7903 = vmatprep.subr.bf16.mxu1 %v16228_v33  ;;  %v16238_v42 = vld [vmem:[#allocation39_spill] sm:$0xff]  ;;  %v16239_v33 = vld [vmem:[#allocation40_spill] sm:$0xff] }
 0x626   :  { %7841 = vmatpush1.bf16.msra.mxu0 %v16229_v47  ;;  %7905 = vmatpush1.bf16.msra.mxu1 %v16230_v56  ;;  %v16240_v47 = vld [vmem:[#allocation41_spill] sm:$0xff]  ;;  %v16241_v56 = vld [vmem:[#allocation42_spill] sm:$0xff] }
 0x627   :  { %7843 = vmatprep.subr.bf16.mxu0 %v16231_v17  ;;  %7907 = vmatprep.subr.bf16.mxu1 %v16232_v2  ;;  %v16242_v17 = vld [vmem:[#allocation43_spill] sm:$0xff]  ;;  %v16243_v2 = vld [vmem:[#allocation44_spill] sm:$0xff] }
 0x62a   :  { %7845 = vmatpush1.bf16.msra.mxu0 %v16233_v3  ;;  %7909 = vmatpush1.bf16.msra.mxu1 %v16234_v40  ;;  %v16244_v3 = vld [vmem:[#allocation45_spill] sm:$0xff]  ;;  %v16245_v40 = vld [vmem:[#allocation46_spill] sm:$0xff] }
 0x62b   :  { %7847 = vmatprep.subr.bf16.mxu0 %v16235_v51  ;;  %7911 = vmatprep.subr.bf16.mxu1 %v16236_v18  ;;  %v16246_v51 = vld [vmem:[#allocation47_spill] sm:$0xff]  ;;  %v16247_v18 = vld [vmem:[#allocation48_spill] sm:$0xff] }
 0x62e   :  { %7849 = vmatpush1.bf16.msra.mxu0 %v16237_v55  ;;  %7913 = vmatpush1.bf16.msra.mxu1 %v16238_v42  ;;  %v16248_v55 = vld [vmem:[#allocation49_spill] sm:$0xff]  ;;  %v16249_v42 = vld [vmem:[#allocation50_spill] sm:$0xff] }
 0x62f   :  { %7851 = vmatprep.subr.bf16.mxu0 %v16239_v33  ;;  %7915 = vmatprep.subr.bf16.mxu1 %v16240_v47  ;;  %v16250_v33 = vld [vmem:[#allocation51_spill] sm:$0xff]  ;;  %v16251_v47 = vld [vmem:[#allocation52_spill] sm:$0xff] }
 0x632   :  { %7853 = vmatpush1.bf16.msra.mxu0 %v16241_v56  ;;  %7917 = vmatpush1.bf16.msra.mxu1 %v16242_v17  ;;  %v16252_v56 = vld [vmem:[#allocation53_spill] sm:$0xff]  ;;  %v16253_v17 = vld [vmem:[#allocation54_spill] sm:$0xff] }
 0x633   :  { %7855 = vmatprep.subr.bf16.mxu0 %v16243_v2  ;;  %7919 = vmatprep.subr.bf16.mxu1 %v16244_v3  ;;  %v16254_v2 = vld [vmem:[#allocation55_spill] sm:$0xff]  ;;  %v16255_v3 = vld [vmem:[#allocation56_spill] sm:$0xff] }
 0x636   :  { %7857 = vmatpush1.bf16.msra.mxu0 %v16245_v40  ;;  %7921 = vmatpush1.bf16.msra.mxu1 %v16246_v51  ;;  %v16256_v40 = vld [vmem:[#allocation57_spill] sm:$0xff]  ;;  %v16257_v51 = vld [vmem:[#allocation58_spill] sm:$0xff] }
 0x637   :  { %7859 = vmatprep.subr.bf16.mxu0 %v16247_v18  ;;  %7923 = vmatprep.subr.bf16.mxu1 %v16248_v55  ;;  %v16258_v18 = vld [vmem:[#allocation59_spill] sm:$0xff]  ;;  %v16259_v55 = vld [vmem:[#allocation2_spill] sm:$0xff] }
 0x63a   :  { %7861 = vmatpush1.bf16.msra.mxu0 %v16249_v42  ;;  %7925 = vmatpush1.bf16.msra.mxu1 %v16250_v33  ;;  %v16260_v42 = vld [vmem:[#allocation3_spill] sm:$0xff] }
 0x63b   :  { %7863 = vmatprep.subr.bf16.mxu0 %v16251_v47  ;;  %7927 = vmatprep.subr.bf16.mxu1 %v16252_v56 }
 0x63e   :  { %7865 = vmatpush1.bf16.msra.mxu0 %v16253_v17  ;;  %7929 = vmatpush1.bf16.msra.mxu1 %v16254_v2 }
 0x63f   :  { %7867 = vmatprep.subr.bf16.mxu0 %v16255_v3  ;;  %7931 = vmatprep.subr.bf16.mxu1 %v16256_v40  ;;  %v16263_v40 = vld [vmem:[#allocation74_spill] sm:$0xff] }
 0x642   :  { %7869 = vmatpush1.bf16.msra.mxu0 %v16257_v51  ;;  %7933 = vmatpush1.bf16.msra.mxu1 %v16258_v18 }
 0x643   :  { %7935 = vmatprep.subr.bf16.mxu0 %v16259_v55  ;;  %7967 = vmatprep.subr.bf16.mxu1 %v16260_v42 }
 0x6b8   :  { %v2091_v33 = vpop.f32.mrb[18].mxu0  ;;  %v2162_v47 = vpop.f32.mrb[26].mxu1 }
 0x6b9   :  { %v2092_v56 = vadd.f32 %v2091_v33, %v16261_v25  ;;  %v2093_v49 = vpop.f32.mrb[19].mxu0  ;;  %v2164_v17 = vpop.f32.mrb[27].mxu1  ;;  %v2163_v51 = vadd.f32 %v2162_v47, %v16263_v40  ;;  %v2196_v47 = vrot.slane %v16202_v46, 2 }
 0x6ba   :  { %v2094_v2 = vadd.f32 %v2093_v49, %v16262_v9  ;;  %v16264_v49 = vld [vmem:[#allocation64_spill] sm:$0xff] }
 0x6bb   :  { %v6649_v24 = vmul.f32 -1.442695, %v2092_v56  ;;  %v2195_v56 = vrot.slane %v16264_v49, 2 }
 0x6bc   :  { %v6650_v3 = vmul.f32 -1.442695, %v2094_v2 }
 0x6bd   :  { %10551 = vpow2.f32 %v6649_v24 }
 0x6be   :  { %10553 = vpow2.f32 %v6650_v3 }
 0x6bf   :  { %10555 = vtanh.f32 %v2163_v51 }
 0x6c7   :  { %v10552_v36 = vpop.eup %10551 }
 0x6c8   :  { %v10554_v18 = vpop.eup %10553  ;;  %v2170_v16 = vadd.f32 1.0, %v10552_v36 }
 0x6c9   :  { %v2176_v55 = vadd.f32 1.0, %v10554_v18  ;;  %v10556_v42 = vpop.eup %10555 }
 0x6ca   :  { %10557 = vrcp.f32 %v2170_v16 }
 0x6cb   :  { %10559 = vrcp.f32 %v2176_v55 }
 0x6d4   :  { %v10558_v63 = vpop.eup %10557 }
 0x6d5   :  { %v10560_v33 = vpop.eup %10559  ;;  %v2187_v25 = vmul.f32 %v10558_v63, %v10556_v42  ;;  %v2198_v63 = vrot.slane %v16203_v1, 2 }
 0x6d6   :  { %v2186_v27 = vmul.f32 %v10560_v33, %v12574_v7  ;;  %v2165_v7 = vadd.f32 %v2164_v17, %v12236_v32 }
 0x6d8   :  { %v12689_v2 = vadd.f32 %v2187_v25, %v2186_v27  ;;  %v2269_v24 = vpop.f32.mrb[20].mxu0  ;;  %v2340_v3 = vpop.f32.mrb[28].mxu1  ;;  %v6651_v33 = vmul.f32 -1.442695, %v2165_v7  ;;  %v2197_v27 = vrot.slane %v16204_v45, 2 }
 0x6d9   :  { %v2270_v40 = vadd.f32 %v2269_v24, %v2195_v56  ;;  %v2271_v36 = vpop.f32.mrb[21].mxu0  ;;  %v2342_v51 = vpop.f32.mrb[29].mxu1 }
 0x6da   :  { %v2272_v18 = vadd.f32 %v2271_v36, %v2196_v47  ;;  %v2343_v42 = vadd.f32 %v2342_v51, %v2198_v63  ;;  %v2341_v49 = vadd.f32 %v2340_v3, %v2197_v27 }
 0x6db   :  { %v6652_v16 = vmul.f32 -1.442695, %v2270_v40 }
 0x6dc   :  { %v6653_v55 = vmul.f32 -1.442695, %v2272_v18  ;;  %v6654_v25 = vmul.f32 -1.442695, %v2343_v42 }
 0x6dd   :  { %10561 = vpow2.f32 %v6652_v16 }
 0x6de   :  { %10563 = vpow2.f32 %v6653_v55 }
 0x6df   :  { %10565 = vpow2.f32 %v6651_v33 }
 0x6e0   :  { %10567 = vpow2.f32 %v6654_v25 }
 0x6e1   :  { %10569 = vtanh.f32 %v2341_v49 }
 0x6e7   :  { %v10562_v9 = vpop.eup %10561 }
 0x6e8   :  { %v10564_v56 = vpop.eup %10563  ;;  %v2348_v24 = vadd.f32 1.0, %v10562_v9 }
 0x6e9   :  { %v2354_v40 = vadd.f32 1.0, %v10564_v56  ;;  %v10566_v47 = vpop.eup %10565  ;;  %v16266_v56 = vld [vmem:[#allocation5_spill] sm:$0xff] }
 0x6ea   :  { %10571 = vrcp.f32 %v2348_v24  ;;  %v10568_v36 = vpop.eup %10567  ;;  %v2183_v7 = vadd.f32 1.0, %v10566_v47  ;;  %v16267_v24 = vld [vmem:[#allocation6_spill] sm:$0xff]  ;;  %v16269_v47 = vld [vmem:[#allocation8_spill] sm:$0xff] }
 0x6eb   :  { %10573 = vrcp.f32 %v2354_v40  ;;  %v10570_v18 = vpop.eup %10569  ;;  %v2361_v55 = vadd.f32 1.0, %v10568_v36  ;;  %v16268_v40 = vld [vmem:[#allocation7_spill] sm:$0xff]  ;;  %v16270_v36 = vld [vmem:[#allocation9_spill] sm:$0xff] }
 0x6ec   :  { %10575 = vtanh.f32 %v12689_v2 }
 0x6ed   :  { %10577 = vrcp.f32 %v2361_v55  ;;  %v16275_v55 = vld [vmem:[#allocation14_spill] sm:$0xff] }
 0x6f4   :  { %v10572_v16 = vpop.eup %10571 }
 0x6f5   :  { %v10574_v17 = vpop.eup %10573  ;;  %v2365_v51 = vmul.f32 %v10572_v16, %v10570_v18  ;;  %v16271_v18 = vld [vmem:[#allocation10_spill] sm:$0xff]  ;;  %v16272_v16 = vld [vmem:[#allocation11_spill] sm:$0xff] }
 0x6f6   :  { %v2364_v63 = vmul.f32 %v10574_v17, %v12582_v8  ;;  %v10576_v9 = vpop.eup %10575  ;;  %v16265_v8 = vld [vmem:[#allocation4_spill] sm:$0xff] }
 0x6f7   :  { %v10578_v49 = vpop.eup %10577  ;;  %v16273_v17 = vld [vmem:[#allocation12_spill] sm:$0xff] }
 0x6f8   :  { %v12696_v3 = vadd.f32 %v2365_v51, %v2364_v63  ;;  %v16274_v51 = vld [vmem:[#allocation13_spill] sm:$0xff]  ;;  %v16276_v63 = vld [vmem:[#allocation15_spill] sm:$0xff] }
 0x6fa   :  { %10579 = vtanh.f32 %v12696_v3 }
 0x6fb   :  { %10581 = vrcp.f32 %v2183_v7  ;;  %v16277_v7 = vld [vmem:[#allocation16_spill] sm:$0xff] }
 0x704   :  { %v10580_v42 = vpop.eup %10579 }
 0x705   :  { %v10582_v33 = vpop.eup %10581  ;;  %v2368_v27 = vmul.f32 %v10580_v42, %v10578_v49  ;;  %v16279_v49 = vld [vmem:[#allocation18_spill] sm:$0xff]  ;;  %v16280_v42 = vld [vmem:[#allocation19_spill] sm:$0xff] }
 0x706   :  { %v2190_v25 = vmul.f32 %v10582_v33, %v10576_v9  ;;  %v16278_v9 = vld [vmem:[#allocation17_spill] sm:$0xff]  ;;  %v16281_v33 = vld [vmem:[#allocation20_spill] sm:$0xff] }
 0x707   :  { %2433 = vmatprep.mubr.f32.mxu0 %v2368_v27  ;;  %2504 = vmatprep.mubr.f32.mxu1 %v2368_v27 }
 0x708   :  { %2434 = vmatmul.mubr.f32.vlgmr.msra.gmra.mrb[22].mxu0 %v2190_v25  ;;  %2505 = vmatmul.mubr.f32.vlgmr.msra.gmra.mrb[30].mxu1 %v2190_v25  ;;  %v16283_v25 = vld [vmem:[#allocation22_spill] sm:$0xff] }
 0x709   :  { %7937 = vmatpush1.bf16.msra.mxu0 %v11027_v13  ;;  %7969 = vmatpush1.bf16.msra.mxu1 %v11369_v53 }
 0x70a   :  { %7939 = vmatprep.subr.bf16.mxu0 %v11049_v22  ;;  %7971 = vmatprep.subr.bf16.mxu1 %v11372_v54 }
 0x70b   :  { %2607 = vmatprep.mubr.f32.mxu0 %v15949_v58  ;;  %2678 = vmatprep.mubr.f32.mxu1 %v15949_v58 }
 0x70d   :  { %7941 = vmatpush1.bf16.msra.mxu0 %v11060_v26  ;;  %7973 = vmatpush1.bf16.msra.mxu1 %v11388_v61 }
 0x70e   :  { %7943 = vmatprep.subr.bf16.mxu0 %v11081_v35  ;;  %7975 = vmatprep.subr.bf16.mxu1 %v11392_v62 }
 0x711   :  { %7945 = vmatpush1.bf16.msra.mxu0 %v11093_v39  ;;  %7977 = vmatpush1.bf16.msra.mxu1 %v11408_v4 }
 0x712   :  { %7947 = vmatprep.subr.bf16.mxu0 %v11105_v44  ;;  %7979 = vmatprep.subr.bf16.mxu1 %v11412_v5 }
 0x715   :  { %7949 = vmatpush1.bf16.msra.mxu0 %v11126_v52  ;;  %7981 = vmatpush1.bf16.msra.mxu1 %v11427_v11 }
 0x716   :  { %7951 = vmatprep.subr.bf16.mxu0 %v11138_v57  ;;  %7983 = vmatprep.subr.bf16.mxu1 %v11430_v12 }
 0x719   :  { %7953 = vmatpush1.bf16.msra.mxu0 %v11156_v0  ;;  %7985 = vmatpush1.bf16.msra.mxu1 %v11445_v19 }
 0x71a   :  { %7955 = vmatprep.subr.bf16.mxu0 %v11168_v6  ;;  %7987 = vmatprep.subr.bf16.mxu1 %v11448_v21 }
 0x71d   :  { %7957 = vmatpush1.bf16.msra.mxu0 %v11186_v15  ;;  %7989 = vmatpush1.bf16.msra.mxu1 %v11463_v28 }
 0x71e   :  { %7959 = vmatprep.subr.bf16.mxu0 %v11198_v20  ;;  %7991 = vmatprep.subr.bf16.mxu1 %v11466_v30 }
 0x721   :  { %7961 = vmatpush1.bf16.msra.mxu0 %v11216_v29  ;;  %7993 = vmatpush1.bf16.msra.mxu1 %v11481_v37 }
 0x722   :  { %7963 = vmatprep.subr.bf16.mxu0 %v11228_v34  ;;  %7995 = vmatprep.subr.bf16.mxu1 %v11484_v38 }
 0x725   :  { %7965 = vmatpush1.bf16.msra.mxu0 %v11240_v41  ;;  %7997 = vmatpush1.bf16.msra.mxu1 %v11493_v43 }
 0x726   :  { %7999 = vmatprep.subr.bf16.mxu0 %v11507_v50  ;;  %8063 = vmatprep.subr.bf16.mxu1 %v11518_v59 }
 0x728   :  { %2608 = vmatmul.mubr.f32.vlgmr.msra.gmra.mrb[24].mxu0 %v2368_v27  ;;  %2679 = vmatmul.mubr.f32.vlgmr.msra.gmra.mrb[32].mxu1 %v2368_v27  ;;  %v16282_v27 = vld [vmem:[#allocation21_spill] sm:$0xff] }
 0x729   :  { %8001 = vmatpush1.bf16.msra.mxu0 %v11520_v60  ;;  %8065 = vmatpush1.bf16.msra.mxu1 %v11529_v48 }
 0x72a   :  { %8003 = vmatprep.subr.bf16.mxu0 %v11546_v10  ;;  %8067 = vmatprep.subr.bf16.mxu1 %v11548_v14 }
 0x72d   :  { %8005 = vmatpush1.bf16.msra.mxu0 %v11559_v23  ;;  %8069 = vmatpush1.bf16.msra.mxu1 %v11572_v31 }
 0x72e   :  { %8007 = vmatprep.subr.bf16.mxu0 %v16265_v8  ;;  %8071 = vmatprep.subr.bf16.mxu1 %v16266_v56 }
 0x731   :  { %8009 = vmatpush1.bf16.msra.mxu0 %v16267_v24  ;;  %8073 = vmatpush1.bf16.msra.mxu1 %v16268_v40 }
 0x732   :  { %8011 = vmatprep.subr.bf16.mxu0 %v16269_v47  ;;  %8075 = vmatprep.subr.bf16.mxu1 %v16270_v36  ;;  %v16324_v36 = vld [vmem:[#allocation73_spill] sm:$0xff] }
 0x735   :  { %8013 = vmatpush1.bf16.msra.mxu0 %v16271_v18  ;;  %8077 = vmatpush1.bf16.msra.mxu1 %v16272_v16  ;;  %v16323_v16 = vld [vmem:[#allocation72_spill] sm:$0xff] }
 0x736   :  { %8015 = vmatprep.subr.bf16.mxu0 %v16273_v17  ;;  %8079 = vmatprep.subr.bf16.mxu1 %v16274_v51  ;;  %v16284_v17 = vld [vmem:[#allocation23_spill] sm:$0xff]  ;;  %v16285_v51 = vld [vmem:[#allocation24_spill] sm:$0xff] }
 0x739   :  { %8017 = vmatpush1.bf16.msra.mxu0 %v16275_v55  ;;  %8081 = vmatpush1.bf16.msra.mxu1 %v16276_v63  ;;  %v16286_v55 = vld [vmem:[#allocation25_spill] sm:$0xff]  ;;  %v16287_v63 = vld [vmem:[#allocation26_spill] sm:$0xff] }
 0x73a   :  { %8019 = vmatprep.subr.bf16.mxu0 %v16277_v7  ;;  %8083 = vmatprep.subr.bf16.mxu1 %v16278_v9  ;;  %v16288_v7 = vld [vmem:[#allocation27_spill] sm:$0xff]  ;;  %v16289_v9 = vld [vmem:[#allocation28_spill] sm:$0xff] }
 0x73d   :  { %8021 = vmatpush1.bf16.msra.mxu0 %v16279_v49  ;;  %8085 = vmatpush1.bf16.msra.mxu1 %v16280_v42  ;;  %v16290_v49 = vld [vmem:[#allocation29_spill] sm:$0xff]  ;;  %v16291_v42 = vld [vmem:[#allocation30_spill] sm:$0xff] }
 0x73e   :  { %8023 = vmatprep.subr.bf16.mxu0 %v16281_v33  ;;  %8087 = vmatprep.subr.bf16.mxu1 %v16282_v27  ;;  %v16292_v33 = vld [vmem:[#allocation31_spill] sm:$0xff]  ;;  %v16293_v27 = vld [vmem:[#allocation32_spill] sm:$0xff] }
 0x741   :  { %8025 = vmatpush1.bf16.msra.mxu0 %v16283_v25  ;;  %8089 = vmatpush1.bf16.msra.mxu1 %v16284_v17  ;;  %v16294_v25 = vld [vmem:[#allocation33_spill] sm:$0xff]  ;;  %v16295_v17 = vld [vmem:[#allocation34_spill] sm:$0xff] }
 0x742   :  { %8027 = vmatprep.subr.bf16.mxu0 %v16285_v51  ;;  %8091 = vmatprep.subr.bf16.mxu1 %v16286_v55  ;;  %v16296_v51 = vld [vmem:[#allocation35_spill] sm:$0xff]  ;;  %v16297_v55 = vld [vmem:[#allocation36_spill] sm:$0xff] }
 0x745   :  { %8029 = vmatpush1.bf16.msra.mxu0 %v16287_v63  ;;  %8093 = vmatpush1.bf16.msra.mxu1 %v16288_v7  ;;  %v16298_v63 = vld [vmem:[#allocation37_spill] sm:$0xff]  ;;  %v16299_v7 = vld [vmem:[#allocation38_spill] sm:$0xff] }
 0x746   :  { %8031 = vmatprep.subr.bf16.mxu0 %v16289_v9  ;;  %8095 = vmatprep.subr.bf16.mxu1 %v16290_v49  ;;  %v16300_v9 = vld [vmem:[#allocation39_spill] sm:$0xff]  ;;  %v16301_v49 = vld [vmem:[#allocation40_spill] sm:$0xff] }
 0x749   :  { %8033 = vmatpush1.bf16.msra.mxu0 %v16291_v42  ;;  %8097 = vmatpush1.bf16.msra.mxu1 %v16292_v33  ;;  %v16302_v42 = vld [vmem:[#allocation41_spill] sm:$0xff]  ;;  %v16303_v33 = vld [vmem:[#allocation42_spill] sm:$0xff] }
 0x74a   :  { %8035 = vmatprep.subr.bf16.mxu0 %v16293_v27  ;;  %8099 = vmatprep.subr.bf16.mxu1 %v16294_v25  ;;  %v16304_v27 = vld [vmem:[#allocation43_spill] sm:$0xff]  ;;  %v16305_v25 = vld [vmem:[#allocation44_spill] sm:$0xff] }
 0x74d   :  { %8037 = vmatpush1.bf16.msra.mxu0 %v16295_v17  ;;  %8101 = vmatpush1.bf16.msra.mxu1 %v16296_v51  ;;  %v16306_v17 = vld [vmem:[#allocation45_spill] sm:$0xff]  ;;  %v16307_v51 = vld [vmem:[#allocation46_spill] sm:$0xff] }
 0x74e   :  { %8039 = vmatprep.subr.bf16.mxu0 %v16297_v55  ;;  %8103 = vmatprep.subr.bf16.mxu1 %v16298_v63  ;;  %v16308_v55 = vld [vmem:[#allocation47_spill] sm:$0xff]  ;;  %v16309_v63 = vld [vmem:[#allocation48_spill] sm:$0xff] }
 0x751   :  { %8041 = vmatpush1.bf16.msra.mxu0 %v16299_v7  ;;  %8105 = vmatpush1.bf16.msra.mxu1 %v16300_v9  ;;  %v16310_v7 = vld [vmem:[#allocation49_spill] sm:$0xff]  ;;  %v16311_v9 = vld [vmem:[#allocation50_spill] sm:$0xff] }
 0x752   :  { %8043 = vmatprep.subr.bf16.mxu0 %v16301_v49  ;;  %8107 = vmatprep.subr.bf16.mxu1 %v16302_v42  ;;  %v16312_v49 = vld [vmem:[#allocation51_spill] sm:$0xff]  ;;  %v16313_v42 = vld [vmem:[#allocation52_spill] sm:$0xff] }
 0x755   :  { %8045 = vmatpush1.bf16.msra.mxu0 %v16303_v33  ;;  %8109 = vmatpush1.bf16.msra.mxu1 %v16304_v27  ;;  %v16314_v33 = vld [vmem:[#allocation53_spill] sm:$0xff]  ;;  %v16315_v27 = vld [vmem:[#allocation54_spill] sm:$0xff] }
 0x756   :  { %8047 = vmatprep.subr.bf16.mxu0 %v16305_v25  ;;  %8111 = vmatprep.subr.bf16.mxu1 %v16306_v17  ;;  %v16316_v25 = vld [vmem:[#allocation55_spill] sm:$0xff]  ;;  %v16317_v17 = vld [vmem:[#allocation56_spill] sm:$0xff] }
 0x759   :  { %8049 = vmatpush1.bf16.msra.mxu0 %v16307_v51  ;;  %8113 = vmatpush1.bf16.msra.mxu1 %v16308_v55  ;;  %v16318_v51 = vld [vmem:[#allocation57_spill] sm:$0xff]  ;;  %v16319_v55 = vld [vmem:[#allocation58_spill] sm:$0xff] }
 0x75a   :  { %8051 = vmatprep.subr.bf16.mxu0 %v16309_v63  ;;  %8115 = vmatprep.subr.bf16.mxu1 %v16310_v7  ;;  %v16320_v63 = vld [vmem:[#allocation59_spill] sm:$0xff]  ;;  %v16321_v7 = vld [vmem:[#allocation2_spill] sm:$0xff] }
 0x75d   :  { %8053 = vmatpush1.bf16.msra.mxu0 %v16311_v9  ;;  %8117 = vmatpush1.bf16.msra.mxu1 %v16312_v49  ;;  %v16322_v9 = vld [vmem:[#allocation3_spill] sm:$0xff] }
 0x75e   :  { %8055 = vmatprep.subr.bf16.mxu0 %v16313_v42  ;;  %8119 = vmatprep.subr.bf16.mxu1 %v16314_v33 }
 0x761   :  { %8057 = vmatpush1.bf16.msra.mxu0 %v16315_v27  ;;  %8121 = vmatpush1.bf16.msra.mxu1 %v16316_v25 }
 0x762   :  { %8059 = vmatprep.subr.bf16.mxu0 %v16317_v17  ;;  %8123 = vmatprep.subr.bf16.mxu1 %v16318_v51  ;;  %v16325_v51 = vld [vmem:[#allocation74_spill] sm:$0xff] }
 0x765   :  { %8061 = vmatpush1.bf16.msra.mxu0 %v16319_v55  ;;  %8125 = vmatpush1.bf16.msra.mxu1 %v16320_v63 }
 0x766   :  { %8127 = vmatprep.subr.bf16.mxu0 %v16321_v7  ;;  %8159 = vmatprep.subr.bf16.mxu1 %v16322_v9 }
 0x7db   :  { %v2435_v49 = vpop.f32.mrb[22].mxu0  ;;  %v2506_v42 = vpop.f32.mrb[30].mxu1 }
 0x7dc   :  { %v2436_v33 = vadd.f32 %v2435_v49, %v16323_v16  ;;  %v2437_v18 = vpop.f32.mrb[23].mxu0  ;;  %v2508_v27 = vpop.f32.mrb[31].mxu1  ;;  %v2507_v55 = vadd.f32 %v2506_v42, %v16325_v51  ;;  %v2536_v42 = vrot.slane %v16202_v46, 4 }
 0x7dd   :  { %v2438_v25 = vadd.f32 %v2437_v18, %v16324_v36  ;;  %v16326_v18 = vld [vmem:[#allocation64_spill] sm:$0xff] }
 0x7de   :  { %v6655_v47 = vmul.f32 -1.442695, %v2436_v33  ;;  %v2535_v33 = vrot.slane %v16326_v18, 4 }
 0x7df   :  { %v6656_v17 = vmul.f32 -1.442695, %v2438_v25 }
 0x7e0   :  { %10583 = vpow2.f32 %v6655_v47 }
 0x7e1   :  { %10585 = vpow2.f32 %v6656_v17 }
 0x7e2   :  { %10587 = vtanh.f32 %v2507_v55 }
 0x7ea   :  { %v10584_v40 = vpop.eup %10583 }
 0x7eb   :  { %v10586_v63 = vpop.eup %10585  ;;  %v2514_v24 = vadd.f32 1.0, %v10584_v40 }
 0x7ec   :  { %v2520_v7 = vadd.f32 1.0, %v10586_v63  ;;  %v10588_v9 = vpop.eup %10587 }
 0x7ed   :  { %10589 = vrcp.f32 %v2514_v24 }
 0x7ee   :  { %10591 = vrcp.f32 %v2520_v7 }
 0x7f7   :  { %v10590_v56 = vpop.eup %10589 }
 0x7f8   :  { %v10592_v49 = vpop.eup %10591  ;;  %v2531_v16 = vmul.f32 %v10590_v56, %v10588_v9  ;;  %v2538_v56 = vrot.slane %v16203_v1, 4 }
 0x7f9   :  { %v2530_v8 = vmul.f32 %v10592_v49, %v12689_v2  ;;  %v2509_v2 = vadd.f32 %v2508_v27, %v12236_v32 }
 0x7fb   :  { %v12803_v25 = vadd.f32 %v2531_v16, %v2530_v8  ;;  %v2609_v47 = vpop.f32.mrb[24].mxu0  ;;  %v2680_v17 = vpop.f32.mrb[32].mxu1  ;;  %v6657_v49 = vmul.f32 -1.442695, %v2509_v2  ;;  %v2537_v8 = vrot.slane %v16204_v45, 4 }
 0x7fc   :  { %v2610_v51 = vadd.f32 %v2609_v47, %v2535_v33  ;;  %v2611_v40 = vpop.f32.mrb[25].mxu0  ;;  %v2682_v55 = vpop.f32.mrb[33].mxu1 }
 0x7fd   :  { %v2612_v63 = vadd.f32 %v2611_v40, %v2536_v42  ;;  %v2683_v9 = vadd.f32 %v2682_v55, %v2538_v56  ;;  %v2681_v18 = vadd.f32 %v2680_v17, %v2537_v8 }
 0x7fe   :  { %v6658_v24 = vmul.f32 -1.442695, %v2610_v51 }
 0x7ff   :  { %v6659_v7 = vmul.f32 -1.442695, %v2612_v63  ;;  %v6660_v16 = vmul.f32 -1.442695, %v2683_v9 }
 0x800   :  { %10593 = vpow2.f32 %v6658_v24 }
 0x801   :  { %10595 = vpow2.f32 %v6659_v7 }
 0x802   :  { %10597 = vpow2.f32 %v6657_v49 }
 0x803   :  { %10599 = vpow2.f32 %v6660_v16 }
 0x804   :  { %10601 = vtanh.f32 %v2681_v18 }
 0x80a   :  { %v10594_v36 = vpop.eup %10593 }
 0x80b   :  { %v10596_v33 = vpop.eup %10595  ;;  %v2688_v47 = vadd.f32 1.0, %v10594_v36 }
 0x80c   :  { %v2694_v51 = vadd.f32 1.0, %v10596_v33  ;;  %v10598_v42 = vpop.eup %10597  ;;  %v16366_v33 = vld [vmem:[#allocation43_spill] sm:$0xff] }
 0x80d   :  { %10603 = vrcp.f32 %v2688_v47  ;;  %v10600_v40 = vpop.eup %10599  ;;  %v2527_v2 = vadd.f32 1.0, %v10598_v42  ;;  %v16367_v47 = vld [vmem:[#allocation44_spill] sm:$0xff]  ;;  %v16369_v42 = vld [vmem:[#allocation46_spill] sm:$0xff] }
 0x80e   :  { %10605 = vrcp.f32 %v2694_v51  ;;  %v10602_v63 = vpop.eup %10601  ;;  %v2701_v7 = vadd.f32 1.0, %v10600_v40  ;;  %v16368_v51 = vld [vmem:[#allocation45_spill] sm:$0xff]  ;;  %v16370_v40 = vld [vmem:[#allocation47_spill] sm:$0xff] }
 0x80f   :  { %10607 = vtanh.f32 %v12803_v25 }
 0x810   :  { %10609 = vrcp.f32 %v2701_v7  ;;  %v16375_v7 = vld [vmem:[#allocation52_spill] sm:$0xff] }
 0x817   :  { %v10604_v24 = vpop.eup %10603 }
 0x818   :  { %v10606_v27 = vpop.eup %10605  ;;  %v2705_v55 = vmul.f32 %v10604_v24, %v10602_v63  ;;  %v16371_v63 = vld [vmem:[#allocation48_spill] sm:$0xff]  ;;  %v16372_v24 = vld [vmem:[#allocation49_spill] sm:$0xff] }
 0x819   :  { %v2704_v56 = vmul.f32 %v10606_v27, %v12696_v3  ;;  %v10608_v36 = vpop.eup %10607  ;;  %v16365_v3 = vld [vmem:[#allocation42_spill] sm:$0xff] }
 0x81a   :  { %v10610_v18 = vpop.eup %10609  ;;  %v16373_v27 = vld [vmem:[#allocation50_spill] sm:$0xff] }
 0x81b   :  { %v12810_v17 = vadd.f32 %v2705_v55, %v2704_v56  ;;  %v16374_v55 = vld [vmem:[#allocation51_spill] sm:$0xff]  ;;  %v16376_v56 = vld [vmem:[#allocation53_spill] sm:$0xff] }
 0x81d   :  { %10611 = vtanh.f32 %v12810_v17 }
 0x81e   :  { %10613 = vrcp.f32 %v2527_v2  ;;  %v16377_v2 = vld [vmem:[#allocation54_spill] sm:$0xff] }
 0x827   :  { %v10612_v9 = vpop.eup %10611 }
 0x828   :  { %v10614_v49 = vpop.eup %10613  ;;  %v2708_v8 = vmul.f32 %v10612_v9, %v10610_v18  ;;  %v16379_v18 = vld [vmem:[#allocation56_spill] sm:$0xff]  ;;  %v16380_v9 = vld [vmem:[#allocation57_spill] sm:$0xff] }
 0x829   :  { %v2534_v16 = vmul.f32 %v10614_v49, %v10608_v36  ;;  %v16378_v36 = vld [vmem:[#allocation55_spill] sm:$0xff]  ;;  %v16381_v49 = vld [vmem:[#allocation58_spill] sm:$0xff] }
 0x82a   :  { %2773 = vmatprep.mubr.f32.mxu0 %v2708_v8  ;;  %2844 = vmatprep.mubr.f32.mxu1 %v2708_v8 }
 0x82b   :  { %2774 = vmatmul.mubr.f32.vlgmr.msra.gmra.mrb[26].mxu0 %v2534_v16  ;;  %2845 = vmatmul.mubr.f32.vlgmr.msra.gmra.mrb[34].mxu1 %v2534_v16  ;;  %v3218_v16 = vld [vmem:[%s15528_s6 + $0x8] sm:$0xff] }
 0x82c   :  { %8129 = vmatpush1.bf16.msra.mxu0 %v11027_v13  ;;  %8161 = vmatpush1.bf16.msra.mxu1 %v11369_v53  ;;  %v16327_v13 = vld [vmem:[#allocation4_spill] sm:$0xff]  ;;  %v16342_v53 = vld [vmem:[#allocation19_spill] sm:$0xff] }
 0x82d   :  { %8131 = vmatprep.subr.bf16.mxu0 %v11049_v22  ;;  %8163 = vmatprep.subr.bf16.mxu1 %v11372_v54  ;;  %v16328_v22 = vld [vmem:[#allocation5_spill] sm:$0xff]  ;;  %v16343_v54 = vld [vmem:[#allocation20_spill] sm:$0xff] }
 0x82e   :  { %2947 = vmatprep.mubr.f32.mxu0 %v15949_v58  ;;  %3018 = vmatprep.mubr.f32.mxu1 %v15949_v58 }
 0x830   :  { %8133 = vmatpush1.bf16.msra.mxu0 %v11060_v26  ;;  %8165 = vmatpush1.bf16.msra.mxu1 %v11388_v61  ;;  %v16329_v26 = vld [vmem:[#allocation6_spill] sm:$0xff]  ;;  %v16344_v61 = vld [vmem:[#allocation21_spill] sm:$0xff] }
 0x831   :  { %8135 = vmatprep.subr.bf16.mxu0 %v11081_v35  ;;  %8167 = vmatprep.subr.bf16.mxu1 %v11392_v62  ;;  %v16330_v35 = vld [vmem:[#allocation7_spill] sm:$0xff]  ;;  %v16345_v62 = vld [vmem:[#allocation22_spill] sm:$0xff] }
 0x834   :  { %8137 = vmatpush1.bf16.msra.mxu0 %v11093_v39  ;;  %8169 = vmatpush1.bf16.msra.mxu1 %v11408_v4  ;;  %v16331_v39 = vld [vmem:[#allocation8_spill] sm:$0xff]  ;;  %v16346_v4 = vld [vmem:[#allocation23_spill] sm:$0xff] }
 0x835   :  { %8139 = vmatprep.subr.bf16.mxu0 %v11105_v44  ;;  %8171 = vmatprep.subr.bf16.mxu1 %v11412_v5  ;;  %v16332_v44 = vld [vmem:[#allocation9_spill] sm:$0xff]  ;;  %v16347_v5 = vld [vmem:[#allocation24_spill] sm:$0xff] }
 0x838   :  { %8141 = vmatpush1.bf16.msra.mxu0 %v11126_v52  ;;  %8173 = vmatpush1.bf16.msra.mxu1 %v11427_v11  ;;  %v16333_v52 = vld [vmem:[#allocation10_spill] sm:$0xff]  ;;  %v16348_v11 = vld [vmem:[#allocation25_spill] sm:$0xff] }
 0x839   :  { %8143 = vmatprep.subr.bf16.mxu0 %v11138_v57  ;;  %8175 = vmatprep.subr.bf16.mxu1 %v11430_v12  ;;  %v16334_v57 = vld [vmem:[#allocation11_spill] sm:$0xff]  ;;  %v16349_v12 = vld [vmem:[#allocation26_spill] sm:$0xff] }
 0x83c   :  { %8145 = vmatpush1.bf16.msra.mxu0 %v11156_v0  ;;  %8177 = vmatpush1.bf16.msra.mxu1 %v11445_v19  ;;  %v16335_v0 = vld [vmem:[#allocation12_spill] sm:$0xff]  ;;  %v16350_v19 = vld [vmem:[#allocation27_spill] sm:$0xff] }
 0x83d   :  { %8147 = vmatprep.subr.bf16.mxu0 %v11168_v6  ;;  %8179 = vmatprep.subr.bf16.mxu1 %v11448_v21  ;;  %v16336_v6 = vld [vmem:[#allocation13_spill] sm:$0xff]  ;;  %v16351_v21 = vld [vmem:[#allocation28_spill] sm:$0xff] }
 0x840   :  { %8149 = vmatpush1.bf16.msra.mxu0 %v11186_v15  ;;  %8181 = vmatpush1.bf16.msra.mxu1 %v11463_v28  ;;  %v16337_v15 = vld [vmem:[#allocation14_spill] sm:$0xff]  ;;  %v16352_v28 = vld [vmem:[#allocation29_spill] sm:$0xff] }
 0x841   :  { %8151 = vmatprep.subr.bf16.mxu0 %v11198_v20  ;;  %8183 = vmatprep.subr.bf16.mxu1 %v11466_v30  ;;  %v16338_v20 = vld [vmem:[#allocation15_spill] sm:$0xff]  ;;  %v16353_v30 = vld [vmem:[#allocation30_spill] sm:$0xff] }
 0x844   :  { %8153 = vmatpush1.bf16.msra.mxu0 %v11216_v29  ;;  %8185 = vmatpush1.bf16.msra.mxu1 %v11481_v37  ;;  %v16339_v29 = vld [vmem:[#allocation16_spill] sm:$0xff]  ;;  %v16354_v37 = vld [vmem:[#allocation31_spill] sm:$0xff] }
 0x845   :  { %8155 = vmatprep.subr.bf16.mxu0 %v11228_v34  ;;  %8187 = vmatprep.subr.bf16.mxu1 %v11484_v38  ;;  %v16340_v34 = vld [vmem:[#allocation17_spill] sm:$0xff]  ;;  %v16355_v38 = vld [vmem:[#allocation32_spill] sm:$0xff] }
 0x848   :  { %8157 = vmatpush1.bf16.msra.mxu0 %v11240_v41  ;;  %8189 = vmatpush1.bf16.msra.mxu1 %v11493_v43  ;;  %v16341_v41 = vld [vmem:[#allocation18_spill] sm:$0xff]  ;;  %v16356_v43 = vld [vmem:[#allocation33_spill] sm:$0xff] }
 0x849   :  { %8191 = vmatprep.subr.bf16.mxu0 %v11507_v50  ;;  %8255 = vmatprep.subr.bf16.mxu1 %v11518_v59  ;;  %v16357_v50 = vld [vmem:[#allocation34_spill] sm:$0xff]  ;;  %v16358_v59 = vld [vmem:[#allocation35_spill] sm:$0xff] }
 0x84b   :  { %2948 = vmatmul.mubr.f32.vlgmr.msra.gmra.mrb[28].mxu0 %v2708_v8  ;;  %3019 = vmatmul.mubr.f32.vlgmr.msra.gmra.mrb[36].mxu1 %v2708_v8  ;;  %v16382_v8 = vld [vmem:[#allocation59_spill] sm:$0xff] }
 0x84c   :  { %8193 = vmatpush1.bf16.msra.mxu0 %v11520_v60  ;;  %8257 = vmatpush1.bf16.msra.mxu1 %v11529_v48  ;;  %v16359_v60 = vld [vmem:[#allocation36_spill] sm:$0xff]  ;;  %v16360_v48 = vld [vmem:[#allocation37_spill] sm:$0xff] }
 0x84d   :  { %8195 = vmatprep.subr.bf16.mxu0 %v11546_v10  ;;  %8259 = vmatprep.subr.bf16.mxu1 %v11548_v14  ;;  %v16361_v10 = vld [vmem:[#allocation38_spill] sm:$0xff]  ;;  %v16362_v14 = vld [vmem:[#allocation39_spill] sm:$0xff] }
 0x850   :  { %8197 = vmatpush1.bf16.msra.mxu0 %v11559_v23  ;;  %8261 = vmatpush1.bf16.msra.mxu1 %v11572_v31  ;;  %v16363_v23 = vld [vmem:[#allocation40_spill] sm:$0xff]  ;;  %v16364_v31 = vld [vmem:[#allocation41_spill] sm:$0xff] }
 0x851   :  { %8199 = vmatprep.subr.bf16.mxu0 %v16327_v13  ;;  %8263 = vmatprep.subr.bf16.mxu1 %v16328_v22  ;;  %v3222_v13 = vld [vmem:[%s15528_s6 + $0x28] sm:$0xff]  ;;  %v3220_v22 = vld [vmem:[%s15528_s6 + $0x18] sm:$0xff] }
 0x854   :  { %8201 = vmatpush1.bf16.msra.mxu0 %v16329_v26  ;;  %8265 = vmatpush1.bf16.msra.mxu1 %v16330_v35  ;;  %v8318_v26 = vpack.c.bf16 %v3222_v13, %v3218_v16  ;;  %v3224_v35 = vld [vmem:[%s15528_s6 + $0x38] sm:$0xff]  ;;  %v3221_v16 = vld [vmem:[%s15528_s6 + $0x20] sm:$0xff] }
 0x855   :  { %8203 = vmatprep.subr.bf16.mxu0 %v16331_v39  ;;  %8267 = vmatprep.subr.bf16.mxu1 %v16332_v44  ;;  %v8350_v39 = vpack.c.bf16 %v3224_v35, %v3220_v22  ;;  %v3223_v22 = vld [vmem:[%s15528_s6 + $0x30] sm:$0xff] }
 0x858   :  { %8205 = vmatpush1.bf16.msra.mxu0 %v16333_v52  ;;  %8269 = vmatpush1.bf16.msra.mxu1 %v16334_v57  ;;  %v16383_v57 = vld [vmem:[#allocation72_spill] sm:$0xff] }
 0x859   :  { %8207 = vmatprep.subr.bf16.mxu0 %v16335_v0  ;;  %8271 = vmatprep.subr.bf16.mxu1 %v16336_v6 }
 0x85c   :  { %8209 = vmatpush1.bf16.msra.mxu0 %v16337_v15  ;;  %8273 = vmatpush1.bf16.msra.mxu1 %v16338_v20  ;;  %v16384_v20 = vld [vmem:[#allocation73_spill] sm:$0xff] }
 0x85d   :  { %8211 = vmatprep.subr.bf16.mxu0 %v16339_v29  ;;  %8275 = vmatprep.subr.bf16.mxu1 %v16340_v34 }
 0x860   :  { %8213 = vmatpush1.bf16.msra.mxu0 %v16341_v41  ;;  %8277 = vmatpush1.bf16.msra.mxu1 %v16342_v53  ;;  %v16385_v53 = vld [vmem:[#allocation74_spill] sm:$0xff] }
 0x861   :  { %8215 = vmatprep.subr.bf16.mxu0 %v16343_v54  ;;  %8279 = vmatprep.subr.bf16.mxu1 %v16344_v61 }
 0x864   :  { %8217 = vmatpush1.bf16.msra.mxu0 %v16345_v62  ;;  %8281 = vmatpush1.bf16.msra.mxu1 %v16346_v4 }
 0x865   :  { %8219 = vmatprep.subr.bf16.mxu0 %v16347_v5  ;;  %8283 = vmatprep.subr.bf16.mxu1 %v16348_v11 }
 0x868   :  { %8221 = vmatpush1.bf16.msra.mxu0 %v16349_v12  ;;  %8285 = vmatpush1.bf16.msra.mxu1 %v16350_v19 }
 0x869   :  { %8223 = vmatprep.subr.bf16.mxu0 %v16351_v21  ;;  %8287 = vmatprep.subr.bf16.mxu1 %v16352_v28 }
 0x86c   :  { %8225 = vmatpush1.bf16.msra.mxu0 %v16353_v30  ;;  %8289 = vmatpush1.bf16.msra.mxu1 %v16354_v37  ;;  %v16386_v30 = vld [vmem:[#allocation64_spill] sm:$0xff] }
 0x86d   :  { %8227 = vmatprep.subr.bf16.mxu0 %v16355_v38  ;;  %8291 = vmatprep.subr.bf16.mxu1 %v16356_v43  ;;  %v2875_v37 = vrot.slane %v16386_v30, 6 }
 0x870   :  { %8229 = vmatpush1.bf16.msra.mxu0 %v16357_v50  ;;  %8293 = vmatpush1.bf16.msra.mxu1 %v16358_v59  ;;  %v2876_v59 = vrot.slane %v16202_v46, 6 }
 0x871   :  { %8231 = vmatprep.subr.bf16.mxu0 %v16359_v60  ;;  %8295 = vmatprep.subr.bf16.mxu1 %v16360_v48 }
 0x874   :  { %8233 = vmatpush1.bf16.msra.mxu0 %v16361_v10  ;;  %8297 = vmatpush1.bf16.msra.mxu1 %v16362_v14 }
 0x875   :  { %8235 = vmatprep.subr.bf16.mxu0 %v16363_v23  ;;  %8299 = vmatprep.subr.bf16.mxu1 %v16364_v31 }
 0x878   :  { %8237 = vmatpush1.bf16.msra.mxu0 %v16365_v3  ;;  %8301 = vmatpush1.bf16.msra.mxu1 %v16366_v33  ;;  %v2878_v3 = vrot.slane %v16203_v1, 6 }
 0x879   :  { %8239 = vmatprep.subr.bf16.mxu0 %v16367_v47  ;;  %8303 = vmatprep.subr.bf16.mxu1 %v16368_v51  ;;  %v2877_v51 = vrot.slane %v16204_v45, 6 }
 0x87c   :  { %8241 = vmatpush1.bf16.msra.mxu0 %v16369_v42  ;;  %8305 = vmatpush1.bf16.msra.mxu1 %v16370_v40 }
 0x87d   :  { %8243 = vmatprep.subr.bf16.mxu0 %v16371_v63  ;;  %8307 = vmatprep.subr.bf16.mxu1 %v16372_v24 }
 0x880   :  { %8245 = vmatpush1.bf16.msra.mxu0 %v16373_v27  ;;  %8309 = vmatpush1.bf16.msra.mxu1 %v16374_v55 }
 0x881   :  { %8247 = vmatprep.subr.bf16.mxu0 %v16375_v7  ;;  %8311 = vmatprep.subr.bf16.mxu1 %v16376_v56 }
 0x884   :  { %8249 = vmatpush1.bf16.msra.mxu0 %v16377_v2  ;;  %8313 = vmatpush1.bf16.msra.mxu1 %v16378_v36 }
 0x885   :  { %8251 = vmatprep.subr.bf16.mxu0 %v16379_v18  ;;  %8315 = vmatprep.subr.bf16.mxu1 %v16380_v9 }
 0x888   :  { %8253 = vmatpush1.bf16.msra.mxu0 %v16381_v49  ;;  %8317 = vmatpush1.bf16.msra.mxu1 %v16382_v8  ;;  %v3217_v8 = vld [vmem:[%s15528_s6] sm:$0xff] }
 0x889   :  { %8319 = vmatprep.subr.bf16.mxu0 %v8318_v26  ;;  %8351 = vmatprep.subr.bf16.mxu1 %v8350_v39  ;;  %v3226_v26 = vld [vmem:[%s15528_s6 + $0x48] sm:$0xff] }
 0x88a   :  { %v3230_v39 = vld [vmem:[%s15528_s6 + $0x68] sm:$0xff] }
 0x8fe   :  { %v2775_v44 = vpop.f32.mrb[26].mxu0  ;;  %v2846_v52 = vpop.f32.mrb[34].mxu1 }
 0x8ff   :  { %v2776_v0 = vadd.f32 %v2775_v44, %v16383_v57  ;;  %v2777_v6 = vpop.f32.mrb[27].mxu0  ;;  %v2848_v15 = vpop.f32.mrb[35].mxu1  ;;  %v2847_v54 = vadd.f32 %v2846_v52, %v16385_v53  ;;  %v3228_v44 = vld [vmem:[%s15528_s6 + $0x58] sm:$0xff] }
 0x900   :  { %v2778_v29 = vadd.f32 %v2777_v6, %v16384_v20  ;;  %v3232_v52 = vld [vmem:[%s15528_s6 + $0x78] sm:$0xff] }
 0x901   :  { %v6661_v34 = vmul.f32 -1.442695, %v2776_v0 }
 0x902   :  { %v6662_v41 = vmul.f32 -1.442695, %v2778_v29  ;;  %v8320_v29 = vpack.c.bf16 %v3221_v16, %v3217_v8  ;;  %v3255_v8 = vld [vmem:[%s15528_s6 + $0x130] sm:$0xff]  ;;  %v3258_v16 = vld [vmem:[%s15528_s6 + $0x148] sm:$0xff] }
 0x903   :  { %10615 = vpow2.f32 %v6661_v34 }
 0x904   :  { %10617 = vpow2.f32 %v6662_v41  ;;  %v3225_v41 = vld [vmem:[%s15528_s6 + $0x40] sm:$0xff] }
 0x905   :  { %10619 = vtanh.f32 %v2847_v54  ;;  %v3229_v54 = vld [vmem:[%s15528_s6 + $0x60] sm:$0xff] }
 0x906   :  { %v8324_v30 = vpack.c.bf16 %v3229_v54, %v3225_v41  ;;  %v3270_v41 = vld [vmem:[%s15528_s6 + $0x1a8] sm:$0xff]  ;;  %v3268_v54 = vld [vmem:[%s15528_s6 + $0x198] sm:$0xff] }
 0x90d   :  { %v10616_v61 = vpop.eup %10615 }
 0x90e   :  { %v10618_v62 = vpop.eup %10617  ;;  %v2854_v4 = vadd.f32 1.0, %v10616_v61 }
 0x90f   :  { %v2860_v5 = vadd.f32 1.0, %v10618_v62  ;;  %v10620_v11 = vpop.eup %10619  ;;  %v8322_v62 = vpack.c.bf16 %v3230_v39, %v3226_v26  ;;  %v3257_v39 = vld [vmem:[%s15528_s6 + $0x140] sm:$0xff] }
 0x910   :  { %10621 = vrcp.f32 %v2854_v4  ;;  %v8354_v4 = vpack.c.bf16 %v3232_v52, %v3228_v44  ;;  %v3261_v44 = vld [vmem:[%s15528_s6 + $0x160] sm:$0xff] }
 0x911   :  { %10623 = vrcp.f32 %v2860_v5  ;;  %v3227_v5 = vld [vmem:[%s15528_s6 + $0x50] sm:$0xff] }
 0x91a   :  { %v10622_v12 = vpop.eup %10621 }
 0x91b   :  { %v10624_v19 = vpop.eup %10623  ;;  %v2871_v21 = vmul.f32 %v10622_v12, %v10620_v11  ;;  %v3231_v11 = vld [vmem:[%s15528_s6 + $0x70] sm:$0xff]  ;;  %v3234_v12 = vld [vmem:[%s15528_s6 + $0x88] sm:$0xff] }
 0x91c   :  { %v2870_v28 = vmul.f32 %v10624_v19, %v12803_v25  ;;  %v2849_v25 = vadd.f32 %v2848_v15, %v12236_v32  ;;  %v3238_v19 = vld [vmem:[%s15528_s6 + $0xa8] sm:$0xff] }
 0x91e   :  { %v12927_v38 = vadd.f32 %v2871_v21, %v2870_v28  ;;  %v2949_v43 = vpop.f32.mrb[28].mxu0  ;;  %v3020_v50 = vpop.f32.mrb[36].mxu1  ;;  %v6663_v47 = vmul.f32 -1.442695, %v2849_v25  ;;  %v3236_v21 = vld [vmem:[%s15528_s6 + $0x98] sm:$0xff] }
 0x91f   :  { %v2950_v60 = vadd.f32 %v2949_v43, %v2875_v37  ;;  %v2951_v48 = vpop.f32.mrb[29].mxu0  ;;  %v3022_v10 = vpop.f32.mrb[37].mxu1  ;;  %v3021_v40 = vadd.f32 %v3020_v50, %v2877_v51  ;;  %v3240_v28 = vld [vmem:[%s15528_s6 + $0xb8] sm:$0xff]  ;;  %v8356_v37 = vpack.c.bf16 %v3231_v11, %v3227_v5  ;;  %v3233_v43 = vld [vmem:[%s15528_s6 + $0x80] sm:$0xff] }
 0x920   :  { %v2952_v14 = vadd.f32 %v2951_v48, %v2876_v59  ;;  %v3023_v33 = vadd.f32 %v3022_v10, %v2878_v3  ;;  %v3237_v50 = vld [vmem:[%s15528_s6 + $0xa0] sm:$0xff]  ;;  %v8326_v59 = vpack.c.bf16 %v3238_v19, %v3234_v12  ;;  %v3235_v48 = vld [vmem:[%s15528_s6 + $0x90] sm:$0xff]  ;;  %v3248_v3 = vld [vmem:[%s15528_s6 + $0xf8] sm:$0xff] }
 0x921   :  { %v6664_v23 = vmul.f32 -1.442695, %v2950_v60  ;;  %v8358_v60 = vpack.c.bf16 %v3240_v28, %v3236_v21  ;;  %v3239_v10 = vld [vmem:[%s15528_s6 + $0xb0] sm:$0xff]  ;;  %v8328_v25 = vpack.c.bf16 %v3237_v50, %v3233_v43  ;;  %v3245_v51 = vld [vmem:[%s15528_s6 + $0xe0] sm:$0xff]  ;;  %v3276_v43 = vld [vmem:[%s15528_s6 + $0x1d8] sm:$0xff] }
 0x922   :  { %v6665_v31 = vmul.f32 -1.442695, %v2952_v14  ;;  %v6666_v42 = vmul.f32 -1.442695, %v3023_v33  ;;  %v3242_v14 = vld [vmem:[%s15528_s6 + $0xc8] sm:$0xff]  ;;  %v8360_v33 = vpack.c.bf16 %v3239_v10, %v3235_v48  ;;  %v3265_v5 = vld [vmem:[%s15528_s6 + $0x180] sm:$0xff] }
 0x923   :  { %10625 = vpow2.f32 %v6664_v23  ;;  %v3246_v23 = vld [vmem:[%s15528_s6 + $0xe8] sm:$0xff]  ;;  %v3269_v11 = vld [vmem:[%s15528_s6 + $0x1a0] sm:$0xff]  ;;  %v3267_v21 = vld [vmem:[%s15528_s6 + $0x190] sm:$0xff] }
 0x924   :  { %10627 = vpow2.f32 %v6665_v31  ;;  %v3244_v31 = vld [vmem:[%s15528_s6 + $0xd8] sm:$0xff]  ;;  %v3271_v28 = vld [vmem:[%s15528_s6 + $0x1b0] sm:$0xff]  ;;  %v3273_v48 = vld [vmem:[%s15528_s6 + $0x1c0] sm:$0xff] }
 0x925   :  { %10629 = vpow2.f32 %v6663_v47  ;;  %v3241_v47 = vld [vmem:[%s15528_s6 + $0xc0] sm:$0xff]  ;;  %v3280_v50 = vld [vmem:[%s15528_s6 + $0x1f8] sm:$0xff] }
 0x926   :  { %10631 = vpow2.f32 %v6666_v42  ;;  %v8330_v42 = vpack.c.bf16 %v3246_v23, %v3242_v14  ;;  %v3277_v10 = vld [vmem:[%s15528_s6 + $0x1e0] sm:$0xff]  ;;  %v8378_v23 = vpack.c.bf16 %v3280_v50, %v3276_v43 }
 0x927   :  { %10633 = vtanh.f32 %v3021_v40  ;;  %v8362_v40 = vpack.c.bf16 %v3248_v3, %v3244_v31  ;;  %v3275_v31 = vld [vmem:[%s15528_s6 + $0x1d0] sm:$0xff] }
 0x928   :  { %v3279_v3 = vld [vmem:[%s15528_s6 + $0x1f0] sm:$0xff] }
 0x92d   :  { %v10626_v63 = vpop.eup %10625 }
 0x92e   :  { %v10628_v46 = vpop.eup %10627  ;;  %v3028_v24 = vadd.f32 1.0, %v10626_v63  ;;  %v3243_v63 = vld [vmem:[%s15528_s6 + $0xd0] sm:$0xff] }
 0x92f   :  { %v3034_v27 = vadd.f32 1.0, %v10628_v46  ;;  %v10630_v55 = vpop.eup %10629  ;;  %v3247_v46 = vld [vmem:[%s15528_s6 + $0xf0] sm:$0xff] }
 0x930   :  { %10635 = vrcp.f32 %v3028_v24  ;;  %v10632_v7 = vpop.eup %10631  ;;  %v2867_v9 = vadd.f32 1.0, %v10630_v55  ;;  %v3250_v24 = vld [vmem:[%s15528_s6 + $0x108] sm:$0xff]  ;;  %v3252_v55 = vld [vmem:[%s15528_s6 + $0x118] sm:$0xff] }
 0x931   :  { %10637 = vrcp.f32 %v3034_v27  ;;  %v10634_v1 = vpop.eup %10633  ;;  %v3041_v18 = vadd.f32 1.0, %v10632_v7  ;;  %v3254_v27 = vld [vmem:[%s15528_s6 + $0x128] sm:$0xff]  ;;  %v3256_v7 = vld [vmem:[%s15528_s6 + $0x138] sm:$0xff] }
 0x932   :  { %10639 = vtanh.f32 %v12927_v38 }
 0x933   :  { %10641 = vrcp.f32 %v3041_v18  ;;  %v8334_v18 = vpack.c.bf16 %v3254_v27, %v3250_v24 }
 0x93a   :  { %v10636_v56 = vpop.eup %10635 }
 0x93b   :  { %v10638_v2 = vpop.eup %10637  ;;  %v3045_v36 = vmul.f32 %v10636_v56, %v10634_v1  ;;  %v8332_v1 = vpack.c.bf16 %v3245_v51, %v3241_v47  ;;  %v8364_v56 = vpack.c.bf16 %v3247_v46, %v3243_v63  ;;  %v3451_v47 = vld [vmem:[%s15529_s8 + $0x18] sm:$0xff]  ;;  %v3448_v63 = vld [vmem:[%s15529_s8] sm:$0xff] }
 0x93c   :  { %v3044_v45 = vmul.f32 %v10638_v2, %v12810_v17  ;;  %v10640_v13 = vpop.eup %10639  ;;  %v3219_v17 = vld [vmem:[%s15528_s6 + $0x10] sm:$0xff]  ;;  %v3249_v2 = vld [vmem:[%s15528_s6 + $0x100] sm:$0xff]  ;;  %v3455_v51 = vld [vmem:[%s15529_s8 + $0x38] sm:$0xff] }
 0x93d   :  { %v10642_v35 = vpop.eup %10641  ;;  %v8352_v34 = vpack.c.bf16 %v3223_v22, %v3219_v17  ;;  %v3260_v17 = vld [vmem:[%s15528_s6 + $0x158] sm:$0xff]  ;;  %v3452_v46 = vld [vmem:[%s15529_s8 + $0x20] sm:$0xff]  ;;  %v13144_v27 = vpack.c.bf16 %v3455_v51, %v3451_v47 }
 0x93e   :  { %v12934_v49 = vadd.f32 %v3045_v36, %v3044_v45  ;;  %v3253_v36 = vld [vmem:[%s15528_s6 + $0x120] sm:$0xff]  ;;  %v8366_v45 = vpack.c.bf16 %v3256_v7, %v3252_v55  ;;  %v3264_v22 = vld [vmem:[%s15528_s6 + $0x178] sm:$0xff]  ;;  %v3450_v55 = vld [vmem:[%s15529_s8 + $0x10] sm:$0xff] }
 0x93f   :  { %v8336_v26 = vpack.c.bf16 %v3253_v36, %v3249_v2  ;;  %16388 = vst [vmem:[#allocation62_spill] sm:$0xff] %v13144_v27  ;;  %v3454_v7 = vld [vmem:[%s15529_s8 + $0x30] sm:$0xff]  ;;  %v3459_v2 = vld [vmem:[%s15529_s8 + $0x58] sm:$0xff] }
 0x940   :  { %10643 = vtanh.f32 %v12934_v49  ;;  %v3463_v36 = vld [vmem:[%s15529_s8 + $0x78] sm:$0xff] }
 0x941   :  { %10645 = vrcp.f32 %v2867_v9  ;;  %v3251_v9 = vld [vmem:[%s15528_s6 + $0x110] sm:$0xff] }
 0x94a   :  { %v10644_v0 = vpop.eup %10643 }
 0x94b   :  { %v10646_v6 = vpop.eup %10645  ;;  %v12962_v15 = vmul.f32 %v10644_v0, %v10642_v35  ;;  %v8368_v35 = vpack.c.bf16 %v3255_v8, %v3251_v9  ;;  %v8370_v0 = vpack.c.bf16 %v3264_v22, %v3260_v17  ;;  %v13167_v9 = vpack.c.bf16 %v3452_v46, %v3448_v63  ;;  %v3489_v63 = vld [vmem:[%s15529_s8 + $0x148] sm:$0xff] }
 0x94c   :  { %v2874_v61 = vmul.f32 %v10646_v6, %v10640_v13  ;;  %v3262_v13 = vld [vmem:[%s15528_s6 + $0x168] sm:$0xff]  ;;  %v3259_v6 = vld [vmem:[%s15528_s6 + $0x150] sm:$0xff]  ;;  %v13169_v8 = vpack.c.bf16 %v3454_v7, %v3450_v55  ;;  %v13181_v22 = vpack.c.bf16 %v3463_v36, %v3459_v2  ;;  %v3491_v55 = vld [vmem:[%s15529_s8 + $0x158] sm:$0xff] }
 0x94d   :  { %3113 = vmatprep.mubr.f32.mxu0 %v12962_v15  ;;  %3184 = vmatprep.mubr.f32.mxu1 %v12962_v15  ;;  %v8338_v52 = vpack.c.bf16 %v3262_v13, %v3258_v16  ;;  %v3456_v16 = vld [vmem:[%s15529_s8 + $0x40] sm:$0xff]  ;;  %v3493_v46 = vld [vmem:[%s15529_s8 + $0x168] sm:$0xff]  ;;  %v3495_v7 = vld [vmem:[%s15529_s8 + $0x178] sm:$0xff] }
 0x94e   :  { %3114 = vmatmul.mubr.f32.vlgmr.msra.gmra.mrb[30].mxu0 %v2874_v61  ;;  %3185 = vmatmul.mubr.f32.vlgmr.msra.gmra.mrb[38].mxu1 %v2874_v61  ;;  %v3272_v61 = vld [vmem:[%s15528_s6 + $0x1b8] sm:$0xff]  ;;  %v3460_v13 = vld [vmem:[%s15529_s8 + $0x60] sm:$0xff] }
 0x94f   :  { %8321 = vmatpush1.bf16.msra.mxu0 %v8320_v29  ;;  %8353 = vmatpush1.bf16.msra.mxu1 %v8352_v34  ;;  %v3263_v29 = vld [vmem:[%s15528_s6 + $0x170] sm:$0xff]  ;;  %v3266_v34 = vld [vmem:[%s15528_s6 + $0x188] sm:$0xff]  ;;  %v8374_v19 = vpack.c.bf16 %v3272_v61, %v3268_v54  ;;  %v3488_v2 = vld [vmem:[%s15529_s8 + $0x140] sm:$0xff] }
 0x950   :  { %8323 = vmatprep.subr.bf16.mxu0 %v8322_v62  ;;  %8355 = vmatprep.subr.bf16.mxu1 %v8354_v4  ;;  %v8340_v62 = vpack.c.bf16 %v3261_v44, %v3257_v39  ;;  %v8372_v4 = vpack.c.bf16 %v3263_v29, %v3259_v6  ;;  %v8342_v12 = vpack.c.bf16 %v3270_v41, %v3266_v34  ;;  %v3465_v39 = vld [vmem:[%s15529_s8 + $0x88] sm:$0xff]  ;;  %v3464_v34 = vld [vmem:[%s15529_s8 + $0x80] sm:$0xff] }
 0x951   :  { %3370 = vmatprep.mubr.f32.mxu0 %v15949_v58  ;;  %3441 = vmatprep.mubr.f32.mxu1 %v15949_v58  ;;  %v3469_v44 = vld [vmem:[%s15529_s8 + $0xa8] sm:$0xff]  ;;  %v13203_v6 = vpack.c.bf16 %v3460_v13, %v3456_v16  ;;  %v3468_v41 = vld [vmem:[%s15529_s8 + $0xa0] sm:$0xff]  ;;  %v3490_v16 = vld [vmem:[%s15529_s8 + $0x150] sm:$0xff] }
 0x952   :  { %v13215_v54 = vpack.c.bf16 %v3469_v44, %v3465_v39  ;;  %v3492_v36 = vld [vmem:[%s15529_s8 + $0x160] sm:$0xff]  ;;  %v3494_v13 = vld [vmem:[%s15529_s8 + $0x170] sm:$0xff]  ;;  %v3499_v39 = vld [vmem:[%s15529_s8 + $0x198] sm:$0xff] }
 0x953   :  { %8325 = vmatpush1.bf16.msra.mxu0 %v8324_v30  ;;  %8357 = vmatpush1.bf16.msra.mxu1 %v8356_v37  ;;  %v3274_v30 = vld [vmem:[%s15528_s6 + $0x1c8] sm:$0xff]  ;;  %v3503_v44 = vld [vmem:[%s15529_s8 + $0x1b8] sm:$0xff] }
 0x954   :  { %8327 = vmatprep.subr.bf16.mxu0 %v8326_v59  ;;  %8359 = vmatprep.subr.bf16.mxu1 %v8358_v60  ;;  %v3278_v37 = vld [vmem:[%s15528_s6 + $0x1e8] sm:$0xff]  ;;  %v8344_v59 = vpack.c.bf16 %v3269_v11, %v3265_v5  ;;  %v8376_v60 = vpack.c.bf16 %v3271_v28, %v3267_v21  ;;  %v13241_v21 = vpack.c.bf16 %v3468_v41, %v3464_v34  ;;  %v3496_v34 = vld [vmem:[%s15529_s8 + $0x180] sm:$0xff] }
 0x955   :  { %v8346_v14 = vpack.c.bf16 %v3278_v37, %v3274_v30  ;;  %v3473_v5 = vld [vmem:[%s15529_s8 + $0xc8] sm:$0xff]  ;;  %v3472_v30 = vld [vmem:[%s15529_s8 + $0xc0] sm:$0xff] }
 0x956   :  { %v3477_v11 = vld [vmem:[%s15529_s8 + $0xe8] sm:$0xff]  ;;  %v3476_v37 = vld [vmem:[%s15529_s8 + $0xe0] sm:$0xff] }
 0x957   :  { %8329 = vmatpush1.bf16.msra.mxu0 %v8328_v25  ;;  %8361 = vmatpush1.bf16.msra.mxu1 %v8360_v33  ;;  %v3449_v25 = vld [vmem:[%s15529_s8 + $0x8] sm:$0xff]  ;;  %v13253_v43 = vpack.c.bf16 %v3477_v11, %v3473_v5  ;;  %v3500_v41 = vld [vmem:[%s15529_s8 + $0x1a0] sm:$0xff]  ;;  %v3498_v5 = vld [vmem:[%s15529_s8 + $0x190] sm:$0xff] }
 0x958   :  { %8331 = vmatprep.subr.bf16.mxu0 %v8330_v42  ;;  %8363 = vmatprep.subr.bf16.mxu1 %v8362_v40  ;;  %v3453_v33 = vld [vmem:[%s15529_s8 + $0x28] sm:$0xff]  ;;  %v8348_v42 = vpack.c.bf16 %v3277_v10, %v3273_v48  ;;  %v8380_v40 = vpack.c.bf16 %v3279_v3, %v3275_v31  ;;  %v13277_v31 = vpack.c.bf16 %v3476_v37, %v3472_v30  ;;  %v3502_v11 = vld [vmem:[%s15529_s8 + $0x1b0] sm:$0xff]  ;;  %v3507_v30 = vld [vmem:[%s15529_s8 + $0x1d8] sm:$0xff] }
 0x959   :  { %v13142_v24 = vpack.c.bf16 %v3453_v33, %v3449_v25  ;;  %v3481_v48 = vld [vmem:[%s15529_s8 + $0x108] sm:$0xff]  ;;  %v3480_v25 = vld [vmem:[%s15529_s8 + $0x100] sm:$0xff]  ;;  %v3511_v37 = vld [vmem:[%s15529_s8 + $0x1f8] sm:$0xff] }
 0x95a   :  { %v3485_v10 = vld [vmem:[%s15529_s8 + $0x128] sm:$0xff]  ;;  %v3484_v33 = vld [vmem:[%s15529_s8 + $0x120] sm:$0xff] }
 0x95b   :  { %8333 = vmatpush1.bf16.msra.mxu0 %v8332_v1  ;;  %8365 = vmatpush1.bf16.msra.mxu1 %v8364_v56  ;;  %16387 = vst [vmem:[#allocation71_spill] sm:$0xff] %v13142_v24  ;;  %v3457_v1 = vld [vmem:[%s15529_s8 + $0x48] sm:$0xff]  ;;  %v13289_v47 = vpack.c.bf16 %v3485_v10, %v3481_v48  ;;  %v3504_v48 = vld [vmem:[%s15529_s8 + $0x1c0] sm:$0xff] }
 0x95c   :  { %8335 = vmatprep.subr.bf16.mxu0 %v8334_v18  ;;  %8367 = vmatprep.subr.bf16.mxu1 %v8366_v45  ;;  %v3461_v56 = vld [vmem:[%s15529_s8 + $0x68] sm:$0xff] }
 0x95d   :  { %v10919_v18 = vld [vmem:[%s15524_s0 + $0x8] sm:$0xff]  ;;  %v13179_v17 = vpack.c.bf16 %v3461_v56, %v3457_v1  ;;  %v13313_v1 = vpack.c.bf16 %v3484_v33, %v3480_v25  ;;  %v3506_v25 = vld [vmem:[%s15529_s8 + $0x1d0] sm:$0xff] }
 0x95e   :  { %v3304_v45 = vrot.slane %v10919_v18, 6  ;;  %v13325_v18 = vpack.c.bf16 %v3493_v46, %v3489_v63  ;;  %v3510_v33 = vld [vmem:[%s15529_s8 + $0x1f0] sm:$0xff]  ;;  %v3679_v63 = vld [vmem:[%s15530_s10 + $0x8] sm:$0xff] }
 0x95f   :  { %8337 = vmatpush1.bf16.msra.mxu0 %v8336_v26  ;;  %8369 = vmatpush1.bf16.msra.mxu1 %v8368_v35  ;;  %v3458_v26 = vld [vmem:[%s15529_s8 + $0x50] sm:$0xff]  ;;  %v3683_v46 = vld [vmem:[%s15530_s10 + $0x28] sm:$0xff] }
 0x960   :  { %8339 = vmatprep.subr.bf16.mxu0 %v8338_v52  ;;  %8371 = vmatprep.subr.bf16.mxu1 %v8370_v0  ;;  %v3462_v35 = vld [vmem:[%s15529_s8 + $0x70] sm:$0xff]  ;;  %v3467_v52 = vld [vmem:[%s15529_s8 + $0x98] sm:$0xff] }
 0x961   :  { %v3471_v0 = vld [vmem:[%s15529_s8 + $0xb8] sm:$0xff]  ;;  %v13205_v29 = vpack.c.bf16 %v3462_v35, %v3458_v26  ;;  %v3497_v26 = vld [vmem:[%s15529_s8 + $0x188] sm:$0xff] }
 0x962   :  { %v13217_v61 = vpack.c.bf16 %v3471_v0, %v3467_v52  ;;  %v3501_v35 = vld [vmem:[%s15529_s8 + $0x1a8] sm:$0xff]  ;;  %v13349_v52 = vpack.c.bf16 %v3492_v36, %v3488_v2  ;;  %v13351_v0 = vpack.c.bf16 %v3494_v13, %v3490_v16  ;;  %v3685_v2 = vld [vmem:[%s15530_s10 + $0x38] sm:$0xff]  ;;  %v3682_v36 = vld [vmem:[%s15530_s10 + $0x20] sm:$0xff] }
 0x963   :  { %8341 = vmatpush1.bf16.msra.mxu0 %v8340_v62  ;;  %8373 = vmatpush1.bf16.msra.mxu1 %v8372_v4  ;;  %v3466_v62 = vld [vmem:[%s15529_s8 + $0x90] sm:$0xff] }
 0x964   :  { %8343 = vmatprep.subr.bf16.mxu0 %v8342_v12  ;;  %8375 = vmatprep.subr.bf16.mxu1 %v8374_v19  ;;  %v3470_v4 = vld [vmem:[%s15529_s8 + $0xb0] sm:$0xff]  ;;  %v3475_v12 = vld [vmem:[%s15529_s8 + $0xd8] sm:$0xff] }
 0x965   :  { %v3479_v19 = vld [vmem:[%s15529_s8 + $0xf8] sm:$0xff]  ;;  %v13243_v28 = vpack.c.bf16 %v3470_v4, %v3466_v62  ;;  %v13361_v62 = vpack.c.bf16 %v3501_v35, %v3497_v26  ;;  %v13363_v4 = vpack.c.bf16 %v3503_v44, %v3499_v39  ;;  %v3680_v26 = vld [vmem:[%s15530_s10 + $0x10] sm:$0xff]  ;;  %v3687_v39 = vld [vmem:[%s15530_s10 + $0x48] sm:$0xff] }
 0x966   :  { %v13255_v50 = vpack.c.bf16 %v3479_v19, %v3475_v12  ;;  %v3505_v12 = vld [vmem:[%s15529_s8 + $0x1c8] sm:$0xff]  ;;  %v3684_v35 = vld [vmem:[%s15530_s10 + $0x30] sm:$0xff] }
 0x967   :  { %8345 = vmatpush1.bf16.msra.mxu0 %v8344_v59  ;;  %8377 = vmatpush1.bf16.msra.mxu1 %v8376_v60  ;;  %v3474_v59 = vld [vmem:[%s15529_s8 + $0xd0] sm:$0xff]  ;;  %v3509_v19 = vld [vmem:[%s15529_s8 + $0x1e8] sm:$0xff]  ;;  %v13453_v44 = vpack.c.bf16 %v3684_v35, %v3680_v26  ;;  %v3698_v26 = vld [vmem:[%s15530_s10 + $0xa0] sm:$0xff] }
 0x968   :  { %8347 = vmatprep.subr.bf16.mxu0 %v8346_v14  ;;  %8379 = vmatprep.subr.bf16.mxu1 %v8378_v23  ;;  %v3478_v60 = vld [vmem:[%s15529_s8 + $0xf0] sm:$0xff]  ;;  %v3483_v14 = vld [vmem:[%s15529_s8 + $0x118] sm:$0xff]  ;;  %v13394_v10 = vpack.c.bf16 %v3509_v19, %v3505_v12  ;;  %v3686_v19 = vld [vmem:[%s15530_s10 + $0x40] sm:$0xff] }
 0x969   :  { %v3487_v23 = vld [vmem:[%s15529_s8 + $0x138] sm:$0xff]  ;;  %v13279_v3 = vpack.c.bf16 %v3478_v60, %v3474_v59  ;;  %v13385_v59 = vpack.c.bf16 %v3500_v41, %v3496_v34  ;;  %v13387_v60 = vpack.c.bf16 %v3502_v11, %v3498_v5  ;;  %v3691_v34 = vld [vmem:[%s15530_s10 + $0x68] sm:$0xff]  ;;  %v3696_v35 = vld [vmem:[%s15530_s10 + $0x90] sm:$0xff] }
 0x96a   :  { %v13291_v51 = vpack.c.bf16 %v3487_v23, %v3483_v14  ;;  %v13396_v14 = vpack.c.bf16 %v3511_v37, %v3507_v30  ;;  %v3508_v23 = vld [vmem:[%s15529_s8 + $0x1e0] sm:$0xff]  ;;  %v3689_v41 = vld [vmem:[%s15530_s10 + $0x58] sm:$0xff]  ;;  %v13466_v11 = vpack.c.bf16 %v3691_v34, %v3687_v39  ;;  %v3688_v37 = vld [vmem:[%s15530_s10 + $0x50] sm:$0xff] }
 0x96b   :  { %8349 = vmatpush1.bf16.msra.mxu0 %v8348_v42  ;;  %8381 = vmatpush1.bf16.msra.mxu1 %v8380_v40  ;;  %v3482_v42 = vld [vmem:[%s15529_s8 + $0x110] sm:$0xff]  ;;  %v3693_v5 = vld [vmem:[%s15530_s10 + $0x78] sm:$0xff]  ;;  %v3690_v30 = vld [vmem:[%s15530_s10 + $0x60] sm:$0xff] }
 0x96c   :  { %8383 = vmatprep.subr.bf16.mxu0 %v13142_v24  ;;  %8415 = vmatprep.subr.bf16.mxu1 %v13144_v27  ;;  %v3486_v40 = vld [vmem:[%s15529_s8 + $0x130] sm:$0xff]  ;;  %v13468_v12 = vpack.c.bf16 %v3693_v5, %v3689_v41  ;;  %v3703_v41 = vld [vmem:[%s15530_s10 + $0xc8] sm:$0xff] }
 0x96d   :  { %v13315_v56 = vpack.c.bf16 %v3486_v40, %v3482_v42  ;;  %v13409_v42 = vpack.c.bf16 %v3508_v23, %v3504_v48  ;;  %v13411_v40 = vpack.c.bf16 %v3510_v33, %v3506_v25  ;;  %v13480_v48 = vpack.c.bf16 %v3690_v30, %v3686_v19  ;;  %v3692_v23 = vld [vmem:[%s15530_s10 + $0x70] sm:$0xff]  ;;  %v3695_v25 = vld [vmem:[%s15530_s10 + $0x88] sm:$0xff]  ;;  %v3705_v19 = vld [vmem:[%s15530_s10 + $0xd8] sm:$0xff] }
 0x96e   :  { %3371 = vmatmul.mubr.f32.vlgmr.msra.gmra.mrb[32].mxu0 %v3304_v45  ;;  %3442 = vmatmul.mubr.f32.vlgmr.msra.gmra.mrb[40].mxu1 %v3304_v45  ;;  %v13327_v45 = vpack.c.bf16 %v3495_v7, %v3491_v55  ;;  %v3681_v55 = vld [vmem:[%s15530_s10 + $0x18] sm:$0xff]  ;;  %v13428_v7 = vpack.c.bf16 %v3683_v46, %v3679_v63  ;;  %v3699_v33 = vld [vmem:[%s15530_s10 + $0xa8] sm:$0xff]  ;;  %v13493_v63 = vpack.c.bf16 %v3692_v23, %v3688_v37  ;;  %v3700_v39 = vld [vmem:[%s15530_s10 + $0xb0] sm:$0xff] }
 0x96f   :  { %8385 = vmatpush1.bf16.msra.mxu0 %v13167_v9  ;;  %8417 = vmatpush1.bf16.msra.mxu1 %v13169_v8  ;;  %v13439_v16 = vpack.c.bf16 %v3685_v2, %v3681_v55  ;;  %v13495_v46 = vpack.c.bf16 %v3699_v33, %v3695_v25  ;;  %v3697_v55 = vld [vmem:[%s15530_s10 + $0x98] sm:$0xff]  ;;  %v3707_v5 = vld [vmem:[%s15530_s10 + $0xe8] sm:$0xff]  ;;  %v13531_v30 = vpack.c.bf16 %v3700_v39, %v3696_v35  ;;  %v3702_v25 = vld [vmem:[%s15530_s10 + $0xc0] sm:$0xff] }
 0x970   :  { %8387 = vmatprep.subr.bf16.mxu0 %v13179_v17  ;;  %8419 = vmatprep.subr.bf16.mxu1 %v13181_v22  ;;  %16389 = vst [vmem:[#allocation70_spill] sm:$0xff] %v13428_v7  ;;  %16391 = vst [vmem:[#allocation65_spill] sm:$0xff] %v13493_v63  ;;  %v3701_v2 = vld [vmem:[%s15530_s10 + $0xb8] sm:$0xff]  ;;  %v13533_v37 = vpack.c.bf16 %v3707_v5, %v3703_v41  ;;  %v3706_v33 = vld [vmem:[%s15530_s10 + $0xe0] sm:$0xff] }
 0x971   :  { %3576 = vmatprep.mubr.f32.mxu0 %v15949_v58  ;;  %3647 = vmatprep.mubr.f32.mxu1 %v15949_v58  ;;  %16390 = vst [vmem:[#allocation63_spill] sm:$0xff] %v13439_v16  ;;  %16392 = vst [vmem:[#allocation69_spill] sm:$0xff] %v13495_v46  ;;  %v3709_v23 = vld [vmem:[%s15530_s10 + $0xf8] sm:$0xff]  ;;  %v3711_v39 = vld [vmem:[%s15530_s10 + $0x108] sm:$0xff] }
 0x972   :  { %16395 = vst [vmem:[#allocation3_spill] sm:$0xff] %v13531_v30  ;;  %16396 = vst [vmem:[#allocation4_spill] sm:$0xff] %v13533_v37  ;;  %v3715_v41 = vld [vmem:[%s15530_s10 + $0x128] sm:$0xff]  ;;  %v3713_v5 = vld [vmem:[%s15530_s10 + $0x118] sm:$0xff] }
 0x973   :  { %8389 = vmatpush1.bf16.msra.mxu0 %v13203_v6  ;;  %8421 = vmatpush1.bf16.msra.mxu1 %v13205_v29  ;;  %v3723_v58 = vld [vmem:[%s15530_s10 + $0x168] sm:$0xff] }
 0x974   :  { %8391 = vmatprep.subr.bf16.mxu0 %v13215_v54  ;;  %8423 = vmatprep.subr.bf16.mxu1 %v13217_v61 }
 0x977   :  { %8393 = vmatpush1.bf16.msra.mxu0 %v13241_v21  ;;  %8425 = vmatpush1.bf16.msra.mxu1 %v13243_v28 }
 0x978   :  { %8395 = vmatprep.subr.bf16.mxu0 %v13253_v43  ;;  %8427 = vmatprep.subr.bf16.mxu1 %v13255_v50 }
 0x97b   :  { %8397 = vmatpush1.bf16.msra.mxu0 %v13277_v31  ;;  %8429 = vmatpush1.bf16.msra.mxu1 %v13279_v3 }
 0x97c   :  { %8399 = vmatprep.subr.bf16.mxu0 %v13289_v47  ;;  %8431 = vmatprep.subr.bf16.mxu1 %v13291_v51 }
 0x97f   :  { %8401 = vmatpush1.bf16.msra.mxu0 %v13313_v1  ;;  %8433 = vmatpush1.bf16.msra.mxu1 %v13315_v56 }
 0x980   :  { %8403 = vmatprep.subr.bf16.mxu0 %v13325_v18  ;;  %8435 = vmatprep.subr.bf16.mxu1 %v13327_v45 }
 0x983   :  { %8405 = vmatpush1.bf16.msra.mxu0 %v13349_v52  ;;  %8437 = vmatpush1.bf16.msra.mxu1 %v13351_v0 }
 0x984   :  { %8407 = vmatprep.subr.bf16.mxu0 %v13361_v62  ;;  %8439 = vmatprep.subr.bf16.mxu1 %v13363_v4 }
 0x987   :  { %8409 = vmatpush1.bf16.msra.mxu0 %v13385_v59  ;;  %8441 = vmatpush1.bf16.msra.mxu1 %v13387_v60 }
 0x988   :  { %8411 = vmatprep.subr.bf16.mxu0 %v13394_v10  ;;  %8443 = vmatprep.subr.bf16.mxu1 %v13396_v14 }
 0x98b   :  { %8413 = vmatpush1.bf16.msra.mxu0 %v13409_v42  ;;  %8445 = vmatpush1.bf16.msra.mxu1 %v13411_v40 }
 0x98c   :  { %8447 = vmatprep.subr.bf16.mxu0 %v13428_v7  ;;  %8511 = vmatprep.subr.bf16.mxu1 %v13439_v16 }
 0x98e   :  { %3577 = vmatmul.mubr.f32.vlgmr.msra.gmra.mrb[32].mxu0 %v12962_v15  ;;  %3648 = vmatmul.mubr.f32.vlgmr.msra.gmra.mrb[40].mxu1 %v12962_v15  ;;  %v3678_v15 = vld [vmem:[%s15530_s10] sm:$0xff] }
 0x98f   :  { %v13441_v13 = vpack.c.bf16 %v3682_v36, %v3678_v15  ;;  %8513 = vmatpush1.bf16.msra.mxu1 %v13453_v44  ;;  %v3694_v15 = vld [vmem:[%s15530_s10 + $0x80] sm:$0xff]  ;;  %v13506_v36 = vpack.c.bf16 %v3701_v2, %v3697_v55  ;;  %v13545_v55 = vpack.c.bf16 %v3709_v23, %v3705_v19  ;;  %v3704_v2 = vld [vmem:[%s15530_s10 + $0xd0] sm:$0xff]  ;;  %v13572_v19 = vpack.c.bf16 %v3715_v41, %v3711_v39  ;;  %v3717_v23 = vld [vmem:[%s15530_s10 + $0x138] sm:$0xff] }
 0x990   :  { %8515 = vmatprep.subr.bf16.mxu1 %v13468_v12  ;;  %v13518_v34 = vpack.c.bf16 %v3698_v26, %v3694_v15  ;;  %v3708_v15 = vld [vmem:[%s15530_s10 + $0xf0] sm:$0xff]  ;;  %v13554_v26 = vpack.c.bf16 %v3706_v33, %v3702_v25  ;;  %v13577_v25 = vpack.c.bf16 %v3717_v23, %v3713_v5  ;;  %v3710_v33 = vld [vmem:[%s15530_s10 + $0x100] sm:$0xff]  ;;  %v3719_v23 = vld [vmem:[%s15530_s10 + $0x148] sm:$0xff] }
 0x991   :  { %8449 = vmatpush1.bf16.msra.mxu0 %v13441_v13  ;;  %16393 = vst [vmem:[#allocation68_spill] sm:$0xff] %v13506_v36  ;;  %16397 = vst [vmem:[#allocation5_spill] sm:$0xff] %v13545_v55  ;;  %v13558_v35 = vpack.c.bf16 %v3708_v15, %v3704_v2  ;;  %v3714_v2 = vld [vmem:[%s15530_s10 + $0x120] sm:$0xff]  ;;  %v3712_v15 = vld [vmem:[%s15530_s10 + $0x110] sm:$0xff] }
 0x992   :  { %8451 = vmatprep.subr.bf16.mxu0 %v13466_v11  ;;  %16394 = vst [vmem:[#allocation2_spill] sm:$0xff] %v13518_v34  ;;  %16398 = vst [vmem:[#allocation6_spill] sm:$0xff] %v13554_v26  ;;  %v13589_v39 = vpack.c.bf16 %v3714_v2, %v3710_v33  ;;  %v3716_v41 = vld [vmem:[%s15530_s10 + $0x130] sm:$0xff]  ;;  %v3721_v33 = vld [vmem:[%s15530_s10 + $0x158] sm:$0xff]  ;;  %v13608_v2 = vpack.c.bf16 %v3723_v58, %v3719_v23 }
 0x993   :  { %8517 = vmatpush1.bf16.msra.mxu1 %v13493_v63  ;;  %16399 = vst [vmem:[#allocation7_spill] sm:$0xff] %v13558_v35  ;;  %16400 = vst [vmem:[#allocation8_spill] sm:$0xff] %v13572_v19  ;;  %v13595_v5 = vpack.c.bf16 %v3716_v41, %v3712_v15  ;;  %v3725_v15 = vld [vmem:[%s15530_s10 + $0x178] sm:$0xff]  ;;  %v3718_v41 = vld [vmem:[%s15530_s10 + $0x140] sm:$0xff] }
 0x994   :  { %8519 = vmatprep.subr.bf16.mxu1 %v13506_v36  ;;  %16401 = vst [vmem:[#allocation9_spill] sm:$0xff] %v13577_v25  ;;  %16402 = vst [vmem:[#allocation10_spill] sm:$0xff] %v13589_v39  ;;  %v3720_v58 = vld [vmem:[%s15530_s10 + $0x150] sm:$0xff] }
 0x995   :  { %8453 = vmatpush1.bf16.msra.mxu0 %v13480_v48  ;;  %16403 = vst [vmem:[#allocation11_spill] sm:$0xff] %v13595_v5  ;;  %16404 = vst [vmem:[#allocation12_spill] sm:$0xff] %v13608_v2  ;;  %v3724_v23 = vld [vmem:[%s15530_s10 + $0x170] sm:$0xff] }
 0x996   :  { %8455 = vmatprep.subr.bf16.mxu0 %v13495_v46 }
 0x997   :  { %8521 = vmatpush1.bf16.msra.mxu1 %v13531_v30 }
 0x998   :  { %8523 = vmatprep.subr.bf16.mxu1 %v13545_v55 }
 0x999   :  { %8457 = vmatpush1.bf16.msra.mxu0 %v13518_v34 }
 0x99a   :  { %8459 = vmatprep.subr.bf16.mxu0 %v13533_v37  ;;  %v3802_v37 = vld [vmem:[%s15530_s10 + $0x3e0] sm:$0xff] }
 0x99b   :  { %8525 = vmatpush1.bf16.msra.mxu1 %v13558_v35 }
 0x99c   :  { %8527 = vmatprep.subr.bf16.mxu1 %v13577_v25  ;;  %v13619_v25 = vpack.c.bf16 %v3725_v15, %v3721_v33  ;;  %v3731_v33 = vld [vmem:[%s15530_s10 + $0x1a8] sm:$0xff]  ;;  %v3729_v15 = vld [vmem:[%s15530_s10 + $0x198] sm:$0xff] }
 0x99d   :  { %8461 = vmatpush1.bf16.msra.mxu0 %v13554_v26  ;;  %v3784_v26 = vld [vmem:[%s15530_s10 + $0x350] sm:$0xff] }
 0x99e   :  { %8463 = vmatprep.subr.bf16.mxu0 %v13572_v19  ;;  %16405 = vst [vmem:[#allocation13_spill] sm:$0xff] %v13619_v25 }
 0x99f   :  { %8529 = vmatpush1.bf16.msra.mxu1 %v13595_v5  ;;  %v13630_v5 = vpack.c.bf16 %v3724_v23, %v3720_v58  ;;  %v3733_v58 = vld [vmem:[%s15530_s10 + $0x1b8] sm:$0xff]  ;;  %v3726_v23 = vld [vmem:[%s15530_s10 + $0x180] sm:$0xff] }
 0x9a0   :  { %8531 = vmatprep.subr.bf16.mxu1 %v13619_v25  ;;  %v13655_v25 = vpack.c.bf16 %v3733_v58, %v3729_v15  ;;  %v3739_v15 = vld [vmem:[%s15530_s10 + $0x1e8] sm:$0xff]  ;;  %v3737_v58 = vld [vmem:[%s15530_s10 + $0x1d8] sm:$0xff] }
 0x9a1   :  { %8465 = vmatpush1.bf16.msra.mxu0 %v13589_v39  ;;  %v3722_v39 = vld [vmem:[%s15530_s10 + $0x160] sm:$0xff]  ;;  %16407 = vst [vmem:[#allocation15_spill] sm:$0xff] %v13630_v5 }
 0x9a2   :  { %v13621_v19 = vpack.c.bf16 %v3722_v39, %v3718_v41  ;;  %8467 = vmatprep.subr.bf16.mxu0 %v13608_v2  ;;  %v3727_v39 = vld [vmem:[%s15530_s10 + $0x188] sm:$0xff]  ;;  %16409 = vst [vmem:[#allocation17_spill] sm:$0xff] %v13655_v25 }
 0x9a3   :  { %8533 = vmatpush1.bf16.msra.mxu1 %v13630_v5  ;;  %v13644_v41 = vpack.c.bf16 %v3731_v33, %v3727_v39  ;;  %v3728_v39 = vld [vmem:[%s15530_s10 + $0x190] sm:$0xff] }
 0x9a4   :  { %16406 = vst [vmem:[#allocation14_spill] sm:$0xff] %v13621_v19  ;;  %v3732_v33 = vld [vmem:[%s15530_s10 + $0x1b0] sm:$0xff]  ;;  %8535 = vmatprep.subr.bf16.mxu1 %v13655_v25 }
 0x9a5   :  { %8469 = vmatpush1.bf16.msra.mxu0 %v13621_v19  ;;  %16408 = vst [vmem:[#allocation16_spill] sm:$0xff] %v13644_v41  ;;  %v3730_v19 = vld [vmem:[%s15530_s10 + $0x1a0] sm:$0xff]  ;;  %v13666_v5 = vpack.c.bf16 %v3732_v33, %v3728_v39  ;;  %v3741_v39 = vld [vmem:[%s15530_s10 + $0x1f8] sm:$0xff] }
 0x9a6   :  { %v13657_v2 = vpack.c.bf16 %v3730_v19, %v3726_v23  ;;  %8471 = vmatprep.subr.bf16.mxu0 %v13644_v41  ;;  %v3735_v19 = vld [vmem:[%s15530_s10 + $0x1c8] sm:$0xff]  ;;  %v3734_v33 = vld [vmem:[%s15530_s10 + $0x1c0] sm:$0xff]  ;;  %v13691_v25 = vpack.c.bf16 %v3741_v39, %v3737_v58  ;;  %v3745_v39 = vld [vmem:[%s15530_s10 + $0x218] sm:$0xff] }
 0x9a7   :  { %16411 = vst [vmem:[#allocation19_spill] sm:$0xff] %v13666_v5  ;;  %8537 = vmatpush1.bf16.msra.mxu1 %v13666_v5  ;;  %v13680_v23 = vpack.c.bf16 %v3739_v15, %v3735_v19  ;;  %v3736_v19 = vld [vmem:[%s15530_s10 + $0x1d0] sm:$0xff]  ;;  %v3747_v58 = vld [vmem:[%s15530_s10 + $0x228] sm:$0xff] }
 0x9a8   :  { %16410 = vst [vmem:[#allocation18_spill] sm:$0xff] %v13657_v2  ;;  %16413 = vst [vmem:[#allocation21_spill] sm:$0xff] %v13691_v25  ;;  %v3740_v15 = vld [vmem:[%s15530_s10 + $0x1f0] sm:$0xff]  ;;  %8539 = vmatprep.subr.bf16.mxu1 %v13691_v25 }
 0x9a9   :  { %8473 = vmatpush1.bf16.msra.mxu0 %v13657_v2  ;;  %16412 = vst [vmem:[#allocation20_spill] sm:$0xff] %v13680_v23  ;;  %v3738_v2 = vld [vmem:[%s15530_s10 + $0x1e0] sm:$0xff]  ;;  %v13702_v5 = vpack.c.bf16 %v3740_v15, %v3736_v19  ;;  %v3749_v19 = vld [vmem:[%s15530_s10 + $0x238] sm:$0xff] }
 0x9aa   :  { %v13693_v41 = vpack.c.bf16 %v3738_v2, %v3734_v33  ;;  %8475 = vmatprep.subr.bf16.mxu0 %v13680_v23  ;;  %v3743_v2 = vld [vmem:[%s15530_s10 + $0x208] sm:$0xff]  ;;  %v3742_v15 = vld [vmem:[%s15530_s10 + $0x200] sm:$0xff]  ;;  %v13727_v25 = vpack.c.bf16 %v3749_v19, %v3745_v39  ;;  %v3753_v19 = vld [vmem:[%s15530_s10 + $0x258] sm:$0xff] }
 0x9ab   :  { %16415 = vst [vmem:[#allocation23_spill] sm:$0xff] %v13702_v5  ;;  %8541 = vmatpush1.bf16.msra.mxu1 %v13702_v5  ;;  %v13716_v33 = vpack.c.bf16 %v3747_v58, %v3743_v2  ;;  %v3744_v2 = vld [vmem:[%s15530_s10 + $0x210] sm:$0xff]  ;;  %v3755_v39 = vld [vmem:[%s15530_s10 + $0x268] sm:$0xff] }
 0x9ac   :  { %16414 = vst [vmem:[#allocation22_spill] sm:$0xff] %v13693_v41  ;;  %16417 = vst [vmem:[#allocation25_spill] sm:$0xff] %v13727_v25  ;;  %v3748_v58 = vld [vmem:[%s15530_s10 + $0x230] sm:$0xff]  ;;  %8543 = vmatprep.subr.bf16.mxu1 %v13727_v25 }
 0x9ad   :  { %8477 = vmatpush1.bf16.msra.mxu0 %v13693_v41  ;;  %16416 = vst [vmem:[#allocation24_spill] sm:$0xff] %v13716_v33  ;;  %v3746_v41 = vld [vmem:[%s15530_s10 + $0x220] sm:$0xff]  ;;  %v13738_v5 = vpack.c.bf16 %v3748_v58, %v3744_v2  ;;  %v3757_v2 = vld [vmem:[%s15530_s10 + $0x278] sm:$0xff] }
 0x9ae   :  { %v13729_v23 = vpack.c.bf16 %v3746_v41, %v3742_v15  ;;  %8479 = vmatprep.subr.bf16.mxu0 %v13716_v33  ;;  %v3751_v41 = vld [vmem:[%s15530_s10 + $0x248] sm:$0xff]  ;;  %v3750_v58 = vld [vmem:[%s15530_s10 + $0x240] sm:$0xff]  ;;  %v13763_v25 = vpack.c.bf16 %v3757_v2, %v3753_v19  ;;  %v3761_v2 = vld [vmem:[%s15530_s10 + $0x298] sm:$0xff] }
 0x9af   :  { %16419 = vst [vmem:[#allocation27_spill] sm:$0xff] %v13738_v5  ;;  %8545 = vmatpush1.bf16.msra.mxu1 %v13738_v5  ;;  %v13752_v15 = vpack.c.bf16 %v3755_v39, %v3751_v41  ;;  %v3752_v41 = vld [vmem:[%s15530_s10 + $0x250] sm:$0xff]  ;;  %v3763_v19 = vld [vmem:[%s15530_s10 + $0x2a8] sm:$0xff] }
 0x9b0   :  { %16418 = vst [vmem:[#allocation26_spill] sm:$0xff] %v13729_v23  ;;  %16421 = vst [vmem:[#allocation29_spill] sm:$0xff] %v13763_v25  ;;  %v3756_v39 = vld [vmem:[%s15530_s10 + $0x270] sm:$0xff]  ;;  %8547 = vmatprep.subr.bf16.mxu1 %v13763_v25 }
 0x9b1   :  { %8481 = vmatpush1.bf16.msra.mxu0 %v13729_v23  ;;  %16420 = vst [vmem:[#allocation28_spill] sm:$0xff] %v13752_v15  ;;  %v3754_v23 = vld [vmem:[%s15530_s10 + $0x260] sm:$0xff]  ;;  %v13774_v5 = vpack.c.bf16 %v3756_v39, %v3752_v41  ;;  %v3765_v41 = vld [vmem:[%s15530_s10 + $0x2b8] sm:$0xff] }
 0x9b2   :  { %v13765_v33 = vpack.c.bf16 %v3754_v23, %v3750_v58  ;;  %8483 = vmatprep.subr.bf16.mxu0 %v13752_v15  ;;  %v3759_v23 = vld [vmem:[%s15530_s10 + $0x288] sm:$0xff]  ;;  %v3758_v39 = vld [vmem:[%s15530_s10 + $0x280] sm:$0xff]  ;;  %v13799_v25 = vpack.c.bf16 %v3765_v41, %v3761_v2  ;;  %v3769_v41 = vld [vmem:[%s15530_s10 + $0x2d8] sm:$0xff] }
 0x9b3   :  { %16423 = vst [vmem:[#allocation31_spill] sm:$0xff] %v13774_v5  ;;  %8549 = vmatpush1.bf16.msra.mxu1 %v13774_v5  ;;  %v13788_v58 = vpack.c.bf16 %v3763_v19, %v3759_v23  ;;  %v3760_v23 = vld [vmem:[%s15530_s10 + $0x290] sm:$0xff]  ;;  %v3771_v2 = vld [vmem:[%s15530_s10 + $0x2e8] sm:$0xff] }
 0x9b4   :  { %16422 = vst [vmem:[#allocation30_spill] sm:$0xff] %v13765_v33  ;;  %16425 = vst [vmem:[#allocation33_spill] sm:$0xff] %v13799_v25  ;;  %v3764_v19 = vld [vmem:[%s15530_s10 + $0x2b0] sm:$0xff]  ;;  %8551 = vmatprep.subr.bf16.mxu1 %v13799_v25 }
 0x9b5   :  { %8485 = vmatpush1.bf16.msra.mxu0 %v13765_v33  ;;  %16424 = vst [vmem:[#allocation32_spill] sm:$0xff] %v13788_v58  ;;  %v3762_v33 = vld [vmem:[%s15530_s10 + $0x2a0] sm:$0xff]  ;;  %v13810_v5 = vpack.c.bf16 %v3764_v19, %v3760_v23  ;;  %v3773_v23 = vld [vmem:[%s15530_s10 + $0x2f8] sm:$0xff] }
 0x9b6   :  { %v13801_v15 = vpack.c.bf16 %v3762_v33, %v3758_v39  ;;  %8487 = vmatprep.subr.bf16.mxu0 %v13788_v58  ;;  %v3767_v33 = vld [vmem:[%s15530_s10 + $0x2c8] sm:$0xff]  ;;  %v3766_v19 = vld [vmem:[%s15530_s10 + $0x2c0] sm:$0xff]  ;;  %v13835_v25 = vpack.c.bf16 %v3773_v23, %v3769_v41  ;;  %v3777_v23 = vld [vmem:[%s15530_s10 + $0x318] sm:$0xff] }
 0x9b7   :  { %16427 = vst [vmem:[#allocation35_spill] sm:$0xff] %v13810_v5  ;;  %8553 = vmatpush1.bf16.msra.mxu1 %v13810_v5  ;;  %v13824_v39 = vpack.c.bf16 %v3771_v2, %v3767_v33  ;;  %v3768_v33 = vld [vmem:[%s15530_s10 + $0x2d0] sm:$0xff]  ;;  %v3779_v41 = vld [vmem:[%s15530_s10 + $0x328] sm:$0xff] }
 0x9b8   :  { %16426 = vst [vmem:[#allocation34_spill] sm:$0xff] %v13801_v15  ;;  %16429 = vst [vmem:[#allocation37_spill] sm:$0xff] %v13835_v25  ;;  %v3772_v2 = vld [vmem:[%s15530_s10 + $0x2f0] sm:$0xff]  ;;  %8555 = vmatprep.subr.bf16.mxu1 %v13835_v25 }
 0x9b9   :  { %8489 = vmatpush1.bf16.msra.mxu0 %v13801_v15  ;;  %16428 = vst [vmem:[#allocation36_spill] sm:$0xff] %v13824_v39  ;;  %v3770_v15 = vld [vmem:[%s15530_s10 + $0x2e0] sm:$0xff]  ;;  %v13846_v5 = vpack.c.bf16 %v3772_v2, %v3768_v33  ;;  %v3781_v33 = vld [vmem:[%s15530_s10 + $0x338] sm:$0xff] }
 0x9ba   :  { %v13837_v58 = vpack.c.bf16 %v3770_v15, %v3766_v19  ;;  %8491 = vmatprep.subr.bf16.mxu0 %v13824_v39  ;;  %v3775_v15 = vld [vmem:[%s15530_s10 + $0x308] sm:$0xff]  ;;  %v3774_v2 = vld [vmem:[%s15530_s10 + $0x300] sm:$0xff]  ;;  %v13871_v25 = vpack.c.bf16 %v3781_v33, %v3777_v23  ;;  %v3785_v23 = vld [vmem:[%s15530_s10 + $0x358] sm:$0xff] }
 0x9bb   :  { %16431 = vst [vmem:[#allocation39_spill] sm:$0xff] %v13846_v5  ;;  %8557 = vmatpush1.bf16.msra.mxu1 %v13846_v5  ;;  %v13860_v19 = vpack.c.bf16 %v3779_v41, %v3775_v15  ;;  %v3776_v15 = vld [vmem:[%s15530_s10 + $0x310] sm:$0xff]  ;;  %v3783_v5 = vld [vmem:[%s15530_s10 + $0x348] sm:$0xff]  ;;  %v3789_v33 = vld [vmem:[%s15530_s10 + $0x378] sm:$0xff] }
 0x9bc   :  { %16430 = vst [vmem:[#allocation38_spill] sm:$0xff] %v13837_v58  ;;  %16433 = vst [vmem:[#allocation41_spill] sm:$0xff] %v13871_v25  ;;  %v3780_v41 = vld [vmem:[%s15530_s10 + $0x330] sm:$0xff]  ;;  %8559 = vmatprep.subr.bf16.mxu1 %v13871_v25 }
 0x9bd   :  { %8493 = vmatpush1.bf16.msra.mxu0 %v13837_v58  ;;  %16432 = vst [vmem:[#allocation40_spill] sm:$0xff] %v13860_v19  ;;  %v3778_v58 = vld [vmem:[%s15530_s10 + $0x320] sm:$0xff]  ;;  %v13885_v35 = vpack.c.bf16 %v3780_v41, %v3776_v15  ;;  %v13900_v15 = vpack.c.bf16 %v3789_v33, %v3785_v23  ;;  %v3795_v23 = vld [vmem:[%s15530_s10 + $0x3a8] sm:$0xff] }
 0x9be   :  { %v13873_v39 = vpack.c.bf16 %v3778_v58, %v3774_v2  ;;  %8495 = vmatprep.subr.bf16.mxu0 %v13860_v19  ;;  %v3787_v58 = vld [vmem:[%s15530_s10 + $0x368] sm:$0xff]  ;;  %v3782_v41 = vld [vmem:[%s15530_s10 + $0x340] sm:$0xff] }
 0x9bf   :  { %16435 = vst [vmem:[#allocation43_spill] sm:$0xff] %v13885_v35  ;;  %v13898_v2 = vpack.c.bf16 %v3787_v58, %v3783_v5  ;;  %16437 = vst [vmem:[#allocation45_spill] sm:$0xff] %v13900_v15  ;;  %v3786_v19 = vld [vmem:[%s15530_s10 + $0x360] sm:$0xff]  ;;  %8561 = vmatpush1.bf16.msra.mxu1 %v13885_v35  ;;  %v3788_v5 = vld [vmem:[%s15530_s10 + $0x370] sm:$0xff] }
 0x9c0   :  { %16434 = vst [vmem:[#allocation42_spill] sm:$0xff] %v13873_v39  ;;  %v13912_v25 = vpack.c.bf16 %v3786_v19, %v3782_v41  ;;  %v3791_v58 = vld [vmem:[%s15530_s10 + $0x388] sm:$0xff]  ;;  %8563 = vmatprep.subr.bf16.mxu1 %v13900_v15  ;;  %v13925_v33 = vpack.c.bf16 %v3788_v5, %v3784_v26  ;;  %v3793_v41 = vld [vmem:[%s15530_s10 + $0x398] sm:$0xff]  ;;  %v3794_v26 = vld [vmem:[%s15530_s10 + $0x3a0] sm:$0xff] }
 0x9c1   :  { %8497 = vmatpush1.bf16.msra.mxu0 %v13873_v39  ;;  %16436 = vst [vmem:[#allocation44_spill] sm:$0xff] %v13898_v2  ;;  %v13927_v19 = vpack.c.bf16 %v3795_v23, %v3791_v58  ;;  %v3797_v35 = vld [vmem:[%s15530_s10 + $0x3b8] sm:$0xff]  ;;  %v3790_v39 = vld [vmem:[%s15530_s10 + $0x380] sm:$0xff]  ;;  %v3792_v5 = vld [vmem:[%s15530_s10 + $0x390] sm:$0xff] }
 0x9c2   :  { %16438 = vst [vmem:[#allocation46_spill] sm:$0xff] %v13912_v25  ;;  %8499 = vmatprep.subr.bf16.mxu0 %v13898_v2  ;;  %16439 = vst [vmem:[#allocation47_spill] sm:$0xff] %v13925_v33  ;;  %v13938_v55 = vpack.c.bf16 %v3797_v35, %v3793_v41  ;;  %v3796_v58 = vld [vmem:[%s15530_s10 + $0x3b0] sm:$0xff]  ;;  %v13950_v23 = vpack.c.bf16 %v3794_v26, %v3790_v39  ;;  %v3799_v35 = vld [vmem:[%s15530_s10 + $0x3c8] sm:$0xff] }
 0x9c3   :  { %16440 = vst [vmem:[#allocation48_spill] sm:$0xff] %v13927_v19  ;;  %v3803_v41 = vld [vmem:[%s15530_s10 + $0x3e8] sm:$0xff]  ;;  %v3801_v15 = vld [vmem:[%s15530_s10 + $0x3d8] sm:$0xff]  ;;  %8565 = vmatpush1.bf16.msra.mxu1 %v13925_v33  ;;  %v13963_v2 = vpack.c.bf16 %v3796_v58, %v3792_v5  ;;  %v3800_v5 = vld [vmem:[%s15530_s10 + $0x3d0] sm:$0xff] }
 0x9c4   :  { %16441 = vst [vmem:[#allocation49_spill] sm:$0xff] %v13938_v55  ;;  %16442 = vst [vmem:[#allocation50_spill] sm:$0xff] %v13950_v23  ;;  %v13965_v39 = vpack.c.bf16 %v3803_v41, %v3799_v35  ;;  %v3805_v26 = vld [vmem:[%s15530_s10 + $0x3f8] sm:$0xff]  ;;  %8567 = vmatprep.subr.bf16.mxu1 %v13938_v55  ;;  %v3804_v58 = vld [vmem:[%s15530_s10 + $0x3f0] sm:$0xff] }
 0x9c5   :  { %8501 = vmatpush1.bf16.msra.mxu0 %v13912_v25  ;;  %16443 = vst [vmem:[#allocation51_spill] sm:$0xff] %v13963_v2  ;;  %v3798_v25 = vld [vmem:[%s15530_s10 + $0x3c0] sm:$0xff]  ;;  %v13977_v33 = vpack.c.bf16 %v3805_v26, %v3801_v15  ;;  %v13990_v41 = vpack.c.bf16 %v3804_v58, %v3800_v5 }
 0x9c6   :  { %8503 = vmatprep.subr.bf16.mxu0 %v13927_v19  ;;  %16444 = vst [vmem:[#allocation52_spill] sm:$0xff] %v13965_v39  ;;  %v13986_v35 = vpack.c.bf16 %v3802_v37, %v3798_v25 }
 0x9c7   :  { %16445 = vst [vmem:[#allocation53_spill] sm:$0xff] %v13977_v33  ;;  %8569 = vmatpush1.bf16.msra.mxu1 %v13963_v2  ;;  %16447 = vst [vmem:[#allocation55_spill] sm:$0xff] %v13990_v41 }
 0x9c8   :  { %16446 = vst [vmem:[#allocation54_spill] sm:$0xff] %v13986_v35  ;;  %8571 = vmatprep.subr.bf16.mxu1 %v13977_v33 }
 0x9c9   :  { %8505 = vmatpush1.bf16.msra.mxu0 %v13950_v23 }
 0x9ca   :  { %8507 = vmatprep.subr.bf16.mxu0 %v13965_v39 }
 0x9cb   :  { %8573 = vmatpush1.bf16.msra.mxu1 %v13990_v41 }
 0x9cc   :  { %8639 = vmatprep.subr.bf16.mxu1 %v13144_v27 }
 0x9cd   :  { %8509 = vmatpush1.bf16.msra.mxu0 %v13986_v35 }
 0x9ce   :  { %8575 = vmatprep.subr.bf16.mxu0 %v13142_v24 }
 0xa21   :  { %v3115_v15 = vpop.f32.mrb[30].mxu0  ;;  %v3186_v26 = vpop.f32.mrb[38].mxu1 }
 0xa22   :  { %v3116_v37 = vadd.f32 %v3115_v15, %v16383_v57  ;;  %v3117_v25 = vpop.f32.mrb[31].mxu0  ;;  %v3188_v2 = vpop.f32.mrb[39].mxu1  ;;  %v3187_v35 = vadd.f32 %v3186_v26, %v16385_v53  ;;  %v16448_v53 = vld [vmem:[#allocation60_spill] sm:$0xff] }
 0xa23   :  { %v3118_v39 = vadd.f32 %v3117_v25, %v16384_v20 }
 0xa24   :  { %v6667_v5 = vmul.f32 -1.442695, %v3116_v37  ;;  %v16449_v37 = vld [vmem:[#allocation61_spill] sm:$0xff] }
 0xa25   :  { %v6668_v58 = vmul.f32 -1.442695, %v3118_v39  ;;  %v3281_v39 = vld [vmem:[%s15531_s7] sm:$0xf] }
 0xa26   :  { %10647 = vpow2.f32 %v6667_v5  ;;  %v3286_v26 = vrot.slane %v3281_v39, %v16448_v53 }
 0xa27   :  { %10649 = vpow2.f32 %v6668_v58 }
 0xa28   :  { %10651 = vtanh.f32 %v3187_v35 }
 0xa30   :  { %v10648_v33 = vpop.eup %10647 }
 0xa31   :  { %v10650_v41 = vpop.eup %10649  ;;  %v3194_v23 = vadd.f32 1.0, %v10648_v33  ;;  %v3290_v33 = vrot.slane %v3281_v39, %v16449_v37 }
 0xa32   :  { %v3200_v24 = vadd.f32 1.0, %v10650_v41  ;;  %v10652_v27 = vpop.eup %10651 }
 0xa33   :  { %10653 = vrcp.f32 %v3194_v23 }
 0xa34   :  { %10655 = vrcp.f32 %v3200_v24 }
 0xa3d   :  { %v10654_v55 = vpop.eup %10653 }
 0xa3e   :  { %v10656_v57 = vpop.eup %10655  ;;  %v3211_v15 = vmul.f32 %v10654_v55, %v10652_v27  ;;  %v16450_v55 = vld [vmem:[#allocation67_spill] sm:$0xff] }
 0xa3f   :  { %v3210_v19 = vmul.f32 %v10656_v57, %v12927_v38  ;;  %v3298_v38 = vrot.slane %v3281_v39, %v16450_v55 }
 0xa41   :  { %v14001_v20 = vadd.f32 %v3211_v15, %v3210_v19  ;;  %v3189_v19 = vadd.f32 %v3188_v2, %v12236_v32  ;;  %v16451_v15 = vld [vmem:[#allocation66_spill] sm:$0xff] }
 0xa42   :  { %v3294_v30 = vrot.slane %v3281_v39, %v16451_v15 }
 0xa43   :  { %v6669_v34 = vmul.f32 -1.442695, %v3189_v19  ;;  %v4062_v19 = vld [vmem:[%s15529_s8 + $0x228] sm:$0xff] }
 0xa61   :  { %v3578_v35 = vpop.f32.mrb[32].mxu0  ;;  %v3649_v41 = vpop.f32.mrb[40].mxu1 }
 0xa62   :  { %v10398_v23 = vadd.f32 %v3578_v35, %v3286_v26  ;;  %v3580_v24 = vpop.f32.mrb[33].mxu0  ;;  %v3651_v25 = vpop.f32.mrb[41].mxu1  ;;  %v10400_v46 = vadd.f32 %v3649_v41, %v3294_v30 }
 0xa63   :  { %v10399_v5 = vadd.f32 %v3580_v24, %v3290_v33  ;;  %v10401_v57 = vadd.f32 %v3651_v25, %v3298_v38 }
 0xa64   :  { %v6670_v58 = vmul.f32 -1.442695, %v10398_v23 }
 0xa65   :  { %v6671_v27 = vmul.f32 -1.442695, %v10399_v5  ;;  %v6672_v36 = vmul.f32 -1.442695, %v10401_v57  ;;  %v4060_v57 = vld [vmem:[%s15529_s8 + $0x218] sm:$0xff] }
 0xa66   :  { %10657 = vpow2.f32 %v6670_v58 }
 0xa67   :  { %10659 = vpow2.f32 %v6671_v27 }
 0xa68   :  { %10661 = vpow2.f32 %v6669_v34 }
 0xa69   :  { %10663 = vpow2.f32 %v6672_v36 }
 0xa6a   :  { %10665 = vtanh.f32 %v10400_v46 }
 0xa70   :  { %v10658_v63 = vpop.eup %10657 }
 0xa71   :  { %v10660_v26 = vpop.eup %10659  ;;  %v3657_v35 = vadd.f32 1.0, %v10658_v63 }
 0xa72   :  { %v3663_v33 = vadd.f32 1.0, %v10660_v26  ;;  %v10662_v23 = vpop.eup %10661 }
 0xa73   :  { %10667 = vrcp.f32 %v3657_v35  ;;  %v10664_v24 = vpop.eup %10663  ;;  %v3207_v27 = vadd.f32 1.0, %v10662_v23  ;;  %v4064_v35 = vld [vmem:[%s15529_s8 + $0x238] sm:$0xff]  ;;  %v4061_v23 = vld [vmem:[%s15529_s8 + $0x220] sm:$0xff] }
 0xa74   :  { %10669 = vrcp.f32 %v3663_v33  ;;  %v10666_v5 = vpop.eup %10665  ;;  %v3670_v25 = vadd.f32 1.0, %v10664_v24  ;;  %v4057_v33 = vld [vmem:[%s15529_s8 + $0x200] sm:$0xff]  ;;  %v14070_v24 = vpack.c.bf16 %v4064_v35, %v4060_v57  ;;  %v4071_v57 = vld [vmem:[%s15529_s8 + $0x270] sm:$0xff] }
 0xa75   :  { %10671 = vtanh.f32 %v14001_v20 }
 0xa76   :  { %10673 = vrcp.f32 %v3670_v25  ;;  %v4066_v25 = vld [vmem:[%s15529_s8 + $0x248] sm:$0xff] }
 0xa7d   :  { %v10668_v58 = vpop.eup %10667 }
 0xa7e   :  { %v10670_v32 = vpop.eup %10669  ;;  %v3674_v2 = vmul.f32 %v10668_v58, %v10666_v5  ;;  %v14072_v5 = vpack.c.bf16 %v4061_v23, %v4057_v33  ;;  %v4059_v58 = vld [vmem:[%s15529_s8 + $0x210] sm:$0xff]  ;;  %v4074_v33 = vld [vmem:[%s15529_s8 + $0x288] sm:$0xff] }
 0xa7f   :  { %v3673_v39 = vmul.f32 %v10670_v32, %v12934_v49  ;;  %v10672_v63 = vpop.eup %10671  ;;  %v4058_v49 = vld [vmem:[%s15529_s8 + $0x208] sm:$0xff]  ;;  %v4063_v32 = vld [vmem:[%s15529_s8 + $0x230] sm:$0xff] }
 0xa80   :  { %v10674_v46 = vpop.eup %10673  ;;  %v14059_v26 = vpack.c.bf16 %v4062_v19, %v4058_v49  ;;  %v4067_v19 = vld [vmem:[%s15529_s8 + $0x250] sm:$0xff]  ;;  %v4078_v23 = vld [vmem:[%s15529_s8 + $0x2a8] sm:$0xff] }
 0xa81   :  { %v14012_v30 = vadd.f32 %v3674_v2, %v3673_v39  ;;  %v14081_v2 = vpack.c.bf16 %v4063_v32, %v4059_v58  ;;  %v4070_v39 = vld [vmem:[%s15529_s8 + $0x268] sm:$0xff]  ;;  %v14117_v35 = vpack.c.bf16 %v4071_v57, %v4067_v19  ;;  %v4076_v58 = vld [vmem:[%s15529_s8 + $0x298] sm:$0xff]  ;;  %v14131_v32 = vpack.c.bf16 %v4078_v23, %v4074_v33  ;;  %v4079_v19 = vld [vmem:[%s15529_s8 + $0x2b0] sm:$0xff] }
 0xa82   :  { %v4082_v33 = vld [vmem:[%s15529_s8 + $0x2c8] sm:$0xff] }
 0xa83   :  { %10675 = vtanh.f32 %v14012_v30  ;;  %16452 = vst [vmem:[#allocation56_spill] sm:$0xff] %v14081_v2  ;;  %16456 = vst [vmem:[#allocation72_spill] sm:$0xff] %v14117_v35  ;;  %v4086_v23 = vld [vmem:[%s15529_s8 + $0x2e8] sm:$0xff] }
 0xa84   :  { %10677 = vrcp.f32 %v3207_v27  ;;  %v4068_v27 = vld [vmem:[%s15529_s8 + $0x258] sm:$0xff]  ;;  %16457 = vst [vmem:[#allocation73_spill] sm:$0xff] %v14131_v32 }
 0xa8d   :  { %v10676_v36 = vpop.eup %10675 }
 0xa8e   :  { %v10678_v34 = vpop.eup %10677  ;;  %v14016_v41 = vmul.f32 %v10676_v36, %v10674_v46  ;;  %v4072_v46 = vld [vmem:[%s15529_s8 + $0x278] sm:$0xff]  ;;  %v4065_v36 = vld [vmem:[%s15529_s8 + $0x240] sm:$0xff] }
 0xa8f   :  { %v3214_v38 = vmul.f32 %v10678_v34, %v10672_v63  ;;  %v14095_v63 = vpack.c.bf16 %v4070_v39, %v4066_v25  ;;  %v4069_v34 = vld [vmem:[%s15529_s8 + $0x260] sm:$0xff]  ;;  %v4080_v25 = vld [vmem:[%s15529_s8 + $0x2b8] sm:$0xff] }
 0xa90   :  { %3891 = vmatprep.mubr.f32.mxu0 %v14016_v41  ;;  %3962 = vmatprep.mubr.f32.mxu1 %v14016_v41  ;;  %v14108_v49 = vpack.c.bf16 %v4069_v34, %v4065_v36  ;;  %v4073_v39 = vld [vmem:[%s15529_s8 + $0x280] sm:$0xff]  ;;  %v4075_v34 = vld [vmem:[%s15529_s8 + $0x290] sm:$0xff] }
 0xa91   :  { %3892 = vmatmul.mubr.f32.vlgmr.msra.gmra.mrb[34].mxu0 %v3214_v38  ;;  %3963 = vmatmul.mubr.f32.vlgmr.msra.gmra.mrb[42].mxu1 %v3214_v38  ;;  %16453 = vst [vmem:[#allocation57_spill] sm:$0xff] %v14095_v63  ;;  %v14106_v38 = vpack.c.bf16 %v4072_v46, %v4068_v27  ;;  %v4077_v27 = vld [vmem:[%s15529_s8 + $0x2a0] sm:$0xff]  ;;  %v14142_v46 = vpack.c.bf16 %v4080_v25, %v4076_v58  ;;  %v4084_v58 = vld [vmem:[%s15529_s8 + $0x2d8] sm:$0xff] }
 0xa92   :  { %8577 = vmatpush1.bf16.msra.mxu0 %v13167_v9  ;;  %8641 = vmatpush1.bf16.msra.mxu1 %v13169_v8  ;;  %16455 = vst [vmem:[#allocation59_spill] sm:$0xff] %v14108_v49  ;;  %v14144_v36 = vpack.c.bf16 %v4077_v27, %v4073_v39  ;;  %v14153_v57 = vpack.c.bf16 %v4079_v19, %v4075_v34  ;;  %v4088_v39 = vld [vmem:[%s15529_s8 + $0x2f8] sm:$0xff]  ;;  %v4081_v27 = vld [vmem:[%s15529_s8 + $0x2c0] sm:$0xff] }
 0xa93   :  { %8579 = vmatprep.subr.bf16.mxu0 %v13179_v17  ;;  %8643 = vmatprep.subr.bf16.mxu1 %v13181_v22  ;;  %16454 = vst [vmem:[#allocation58_spill] sm:$0xff] %v14106_v38  ;;  %16458 = vst [vmem:[#allocation74_spill] sm:$0xff] %v14142_v46  ;;  %v14167_v25 = vpack.c.bf16 %v4086_v23, %v4082_v33  ;;  %v4085_v34 = vld [vmem:[%s15529_s8 + $0x2e0] sm:$0xff]  ;;  %v14178_v19 = vpack.c.bf16 %v4088_v39, %v4084_v58  ;;  %v4083_v33 = vld [vmem:[%s15529_s8 + $0x2d0] sm:$0xff] }
 0xa94   :  { %16459 = vst [vmem:[#allocation64_spill] sm:$0xff] %v14144_v36  ;;  %16460 = vst [vmem:[#allocation67_spill] sm:$0xff] %v14153_v57  ;;  %v4087_v23 = vld [vmem:[%s15529_s8 + $0x2f0] sm:$0xff]  ;;  %v4090_v58 = vld [vmem:[%s15529_s8 + $0x308] sm:$0xff] }
 0xa95   :  { %16461 = vst [vmem:[#allocation66_spill] sm:$0xff] %v14167_v25  ;;  %16462 = vst [vmem:[#allocation75_spill] sm:$0xff] %v14178_v19  ;;  %v4094_v39 = vld [vmem:[%s15529_s8 + $0x328] sm:$0xff] }
 0xa96   :  { %8581 = vmatpush1.bf16.msra.mxu0 %v13203_v6  ;;  %8645 = vmatpush1.bf16.msra.mxu1 %v13205_v29 }
 0xa97   :  { %8583 = vmatprep.subr.bf16.mxu0 %v13215_v54  ;;  %8647 = vmatprep.subr.bf16.mxu1 %v13217_v61 }
 0xa9a   :  { %8585 = vmatpush1.bf16.msra.mxu0 %v13241_v21  ;;  %8649 = vmatpush1.bf16.msra.mxu1 %v13243_v28 }
 0xa9b   :  { %8587 = vmatprep.subr.bf16.mxu0 %v13253_v43  ;;  %8651 = vmatprep.subr.bf16.mxu1 %v13255_v50 }
 0xa9e   :  { %8589 = vmatpush1.bf16.msra.mxu0 %v13277_v31  ;;  %8653 = vmatpush1.bf16.msra.mxu1 %v13279_v3 }
 0xa9f   :  { %8591 = vmatprep.subr.bf16.mxu0 %v13289_v47  ;;  %8655 = vmatprep.subr.bf16.mxu1 %v13291_v51 }
 0xaa2   :  { %8593 = vmatpush1.bf16.msra.mxu0 %v13313_v1  ;;  %8657 = vmatpush1.bf16.msra.mxu1 %v13315_v56 }
 0xaa3   :  { %8595 = vmatprep.subr.bf16.mxu0 %v13325_v18  ;;  %8659 = vmatprep.subr.bf16.mxu1 %v13327_v45 }
 0xaa6   :  { %8597 = vmatpush1.bf16.msra.mxu0 %v13349_v52  ;;  %8661 = vmatpush1.bf16.msra.mxu1 %v13351_v0 }
 0xaa7   :  { %8599 = vmatprep.subr.bf16.mxu0 %v13361_v62  ;;  %8663 = vmatprep.subr.bf16.mxu1 %v13363_v4 }
 0xaaa   :  { %8601 = vmatpush1.bf16.msra.mxu0 %v13385_v59  ;;  %8665 = vmatpush1.bf16.msra.mxu1 %v13387_v60 }
 0xaab   :  { %8603 = vmatprep.subr.bf16.mxu0 %v13394_v10  ;;  %8667 = vmatprep.subr.bf16.mxu1 %v13396_v14 }
 0xaae   :  { %8605 = vmatpush1.bf16.msra.mxu0 %v13409_v42  ;;  %8669 = vmatpush1.bf16.msra.mxu1 %v13411_v40 }
 0xaaf   :  { %8607 = vmatprep.subr.bf16.mxu0 %v14059_v26  ;;  %8671 = vmatprep.subr.bf16.mxu1 %v14070_v24 }
 0xab2   :  { %8609 = vmatpush1.bf16.msra.mxu0 %v14072_v5  ;;  %8673 = vmatpush1.bf16.msra.mxu1 %v14081_v2 }
 0xab3   :  { %8611 = vmatprep.subr.bf16.mxu0 %v14095_v63  ;;  %8675 = vmatprep.subr.bf16.mxu1 %v14106_v38 }
 0xab6   :  { %8613 = vmatpush1.bf16.msra.mxu0 %v14108_v49  ;;  %8677 = vmatpush1.bf16.msra.mxu1 %v14117_v35 }
 0xab7   :  { %8615 = vmatprep.subr.bf16.mxu0 %v14131_v32  ;;  %8679 = vmatprep.subr.bf16.mxu1 %v14142_v46  ;;  %v4107_v32 = vld [vmem:[%s15529_s8 + $0x390] sm:$0xff] }
 0xaba   :  { %8617 = vmatpush1.bf16.msra.mxu0 %v14144_v36  ;;  %8681 = vmatpush1.bf16.msra.mxu1 %v14153_v57  ;;  %v14180_v36 = vpack.c.bf16 %v4085_v34, %v4081_v27  ;;  %v14189_v57 = vpack.c.bf16 %v4087_v23, %v4083_v33  ;;  %v4092_v27 = vld [vmem:[%s15529_s8 + $0x318] sm:$0xff]  ;;  %v14203_v34 = vpack.c.bf16 %v4094_v39, %v4090_v58  ;;  %v4089_v23 = vld [vmem:[%s15529_s8 + $0x300] sm:$0xff]  ;;  %v4091_v58 = vld [vmem:[%s15529_s8 + $0x310] sm:$0xff] }
 0xabb   :  { %8619 = vmatprep.subr.bf16.mxu0 %v14167_v25  ;;  %8683 = vmatprep.subr.bf16.mxu1 %v14178_v19  ;;  %v4096_v33 = vld [vmem:[%s15529_s8 + $0x338] sm:$0xff]  ;;  %v4095_v39 = vld [vmem:[%s15529_s8 + $0x330] sm:$0xff] }
 0xabc   :  { %16463 = vst [vmem:[#allocation76_spill] sm:$0xff] %v14180_v36  ;;  %16464 = vst [vmem:[#allocation77_spill] sm:$0xff] %v14189_v57  ;;  %v14214_v19 = vpack.c.bf16 %v4096_v33, %v4092_v27  ;;  %v4102_v27 = vld [vmem:[%s15529_s8 + $0x368] sm:$0xff]  ;;  %v4100_v33 = vld [vmem:[%s15529_s8 + $0x358] sm:$0xff] }
 0xabd   :  { %16465 = vst [vmem:[#allocation78_spill] sm:$0xff] %v14203_v34 }
 0xabe   :  { %8621 = vmatpush1.bf16.msra.mxu0 %v14180_v36  ;;  %8685 = vmatpush1.bf16.msra.mxu1 %v14189_v57  ;;  %v4093_v36 = vld [vmem:[%s15529_s8 + $0x320] sm:$0xff]  ;;  %16466 = vst [vmem:[#allocation79_spill] sm:$0xff] %v14214_v19  ;;  %v14225_v57 = vpack.c.bf16 %v4095_v39, %v4091_v58  ;;  %v4104_v58 = vld [vmem:[%s15529_s8 + $0x378] sm:$0xff] }
 0xabf   :  { %v14216_v25 = vpack.c.bf16 %v4093_v36, %v4089_v23  ;;  %8623 = vmatprep.subr.bf16.mxu0 %v14203_v34  ;;  %8687 = vmatprep.subr.bf16.mxu1 %v14214_v19  ;;  %v4098_v36 = vld [vmem:[%s15529_s8 + $0x348] sm:$0xff]  ;;  %v4097_v39 = vld [vmem:[%s15529_s8 + $0x340] sm:$0xff]  ;;  %v14250_v19 = vpack.c.bf16 %v4104_v58, %v4100_v33  ;;  %v4108_v33 = vld [vmem:[%s15529_s8 + $0x398] sm:$0xff] }
 0xac0   :  { %16468 = vst [vmem:[#allocation81_spill] sm:$0xff] %v14225_v57  ;;  %v14239_v23 = vpack.c.bf16 %v4102_v27, %v4098_v36  ;;  %v4099_v36 = vld [vmem:[%s15529_s8 + $0x350] sm:$0xff]  ;;  %v4112_v58 = vld [vmem:[%s15529_s8 + $0x3b8] sm:$0xff] }
 0xac1   :  { %16467 = vst [vmem:[#allocation80_spill] sm:$0xff] %v14216_v25  ;;  %16470 = vst [vmem:[#allocation83_spill] sm:$0xff] %v14250_v19  ;;  %v4103_v27 = vld [vmem:[%s15529_s8 + $0x370] sm:$0xff] }
 0xac2   :  { %8625 = vmatpush1.bf16.msra.mxu0 %v14216_v25  ;;  %8689 = vmatpush1.bf16.msra.mxu1 %v14225_v57  ;;  %16469 = vst [vmem:[#allocation82_spill] sm:$0xff] %v14239_v23  ;;  %v4101_v25 = vld [vmem:[%s15529_s8 + $0x360] sm:$0xff]  ;;  %v4106_v57 = vld [vmem:[%s15529_s8 + $0x388] sm:$0xff]  ;;  %v14264_v46 = vpack.c.bf16 %v4103_v27, %v4099_v36  ;;  %v14279_v36 = vpack.c.bf16 %v4112_v58, %v4108_v33 }
 0xac3   :  { %v14252_v34 = vpack.c.bf16 %v4101_v25, %v4097_v39  ;;  %8627 = vmatprep.subr.bf16.mxu0 %v14239_v23  ;;  %v4110_v25 = vld [vmem:[%s15529_s8 + $0x3a8] sm:$0xff]  ;;  %8691 = vmatprep.subr.bf16.mxu1 %v14250_v19  ;;  %v4105_v27 = vld [vmem:[%s15529_s8 + $0x380] sm:$0xff] }
 0xac4   :  { %16472 = vst [vmem:[#allocation85_spill] sm:$0xff] %v14264_v46  ;;  %v14277_v39 = vpack.c.bf16 %v4110_v25, %v4106_v57  ;;  %16474 = vst [vmem:[#allocation87_spill] sm:$0xff] %v14279_v36  ;;  %v4109_v23 = vld [vmem:[%s15529_s8 + $0x3a0] sm:$0xff]  ;;  %v4111_v57 = vld [vmem:[%s15529_s8 + $0x3b0] sm:$0xff] }
 0xac5   :  { %16471 = vst [vmem:[#allocation84_spill] sm:$0xff] %v14252_v34  ;;  %v14291_v19 = vpack.c.bf16 %v4109_v23, %v4105_v27  ;;  %v4114_v25 = vld [vmem:[%s15529_s8 + $0x3c8] sm:$0xff]  ;;  %v14304_v58 = vpack.c.bf16 %v4111_v57, %v4107_v32  ;;  %v4116_v27 = vld [vmem:[%s15529_s8 + $0x3d8] sm:$0xff]  ;;  %v4117_v32 = vld [vmem:[%s15529_s8 + $0x3e0] sm:$0xff] }
 0xac6   :  { %8629 = vmatpush1.bf16.msra.mxu0 %v14252_v34  ;;  %16473 = vst [vmem:[#allocation86_spill] sm:$0xff] %v14277_v39  ;;  %8693 = vmatpush1.bf16.msra.mxu1 %v14264_v46  ;;  %v4118_v33 = vld [vmem:[%s15529_s8 + $0x3e8] sm:$0xff]  ;;  %v4120_v46 = vld [vmem:[%s15529_s8 + $0x3f8] sm:$0xff]  ;;  %v4113_v34 = vld [vmem:[%s15529_s8 + $0x3c0] sm:$0xff] }
 0xac7   :  { %16475 = vst [vmem:[#allocation88_spill] sm:$0xff] %v14291_v19  ;;  %8631 = vmatprep.subr.bf16.mxu0 %v14277_v39  ;;  %8695 = vmatprep.subr.bf16.mxu1 %v14279_v36  ;;  %16476 = vst [vmem:[#allocation89_spill] sm:$0xff] %v14304_v58  ;;  %v14306_v23 = vpack.c.bf16 %v4118_v33, %v4114_v25  ;;  %v14317_v35 = vpack.c.bf16 %v4120_v46, %v4116_v27  ;;  %v4115_v57 = vld [vmem:[%s15529_s8 + $0x3d0] sm:$0xff] }
 0xac8   :  { %v4119_v25 = vld [vmem:[%s15529_s8 + $0x3f0] sm:$0xff]  ;;  %v14329_v33 = vpack.c.bf16 %v4117_v32, %v4113_v34  ;;  %v3216_v34 = vld [vmem:[%s15532_s11] sm:$0xf] }
 0xac9   :  { %16477 = vst [vmem:[#allocation90_spill] sm:$0xff] %v14306_v23  ;;  %16478 = vst [vmem:[#allocation91_spill] sm:$0xff] %v14317_v35  ;;  %v14333_v46 = vpack.c.bf16 %v4119_v25, %v4115_v57  ;;  %v14344_v27 = vrot.slane %v3216_v34, %v16448_v53  ;;  %v14347_v32 = vrot.slane %v3216_v34, %v16449_v37 }
 0xaca   :  { %8633 = vmatpush1.bf16.msra.mxu0 %v14291_v19  ;;  %16479 = vst [vmem:[#allocation92_spill] sm:$0xff] %v14329_v33  ;;  %8697 = vmatpush1.bf16.msra.mxu1 %v14304_v58  ;;  %v14356_v36 = vrot.slane %v3216_v34, %v16451_v15 }
 0xacb   :  { %8635 = vmatprep.subr.bf16.mxu0 %v14306_v23  ;;  %16480 = vst [vmem:[#allocation93_spill] sm:$0xff] %v14333_v46  ;;  %8699 = vmatprep.subr.bf16.mxu1 %v14317_v35  ;;  %16481 = vst [vmem:[#allocation94_spill] sm:$0xff] %v14344_v27 }
 0xacc   :  { %16482 = vst [vmem:[#allocation95_spill] sm:$0xff] %v14347_v32 }
 0xace   :  { %8637 = vmatpush1.bf16.msra.mxu0 %v14329_v33  ;;  %8701 = vmatpush1.bf16.msra.mxu1 %v14333_v46 }
 0xacf   :  { %8703 = vmatprep.subr.bf16.mxu0 %v13428_v7  ;;  %8767 = vmatprep.subr.bf16.mxu1 %v13439_v16  ;;  %v14352_v16 = vrot.slane %v3216_v34, %v16450_v55 }
 0xad1   :  { %16483 = vst [vmem:[#allocation96_spill] sm:$0xff] %v14352_v16 }
 0xb64   :  { %v3893_v57 = vpop.f32.mrb[34].mxu0  ;;  %v3964_v25 = vpop.f32.mrb[42].mxu1 }
 0xb65   :  { %v3894_v33 = vadd.f32 %v3893_v57, %v14344_v27  ;;  %v3895_v35 = vpop.f32.mrb[35].mxu0  ;;  %v3966_v46 = vpop.f32.mrb[43].mxu1  ;;  %v3965_v49 = vadd.f32 %v3964_v25, %v14356_v36 }
 0xb66   :  { %v3896_v7 = vadd.f32 %v3895_v35, %v14347_v32  ;;  %v3967_v19 = vadd.f32 %v3966_v46, %v14352_v16 }
 0xb67   :  { %v6673_v23 = vmul.f32 -1.442695, %v3894_v33 }
 0xb68   :  { %v6674_v58 = vmul.f32 -1.442695, %v3896_v7  ;;  %v6675_v39 = vmul.f32 -1.442695, %v3967_v19 }
 0xb69   :  { %10679 = vpow2.f32 %v6673_v23 }
 0xb6a   :  { %10681 = vpow2.f32 %v6674_v58 }
 0xb6b   :  { %10683 = vpow2.f32 %v6675_v39 }
 0xb6c   :  { %10685 = vtanh.f32 %v3965_v49  ;;  %v16487_v49 = vld [vmem:[#allocation68_spill] sm:$0xff] }
 0xb73   :  { %v10680_v57 = vpop.eup %10679 }
 0xb74   :  { %v10682_v27 = vpop.eup %10681  ;;  %v3972_v38 = vadd.f32 1.0, %v10680_v57  ;;  %v16491_v57 = vld [vmem:[#allocation5_spill] sm:$0xff] }
 0xb75   :  { %v3978_v35 = vadd.f32 1.0, %v10682_v27  ;;  %v10684_v33 = vpop.eup %10683  ;;  %v16488_v27 = vld [vmem:[#allocation2_spill] sm:$0xff] }
 0xb76   :  { %10687 = vrcp.f32 %v3972_v38  ;;  %v10686_v7 = vpop.eup %10685  ;;  %v3985_v46 = vadd.f32 1.0, %v10684_v33  ;;  %v16486_v38 = vld [vmem:[#allocation69_spill] sm:$0xff]  ;;  %v16493_v33 = vld [vmem:[#allocation7_spill] sm:$0xff] }
 0xb77   :  { %10689 = vrcp.f32 %v3978_v35  ;;  %v16492_v35 = vld [vmem:[#allocation6_spill] sm:$0xff] }
 0xb78   :  { %10691 = vrcp.f32 %v3985_v46  ;;  %v16497_v46 = vld [vmem:[#allocation11_spill] sm:$0xff] }
 0xb80   :  { %v10688_v23 = vpop.eup %10687 }
 0xb81   :  { %v10690_v58 = vpop.eup %10689  ;;  %v3989_v32 = vmul.f32 %v10688_v23, %v10686_v7  ;;  %v16494_v7 = vld [vmem:[#allocation8_spill] sm:$0xff]  ;;  %v16495_v23 = vld [vmem:[#allocation9_spill] sm:$0xff] }
 0xb82   :  { %v3988_v34 = vmul.f32 %v10690_v58, %v14001_v20  ;;  %v10692_v19 = vpop.eup %10691  ;;  %v16485_v20 = vld [vmem:[#allocation65_spill] sm:$0xff]  ;;  %v16496_v58 = vld [vmem:[#allocation10_spill] sm:$0xff] }
 0xb84   :  { %v14360_v16 = vadd.f32 %v3989_v32, %v3988_v34  ;;  %v16489_v32 = vld [vmem:[#allocation3_spill] sm:$0xff]  ;;  %v16498_v34 = vld [vmem:[#allocation12_spill] sm:$0xff] }
 0xb86   :  { %10693 = vtanh.f32 %v14360_v16 }
 0xb90   :  { %v10694_v25 = vpop.eup %10693 }
 0xb91   :  { %v14363_v39 = vmul.f32 %v10694_v25, %v10692_v19  ;;  %v16499_v19 = vld [vmem:[#allocation13_spill] sm:$0xff]  ;;  %v16500_v25 = vld [vmem:[#allocation14_spill] sm:$0xff] }
 0xb93   :  { %16484 = vst [vmem:[#allocation97_spill] sm:$0xff] %v14363_v39  ;;  %4206 = vmatprep.mubr.f32.mxu0 %v14363_v39  ;;  %4277 = vmatprep.mubr.f32.mxu1 %v14363_v39 }
 0xb94   :  { %4207 = vmatmul.mubr.f32.vlgmr.msra.gmra.mrb[36].mxu0 %v14016_v41  ;;  %4278 = vmatmul.mubr.f32.vlgmr.msra.gmra.mrb[44].mxu1 %v14016_v41  ;;  %v16490_v41 = vld [vmem:[#allocation4_spill] sm:$0xff] }
 0xb95   :  { %8705 = vmatpush1.bf16.msra.mxu0 %v13441_v13  ;;  %8769 = vmatpush1.bf16.msra.mxu1 %v13453_v44 }
 0xb96   :  { %8707 = vmatprep.subr.bf16.mxu0 %v13466_v11  ;;  %8771 = vmatprep.subr.bf16.mxu1 %v13468_v12 }
 0xb99   :  { %8709 = vmatpush1.bf16.msra.mxu0 %v13480_v48  ;;  %8773 = vmatpush1.bf16.msra.mxu1 %v16485_v20 }
 0xb9a   :  { %8711 = vmatprep.subr.bf16.mxu0 %v16486_v38  ;;  %8775 = vmatprep.subr.bf16.mxu1 %v16487_v49 }
 0xb9d   :  { %8713 = vmatpush1.bf16.msra.mxu0 %v16488_v27  ;;  %8777 = vmatpush1.bf16.msra.mxu1 %v16489_v32 }
 0xb9e   :  { %8715 = vmatprep.subr.bf16.mxu0 %v16490_v41  ;;  %8779 = vmatprep.subr.bf16.mxu1 %v16491_v57  ;;  %v16501_v41 = vld [vmem:[#allocation15_spill] sm:$0xff]  ;;  %v16502_v57 = vld [vmem:[#allocation16_spill] sm:$0xff] }
 0xba1   :  { %8717 = vmatpush1.bf16.msra.mxu0 %v16492_v35  ;;  %8781 = vmatpush1.bf16.msra.mxu1 %v16493_v33  ;;  %v16503_v35 = vld [vmem:[#allocation17_spill] sm:$0xff]  ;;  %v16504_v33 = vld [vmem:[#allocation18_spill] sm:$0xff] }
 0xba2   :  { %8719 = vmatprep.subr.bf16.mxu0 %v16494_v7  ;;  %8783 = vmatprep.subr.bf16.mxu1 %v16495_v23  ;;  %v16505_v7 = vld [vmem:[#allocation19_spill] sm:$0xff]  ;;  %v16506_v23 = vld [vmem:[#allocation20_spill] sm:$0xff] }
 0xba5   :  { %8721 = vmatpush1.bf16.msra.mxu0 %v16496_v58  ;;  %8785 = vmatpush1.bf16.msra.mxu1 %v16497_v46  ;;  %v16507_v58 = vld [vmem:[#allocation21_spill] sm:$0xff]  ;;  %v16508_v46 = vld [vmem:[#allocation22_spill] sm:$0xff] }
 0xba6   :  { %8723 = vmatprep.subr.bf16.mxu0 %v16498_v34  ;;  %8787 = vmatprep.subr.bf16.mxu1 %v16499_v19  ;;  %v16509_v34 = vld [vmem:[#allocation23_spill] sm:$0xff]  ;;  %v16510_v19 = vld [vmem:[#allocation24_spill] sm:$0xff] }
 0xba9   :  { %8725 = vmatpush1.bf16.msra.mxu0 %v16500_v25  ;;  %8789 = vmatpush1.bf16.msra.mxu1 %v16501_v41  ;;  %v16511_v25 = vld [vmem:[#allocation25_spill] sm:$0xff]  ;;  %v16512_v41 = vld [vmem:[#allocation26_spill] sm:$0xff] }
 0xbaa   :  { %8727 = vmatprep.subr.bf16.mxu0 %v16502_v57  ;;  %8791 = vmatprep.subr.bf16.mxu1 %v16503_v35  ;;  %v16513_v57 = vld [vmem:[#allocation27_spill] sm:$0xff]  ;;  %v16514_v35 = vld [vmem:[#allocation28_spill] sm:$0xff] }
 0xbad   :  { %8729 = vmatpush1.bf16.msra.mxu0 %v16504_v33  ;;  %8793 = vmatpush1.bf16.msra.mxu1 %v16505_v7  ;;  %v16515_v33 = vld [vmem:[#allocation29_spill] sm:$0xff]  ;;  %v16516_v7 = vld [vmem:[#allocation30_spill] sm:$0xff] }
 0xbae   :  { %8731 = vmatprep.subr.bf16.mxu0 %v16506_v23  ;;  %8795 = vmatprep.subr.bf16.mxu1 %v16507_v58  ;;  %v16517_v23 = vld [vmem:[#allocation31_spill] sm:$0xff]  ;;  %v16518_v58 = vld [vmem:[#allocation32_spill] sm:$0xff] }
 0xbb1   :  { %8733 = vmatpush1.bf16.msra.mxu0 %v16508_v46  ;;  %8797 = vmatpush1.bf16.msra.mxu1 %v16509_v34  ;;  %v16519_v46 = vld [vmem:[#allocation33_spill] sm:$0xff]  ;;  %v16520_v34 = vld [vmem:[#allocation34_spill] sm:$0xff] }
 0xbb2   :  { %8735 = vmatprep.subr.bf16.mxu0 %v16510_v19  ;;  %8799 = vmatprep.subr.bf16.mxu1 %v16511_v25  ;;  %v16521_v19 = vld [vmem:[#allocation35_spill] sm:$0xff]  ;;  %v16522_v25 = vld [vmem:[#allocation36_spill] sm:$0xff] }
 0xbb5   :  { %8737 = vmatpush1.bf16.msra.mxu0 %v16512_v41  ;;  %8801 = vmatpush1.bf16.msra.mxu1 %v16513_v57  ;;  %v16523_v41 = vld [vmem:[#allocation37_spill] sm:$0xff]  ;;  %v16524_v57 = vld [vmem:[#allocation38_spill] sm:$0xff] }
 0xbb6   :  { %8739 = vmatprep.subr.bf16.mxu0 %v16514_v35  ;;  %8803 = vmatprep.subr.bf16.mxu1 %v16515_v33  ;;  %v16525_v35 = vld [vmem:[#allocation39_spill] sm:$0xff]  ;;  %v16526_v33 = vld [vmem:[#allocation40_spill] sm:$0xff] }
 0xbb9   :  { %8741 = vmatpush1.bf16.msra.mxu0 %v16516_v7  ;;  %8805 = vmatpush1.bf16.msra.mxu1 %v16517_v23  ;;  %v16527_v7 = vld [vmem:[#allocation41_spill] sm:$0xff]  ;;  %v16528_v23 = vld [vmem:[#allocation42_spill] sm:$0xff] }
 0xbba   :  { %8743 = vmatprep.subr.bf16.mxu0 %v16518_v58  ;;  %8807 = vmatprep.subr.bf16.mxu1 %v16519_v46  ;;  %v16529_v58 = vld [vmem:[#allocation43_spill] sm:$0xff]  ;;  %v16530_v46 = vld [vmem:[#allocation44_spill] sm:$0xff] }
 0xbbd   :  { %8745 = vmatpush1.bf16.msra.mxu0 %v16520_v34  ;;  %8809 = vmatpush1.bf16.msra.mxu1 %v16521_v19  ;;  %v16531_v34 = vld [vmem:[#allocation45_spill] sm:$0xff]  ;;  %v16532_v19 = vld [vmem:[#allocation46_spill] sm:$0xff] }
 0xbbe   :  { %8747 = vmatprep.subr.bf16.mxu0 %v16522_v25  ;;  %8811 = vmatprep.subr.bf16.mxu1 %v16523_v41  ;;  %v16533_v25 = vld [vmem:[#allocation47_spill] sm:$0xff]  ;;  %v16534_v41 = vld [vmem:[#allocation48_spill] sm:$0xff] }
 0xbc1   :  { %8749 = vmatpush1.bf16.msra.mxu0 %v16524_v57  ;;  %8813 = vmatpush1.bf16.msra.mxu1 %v16525_v35  ;;  %v16535_v57 = vld [vmem:[#allocation49_spill] sm:$0xff]  ;;  %v16536_v35 = vld [vmem:[#allocation50_spill] sm:$0xff] }
 0xbc2   :  { %8751 = vmatprep.subr.bf16.mxu0 %v16526_v33  ;;  %8815 = vmatprep.subr.bf16.mxu1 %v16527_v7  ;;  %v16537_v33 = vld [vmem:[#allocation51_spill] sm:$0xff]  ;;  %v16538_v7 = vld [vmem:[#allocation52_spill] sm:$0xff] }
 0xbc5   :  { %8753 = vmatpush1.bf16.msra.mxu0 %v16528_v23  ;;  %8817 = vmatpush1.bf16.msra.mxu1 %v16529_v58  ;;  %v16539_v23 = vld [vmem:[#allocation53_spill] sm:$0xff]  ;;  %v16540_v58 = vld [vmem:[#allocation54_spill] sm:$0xff] }
 0xbc6   :  { %8755 = vmatprep.subr.bf16.mxu0 %v16530_v46  ;;  %8819 = vmatprep.subr.bf16.mxu1 %v16531_v34  ;;  %v16541_v46 = vld [vmem:[#allocation55_spill] sm:$0xff] }
 0xbc7   :  { %v16542_v34 = vld [vmem:[#allocation71_spill] sm:$0xff] }
 0xbc9   :  { %8757 = vmatpush1.bf16.msra.mxu0 %v16532_v19  ;;  %8821 = vmatpush1.bf16.msra.mxu1 %v16533_v25  ;;  %v16543_v19 = vld [vmem:[#allocation62_spill] sm:$0xff] }
 0xbca   :  { %8759 = vmatprep.subr.bf16.mxu0 %v16534_v41  ;;  %8823 = vmatprep.subr.bf16.mxu1 %v16535_v57  ;;  %v3215_v57 = vld [vmem:[%s15533_s9] sm:$0xf] }
 0xbcb   :  { %v14445_v32 = vrot.slane %v3215_v57, %v16450_v55 }
 0xbcd   :  { %8761 = vmatpush1.bf16.msra.mxu0 %v16536_v35  ;;  %8825 = vmatpush1.bf16.msra.mxu1 %v16537_v33  ;;  %v14437_v35 = vrot.slane %v3215_v57, %v16448_v53  ;;  %v14440_v33 = vrot.slane %v3215_v57, %v16449_v37  ;;  %v14449_v37 = vrot.slane %v3215_v57, %v16451_v15 }
 0xbce   :  { %8763 = vmatprep.subr.bf16.mxu0 %v16538_v7  ;;  %8827 = vmatprep.subr.bf16.mxu1 %v16539_v23 }
 0xbcf   :  { %16544 = vst [vmem:[#allocation65_spill] sm:$0xff] %v14437_v35 }
 0xbd1   :  { %8765 = vmatpush1.bf16.msra.mxu0 %v16540_v58  ;;  %8829 = vmatpush1.bf16.msra.mxu1 %v16541_v46 }
 0xbd2   :  { %8831 = vmatprep.subr.bf16.mxu0 %v16542_v34  ;;  %8895 = vmatprep.subr.bf16.mxu1 %v16543_v19 }
 0xc67   :  { %v4208_v7 = vpop.f32.mrb[36].mxu0  ;;  %v4279_v23 = vpop.f32.mrb[44].mxu1 }
 0xc68   :  { %v4209_v58 = vadd.f32 %v4208_v7, %v14437_v35  ;;  %v4210_v41 = vpop.f32.mrb[37].mxu0  ;;  %v4281_v46 = vpop.f32.mrb[45].mxu1  ;;  %v4280_v49 = vadd.f32 %v4279_v23, %v14449_v37 }
 0xc69   :  { %v4211_v34 = vadd.f32 %v4210_v41, %v14440_v33  ;;  %v4282_v53 = vadd.f32 %v4281_v46, %v14445_v32 }
 0xc6a   :  { %v6676_v25 = vmul.f32 -1.442695, %v4209_v58 }
 0xc6b   :  { %v6677_v19 = vmul.f32 -1.442695, %v4211_v34  ;;  %v6678_v27 = vmul.f32 -1.442695, %v4282_v53 }
 0xc6c   :  { %10695 = vpow2.f32 %v6676_v25 }
 0xc6d   :  { %10697 = vpow2.f32 %v6677_v19 }
 0xc6e   :  { %10699 = vpow2.f32 %v6678_v27 }
 0xc6f   :  { %10701 = vtanh.f32 %v4280_v49  ;;  %v16547_v49 = vld [vmem:[#allocation72_spill] sm:$0xff] }
 0xc76   :  { %v10696_v7 = vpop.eup %10695 }
 0xc77   :  { %v10698_v35 = vpop.eup %10697  ;;  %v4287_v38 = vadd.f32 1.0, %v10696_v7  ;;  %v16549_v7 = vld [vmem:[#allocation74_spill] sm:$0xff] }
 0xc78   :  { %v4293_v41 = vadd.f32 1.0, %v10698_v35  ;;  %v10700_v55 = vpop.eup %10699  ;;  %v16548_v35 = vld [vmem:[#allocation73_spill] sm:$0xff] }
 0xc79   :  { %10703 = vrcp.f32 %v4287_v38  ;;  %v10702_v58 = vpop.eup %10701  ;;  %v4300_v46 = vadd.f32 1.0, %v10700_v55  ;;  %v16546_v38 = vld [vmem:[#allocation59_spill] sm:$0xff] }
 0xc7a   :  { %10705 = vrcp.f32 %v4293_v41  ;;  %v16550_v41 = vld [vmem:[#allocation64_spill] sm:$0xff]  ;;  %v16551_v55 = vld [vmem:[#allocation67_spill] sm:$0xff] }
 0xc7b   :  { %10707 = vrcp.f32 %v4300_v46  ;;  %v16556_v46 = vld [vmem:[#allocation78_spill] sm:$0xff] }
 0xc83   :  { %v10704_v34 = vpop.eup %10703 }
 0xc84   :  { %v10706_v19 = vpop.eup %10705  ;;  %v4304_v25 = vmul.f32 %v10704_v34, %v10702_v58  ;;  %v16552_v58 = vld [vmem:[#allocation66_spill] sm:$0xff]  ;;  %v16553_v34 = vld [vmem:[#allocation75_spill] sm:$0xff] }
 0xc85   :  { %v4303_v15 = vmul.f32 %v10706_v19, %v14012_v30  ;;  %v10708_v53 = vpop.eup %10707  ;;  %v16545_v30 = vld [vmem:[#allocation58_spill] sm:$0xff]  ;;  %v16554_v19 = vld [vmem:[#allocation76_spill] sm:$0xff] }
 0xc87   :  { %v14453_v57 = vadd.f32 %v4304_v25, %v4303_v15  ;;  %v16555_v25 = vld [vmem:[#allocation77_spill] sm:$0xff]  ;;  %v16557_v15 = vld [vmem:[#allocation79_spill] sm:$0xff] }
 0xc89   :  { %10709 = vtanh.f32 %v14453_v57 }
 0xc93   :  { %v10710_v23 = vpop.eup %10709 }
 0xc94   :  { %v14456_v27 = vmul.f32 %v10710_v23, %v10708_v53  ;;  %v16558_v53 = vld [vmem:[#allocation80_spill] sm:$0xff]  ;;  %v16559_v23 = vld [vmem:[#allocation81_spill] sm:$0xff] }
 0xc96   :  { %4372 = vmatprep.mubr.f32.mxu0 %v14456_v27  ;;  %4443 = vmatprep.mubr.f32.mxu1 %v14456_v27 }
 0xc97   :  { %4373 = vmatmul.mubr.f32.vlgmr.msra.gmra.mrb[38].mxu0 %v14363_v39  ;;  %4444 = vmatmul.mubr.f32.vlgmr.msra.gmra.mrb[46].mxu1 %v14363_v39  ;;  %v16560_v39 = vld [vmem:[#allocation82_spill] sm:$0xff] }
 0xc98   :  { %8833 = vmatpush1.bf16.msra.mxu0 %v13167_v9  ;;  %8897 = vmatpush1.bf16.msra.mxu1 %v13169_v8 }
 0xc99   :  { %8835 = vmatprep.subr.bf16.mxu0 %v13179_v17  ;;  %8899 = vmatprep.subr.bf16.mxu1 %v13181_v22 }
 0xc9c   :  { %8837 = vmatpush1.bf16.msra.mxu0 %v13203_v6  ;;  %8901 = vmatpush1.bf16.msra.mxu1 %v13205_v29 }
 0xc9d   :  { %8839 = vmatprep.subr.bf16.mxu0 %v13215_v54  ;;  %8903 = vmatprep.subr.bf16.mxu1 %v13217_v61 }
 0xca0   :  { %8841 = vmatpush1.bf16.msra.mxu0 %v13241_v21  ;;  %8905 = vmatpush1.bf16.msra.mxu1 %v13243_v28 }
 0xca1   :  { %8843 = vmatprep.subr.bf16.mxu0 %v13253_v43  ;;  %8907 = vmatprep.subr.bf16.mxu1 %v13255_v50 }
 0xca4   :  { %8845 = vmatpush1.bf16.msra.mxu0 %v13277_v31  ;;  %8909 = vmatpush1.bf16.msra.mxu1 %v13279_v3 }
 0xca5   :  { %8847 = vmatprep.subr.bf16.mxu0 %v13289_v47  ;;  %8911 = vmatprep.subr.bf16.mxu1 %v13291_v51 }
 0xca8   :  { %8849 = vmatpush1.bf16.msra.mxu0 %v13313_v1  ;;  %8913 = vmatpush1.bf16.msra.mxu1 %v13315_v56 }
 0xca9   :  { %8851 = vmatprep.subr.bf16.mxu0 %v13325_v18  ;;  %8915 = vmatprep.subr.bf16.mxu1 %v13327_v45 }
 0xcac   :  { %8853 = vmatpush1.bf16.msra.mxu0 %v13349_v52  ;;  %8917 = vmatpush1.bf16.msra.mxu1 %v13351_v0 }
 0xcad   :  { %8855 = vmatprep.subr.bf16.mxu0 %v13361_v62  ;;  %8919 = vmatprep.subr.bf16.mxu1 %v13363_v4 }
 0xcb0   :  { %8857 = vmatpush1.bf16.msra.mxu0 %v13385_v59  ;;  %8921 = vmatpush1.bf16.msra.mxu1 %v13387_v60 }
 0xcb1   :  { %8859 = vmatprep.subr.bf16.mxu0 %v13394_v10  ;;  %8923 = vmatprep.subr.bf16.mxu1 %v13396_v14 }
 0xcb4   :  { %8861 = vmatpush1.bf16.msra.mxu0 %v13409_v42  ;;  %8925 = vmatpush1.bf16.msra.mxu1 %v13411_v40 }
 0xcb5   :  { %8863 = vmatprep.subr.bf16.mxu0 %v14059_v26  ;;  %8927 = vmatprep.subr.bf16.mxu1 %v14070_v24 }
 0xcb8   :  { %8865 = vmatpush1.bf16.msra.mxu0 %v14072_v5  ;;  %8929 = vmatpush1.bf16.msra.mxu1 %v14081_v2 }
 0xcb9   :  { %8867 = vmatprep.subr.bf16.mxu0 %v14095_v63  ;;  %8931 = vmatprep.subr.bf16.mxu1 %v16545_v30 }
 0xcbc   :  { %8869 = vmatpush1.bf16.msra.mxu0 %v16546_v38  ;;  %8933 = vmatpush1.bf16.msra.mxu1 %v16547_v49  ;;  %v16575_v49 = vld [vmem:[#allocation95_spill] sm:$0xff] }
 0xcbd   :  { %8871 = vmatprep.subr.bf16.mxu0 %v16548_v35  ;;  %8935 = vmatprep.subr.bf16.mxu1 %v16549_v7  ;;  %v16574_v7 = vld [vmem:[#allocation94_spill] sm:$0xff] }
 0xcc0   :  { %8873 = vmatpush1.bf16.msra.mxu0 %v16550_v41  ;;  %8937 = vmatpush1.bf16.msra.mxu1 %v16551_v55  ;;  %v16561_v41 = vld [vmem:[#allocation83_spill] sm:$0xff]  ;;  %v16562_v55 = vld [vmem:[#allocation84_spill] sm:$0xff] }
 0xcc1   :  { %8875 = vmatprep.subr.bf16.mxu0 %v16552_v58  ;;  %8939 = vmatprep.subr.bf16.mxu1 %v16553_v34  ;;  %v16563_v58 = vld [vmem:[#allocation85_spill] sm:$0xff]  ;;  %v16564_v34 = vld [vmem:[#allocation86_spill] sm:$0xff] }
 0xcc4   :  { %8877 = vmatpush1.bf16.msra.mxu0 %v16554_v19  ;;  %8941 = vmatpush1.bf16.msra.mxu1 %v16555_v25  ;;  %v16565_v19 = vld [vmem:[#allocation87_spill] sm:$0xff]  ;;  %v16566_v25 = vld [vmem:[#allocation88_spill] sm:$0xff] }
 0xcc5   :  { %8879 = vmatprep.subr.bf16.mxu0 %v16556_v46  ;;  %8943 = vmatprep.subr.bf16.mxu1 %v16557_v15  ;;  %v16567_v46 = vld [vmem:[#allocation89_spill] sm:$0xff]  ;;  %v16568_v15 = vld [vmem:[#allocation90_spill] sm:$0xff] }
 0xcc8   :  { %8881 = vmatpush1.bf16.msra.mxu0 %v16558_v53  ;;  %8945 = vmatpush1.bf16.msra.mxu1 %v16559_v23  ;;  %v16569_v53 = vld [vmem:[#allocation91_spill] sm:$0xff]  ;;  %v16570_v23 = vld [vmem:[#allocation92_spill] sm:$0xff] }
 0xcc9   :  { %8883 = vmatprep.subr.bf16.mxu0 %v16560_v39  ;;  %8947 = vmatprep.subr.bf16.mxu1 %v16561_v41  ;;  %v16571_v39 = vld [vmem:[#allocation93_spill] sm:$0xff]  ;;  %v16572_v41 = vld [vmem:[#allocation70_spill] sm:$0xff] }
 0xccc   :  { %8885 = vmatpush1.bf16.msra.mxu0 %v16562_v55  ;;  %8949 = vmatpush1.bf16.msra.mxu1 %v16563_v58  ;;  %v16573_v55 = vld [vmem:[#allocation63_spill] sm:$0xff] }
 0xccd   :  { %8887 = vmatprep.subr.bf16.mxu0 %v16564_v34  ;;  %8951 = vmatprep.subr.bf16.mxu1 %v16565_v19 }
 0xcd0   :  { %8889 = vmatpush1.bf16.msra.mxu0 %v16566_v25  ;;  %8953 = vmatpush1.bf16.msra.mxu1 %v16567_v46 }
 0xcd1   :  { %8891 = vmatprep.subr.bf16.mxu0 %v16568_v15  ;;  %8955 = vmatprep.subr.bf16.mxu1 %v16569_v53  ;;  %v16576_v53 = vld [vmem:[#allocation96_spill] sm:$0xff] }
 0xcd4   :  { %8893 = vmatpush1.bf16.msra.mxu0 %v16570_v23  ;;  %8957 = vmatpush1.bf16.msra.mxu1 %v16571_v39 }
 0xcd5   :  { %8959 = vmatprep.subr.bf16.mxu0 %v16572_v41  ;;  %9023 = vmatprep.subr.bf16.mxu1 %v16573_v55 }
 0xd6a   :  { %v4374_v58 = vpop.f32.mrb[38].mxu0  ;;  %v4445_v34 = vpop.f32.mrb[46].mxu1 }
 0xd6b   :  { %v4375_v19 = vadd.f32 %v4374_v58, %v16574_v7  ;;  %v4376_v35 = vpop.f32.mrb[39].mxu0  ;;  %v4447_v25 = vpop.f32.mrb[47].mxu1  ;;  %v4446_v39 = vadd.f32 %v4445_v34, %v14356_v36 }
 0xd6c   :  { %v4377_v46 = vadd.f32 %v4376_v35, %v16575_v49  ;;  %v4448_v23 = vadd.f32 %v4447_v25, %v16576_v53 }
 0xd6d   :  { %v6679_v38 = vmul.f32 -1.442695, %v4375_v19 }
 0xd6e   :  { %v6680_v15 = vmul.f32 -1.442695, %v4377_v46  ;;  %v6681_v30 = vmul.f32 -1.442695, %v4448_v23  ;;  %v16585_v23 = vld [vmem:[#allocation7_spill] sm:$0xff] }
 0xd6f   :  { %10711 = vpow2.f32 %v6679_v38 }
 0xd70   :  { %10713 = vpow2.f32 %v6680_v15 }
 0xd71   :  { %10715 = vpow2.f32 %v6681_v30 }
 0xd72   :  { %10717 = vtanh.f32 %v4446_v39  ;;  %v16581_v39 = vld [vmem:[#allocation3_spill] sm:$0xff] }
 0xd79   :  { %v10712_v41 = vpop.eup %10711 }
 0xd7a   :  { %v10714_v63 = vpop.eup %10713  ;;  %v4453_v55 = vadd.f32 1.0, %v10712_v41 }
 0xd7b   :  { %v4459_v2 = vadd.f32 1.0, %v10714_v63  ;;  %v10716_v58 = vpop.eup %10715  ;;  %v16580_v63 = vld [vmem:[#allocation2_spill] sm:$0xff] }
 0xd7c   :  { %10719 = vrcp.f32 %v4453_v55  ;;  %v10718_v7 = vpop.eup %10717  ;;  %v4466_v38 = vadd.f32 1.0, %v10716_v58  ;;  %v16584_v55 = vld [vmem:[#allocation6_spill] sm:$0xff]  ;;  %v16586_v58 = vld [vmem:[#allocation8_spill] sm:$0xff] }
 0xd7d   :  { %10721 = vrcp.f32 %v4459_v2  ;;  %v16579_v2 = vld [vmem:[#allocation68_spill] sm:$0xff] }
 0xd7e   :  { %10723 = vrcp.f32 %v4466_v38  ;;  %v16590_v38 = vld [vmem:[#allocation12_spill] sm:$0xff] }
 0xd86   :  { %v10720_v35 = vpop.eup %10719 }
 0xd87   :  { %v10722_v19 = vpop.eup %10721  ;;  %v4470_v46 = vmul.f32 %v10720_v35, %v10718_v7  ;;  %v16583_v7 = vld [vmem:[#allocation5_spill] sm:$0xff] }
 0xd88   :  { %v4469_v15 = vmul.f32 %v10722_v19, %v14360_v16  ;;  %v10724_v34 = vpop.eup %10723  ;;  %v16578_v16 = vld [vmem:[#allocation69_spill] sm:$0xff]  ;;  %v16588_v19 = vld [vmem:[#allocation10_spill] sm:$0xff] }
 0xd89   :  { %v16587_v35 = vld [vmem:[#allocation9_spill] sm:$0xff] }
 0xd8a   :  { %v14531_v25 = vadd.f32 %v4470_v46, %v4469_v15  ;;  %v16589_v46 = vld [vmem:[#allocation11_spill] sm:$0xff]  ;;  %v16591_v15 = vld [vmem:[#allocation13_spill] sm:$0xff] }
 0xd8c   :  { %10725 = vtanh.f32 %v14531_v25 }
 0xd96   :  { %v10726_v41 = vpop.eup %10725 }
 0xd97   :  { %v14534_v30 = vmul.f32 %v10726_v41, %v10724_v34  ;;  %v16592_v34 = vld [vmem:[#allocation14_spill] sm:$0xff]  ;;  %v16593_v41 = vld [vmem:[#allocation15_spill] sm:$0xff] }
 0xd99   :  { %16577 = vst [vmem:[#allocation95_spill] sm:$0xff] %v14534_v30  ;;  %4538 = vmatprep.mubr.f32.mxu0 %v14534_v30  ;;  %4609 = vmatprep.mubr.f32.mxu1 %v14534_v30 }
 0xd9a   :  { %4539 = vmatmul.mubr.f32.vlgmr.msra.gmra.mrb[40].mxu0 %v14456_v27  ;;  %4610 = vmatmul.mubr.f32.vlgmr.msra.gmra.mrb[48].mxu1 %v14456_v27  ;;  %v16582_v27 = vld [vmem:[#allocation4_spill] sm:$0xff] }
 0xd9b   :  { %8961 = vmatpush1.bf16.msra.mxu0 %v13441_v13  ;;  %9025 = vmatpush1.bf16.msra.mxu1 %v13453_v44 }
 0xd9c   :  { %8963 = vmatprep.subr.bf16.mxu0 %v13466_v11  ;;  %9027 = vmatprep.subr.bf16.mxu1 %v13468_v12 }
 0xd9f   :  { %8965 = vmatpush1.bf16.msra.mxu0 %v13480_v48  ;;  %9029 = vmatpush1.bf16.msra.mxu1 %v16485_v20 }
 0xda0   :  { %8967 = vmatprep.subr.bf16.mxu0 %v16578_v16  ;;  %9031 = vmatprep.subr.bf16.mxu1 %v16579_v2 }
 0xda3   :  { %8969 = vmatpush1.bf16.msra.mxu0 %v16580_v63  ;;  %9033 = vmatpush1.bf16.msra.mxu1 %v16581_v39 }
 0xda4   :  { %8971 = vmatprep.subr.bf16.mxu0 %v16582_v27  ;;  %9035 = vmatprep.subr.bf16.mxu1 %v16583_v7  ;;  %v16594_v7 = vld [vmem:[#allocation16_spill] sm:$0xff]  ;;  %v16636_v27 = vld [vmem:[#allocation65_spill] sm:$0xff] }
 0xda7   :  { %8973 = vmatpush1.bf16.msra.mxu0 %v16584_v55  ;;  %9037 = vmatpush1.bf16.msra.mxu1 %v16585_v23  ;;  %v16595_v55 = vld [vmem:[#allocation17_spill] sm:$0xff]  ;;  %v16596_v23 = vld [vmem:[#allocation18_spill] sm:$0xff] }
 0xda8   :  { %8975 = vmatprep.subr.bf16.mxu0 %v16586_v58  ;;  %9039 = vmatprep.subr.bf16.mxu1 %v16587_v35  ;;  %v16597_v58 = vld [vmem:[#allocation19_spill] sm:$0xff]  ;;  %v16598_v35 = vld [vmem:[#allocation20_spill] sm:$0xff] }
 0xdab   :  { %8977 = vmatpush1.bf16.msra.mxu0 %v16588_v19  ;;  %9041 = vmatpush1.bf16.msra.mxu1 %v16589_v46  ;;  %v16599_v19 = vld [vmem:[#allocation21_spill] sm:$0xff]  ;;  %v16600_v46 = vld [vmem:[#allocation22_spill] sm:$0xff] }
 0xdac   :  { %8979 = vmatprep.subr.bf16.mxu0 %v16590_v38  ;;  %9043 = vmatprep.subr.bf16.mxu1 %v16591_v15  ;;  %v16601_v38 = vld [vmem:[#allocation23_spill] sm:$0xff]  ;;  %v16602_v15 = vld [vmem:[#allocation24_spill] sm:$0xff] }
 0xdaf   :  { %8981 = vmatpush1.bf16.msra.mxu0 %v16592_v34  ;;  %9045 = vmatpush1.bf16.msra.mxu1 %v16593_v41  ;;  %v16603_v34 = vld [vmem:[#allocation25_spill] sm:$0xff]  ;;  %v16604_v41 = vld [vmem:[#allocation26_spill] sm:$0xff] }
 0xdb0   :  { %8983 = vmatprep.subr.bf16.mxu0 %v16594_v7  ;;  %9047 = vmatprep.subr.bf16.mxu1 %v16595_v55  ;;  %v16605_v7 = vld [vmem:[#allocation27_spill] sm:$0xff]  ;;  %v16606_v55 = vld [vmem:[#allocation28_spill] sm:$0xff] }
 0xdb3   :  { %8985 = vmatpush1.bf16.msra.mxu0 %v16596_v23  ;;  %9049 = vmatpush1.bf16.msra.mxu1 %v16597_v58  ;;  %v16607_v23 = vld [vmem:[#allocation29_spill] sm:$0xff]  ;;  %v16608_v58 = vld [vmem:[#allocation30_spill] sm:$0xff] }
 0xdb4   :  { %8987 = vmatprep.subr.bf16.mxu0 %v16598_v35  ;;  %9051 = vmatprep.subr.bf16.mxu1 %v16599_v19  ;;  %v16609_v35 = vld [vmem:[#allocation31_spill] sm:$0xff]  ;;  %v16610_v19 = vld [vmem:[#allocation32_spill] sm:$0xff] }
 0xdb7   :  { %8989 = vmatpush1.bf16.msra.mxu0 %v16600_v46  ;;  %9053 = vmatpush1.bf16.msra.mxu1 %v16601_v38  ;;  %v16611_v46 = vld [vmem:[#allocation33_spill] sm:$0xff]  ;;  %v16612_v38 = vld [vmem:[#allocation34_spill] sm:$0xff] }
 0xdb8   :  { %8991 = vmatprep.subr.bf16.mxu0 %v16602_v15  ;;  %9055 = vmatprep.subr.bf16.mxu1 %v16603_v34  ;;  %v16613_v15 = vld [vmem:[#allocation35_spill] sm:$0xff]  ;;  %v16614_v34 = vld [vmem:[#allocation36_spill] sm:$0xff] }
 0xdbb   :  { %8993 = vmatpush1.bf16.msra.mxu0 %v16604_v41  ;;  %9057 = vmatpush1.bf16.msra.mxu1 %v16605_v7  ;;  %v16615_v41 = vld [vmem:[#allocation37_spill] sm:$0xff]  ;;  %v16616_v7 = vld [vmem:[#allocation38_spill] sm:$0xff] }
 0xdbc   :  { %8995 = vmatprep.subr.bf16.mxu0 %v16606_v55  ;;  %9059 = vmatprep.subr.bf16.mxu1 %v16607_v23  ;;  %v16617_v55 = vld [vmem:[#allocation39_spill] sm:$0xff]  ;;  %v16618_v23 = vld [vmem:[#allocation40_spill] sm:$0xff] }
 0xdbf   :  { %8997 = vmatpush1.bf16.msra.mxu0 %v16608_v58  ;;  %9061 = vmatpush1.bf16.msra.mxu1 %v16609_v35  ;;  %v16619_v58 = vld [vmem:[#allocation41_spill] sm:$0xff]  ;;  %v16620_v35 = vld [vmem:[#allocation42_spill] sm:$0xff] }
 0xdc0   :  { %8999 = vmatprep.subr.bf16.mxu0 %v16610_v19  ;;  %9063 = vmatprep.subr.bf16.mxu1 %v16611_v46  ;;  %v16621_v19 = vld [vmem:[#allocation43_spill] sm:$0xff]  ;;  %v16622_v46 = vld [vmem:[#allocation44_spill] sm:$0xff] }
 0xdc3   :  { %9001 = vmatpush1.bf16.msra.mxu0 %v16612_v38  ;;  %9065 = vmatpush1.bf16.msra.mxu1 %v16613_v15  ;;  %v16623_v38 = vld [vmem:[#allocation45_spill] sm:$0xff]  ;;  %v16624_v15 = vld [vmem:[#allocation46_spill] sm:$0xff] }
 0xdc4   :  { %9003 = vmatprep.subr.bf16.mxu0 %v16614_v34  ;;  %9067 = vmatprep.subr.bf16.mxu1 %v16615_v41  ;;  %v16625_v34 = vld [vmem:[#allocation47_spill] sm:$0xff]  ;;  %v16626_v41 = vld [vmem:[#allocation48_spill] sm:$0xff] }
 0xdc7   :  { %9005 = vmatpush1.bf16.msra.mxu0 %v16616_v7  ;;  %9069 = vmatpush1.bf16.msra.mxu1 %v16617_v55  ;;  %v16627_v7 = vld [vmem:[#allocation49_spill] sm:$0xff]  ;;  %v16628_v55 = vld [vmem:[#allocation50_spill] sm:$0xff] }
 0xdc8   :  { %9007 = vmatprep.subr.bf16.mxu0 %v16618_v23  ;;  %9071 = vmatprep.subr.bf16.mxu1 %v16619_v58  ;;  %v16629_v23 = vld [vmem:[#allocation51_spill] sm:$0xff]  ;;  %v16630_v58 = vld [vmem:[#allocation52_spill] sm:$0xff] }
 0xdcb   :  { %9009 = vmatpush1.bf16.msra.mxu0 %v16620_v35  ;;  %9073 = vmatpush1.bf16.msra.mxu1 %v16621_v19  ;;  %v16631_v35 = vld [vmem:[#allocation53_spill] sm:$0xff]  ;;  %v16632_v19 = vld [vmem:[#allocation54_spill] sm:$0xff] }
 0xdcc   :  { %9011 = vmatprep.subr.bf16.mxu0 %v16622_v46  ;;  %9075 = vmatprep.subr.bf16.mxu1 %v16623_v38  ;;  %v16633_v46 = vld [vmem:[#allocation55_spill] sm:$0xff] }
 0xdcd   :  { %v16634_v38 = vld [vmem:[#allocation71_spill] sm:$0xff] }
 0xdcf   :  { %9013 = vmatpush1.bf16.msra.mxu0 %v16624_v15  ;;  %9077 = vmatpush1.bf16.msra.mxu1 %v16625_v34  ;;  %v16635_v15 = vld [vmem:[#allocation62_spill] sm:$0xff] }
 0xdd0   :  { %9015 = vmatprep.subr.bf16.mxu0 %v16626_v41  ;;  %9079 = vmatprep.subr.bf16.mxu1 %v16627_v7 }
 0xdd3   :  { %9017 = vmatpush1.bf16.msra.mxu0 %v16628_v55  ;;  %9081 = vmatpush1.bf16.msra.mxu1 %v16629_v23 }
 0xdd4   :  { %9019 = vmatprep.subr.bf16.mxu0 %v16630_v58  ;;  %9083 = vmatprep.subr.bf16.mxu1 %v16631_v35 }
 0xdd7   :  { %9021 = vmatpush1.bf16.msra.mxu0 %v16632_v19  ;;  %9085 = vmatpush1.bf16.msra.mxu1 %v16633_v46 }
 0xdd8   :  { %9087 = vmatprep.subr.bf16.mxu0 %v16634_v38  ;;  %9151 = vmatprep.subr.bf16.mxu1 %v16635_v15 }
 0xe6d   :  { %v4540_v34 = vpop.f32.mrb[40].mxu0  ;;  %v4611_v41 = vpop.f32.mrb[48].mxu1 }
 0xe6e   :  { %v4541_v7 = vadd.f32 %v4540_v34, %v16636_v27  ;;  %v4542_v39 = vpop.f32.mrb[41].mxu0  ;;  %v4613_v55 = vpop.f32.mrb[49].mxu1  ;;  %v4612_v46 = vadd.f32 %v4611_v41, %v14449_v37  ;;  %v16643_v41 = vld [vmem:[#allocation74_spill] sm:$0xff] }
 0xe6f   :  { %v4543_v23 = vadd.f32 %v4542_v39, %v14440_v33  ;;  %v4614_v19 = vadd.f32 %v4613_v55, %v14445_v32 }
 0xe70   :  { %v6682_v63 = vmul.f32 -1.442695, %v4541_v7 }
 0xe71   :  { %v6683_v58 = vmul.f32 -1.442695, %v4543_v23  ;;  %v6684_v35 = vmul.f32 -1.442695, %v4614_v19 }
 0xe72   :  { %10727 = vpow2.f32 %v6682_v63 }
 0xe73   :  { %10729 = vpow2.f32 %v6683_v58 }
 0xe74   :  { %10731 = vpow2.f32 %v6684_v35 }
 0xe75   :  { %10733 = vtanh.f32 %v4612_v46  ;;  %v16641_v46 = vld [vmem:[#allocation72_spill] sm:$0xff] }
 0xe7c   :  { %v10728_v38 = vpop.eup %10727 }
 0xe7d   :  { %v10730_v2 = vpop.eup %10729  ;;  %v4619_v15 = vadd.f32 1.0, %v10728_v38 }
 0xe7e   :  { %v4625_v16 = vadd.f32 1.0, %v10730_v2  ;;  %v10732_v34 = vpop.eup %10731  ;;  %v16639_v2 = vld [vmem:[#allocation58_spill] sm:$0xff] }
 0xe7f   :  { %10735 = vrcp.f32 %v4619_v15  ;;  %v10734_v27 = vpop.eup %10733  ;;  %v4632_v63 = vadd.f32 1.0, %v10732_v34  ;;  %v16642_v15 = vld [vmem:[#allocation73_spill] sm:$0xff]  ;;  %v16644_v34 = vld [vmem:[#allocation64_spill] sm:$0xff] }
 0xe80   :  { %10737 = vrcp.f32 %v4625_v16  ;;  %v16638_v16 = vld [vmem:[#allocation57_spill] sm:$0xff] }
 0xe81   :  { %10739 = vrcp.f32 %v4632_v63  ;;  %v16648_v63 = vld [vmem:[#allocation76_spill] sm:$0xff] }
 0xe89   :  { %v10736_v39 = vpop.eup %10735 }
 0xe8a   :  { %v10738_v7 = vpop.eup %10737  ;;  %v4636_v23 = vmul.f32 %v10736_v39, %v10734_v27  ;;  %v16640_v27 = vld [vmem:[#allocation59_spill] sm:$0xff] }
 0xe8b   :  { %v4635_v58 = vmul.f32 %v10738_v7, %v14453_v57  ;;  %v10740_v19 = vpop.eup %10739  ;;  %v16637_v57 = vld [vmem:[#allocation56_spill] sm:$0xff]  ;;  %v16645_v39 = vld [vmem:[#allocation67_spill] sm:$0xff]  ;;  %v16646_v7 = vld [vmem:[#allocation66_spill] sm:$0xff] }
 0xe8d   :  { %v14609_v55 = vadd.f32 %v4636_v23, %v4635_v58  ;;  %v16647_v23 = vld [vmem:[#allocation75_spill] sm:$0xff]  ;;  %v16649_v58 = vld [vmem:[#allocation77_spill] sm:$0xff] }
 0xe8f   :  { %10741 = vtanh.f32 %v14609_v55 }
 0xe99   :  { %v10742_v38 = vpop.eup %10741 }
 0xe9a   :  { %v14612_v35 = vmul.f32 %v10742_v38, %v10740_v19  ;;  %v16650_v19 = vld [vmem:[#allocation78_spill] sm:$0xff]  ;;  %v16651_v38 = vld [vmem:[#allocation79_spill] sm:$0xff] }
 0xe9c   :  { %4704 = vmatprep.mubr.f32.mxu0 %v14612_v35  ;;  %4775 = vmatprep.mubr.f32.mxu1 %v14612_v35 }
 0xe9d   :  { %4705 = vmatmul.mubr.f32.vlgmr.msra.gmra.mrb[42].mxu0 %v14534_v30  ;;  %4776 = vmatmul.mubr.f32.vlgmr.msra.gmra.mrb[50].mxu1 %v14534_v30  ;;  %v16652_v30 = vld [vmem:[#allocation80_spill] sm:$0xff] }
 0xe9e   :  { %9089 = vmatpush1.bf16.msra.mxu0 %v13167_v9  ;;  %9153 = vmatpush1.bf16.msra.mxu1 %v13169_v8 }
 0xe9f   :  { %9091 = vmatprep.subr.bf16.mxu0 %v13179_v17  ;;  %9155 = vmatprep.subr.bf16.mxu1 %v13181_v22 }
 0xea2   :  { %9093 = vmatpush1.bf16.msra.mxu0 %v13203_v6  ;;  %9157 = vmatpush1.bf16.msra.mxu1 %v13205_v29 }
 0xea3   :  { %9095 = vmatprep.subr.bf16.mxu0 %v13215_v54  ;;  %9159 = vmatprep.subr.bf16.mxu1 %v13217_v61 }
 0xea6   :  { %9097 = vmatpush1.bf16.msra.mxu0 %v13241_v21  ;;  %9161 = vmatpush1.bf16.msra.mxu1 %v13243_v28 }
 0xea7   :  { %9099 = vmatprep.subr.bf16.mxu0 %v13253_v43  ;;  %9163 = vmatprep.subr.bf16.mxu1 %v13255_v50 }
 0xeaa   :  { %9101 = vmatpush1.bf16.msra.mxu0 %v13277_v31  ;;  %9165 = vmatpush1.bf16.msra.mxu1 %v13279_v3 }
 0xeab   :  { %9103 = vmatprep.subr.bf16.mxu0 %v13289_v47  ;;  %9167 = vmatprep.subr.bf16.mxu1 %v13291_v51 }
 0xeae   :  { %9105 = vmatpush1.bf16.msra.mxu0 %v13313_v1  ;;  %9169 = vmatpush1.bf16.msra.mxu1 %v13315_v56 }
 0xeaf   :  { %9107 = vmatprep.subr.bf16.mxu0 %v13325_v18  ;;  %9171 = vmatprep.subr.bf16.mxu1 %v13327_v45 }
 0xeb2   :  { %9109 = vmatpush1.bf16.msra.mxu0 %v13349_v52  ;;  %9173 = vmatpush1.bf16.msra.mxu1 %v13351_v0 }
 0xeb3   :  { %9111 = vmatprep.subr.bf16.mxu0 %v13361_v62  ;;  %9175 = vmatprep.subr.bf16.mxu1 %v13363_v4 }
 0xeb6   :  { %9113 = vmatpush1.bf16.msra.mxu0 %v13385_v59  ;;  %9177 = vmatpush1.bf16.msra.mxu1 %v13387_v60 }
 0xeb7   :  { %9115 = vmatprep.subr.bf16.mxu0 %v13394_v10  ;;  %9179 = vmatprep.subr.bf16.mxu1 %v13396_v14 }
 0xeba   :  { %9117 = vmatpush1.bf16.msra.mxu0 %v13409_v42  ;;  %9181 = vmatpush1.bf16.msra.mxu1 %v13411_v40 }
 0xebb   :  { %9119 = vmatprep.subr.bf16.mxu0 %v14059_v26  ;;  %9183 = vmatprep.subr.bf16.mxu1 %v14070_v24 }
 0xebe   :  { %9121 = vmatpush1.bf16.msra.mxu0 %v14072_v5  ;;  %9185 = vmatpush1.bf16.msra.mxu1 %v16637_v57 }
 0xebf   :  { %9123 = vmatprep.subr.bf16.mxu0 %v16638_v16  ;;  %9187 = vmatprep.subr.bf16.mxu1 %v16639_v2 }
 0xec2   :  { %9125 = vmatpush1.bf16.msra.mxu0 %v16640_v27  ;;  %9189 = vmatpush1.bf16.msra.mxu1 %v16641_v46  ;;  %v16668_v46 = vld [vmem:[#allocation94_spill] sm:$0xff] }
 0xec3   :  { %9127 = vmatprep.subr.bf16.mxu0 %v16642_v15  ;;  %9191 = vmatprep.subr.bf16.mxu1 %v16643_v41  ;;  %v16653_v15 = vld [vmem:[#allocation81_spill] sm:$0xff]  ;;  %v16654_v41 = vld [vmem:[#allocation82_spill] sm:$0xff] }
 0xec6   :  { %9129 = vmatpush1.bf16.msra.mxu0 %v16644_v34  ;;  %9193 = vmatpush1.bf16.msra.mxu1 %v16645_v39  ;;  %v16655_v34 = vld [vmem:[#allocation83_spill] sm:$0xff]  ;;  %v16656_v39 = vld [vmem:[#allocation84_spill] sm:$0xff] }
 0xec7   :  { %9131 = vmatprep.subr.bf16.mxu0 %v16646_v7  ;;  %9195 = vmatprep.subr.bf16.mxu1 %v16647_v23  ;;  %v16657_v7 = vld [vmem:[#allocation85_spill] sm:$0xff]  ;;  %v16658_v23 = vld [vmem:[#allocation86_spill] sm:$0xff] }
 0xeca   :  { %9133 = vmatpush1.bf16.msra.mxu0 %v16648_v63  ;;  %9197 = vmatpush1.bf16.msra.mxu1 %v16649_v58  ;;  %v16659_v63 = vld [vmem:[#allocation87_spill] sm:$0xff]  ;;  %v16660_v58 = vld [vmem:[#allocation88_spill] sm:$0xff] }
 0xecb   :  { %9135 = vmatprep.subr.bf16.mxu0 %v16650_v19  ;;  %9199 = vmatprep.subr.bf16.mxu1 %v16651_v38  ;;  %v16661_v19 = vld [vmem:[#allocation89_spill] sm:$0xff]  ;;  %v16662_v38 = vld [vmem:[#allocation90_spill] sm:$0xff] }
 0xece   :  { %9137 = vmatpush1.bf16.msra.mxu0 %v16652_v30  ;;  %9201 = vmatpush1.bf16.msra.mxu1 %v16653_v15  ;;  %v16663_v30 = vld [vmem:[#allocation91_spill] sm:$0xff]  ;;  %v16664_v15 = vld [vmem:[#allocation92_spill] sm:$0xff] }
 0xecf   :  { %9139 = vmatprep.subr.bf16.mxu0 %v16654_v41  ;;  %9203 = vmatprep.subr.bf16.mxu1 %v16655_v34  ;;  %v16665_v41 = vld [vmem:[#allocation93_spill] sm:$0xff]  ;;  %v16666_v34 = vld [vmem:[#allocation70_spill] sm:$0xff] }
 0xed2   :  { %9141 = vmatpush1.bf16.msra.mxu0 %v16656_v39  ;;  %9205 = vmatpush1.bf16.msra.mxu1 %v16657_v7  ;;  %v16667_v39 = vld [vmem:[#allocation63_spill] sm:$0xff] }
 0xed3   :  { %9143 = vmatprep.subr.bf16.mxu0 %v16658_v23  ;;  %9207 = vmatprep.subr.bf16.mxu1 %v16659_v63 }
 0xed6   :  { %9145 = vmatpush1.bf16.msra.mxu0 %v16660_v58  ;;  %9209 = vmatpush1.bf16.msra.mxu1 %v16661_v19 }
 0xed7   :  { %9147 = vmatprep.subr.bf16.mxu0 %v16662_v38  ;;  %9211 = vmatprep.subr.bf16.mxu1 %v16663_v30 }
 0xeda   :  { %9149 = vmatpush1.bf16.msra.mxu0 %v16664_v15  ;;  %9213 = vmatpush1.bf16.msra.mxu1 %v16665_v41 }
 0xedb   :  { %9215 = vmatprep.subr.bf16.mxu0 %v16666_v34  ;;  %9279 = vmatprep.subr.bf16.mxu1 %v16667_v39 }
 0xf70   :  { %v4706_v7 = vpop.f32.mrb[42].mxu0  ;;  %v4777_v23 = vpop.f32.mrb[50].mxu1 }
 0xf71   :  { %v4707_v63 = vadd.f32 %v4706_v7, %v16668_v46  ;;  %v4708_v27 = vpop.f32.mrb[43].mxu0  ;;  %v4779_v58 = vpop.f32.mrb[51].mxu1  ;;  %v4778_v41 = vadd.f32 %v4777_v23, %v14356_v36  ;;  %v16677_v23 = vld [vmem:[#allocation7_spill] sm:$0xff] }
 0xf72   :  { %v4709_v19 = vadd.f32 %v4708_v27, %v16575_v49  ;;  %v4780_v15 = vadd.f32 %v4779_v58, %v16576_v53 }
 0xf73   :  { %v6685_v2 = vmul.f32 -1.442695, %v4707_v63 }
 0xf74   :  { %v6686_v38 = vmul.f32 -1.442695, %v4709_v19  ;;  %v6687_v30 = vmul.f32 -1.442695, %v4780_v15 }
 0xf75   :  { %10743 = vpow2.f32 %v6685_v2 }
 0xf76   :  { %10745 = vpow2.f32 %v6686_v38 }
 0xf77   :  { %10747 = vpow2.f32 %v6687_v30 }
 0xf78   :  { %10749 = vtanh.f32 %v4778_v41  ;;  %v16675_v41 = vld [vmem:[#allocation5_spill] sm:$0xff] }
 0xf7f   :  { %v10744_v34 = vpop.eup %10743 }
 0xf80   :  { %v10746_v16 = vpop.eup %10745  ;;  %v4785_v39 = vadd.f32 1.0, %v10744_v34 }
 0xf81   :  { %v4791_v57 = vadd.f32 1.0, %v10746_v16  ;;  %v10748_v7 = vpop.eup %10747  ;;  %v16672_v16 = vld [vmem:[#allocation2_spill] sm:$0xff] }
 0xf82   :  { %10751 = vrcp.f32 %v4785_v39  ;;  %v10750_v46 = vpop.eup %10749  ;;  %v4798_v2 = vadd.f32 1.0, %v10748_v7  ;;  %v16676_v39 = vld [vmem:[#allocation6_spill] sm:$0xff]  ;;  %v16678_v7 = vld [vmem:[#allocation8_spill] sm:$0xff] }
 0xf83   :  { %10753 = vrcp.f32 %v4791_v57  ;;  %v16671_v57 = vld [vmem:[#allocation68_spill] sm:$0xff] }
 0xf84   :  { %10755 = vrcp.f32 %v4798_v2  ;;  %v16682_v2 = vld [vmem:[#allocation12_spill] sm:$0xff] }
 0xf8c   :  { %v10752_v27 = vpop.eup %10751 }
 0xf8d   :  { %v10754_v63 = vpop.eup %10753  ;;  %v4802_v19 = vmul.f32 %v10752_v27, %v10750_v46  ;;  %v16673_v46 = vld [vmem:[#allocation3_spill] sm:$0xff]  ;;  %v16679_v27 = vld [vmem:[#allocation9_spill] sm:$0xff] }
 0xf8e   :  { %v4801_v38 = vmul.f32 %v10754_v63, %v14531_v25  ;;  %v10756_v15 = vpop.eup %10755  ;;  %v16670_v25 = vld [vmem:[#allocation69_spill] sm:$0xff]  ;;  %v16680_v63 = vld [vmem:[#allocation10_spill] sm:$0xff] }
 0xf90   :  { %v14687_v58 = vadd.f32 %v4802_v19, %v4801_v38  ;;  %v16681_v19 = vld [vmem:[#allocation11_spill] sm:$0xff]  ;;  %v16683_v38 = vld [vmem:[#allocation13_spill] sm:$0xff] }
 0xf92   :  { %10757 = vtanh.f32 %v14687_v58 }
 0xf9c   :  { %v10758_v34 = vpop.eup %10757 }
 0xf9d   :  { %v14690_v30 = vmul.f32 %v10758_v34, %v10756_v15  ;;  %v16684_v15 = vld [vmem:[#allocation14_spill] sm:$0xff]  ;;  %v16685_v34 = vld [vmem:[#allocation15_spill] sm:$0xff] }
 0xf9f   :  { %16669 = vst [vmem:[#allocation96_spill] sm:$0xff] %v14690_v30  ;;  %4870 = vmatprep.mubr.f32.mxu0 %v14690_v30  ;;  %4941 = vmatprep.mubr.f32.mxu1 %v14690_v30 }
 0xfa0   :  { %4871 = vmatmul.mubr.f32.vlgmr.msra.gmra.mrb[44].mxu0 %v14612_v35  ;;  %4942 = vmatmul.mubr.f32.vlgmr.msra.gmra.mrb[52].mxu1 %v14612_v35  ;;  %v16674_v35 = vld [vmem:[#allocation4_spill] sm:$0xff] }
 0xfa1   :  { %9217 = vmatpush1.bf16.msra.mxu0 %v13441_v13  ;;  %9281 = vmatpush1.bf16.msra.mxu1 %v13453_v44 }
 0xfa2   :  { %9219 = vmatprep.subr.bf16.mxu0 %v13466_v11  ;;  %9283 = vmatprep.subr.bf16.mxu1 %v13468_v12 }
 0xfa5   :  { %9221 = vmatpush1.bf16.msra.mxu0 %v13480_v48  ;;  %9285 = vmatpush1.bf16.msra.mxu1 %v16485_v20 }
 0xfa6   :  { %9223 = vmatprep.subr.bf16.mxu0 %v16670_v25  ;;  %9287 = vmatprep.subr.bf16.mxu1 %v16671_v57 }
 0xfa9   :  { %9225 = vmatpush1.bf16.msra.mxu0 %v16672_v16  ;;  %9289 = vmatpush1.bf16.msra.mxu1 %v16673_v46 }
 0xfaa   :  { %9227 = vmatprep.subr.bf16.mxu0 %v16674_v35  ;;  %9291 = vmatprep.subr.bf16.mxu1 %v16675_v41  ;;  %v16686_v41 = vld [vmem:[#allocation16_spill] sm:$0xff]  ;;  %v16728_v35 = vld [vmem:[#allocation65_spill] sm:$0xff] }
 0xfad   :  { %9229 = vmatpush1.bf16.msra.mxu0 %v16676_v39  ;;  %9293 = vmatpush1.bf16.msra.mxu1 %v16677_v23  ;;  %v16687_v39 = vld [vmem:[#allocation17_spill] sm:$0xff]  ;;  %v16688_v23 = vld [vmem:[#allocation18_spill] sm:$0xff] }
 0xfae   :  { %9231 = vmatprep.subr.bf16.mxu0 %v16678_v7  ;;  %9295 = vmatprep.subr.bf16.mxu1 %v16679_v27  ;;  %v16689_v7 = vld [vmem:[#allocation19_spill] sm:$0xff]  ;;  %v16690_v27 = vld [vmem:[#allocation20_spill] sm:$0xff] }
 0xfb1   :  { %9233 = vmatpush1.bf16.msra.mxu0 %v16680_v63  ;;  %9297 = vmatpush1.bf16.msra.mxu1 %v16681_v19  ;;  %v16691_v63 = vld [vmem:[#allocation21_spill] sm:$0xff]  ;;  %v16692_v19 = vld [vmem:[#allocation22_spill] sm:$0xff] }
 0xfb2   :  { %9235 = vmatprep.subr.bf16.mxu0 %v16682_v2  ;;  %9299 = vmatprep.subr.bf16.mxu1 %v16683_v38  ;;  %v16693_v2 = vld [vmem:[#allocation23_spill] sm:$0xff]  ;;  %v16694_v38 = vld [vmem:[#allocation24_spill] sm:$0xff] }
 0xfb5   :  { %9237 = vmatpush1.bf16.msra.mxu0 %v16684_v15  ;;  %9301 = vmatpush1.bf16.msra.mxu1 %v16685_v34  ;;  %v16695_v15 = vld [vmem:[#allocation25_spill] sm:$0xff]  ;;  %v16696_v34 = vld [vmem:[#allocation26_spill] sm:$0xff] }
 0xfb6   :  { %9239 = vmatprep.subr.bf16.mxu0 %v16686_v41  ;;  %9303 = vmatprep.subr.bf16.mxu1 %v16687_v39  ;;  %v16697_v41 = vld [vmem:[#allocation27_spill] sm:$0xff]  ;;  %v16698_v39 = vld [vmem:[#allocation28_spill] sm:$0xff] }
 0xfb9   :  { %9241 = vmatpush1.bf16.msra.mxu0 %v16688_v23  ;;  %9305 = vmatpush1.bf16.msra.mxu1 %v16689_v7  ;;  %v16699_v23 = vld [vmem:[#allocation29_spill] sm:$0xff]  ;;  %v16700_v7 = vld [vmem:[#allocation30_spill] sm:$0xff] }
 0xfba   :  { %9243 = vmatprep.subr.bf16.mxu0 %v16690_v27  ;;  %9307 = vmatprep.subr.bf16.mxu1 %v16691_v63  ;;  %v16701_v27 = vld [vmem:[#allocation31_spill] sm:$0xff]  ;;  %v16702_v63 = vld [vmem:[#allocation32_spill] sm:$0xff] }
 0xfbd   :  { %9245 = vmatpush1.bf16.msra.mxu0 %v16692_v19  ;;  %9309 = vmatpush1.bf16.msra.mxu1 %v16693_v2  ;;  %v16703_v19 = vld [vmem:[#allocation33_spill] sm:$0xff]  ;;  %v16704_v2 = vld [vmem:[#allocation34_spill] sm:$0xff] }
 0xfbe   :  { %9247 = vmatprep.subr.bf16.mxu0 %v16694_v38  ;;  %9311 = vmatprep.subr.bf16.mxu1 %v16695_v15  ;;  %v16705_v38 = vld [vmem:[#allocation35_spill] sm:$0xff]  ;;  %v16706_v15 = vld [vmem:[#allocation36_spill] sm:$0xff] }
 0xfc1   :  { %9249 = vmatpush1.bf16.msra.mxu0 %v16696_v34  ;;  %9313 = vmatpush1.bf16.msra.mxu1 %v16697_v41  ;;  %v16707_v34 = vld [vmem:[#allocation37_spill] sm:$0xff]  ;;  %v16708_v41 = vld [vmem:[#allocation38_spill] sm:$0xff] }
 0xfc2   :  { %9251 = vmatprep.subr.bf16.mxu0 %v16698_v39  ;;  %9315 = vmatprep.subr.bf16.mxu1 %v16699_v23  ;;  %v16709_v39 = vld [vmem:[#allocation39_spill] sm:$0xff]  ;;  %v16710_v23 = vld [vmem:[#allocation40_spill] sm:$0xff] }
 0xfc5   :  { %9253 = vmatpush1.bf16.msra.mxu0 %v16700_v7  ;;  %9317 = vmatpush1.bf16.msra.mxu1 %v16701_v27  ;;  %v16711_v7 = vld [vmem:[#allocation41_spill] sm:$0xff]  ;;  %v16712_v27 = vld [vmem:[#allocation42_spill] sm:$0xff] }
 0xfc6   :  { %9255 = vmatprep.subr.bf16.mxu0 %v16702_v63  ;;  %9319 = vmatprep.subr.bf16.mxu1 %v16703_v19  ;;  %v16713_v63 = vld [vmem:[#allocation43_spill] sm:$0xff]  ;;  %v16714_v19 = vld [vmem:[#allocation44_spill] sm:$0xff] }
 0xfc9   :  { %9257 = vmatpush1.bf16.msra.mxu0 %v16704_v2  ;;  %9321 = vmatpush1.bf16.msra.mxu1 %v16705_v38  ;;  %v16715_v2 = vld [vmem:[#allocation45_spill] sm:$0xff]  ;;  %v16716_v38 = vld [vmem:[#allocation46_spill] sm:$0xff] }
 0xfca   :  { %9259 = vmatprep.subr.bf16.mxu0 %v16706_v15  ;;  %9323 = vmatprep.subr.bf16.mxu1 %v16707_v34  ;;  %v16717_v15 = vld [vmem:[#allocation47_spill] sm:$0xff]  ;;  %v16718_v34 = vld [vmem:[#allocation48_spill] sm:$0xff] }
 0xfcd   :  { %9261 = vmatpush1.bf16.msra.mxu0 %v16708_v41  ;;  %9325 = vmatpush1.bf16.msra.mxu1 %v16709_v39  ;;  %v16719_v41 = vld [vmem:[#allocation49_spill] sm:$0xff]  ;;  %v16720_v39 = vld [vmem:[#allocation50_spill] sm:$0xff] }
 0xfce   :  { %9263 = vmatprep.subr.bf16.mxu0 %v16710_v23  ;;  %9327 = vmatprep.subr.bf16.mxu1 %v16711_v7  ;;  %v16721_v23 = vld [vmem:[#allocation51_spill] sm:$0xff]  ;;  %v16722_v7 = vld [vmem:[#allocation52_spill] sm:$0xff] }
 0xfd1   :  { %9265 = vmatpush1.bf16.msra.mxu0 %v16712_v27  ;;  %9329 = vmatpush1.bf16.msra.mxu1 %v16713_v63  ;;  %v16723_v27 = vld [vmem:[#allocation53_spill] sm:$0xff]  ;;  %v16724_v63 = vld [vmem:[#allocation54_spill] sm:$0xff] }
 0xfd2   :  { %9267 = vmatprep.subr.bf16.mxu0 %v16714_v19  ;;  %9331 = vmatprep.subr.bf16.mxu1 %v16715_v2  ;;  %v16725_v19 = vld [vmem:[#allocation55_spill] sm:$0xff] }
 0xfd3   :  { %v16726_v2 = vld [vmem:[#allocation71_spill] sm:$0xff] }
 0xfd5   :  { %9269 = vmatpush1.bf16.msra.mxu0 %v16716_v38  ;;  %9333 = vmatpush1.bf16.msra.mxu1 %v16717_v15  ;;  %v16727_v38 = vld [vmem:[#allocation62_spill] sm:$0xff] }
 0xfd6   :  { %9271 = vmatprep.subr.bf16.mxu0 %v16718_v34  ;;  %9335 = vmatprep.subr.bf16.mxu1 %v16719_v41 }
 0xfd9   :  { %9273 = vmatpush1.bf16.msra.mxu0 %v16720_v39  ;;  %9337 = vmatpush1.bf16.msra.mxu1 %v16721_v23 }
 0xfda   :  { %9275 = vmatprep.subr.bf16.mxu0 %v16722_v7  ;;  %9339 = vmatprep.subr.bf16.mxu1 %v16723_v27 }
 0xfdd   :  { %9277 = vmatpush1.bf16.msra.mxu0 %v16724_v63  ;;  %9341 = vmatpush1.bf16.msra.mxu1 %v16725_v19 }
 0xfde   :  { %9343 = vmatprep.subr.bf16.mxu0 %v16726_v2  ;;  %9407 = vmatprep.subr.bf16.mxu1 %v16727_v38 }
0x1073   :  { %v4872_v15 = vpop.f32.mrb[44].mxu0  ;;  %v4943_v34 = vpop.f32.mrb[52].mxu1 }
0x1074   :  { %v4873_v41 = vadd.f32 %v4872_v15, %v16728_v35  ;;  %v4874_v46 = vpop.f32.mrb[45].mxu0  ;;  %v4945_v39 = vpop.f32.mrb[53].mxu1  ;;  %v4944_v19 = vadd.f32 %v4943_v34, %v14449_v37  ;;  %v16735_v34 = vld [vmem:[#allocation74_spill] sm:$0xff] }
0x1075   :  { %v4875_v23 = vadd.f32 %v4874_v46, %v14440_v33  ;;  %v4946_v63 = vadd.f32 %v4945_v39, %v14445_v32 }
0x1076   :  { %v6688_v16 = vmul.f32 -1.442695, %v4873_v41 }
0x1077   :  { %v6689_v7 = vmul.f32 -1.442695, %v4875_v23  ;;  %v6690_v27 = vmul.f32 -1.442695, %v4946_v63 }
0x1078   :  { %10759 = vpow2.f32 %v6688_v16 }
0x1079   :  { %10761 = vpow2.f32 %v6689_v7 }
0x107a   :  { %10763 = vpow2.f32 %v6690_v27 }
0x107b   :  { %10765 = vtanh.f32 %v4944_v19  ;;  %v16733_v19 = vld [vmem:[#allocation72_spill] sm:$0xff] }
0x1082   :  { %v10760_v2 = vpop.eup %10759 }
0x1083   :  { %v10762_v57 = vpop.eup %10761  ;;  %v4951_v38 = vadd.f32 1.0, %v10760_v2 }
0x1084   :  { %v4957_v25 = vadd.f32 1.0, %v10762_v57  ;;  %v10764_v15 = vpop.eup %10763  ;;  %v16731_v57 = vld [vmem:[#allocation58_spill] sm:$0xff] }
0x1085   :  { %10767 = vrcp.f32 %v4951_v38  ;;  %v10766_v35 = vpop.eup %10765  ;;  %v4964_v16 = vadd.f32 1.0, %v10764_v15  ;;  %v16734_v38 = vld [vmem:[#allocation73_spill] sm:$0xff]  ;;  %v16736_v15 = vld [vmem:[#allocation64_spill] sm:$0xff] }
0x1086   :  { %10769 = vrcp.f32 %v4957_v25  ;;  %v16730_v25 = vld [vmem:[#allocation57_spill] sm:$0xff] }
0x1087   :  { %10771 = vrcp.f32 %v4964_v16  ;;  %v16740_v16 = vld [vmem:[#allocation76_spill] sm:$0xff] }
0x108f   :  { %v10768_v46 = vpop.eup %10767 }
0x1090   :  { %v10770_v41 = vpop.eup %10769  ;;  %v4968_v23 = vmul.f32 %v10768_v46, %v10766_v35  ;;  %v16732_v35 = vld [vmem:[#allocation59_spill] sm:$0xff] }
0x1091   :  { %v4967_v7 = vmul.f32 %v10770_v41, %v14609_v55  ;;  %v10772_v63 = vpop.eup %10771  ;;  %v16729_v55 = vld [vmem:[#allocation56_spill] sm:$0xff]  ;;  %v16737_v46 = vld [vmem:[#allocation67_spill] sm:$0xff]  ;;  %v16738_v41 = vld [vmem:[#allocation66_spill] sm:$0xff] }
0x1093   :  { %v14765_v39 = vadd.f32 %v4968_v23, %v4967_v7  ;;  %v16739_v23 = vld [vmem:[#allocation75_spill] sm:$0xff]  ;;  %v16741_v7 = vld [vmem:[#allocation77_spill] sm:$0xff] }
0x1095   :  { %10773 = vtanh.f32 %v14765_v39 }
0x109f   :  { %v10774_v2 = vpop.eup %10773 }
0x10a0   :  { %v14768_v27 = vmul.f32 %v10774_v2, %v10772_v63  ;;  %v16742_v63 = vld [vmem:[#allocation78_spill] sm:$0xff]  ;;  %v16743_v2 = vld [vmem:[#allocation79_spill] sm:$0xff] }
0x10a2   :  { %5036 = vmatprep.mubr.f32.mxu0 %v14768_v27  ;;  %5107 = vmatprep.mubr.f32.mxu1 %v14768_v27 }
0x10a3   :  { %5037 = vmatmul.mubr.f32.vlgmr.msra.gmra.mrb[46].mxu0 %v14690_v30  ;;  %5108 = vmatmul.mubr.f32.vlgmr.msra.gmra.mrb[54].mxu1 %v14690_v30  ;;  %v16744_v30 = vld [vmem:[#allocation80_spill] sm:$0xff] }
0x10a4   :  { %9345 = vmatpush1.bf16.msra.mxu0 %v13167_v9  ;;  %9409 = vmatpush1.bf16.msra.mxu1 %v13169_v8 }
0x10a5   :  { %9347 = vmatprep.subr.bf16.mxu0 %v13179_v17  ;;  %9411 = vmatprep.subr.bf16.mxu1 %v13181_v22 }
0x10a8   :  { %9349 = vmatpush1.bf16.msra.mxu0 %v13203_v6  ;;  %9413 = vmatpush1.bf16.msra.mxu1 %v13205_v29 }
0x10a9   :  { %9351 = vmatprep.subr.bf16.mxu0 %v13215_v54  ;;  %9415 = vmatprep.subr.bf16.mxu1 %v13217_v61 }
0x10ac   :  { %9353 = vmatpush1.bf16.msra.mxu0 %v13241_v21  ;;  %9417 = vmatpush1.bf16.msra.mxu1 %v13243_v28 }
0x10ad   :  { %9355 = vmatprep.subr.bf16.mxu0 %v13253_v43  ;;  %9419 = vmatprep.subr.bf16.mxu1 %v13255_v50 }
0x10b0   :  { %9357 = vmatpush1.bf16.msra.mxu0 %v13277_v31  ;;  %9421 = vmatpush1.bf16.msra.mxu1 %v13279_v3 }
0x10b1   :  { %9359 = vmatprep.subr.bf16.mxu0 %v13289_v47  ;;  %9423 = vmatprep.subr.bf16.mxu1 %v13291_v51 }
0x10b4   :  { %9361 = vmatpush1.bf16.msra.mxu0 %v13313_v1  ;;  %9425 = vmatpush1.bf16.msra.mxu1 %v13315_v56 }
0x10b5   :  { %9363 = vmatprep.subr.bf16.mxu0 %v13325_v18  ;;  %9427 = vmatprep.subr.bf16.mxu1 %v13327_v45 }
0x10b8   :  { %9365 = vmatpush1.bf16.msra.mxu0 %v13349_v52  ;;  %9429 = vmatpush1.bf16.msra.mxu1 %v13351_v0 }
0x10b9   :  { %9367 = vmatprep.subr.bf16.mxu0 %v13361_v62  ;;  %9431 = vmatprep.subr.bf16.mxu1 %v13363_v4 }
0x10bc   :  { %9369 = vmatpush1.bf16.msra.mxu0 %v13385_v59  ;;  %9433 = vmatpush1.bf16.msra.mxu1 %v13387_v60 }
0x10bd   :  { %9371 = vmatprep.subr.bf16.mxu0 %v13394_v10  ;;  %9435 = vmatprep.subr.bf16.mxu1 %v13396_v14 }
0x10c0   :  { %9373 = vmatpush1.bf16.msra.mxu0 %v13409_v42  ;;  %9437 = vmatpush1.bf16.msra.mxu1 %v13411_v40 }
0x10c1   :  { %9375 = vmatprep.subr.bf16.mxu0 %v14059_v26  ;;  %9439 = vmatprep.subr.bf16.mxu1 %v14070_v24 }
0x10c4   :  { %9377 = vmatpush1.bf16.msra.mxu0 %v14072_v5  ;;  %9441 = vmatpush1.bf16.msra.mxu1 %v16729_v55 }
0x10c5   :  { %9379 = vmatprep.subr.bf16.mxu0 %v16730_v25  ;;  %9443 = vmatprep.subr.bf16.mxu1 %v16731_v57 }
0x10c8   :  { %9381 = vmatpush1.bf16.msra.mxu0 %v16732_v35  ;;  %9445 = vmatpush1.bf16.msra.mxu1 %v16733_v19  ;;  %v16760_v19 = vld [vmem:[#allocation94_spill] sm:$0xff] }
0x10c9   :  { %9383 = vmatprep.subr.bf16.mxu0 %v16734_v38  ;;  %9447 = vmatprep.subr.bf16.mxu1 %v16735_v34  ;;  %v16745_v38 = vld [vmem:[#allocation81_spill] sm:$0xff]  ;;  %v16746_v34 = vld [vmem:[#allocation82_spill] sm:$0xff] }
0x10cc   :  { %9385 = vmatpush1.bf16.msra.mxu0 %v16736_v15  ;;  %9449 = vmatpush1.bf16.msra.mxu1 %v16737_v46  ;;  %v16747_v15 = vld [vmem:[#allocation83_spill] sm:$0xff]  ;;  %v16748_v46 = vld [vmem:[#allocation84_spill] sm:$0xff] }
0x10cd   :  { %9387 = vmatprep.subr.bf16.mxu0 %v16738_v41  ;;  %9451 = vmatprep.subr.bf16.mxu1 %v16739_v23  ;;  %v16749_v41 = vld [vmem:[#allocation85_spill] sm:$0xff]  ;;  %v16750_v23 = vld [vmem:[#allocation86_spill] sm:$0xff] }
0x10d0   :  { %9389 = vmatpush1.bf16.msra.mxu0 %v16740_v16  ;;  %9453 = vmatpush1.bf16.msra.mxu1 %v16741_v7  ;;  %v16751_v16 = vld [vmem:[#allocation87_spill] sm:$0xff]  ;;  %v16752_v7 = vld [vmem:[#allocation88_spill] sm:$0xff] }
0x10d1   :  { %9391 = vmatprep.subr.bf16.mxu0 %v16742_v63  ;;  %9455 = vmatprep.subr.bf16.mxu1 %v16743_v2  ;;  %v16753_v63 = vld [vmem:[#allocation89_spill] sm:$0xff]  ;;  %v16754_v2 = vld [vmem:[#allocation90_spill] sm:$0xff] }
0x10d4   :  { %9393 = vmatpush1.bf16.msra.mxu0 %v16744_v30  ;;  %9457 = vmatpush1.bf16.msra.mxu1 %v16745_v38  ;;  %v16755_v30 = vld [vmem:[#allocation91_spill] sm:$0xff]  ;;  %v16756_v38 = vld [vmem:[#allocation92_spill] sm:$0xff] }
0x10d5   :  { %9395 = vmatprep.subr.bf16.mxu0 %v16746_v34  ;;  %9459 = vmatprep.subr.bf16.mxu1 %v16747_v15  ;;  %v16757_v34 = vld [vmem:[#allocation93_spill] sm:$0xff]  ;;  %v16758_v15 = vld [vmem:[#allocation70_spill] sm:$0xff] }
0x10d8   :  { %9397 = vmatpush1.bf16.msra.mxu0 %v16748_v46  ;;  %9461 = vmatpush1.bf16.msra.mxu1 %v16749_v41  ;;  %v16759_v46 = vld [vmem:[#allocation63_spill] sm:$0xff] }
0x10d9   :  { %9399 = vmatprep.subr.bf16.mxu0 %v16750_v23  ;;  %9463 = vmatprep.subr.bf16.mxu1 %v16751_v16 }
0x10dc   :  { %9401 = vmatpush1.bf16.msra.mxu0 %v16752_v7  ;;  %9465 = vmatpush1.bf16.msra.mxu1 %v16753_v63 }
0x10dd   :  { %9403 = vmatprep.subr.bf16.mxu0 %v16754_v2  ;;  %9467 = vmatprep.subr.bf16.mxu1 %v16755_v30 }
0x10e0   :  { %9405 = vmatpush1.bf16.msra.mxu0 %v16756_v38  ;;  %9469 = vmatpush1.bf16.msra.mxu1 %v16757_v34 }
0x10e1   :  { %9471 = vmatprep.subr.bf16.mxu0 %v16758_v15  ;;  %9535 = vmatprep.subr.bf16.mxu1 %v16759_v46 }
0x1176   :  { %v5038_v41 = vpop.f32.mrb[46].mxu0  ;;  %v5109_v23 = vpop.f32.mrb[54].mxu1 }
0x1177   :  { %v5039_v16 = vadd.f32 %v5038_v41, %v16760_v19  ;;  %v5040_v35 = vpop.f32.mrb[47].mxu0  ;;  %v5111_v7 = vpop.f32.mrb[55].mxu1  ;;  %v5110_v34 = vadd.f32 %v5109_v23, %v14356_v36  ;;  %v16769_v23 = vld [vmem:[#allocation7_spill] sm:$0xff] }
0x1178   :  { %v5041_v63 = vadd.f32 %v5040_v35, %v16575_v49  ;;  %v5112_v38 = vadd.f32 %v5111_v7, %v16576_v53 }
0x1179   :  { %v6691_v57 = vmul.f32 -1.442695, %v5039_v16 }
0x117a   :  { %v6692_v2 = vmul.f32 -1.442695, %v5041_v63  ;;  %v6693_v30 = vmul.f32 -1.442695, %v5112_v38 }
0x117b   :  { %10775 = vpow2.f32 %v6691_v57 }
0x117c   :  { %10777 = vpow2.f32 %v6692_v2 }
0x117d   :  { %10779 = vpow2.f32 %v6693_v30 }
0x117e   :  { %10781 = vtanh.f32 %v5110_v34  ;;  %v16767_v34 = vld [vmem:[#allocation5_spill] sm:$0xff] }
0x1185   :  { %v10776_v15 = vpop.eup %10775 }
0x1186   :  { %v10778_v25 = vpop.eup %10777  ;;  %v5117_v46 = vadd.f32 1.0, %v10776_v15 }
0x1187   :  { %v5123_v55 = vadd.f32 1.0, %v10778_v25  ;;  %v10780_v41 = vpop.eup %10779  ;;  %v16764_v25 = vld [vmem:[#allocation2_spill] sm:$0xff] }
0x1188   :  { %10783 = vrcp.f32 %v5117_v46  ;;  %v10782_v19 = vpop.eup %10781  ;;  %v5130_v57 = vadd.f32 1.0, %v10780_v41  ;;  %v16768_v46 = vld [vmem:[#allocation6_spill] sm:$0xff]  ;;  %v16770_v41 = vld [vmem:[#allocation8_spill] sm:$0xff] }
0x1189   :  { %10785 = vrcp.f32 %v5123_v55  ;;  %v16763_v55 = vld [vmem:[#allocation68_spill] sm:$0xff] }
0x118a   :  { %10787 = vrcp.f32 %v5130_v57  ;;  %v16774_v57 = vld [vmem:[#allocation12_spill] sm:$0xff] }
0x1192   :  { %v10784_v35 = vpop.eup %10783 }
0x1193   :  { %v10786_v16 = vpop.eup %10785  ;;  %v5134_v63 = vmul.f32 %v10784_v35, %v10782_v19  ;;  %v16765_v19 = vld [vmem:[#allocation3_spill] sm:$0xff]  ;;  %v16771_v35 = vld [vmem:[#allocation9_spill] sm:$0xff] }
0x1194   :  { %v5133_v2 = vmul.f32 %v10786_v16, %v14687_v58  ;;  %v10788_v38 = vpop.eup %10787  ;;  %v16762_v58 = vld [vmem:[#allocation69_spill] sm:$0xff]  ;;  %v16772_v16 = vld [vmem:[#allocation10_spill] sm:$0xff] }
0x1196   :  { %v14843_v7 = vadd.f32 %v5134_v63, %v5133_v2  ;;  %v16773_v63 = vld [vmem:[#allocation11_spill] sm:$0xff]  ;;  %v16775_v2 = vld [vmem:[#allocation13_spill] sm:$0xff] }
0x1198   :  { %10789 = vtanh.f32 %v14843_v7 }
0x11a2   :  { %v10790_v15 = vpop.eup %10789 }
0x11a3   :  { %v14846_v30 = vmul.f32 %v10790_v15, %v10788_v38  ;;  %v16776_v38 = vld [vmem:[#allocation14_spill] sm:$0xff]  ;;  %v16777_v15 = vld [vmem:[#allocation15_spill] sm:$0xff] }
0x11a5   :  { %16761 = vst [vmem:[#allocation98_spill] sm:$0xff] %v14846_v30  ;;  %5202 = vmatprep.mubr.f32.mxu0 %v14846_v30  ;;  %5273 = vmatprep.mubr.f32.mxu1 %v14846_v30 }
0x11a6   :  { %5203 = vmatmul.mubr.f32.vlgmr.msra.gmra.mrb[48].mxu0 %v14768_v27  ;;  %5274 = vmatmul.mubr.f32.vlgmr.msra.gmra.mrb[56].mxu1 %v14768_v27  ;;  %v16766_v27 = vld [vmem:[#allocation4_spill] sm:$0xff] }
0x11a7   :  { %9473 = vmatpush1.bf16.msra.mxu0 %v13441_v13  ;;  %9537 = vmatpush1.bf16.msra.mxu1 %v13453_v44 }
0x11a8   :  { %9475 = vmatprep.subr.bf16.mxu0 %v13466_v11  ;;  %9539 = vmatprep.subr.bf16.mxu1 %v13468_v12 }
0x11ab   :  { %9477 = vmatpush1.bf16.msra.mxu0 %v13480_v48  ;;  %9541 = vmatpush1.bf16.msra.mxu1 %v16485_v20 }
0x11ac   :  { %9479 = vmatprep.subr.bf16.mxu0 %v16762_v58  ;;  %9543 = vmatprep.subr.bf16.mxu1 %v16763_v55 }
0x11af   :  { %9481 = vmatpush1.bf16.msra.mxu0 %v16764_v25  ;;  %9545 = vmatpush1.bf16.msra.mxu1 %v16765_v19 }
0x11b0   :  { %9483 = vmatprep.subr.bf16.mxu0 %v16766_v27  ;;  %9547 = vmatprep.subr.bf16.mxu1 %v16767_v34  ;;  %v16778_v34 = vld [vmem:[#allocation16_spill] sm:$0xff]  ;;  %v16820_v27 = vld [vmem:[#allocation65_spill] sm:$0xff] }
0x11b3   :  { %9485 = vmatpush1.bf16.msra.mxu0 %v16768_v46  ;;  %9549 = vmatpush1.bf16.msra.mxu1 %v16769_v23  ;;  %v16779_v46 = vld [vmem:[#allocation17_spill] sm:$0xff]  ;;  %v16780_v23 = vld [vmem:[#allocation18_spill] sm:$0xff] }
0x11b4   :  { %9487 = vmatprep.subr.bf16.mxu0 %v16770_v41  ;;  %9551 = vmatprep.subr.bf16.mxu1 %v16771_v35  ;;  %v16781_v41 = vld [vmem:[#allocation19_spill] sm:$0xff]  ;;  %v16782_v35 = vld [vmem:[#allocation20_spill] sm:$0xff] }
0x11b7   :  { %9489 = vmatpush1.bf16.msra.mxu0 %v16772_v16  ;;  %9553 = vmatpush1.bf16.msra.mxu1 %v16773_v63  ;;  %v16783_v16 = vld [vmem:[#allocation21_spill] sm:$0xff]  ;;  %v16784_v63 = vld [vmem:[#allocation22_spill] sm:$0xff] }
0x11b8   :  { %9491 = vmatprep.subr.bf16.mxu0 %v16774_v57  ;;  %9555 = vmatprep.subr.bf16.mxu1 %v16775_v2  ;;  %v16785_v57 = vld [vmem:[#allocation23_spill] sm:$0xff]  ;;  %v16786_v2 = vld [vmem:[#allocation24_spill] sm:$0xff] }
0x11bb   :  { %9493 = vmatpush1.bf16.msra.mxu0 %v16776_v38  ;;  %9557 = vmatpush1.bf16.msra.mxu1 %v16777_v15  ;;  %v16787_v38 = vld [vmem:[#allocation25_spill] sm:$0xff]  ;;  %v16788_v15 = vld [vmem:[#allocation26_spill] sm:$0xff] }
0x11bc   :  { %9495 = vmatprep.subr.bf16.mxu0 %v16778_v34  ;;  %9559 = vmatprep.subr.bf16.mxu1 %v16779_v46  ;;  %v16789_v34 = vld [vmem:[#allocation27_spill] sm:$0xff]  ;;  %v16790_v46 = vld [vmem:[#allocation28_spill] sm:$0xff] }
0x11bf   :  { %9497 = vmatpush1.bf16.msra.mxu0 %v16780_v23  ;;  %9561 = vmatpush1.bf16.msra.mxu1 %v16781_v41  ;;  %v16791_v23 = vld [vmem:[#allocation29_spill] sm:$0xff]  ;;  %v16792_v41 = vld [vmem:[#allocation30_spill] sm:$0xff] }
0x11c0   :  { %9499 = vmatprep.subr.bf16.mxu0 %v16782_v35  ;;  %9563 = vmatprep.subr.bf16.mxu1 %v16783_v16  ;;  %v16793_v35 = vld [vmem:[#allocation31_spill] sm:$0xff]  ;;  %v16794_v16 = vld [vmem:[#allocation32_spill] sm:$0xff] }
0x11c3   :  { %9501 = vmatpush1.bf16.msra.mxu0 %v16784_v63  ;;  %9565 = vmatpush1.bf16.msra.mxu1 %v16785_v57  ;;  %v16795_v63 = vld [vmem:[#allocation33_spill] sm:$0xff]  ;;  %v16796_v57 = vld [vmem:[#allocation34_spill] sm:$0xff] }
0x11c4   :  { %9503 = vmatprep.subr.bf16.mxu0 %v16786_v2  ;;  %9567 = vmatprep.subr.bf16.mxu1 %v16787_v38  ;;  %v16797_v2 = vld [vmem:[#allocation35_spill] sm:$0xff]  ;;  %v16798_v38 = vld [vmem:[#allocation36_spill] sm:$0xff] }
0x11c7   :  { %9505 = vmatpush1.bf16.msra.mxu0 %v16788_v15  ;;  %9569 = vmatpush1.bf16.msra.mxu1 %v16789_v34  ;;  %v16799_v15 = vld [vmem:[#allocation37_spill] sm:$0xff]  ;;  %v16800_v34 = vld [vmem:[#allocation38_spill] sm:$0xff] }
0x11c8   :  { %9507 = vmatprep.subr.bf16.mxu0 %v16790_v46  ;;  %9571 = vmatprep.subr.bf16.mxu1 %v16791_v23  ;;  %v16801_v46 = vld [vmem:[#allocation39_spill] sm:$0xff]  ;;  %v16802_v23 = vld [vmem:[#allocation40_spill] sm:$0xff] }
0x11cb   :  { %9509 = vmatpush1.bf16.msra.mxu0 %v16792_v41  ;;  %9573 = vmatpush1.bf16.msra.mxu1 %v16793_v35  ;;  %v16803_v41 = vld [vmem:[#allocation41_spill] sm:$0xff]  ;;  %v16804_v35 = vld [vmem:[#allocation42_spill] sm:$0xff] }
0x11cc   :  { %9511 = vmatprep.subr.bf16.mxu0 %v16794_v16  ;;  %9575 = vmatprep.subr.bf16.mxu1 %v16795_v63  ;;  %v16805_v16 = vld [vmem:[#allocation43_spill] sm:$0xff]  ;;  %v16806_v63 = vld [vmem:[#allocation44_spill] sm:$0xff] }
0x11cf   :  { %9513 = vmatpush1.bf16.msra.mxu0 %v16796_v57  ;;  %9577 = vmatpush1.bf16.msra.mxu1 %v16797_v2  ;;  %v16807_v57 = vld [vmem:[#allocation45_spill] sm:$0xff]  ;;  %v16808_v2 = vld [vmem:[#allocation46_spill] sm:$0xff] }
0x11d0   :  { %9515 = vmatprep.subr.bf16.mxu0 %v16798_v38  ;;  %9579 = vmatprep.subr.bf16.mxu1 %v16799_v15  ;;  %v16809_v38 = vld [vmem:[#allocation47_spill] sm:$0xff]  ;;  %v16810_v15 = vld [vmem:[#allocation48_spill] sm:$0xff] }
0x11d3   :  { %9517 = vmatpush1.bf16.msra.mxu0 %v16800_v34  ;;  %9581 = vmatpush1.bf16.msra.mxu1 %v16801_v46  ;;  %v16811_v34 = vld [vmem:[#allocation49_spill] sm:$0xff]  ;;  %v16812_v46 = vld [vmem:[#allocation50_spill] sm:$0xff] }
0x11d4   :  { %9519 = vmatprep.subr.bf16.mxu0 %v16802_v23  ;;  %9583 = vmatprep.subr.bf16.mxu1 %v16803_v41  ;;  %v16813_v23 = vld [vmem:[#allocation51_spill] sm:$0xff]  ;;  %v16814_v41 = vld [vmem:[#allocation52_spill] sm:$0xff] }
0x11d7   :  { %9521 = vmatpush1.bf16.msra.mxu0 %v16804_v35  ;;  %9585 = vmatpush1.bf16.msra.mxu1 %v16805_v16  ;;  %v16815_v35 = vld [vmem:[#allocation53_spill] sm:$0xff]  ;;  %v16816_v16 = vld [vmem:[#allocation54_spill] sm:$0xff] }
0x11d8   :  { %9523 = vmatprep.subr.bf16.mxu0 %v16806_v63  ;;  %9587 = vmatprep.subr.bf16.mxu1 %v16807_v57  ;;  %v16817_v63 = vld [vmem:[#allocation55_spill] sm:$0xff] }
0x11d9   :  { %v16818_v57 = vld [vmem:[#allocation71_spill] sm:$0xff] }
0x11db   :  { %9525 = vmatpush1.bf16.msra.mxu0 %v16808_v2  ;;  %9589 = vmatpush1.bf16.msra.mxu1 %v16809_v38  ;;  %v16819_v2 = vld [vmem:[#allocation62_spill] sm:$0xff] }
0x11dc   :  { %9527 = vmatprep.subr.bf16.mxu0 %v16810_v15  ;;  %9591 = vmatprep.subr.bf16.mxu1 %v16811_v34 }
0x11df   :  { %9529 = vmatpush1.bf16.msra.mxu0 %v16812_v46  ;;  %9593 = vmatpush1.bf16.msra.mxu1 %v16813_v23 }
0x11e0   :  { %9531 = vmatprep.subr.bf16.mxu0 %v16814_v41  ;;  %9595 = vmatprep.subr.bf16.mxu1 %v16815_v35 }
0x11e3   :  { %9533 = vmatpush1.bf16.msra.mxu0 %v16816_v16  ;;  %9597 = vmatpush1.bf16.msra.mxu1 %v16817_v63 }
0x11e4   :  { %9599 = vmatprep.subr.bf16.mxu0 %v16818_v57  ;;  %9663 = vmatprep.subr.bf16.mxu1 %v16819_v2 }
0x1279   :  { %v5204_v38 = vpop.f32.mrb[48].mxu0  ;;  %v5275_v15 = vpop.f32.mrb[56].mxu1 }
0x127a   :  { %v5205_v34 = vadd.f32 %v5204_v38, %v16820_v27  ;;  %v5206_v19 = vpop.f32.mrb[49].mxu0  ;;  %v5277_v46 = vpop.f32.mrb[57].mxu1  ;;  %v5276_v63 = vadd.f32 %v5275_v15, %v14449_v37  ;;  %v16827_v15 = vld [vmem:[#allocation74_spill] sm:$0xff] }
0x127b   :  { %v5207_v23 = vadd.f32 %v5206_v19, %v14440_v33  ;;  %v5278_v16 = vadd.f32 %v5277_v46, %v14445_v32 }
0x127c   :  { %v6694_v25 = vmul.f32 -1.442695, %v5205_v34 }
0x127d   :  { %v6695_v41 = vmul.f32 -1.442695, %v5207_v23  ;;  %v6696_v35 = vmul.f32 -1.442695, %v5278_v16 }
0x127e   :  { %10791 = vpow2.f32 %v6694_v25 }
0x127f   :  { %10793 = vpow2.f32 %v6695_v41 }
0x1280   :  { %10795 = vpow2.f32 %v6696_v35 }
0x1281   :  { %10797 = vtanh.f32 %v5276_v63  ;;  %v16825_v63 = vld [vmem:[#allocation72_spill] sm:$0xff] }
0x1288   :  { %v10792_v57 = vpop.eup %10791 }
0x1289   :  { %v10794_v55 = vpop.eup %10793  ;;  %v5283_v2 = vadd.f32 1.0, %v10792_v57 }
0x128a   :  { %v5289_v58 = vadd.f32 1.0, %v10794_v55  ;;  %v10796_v38 = vpop.eup %10795  ;;  %v16823_v55 = vld [vmem:[#allocation58_spill] sm:$0xff] }
0x128b   :  { %10799 = vrcp.f32 %v5283_v2  ;;  %v10798_v27 = vpop.eup %10797  ;;  %v5296_v25 = vadd.f32 1.0, %v10796_v38  ;;  %v16826_v2 = vld [vmem:[#allocation73_spill] sm:$0xff]  ;;  %v16828_v38 = vld [vmem:[#allocation64_spill] sm:$0xff] }
0x128c   :  { %10801 = vrcp.f32 %v5289_v58  ;;  %v16822_v58 = vld [vmem:[#allocation57_spill] sm:$0xff] }
0x128d   :  { %10803 = vrcp.f32 %v5296_v25  ;;  %v16832_v25 = vld [vmem:[#allocation76_spill] sm:$0xff] }
0x1295   :  { %v10800_v19 = vpop.eup %10799 }
0x1296   :  { %v10802_v34 = vpop.eup %10801  ;;  %v5300_v23 = vmul.f32 %v10800_v19, %v10798_v27  ;;  %v16824_v27 = vld [vmem:[#allocation59_spill] sm:$0xff] }
0x1297   :  { %v5299_v41 = vmul.f32 %v10802_v34, %v14765_v39  ;;  %v10804_v16 = vpop.eup %10803  ;;  %v16821_v39 = vld [vmem:[#allocation56_spill] sm:$0xff]  ;;  %v16829_v19 = vld [vmem:[#allocation67_spill] sm:$0xff]  ;;  %v16830_v34 = vld [vmem:[#allocation66_spill] sm:$0xff] }
0x1299   :  { %v14921_v46 = vadd.f32 %v5300_v23, %v5299_v41  ;;  %v16831_v23 = vld [vmem:[#allocation75_spill] sm:$0xff]  ;;  %v16833_v41 = vld [vmem:[#allocation77_spill] sm:$0xff] }
0x129b   :  { %10805 = vtanh.f32 %v14921_v46 }
0x12a5   :  { %v10806_v57 = vpop.eup %10805 }
0x12a6   :  { %v14924_v35 = vmul.f32 %v10806_v57, %v10804_v16  ;;  %v16834_v16 = vld [vmem:[#allocation78_spill] sm:$0xff]  ;;  %v16835_v57 = vld [vmem:[#allocation79_spill] sm:$0xff] }
0x12a8   :  { %5368 = vmatprep.mubr.f32.mxu0 %v14924_v35  ;;  %5439 = vmatprep.mubr.f32.mxu1 %v14924_v35 }
0x12a9   :  { %5369 = vmatmul.mubr.f32.vlgmr.msra.gmra.mrb[50].mxu0 %v14846_v30  ;;  %5440 = vmatmul.mubr.f32.vlgmr.msra.gmra.mrb[58].mxu1 %v14846_v30  ;;  %v16836_v30 = vld [vmem:[#allocation80_spill] sm:$0xff] }
0x12aa   :  { %9601 = vmatpush1.bf16.msra.mxu0 %v13167_v9  ;;  %9665 = vmatpush1.bf16.msra.mxu1 %v13169_v8 }
0x12ab   :  { %9603 = vmatprep.subr.bf16.mxu0 %v13179_v17  ;;  %9667 = vmatprep.subr.bf16.mxu1 %v13181_v22 }
0x12ae   :  { %9605 = vmatpush1.bf16.msra.mxu0 %v13203_v6  ;;  %9669 = vmatpush1.bf16.msra.mxu1 %v13205_v29 }
0x12af   :  { %9607 = vmatprep.subr.bf16.mxu0 %v13215_v54  ;;  %9671 = vmatprep.subr.bf16.mxu1 %v13217_v61 }
0x12b2   :  { %9609 = vmatpush1.bf16.msra.mxu0 %v13241_v21  ;;  %9673 = vmatpush1.bf16.msra.mxu1 %v13243_v28 }
0x12b3   :  { %9611 = vmatprep.subr.bf16.mxu0 %v13253_v43  ;;  %9675 = vmatprep.subr.bf16.mxu1 %v13255_v50 }
0x12b6   :  { %9613 = vmatpush1.bf16.msra.mxu0 %v13277_v31  ;;  %9677 = vmatpush1.bf16.msra.mxu1 %v13279_v3 }
0x12b7   :  { %9615 = vmatprep.subr.bf16.mxu0 %v13289_v47  ;;  %9679 = vmatprep.subr.bf16.mxu1 %v13291_v51 }
0x12ba   :  { %9617 = vmatpush1.bf16.msra.mxu0 %v13313_v1  ;;  %9681 = vmatpush1.bf16.msra.mxu1 %v13315_v56 }
0x12bb   :  { %9619 = vmatprep.subr.bf16.mxu0 %v13325_v18  ;;  %9683 = vmatprep.subr.bf16.mxu1 %v13327_v45 }
0x12be   :  { %9621 = vmatpush1.bf16.msra.mxu0 %v13349_v52  ;;  %9685 = vmatpush1.bf16.msra.mxu1 %v13351_v0 }
0x12bf   :  { %9623 = vmatprep.subr.bf16.mxu0 %v13361_v62  ;;  %9687 = vmatprep.subr.bf16.mxu1 %v13363_v4 }
0x12c2   :  { %9625 = vmatpush1.bf16.msra.mxu0 %v13385_v59  ;;  %9689 = vmatpush1.bf16.msra.mxu1 %v13387_v60 }
0x12c3   :  { %9627 = vmatprep.subr.bf16.mxu0 %v13394_v10  ;;  %9691 = vmatprep.subr.bf16.mxu1 %v13396_v14 }
0x12c6   :  { %9629 = vmatpush1.bf16.msra.mxu0 %v13409_v42  ;;  %9693 = vmatpush1.bf16.msra.mxu1 %v13411_v40 }
0x12c7   :  { %9631 = vmatprep.subr.bf16.mxu0 %v14059_v26  ;;  %9695 = vmatprep.subr.bf16.mxu1 %v14070_v24 }
0x12ca   :  { %9633 = vmatpush1.bf16.msra.mxu0 %v14072_v5  ;;  %9697 = vmatpush1.bf16.msra.mxu1 %v16821_v39 }
0x12cb   :  { %9635 = vmatprep.subr.bf16.mxu0 %v16822_v58  ;;  %9699 = vmatprep.subr.bf16.mxu1 %v16823_v55 }
0x12ce   :  { %9637 = vmatpush1.bf16.msra.mxu0 %v16824_v27  ;;  %9701 = vmatpush1.bf16.msra.mxu1 %v16825_v63  ;;  %v16852_v63 = vld [vmem:[#allocation94_spill] sm:$0xff] }
0x12cf   :  { %9639 = vmatprep.subr.bf16.mxu0 %v16826_v2  ;;  %9703 = vmatprep.subr.bf16.mxu1 %v16827_v15  ;;  %v16837_v2 = vld [vmem:[#allocation81_spill] sm:$0xff]  ;;  %v16838_v15 = vld [vmem:[#allocation82_spill] sm:$0xff] }
0x12d2   :  { %9641 = vmatpush1.bf16.msra.mxu0 %v16828_v38  ;;  %9705 = vmatpush1.bf16.msra.mxu1 %v16829_v19  ;;  %v16839_v38 = vld [vmem:[#allocation83_spill] sm:$0xff]  ;;  %v16840_v19 = vld [vmem:[#allocation84_spill] sm:$0xff] }
0x12d3   :  { %9643 = vmatprep.subr.bf16.mxu0 %v16830_v34  ;;  %9707 = vmatprep.subr.bf16.mxu1 %v16831_v23  ;;  %v16841_v34 = vld [vmem:[#allocation85_spill] sm:$0xff]  ;;  %v16842_v23 = vld [vmem:[#allocation86_spill] sm:$0xff] }
0x12d6   :  { %9645 = vmatpush1.bf16.msra.mxu0 %v16832_v25  ;;  %9709 = vmatpush1.bf16.msra.mxu1 %v16833_v41  ;;  %v16843_v25 = vld [vmem:[#allocation87_spill] sm:$0xff]  ;;  %v16844_v41 = vld [vmem:[#allocation88_spill] sm:$0xff] }
0x12d7   :  { %9647 = vmatprep.subr.bf16.mxu0 %v16834_v16  ;;  %9711 = vmatprep.subr.bf16.mxu1 %v16835_v57  ;;  %v16845_v16 = vld [vmem:[#allocation89_spill] sm:$0xff]  ;;  %v16846_v57 = vld [vmem:[#allocation90_spill] sm:$0xff] }
0x12da   :  { %9649 = vmatpush1.bf16.msra.mxu0 %v16836_v30  ;;  %9713 = vmatpush1.bf16.msra.mxu1 %v16837_v2  ;;  %v16847_v30 = vld [vmem:[#allocation91_spill] sm:$0xff]  ;;  %v16848_v2 = vld [vmem:[#allocation92_spill] sm:$0xff] }
0x12db   :  { %9651 = vmatprep.subr.bf16.mxu0 %v16838_v15  ;;  %9715 = vmatprep.subr.bf16.mxu1 %v16839_v38  ;;  %v16849_v15 = vld [vmem:[#allocation93_spill] sm:$0xff]  ;;  %v16850_v38 = vld [vmem:[#allocation70_spill] sm:$0xff] }
0x12de   :  { %9653 = vmatpush1.bf16.msra.mxu0 %v16840_v19  ;;  %9717 = vmatpush1.bf16.msra.mxu1 %v16841_v34  ;;  %v16851_v19 = vld [vmem:[#allocation63_spill] sm:$0xff] }
0x12df   :  { %9655 = vmatprep.subr.bf16.mxu0 %v16842_v23  ;;  %9719 = vmatprep.subr.bf16.mxu1 %v16843_v25 }
0x12e2   :  { %9657 = vmatpush1.bf16.msra.mxu0 %v16844_v41  ;;  %9721 = vmatpush1.bf16.msra.mxu1 %v16845_v16 }
0x12e3   :  { %9659 = vmatprep.subr.bf16.mxu0 %v16846_v57  ;;  %9723 = vmatprep.subr.bf16.mxu1 %v16847_v30 }
0x12e6   :  { %9661 = vmatpush1.bf16.msra.mxu0 %v16848_v2  ;;  %9725 = vmatpush1.bf16.msra.mxu1 %v16849_v15 }
0x12e7   :  { %9727 = vmatprep.subr.bf16.mxu0 %v16850_v38  ;;  %9791 = vmatprep.subr.bf16.mxu1 %v16851_v19 }
0x137c   :  { %v5370_v34 = vpop.f32.mrb[50].mxu0  ;;  %v5441_v23 = vpop.f32.mrb[58].mxu1 }
0x137d   :  { %v5371_v25 = vadd.f32 %v5370_v34, %v16852_v63  ;;  %v5372_v27 = vpop.f32.mrb[51].mxu0  ;;  %v5443_v41 = vpop.f32.mrb[59].mxu1  ;;  %v5442_v15 = vadd.f32 %v5441_v23, %v14356_v36  ;;  %v16861_v23 = vld [vmem:[#allocation7_spill] sm:$0xff] }
0x137e   :  { %v5373_v16 = vadd.f32 %v5372_v27, %v16575_v49  ;;  %v5444_v2 = vadd.f32 %v5443_v41, %v16576_v53 }
0x137f   :  { %v6697_v55 = vmul.f32 -1.442695, %v5371_v25 }
0x1380   :  { %v6698_v57 = vmul.f32 -1.442695, %v5373_v16  ;;  %v6699_v30 = vmul.f32 -1.442695, %v5444_v2 }
0x1381   :  { %10807 = vpow2.f32 %v6697_v55 }
0x1382   :  { %10809 = vpow2.f32 %v6698_v57 }
0x1383   :  { %10811 = vpow2.f32 %v6699_v30 }
0x1384   :  { %10813 = vtanh.f32 %v5442_v15  ;;  %v16859_v15 = vld [vmem:[#allocation5_spill] sm:$0xff] }
0x138b   :  { %v10808_v38 = vpop.eup %10807 }
0x138c   :  { %v10810_v58 = vpop.eup %10809  ;;  %v5449_v19 = vadd.f32 1.0, %v10808_v38 }
0x138d   :  { %v5455_v39 = vadd.f32 1.0, %v10810_v58  ;;  %v10812_v34 = vpop.eup %10811  ;;  %v16856_v58 = vld [vmem:[#allocation2_spill] sm:$0xff] }
0x138e   :  { %10815 = vrcp.f32 %v5449_v19  ;;  %v10814_v63 = vpop.eup %10813  ;;  %v5462_v55 = vadd.f32 1.0, %v10812_v34  ;;  %v16860_v19 = vld [vmem:[#allocation6_spill] sm:$0xff]  ;;  %v16862_v34 = vld [vmem:[#allocation8_spill] sm:$0xff] }
0x138f   :  { %10817 = vrcp.f32 %v5455_v39  ;;  %v16855_v39 = vld [vmem:[#allocation68_spill] sm:$0xff] }
0x1390   :  { %10819 = vrcp.f32 %v5462_v55  ;;  %v16866_v55 = vld [vmem:[#allocation12_spill] sm:$0xff] }
0x1398   :  { %v10816_v27 = vpop.eup %10815 }
0x1399   :  { %v10818_v25 = vpop.eup %10817  ;;  %v5466_v16 = vmul.f32 %v10816_v27, %v10814_v63  ;;  %v16857_v63 = vld [vmem:[#allocation3_spill] sm:$0xff]  ;;  %v16863_v27 = vld [vmem:[#allocation9_spill] sm:$0xff] }
0x139a   :  { %v5465_v57 = vmul.f32 %v10818_v25, %v14843_v7  ;;  %v10820_v2 = vpop.eup %10819  ;;  %v16854_v7 = vld [vmem:[#allocation69_spill] sm:$0xff]  ;;  %v16864_v25 = vld [vmem:[#allocation10_spill] sm:$0xff] }
0x139c   :  { %v14999_v41 = vadd.f32 %v5466_v16, %v5465_v57  ;;  %v16865_v16 = vld [vmem:[#allocation11_spill] sm:$0xff]  ;;  %v16867_v57 = vld [vmem:[#allocation13_spill] sm:$0xff] }
0x139e   :  { %10821 = vtanh.f32 %v14999_v41 }
0x13a8   :  { %v10822_v38 = vpop.eup %10821 }
0x13a9   :  { %v15002_v30 = vmul.f32 %v10822_v38, %v10820_v2  ;;  %v16868_v2 = vld [vmem:[#allocation14_spill] sm:$0xff]  ;;  %v16869_v38 = vld [vmem:[#allocation15_spill] sm:$0xff] }
0x13ab   :  { %16853 = vst [vmem:[#allocation99_spill] sm:$0xff] %v15002_v30  ;;  %5534 = vmatprep.mubr.f32.mxu0 %v15002_v30  ;;  %5605 = vmatprep.mubr.f32.mxu1 %v15002_v30 }
0x13ac   :  { %5535 = vmatmul.mubr.f32.vlgmr.msra.gmra.mrb[52].mxu0 %v14924_v35  ;;  %5606 = vmatmul.mubr.f32.vlgmr.msra.gmra.mrb[60].mxu1 %v14924_v35  ;;  %v16858_v35 = vld [vmem:[#allocation4_spill] sm:$0xff] }
0x13ad   :  { %9729 = vmatpush1.bf16.msra.mxu0 %v13441_v13  ;;  %9793 = vmatpush1.bf16.msra.mxu1 %v13453_v44 }
0x13ae   :  { %9731 = vmatprep.subr.bf16.mxu0 %v13466_v11  ;;  %9795 = vmatprep.subr.bf16.mxu1 %v13468_v12 }
0x13b1   :  { %9733 = vmatpush1.bf16.msra.mxu0 %v13480_v48  ;;  %9797 = vmatpush1.bf16.msra.mxu1 %v16485_v20 }
0x13b2   :  { %9735 = vmatprep.subr.bf16.mxu0 %v16854_v7  ;;  %9799 = vmatprep.subr.bf16.mxu1 %v16855_v39 }
0x13b5   :  { %9737 = vmatpush1.bf16.msra.mxu0 %v16856_v58  ;;  %9801 = vmatpush1.bf16.msra.mxu1 %v16857_v63 }
0x13b6   :  { %9739 = vmatprep.subr.bf16.mxu0 %v16858_v35  ;;  %9803 = vmatprep.subr.bf16.mxu1 %v16859_v15  ;;  %v16870_v15 = vld [vmem:[#allocation16_spill] sm:$0xff]  ;;  %v16912_v35 = vld [vmem:[#allocation65_spill] sm:$0xff] }
0x13b9   :  { %9741 = vmatpush1.bf16.msra.mxu0 %v16860_v19  ;;  %9805 = vmatpush1.bf16.msra.mxu1 %v16861_v23  ;;  %v16871_v19 = vld [vmem:[#allocation17_spill] sm:$0xff]  ;;  %v16872_v23 = vld [vmem:[#allocation18_spill] sm:$0xff] }
0x13ba   :  { %9743 = vmatprep.subr.bf16.mxu0 %v16862_v34  ;;  %9807 = vmatprep.subr.bf16.mxu1 %v16863_v27  ;;  %v16873_v34 = vld [vmem:[#allocation19_spill] sm:$0xff]  ;;  %v16874_v27 = vld [vmem:[#allocation20_spill] sm:$0xff] }
0x13bd   :  { %9745 = vmatpush1.bf16.msra.mxu0 %v16864_v25  ;;  %9809 = vmatpush1.bf16.msra.mxu1 %v16865_v16  ;;  %v16875_v25 = vld [vmem:[#allocation21_spill] sm:$0xff]  ;;  %v16876_v16 = vld [vmem:[#allocation22_spill] sm:$0xff] }
0x13be   :  { %9747 = vmatprep.subr.bf16.mxu0 %v16866_v55  ;;  %9811 = vmatprep.subr.bf16.mxu1 %v16867_v57  ;;  %v16877_v55 = vld [vmem:[#allocation23_spill] sm:$0xff]  ;;  %v16878_v57 = vld [vmem:[#allocation24_spill] sm:$0xff] }
0x13c1   :  { %9749 = vmatpush1.bf16.msra.mxu0 %v16868_v2  ;;  %9813 = vmatpush1.bf16.msra.mxu1 %v16869_v38  ;;  %v16879_v2 = vld [vmem:[#allocation25_spill] sm:$0xff]  ;;  %v16880_v38 = vld [vmem:[#allocation26_spill] sm:$0xff] }
0x13c2   :  { %9751 = vmatprep.subr.bf16.mxu0 %v16870_v15  ;;  %9815 = vmatprep.subr.bf16.mxu1 %v16871_v19  ;;  %v16881_v15 = vld [vmem:[#allocation27_spill] sm:$0xff]  ;;  %v16882_v19 = vld [vmem:[#allocation28_spill] sm:$0xff] }
0x13c5   :  { %9753 = vmatpush1.bf16.msra.mxu0 %v16872_v23  ;;  %9817 = vmatpush1.bf16.msra.mxu1 %v16873_v34  ;;  %v16883_v23 = vld [vmem:[#allocation29_spill] sm:$0xff]  ;;  %v16884_v34 = vld [vmem:[#allocation30_spill] sm:$0xff] }
0x13c6   :  { %9755 = vmatprep.subr.bf16.mxu0 %v16874_v27  ;;  %9819 = vmatprep.subr.bf16.mxu1 %v16875_v25  ;;  %v16885_v27 = vld [vmem:[#allocation31_spill] sm:$0xff]  ;;  %v16886_v25 = vld [vmem:[#allocation32_spill] sm:$0xff] }
0x13c9   :  { %9757 = vmatpush1.bf16.msra.mxu0 %v16876_v16  ;;  %9821 = vmatpush1.bf16.msra.mxu1 %v16877_v55  ;;  %v16887_v16 = vld [vmem:[#allocation33_spill] sm:$0xff]  ;;  %v16888_v55 = vld [vmem:[#allocation34_spill] sm:$0xff] }
0x13ca   :  { %9759 = vmatprep.subr.bf16.mxu0 %v16878_v57  ;;  %9823 = vmatprep.subr.bf16.mxu1 %v16879_v2  ;;  %v16889_v57 = vld [vmem:[#allocation35_spill] sm:$0xff]  ;;  %v16890_v2 = vld [vmem:[#allocation36_spill] sm:$0xff] }
0x13cd   :  { %9761 = vmatpush1.bf16.msra.mxu0 %v16880_v38  ;;  %9825 = vmatpush1.bf16.msra.mxu1 %v16881_v15  ;;  %v16891_v38 = vld [vmem:[#allocation37_spill] sm:$0xff]  ;;  %v16892_v15 = vld [vmem:[#allocation38_spill] sm:$0xff] }
0x13ce   :  { %9763 = vmatprep.subr.bf16.mxu0 %v16882_v19  ;;  %9827 = vmatprep.subr.bf16.mxu1 %v16883_v23  ;;  %v16893_v19 = vld [vmem:[#allocation39_spill] sm:$0xff]  ;;  %v16894_v23 = vld [vmem:[#allocation40_spill] sm:$0xff] }
0x13d1   :  { %9765 = vmatpush1.bf16.msra.mxu0 %v16884_v34  ;;  %9829 = vmatpush1.bf16.msra.mxu1 %v16885_v27  ;;  %v16895_v34 = vld [vmem:[#allocation41_spill] sm:$0xff]  ;;  %v16896_v27 = vld [vmem:[#allocation42_spill] sm:$0xff] }
0x13d2   :  { %9767 = vmatprep.subr.bf16.mxu0 %v16886_v25  ;;  %9831 = vmatprep.subr.bf16.mxu1 %v16887_v16  ;;  %v16897_v25 = vld [vmem:[#allocation43_spill] sm:$0xff]  ;;  %v16898_v16 = vld [vmem:[#allocation44_spill] sm:$0xff] }
0x13d5   :  { %9769 = vmatpush1.bf16.msra.mxu0 %v16888_v55  ;;  %9833 = vmatpush1.bf16.msra.mxu1 %v16889_v57  ;;  %v16899_v55 = vld [vmem:[#allocation45_spill] sm:$0xff]  ;;  %v16900_v57 = vld [vmem:[#allocation46_spill] sm:$0xff] }
0x13d6   :  { %9771 = vmatprep.subr.bf16.mxu0 %v16890_v2  ;;  %9835 = vmatprep.subr.bf16.mxu1 %v16891_v38  ;;  %v16901_v2 = vld [vmem:[#allocation47_spill] sm:$0xff]  ;;  %v16902_v38 = vld [vmem:[#allocation48_spill] sm:$0xff] }
0x13d9   :  { %9773 = vmatpush1.bf16.msra.mxu0 %v16892_v15  ;;  %9837 = vmatpush1.bf16.msra.mxu1 %v16893_v19  ;;  %v16903_v15 = vld [vmem:[#allocation49_spill] sm:$0xff]  ;;  %v16904_v19 = vld [vmem:[#allocation50_spill] sm:$0xff] }
0x13da   :  { %9775 = vmatprep.subr.bf16.mxu0 %v16894_v23  ;;  %9839 = vmatprep.subr.bf16.mxu1 %v16895_v34  ;;  %v16905_v23 = vld [vmem:[#allocation51_spill] sm:$0xff]  ;;  %v16906_v34 = vld [vmem:[#allocation52_spill] sm:$0xff] }
0x13dd   :  { %9777 = vmatpush1.bf16.msra.mxu0 %v16896_v27  ;;  %9841 = vmatpush1.bf16.msra.mxu1 %v16897_v25  ;;  %v16907_v27 = vld [vmem:[#allocation53_spill] sm:$0xff]  ;;  %v16908_v25 = vld [vmem:[#allocation54_spill] sm:$0xff] }
0x13de   :  { %9779 = vmatprep.subr.bf16.mxu0 %v16898_v16  ;;  %9843 = vmatprep.subr.bf16.mxu1 %v16899_v55  ;;  %v16909_v16 = vld [vmem:[#allocation55_spill] sm:$0xff] }
0x13df   :  { %v16910_v55 = vld [vmem:[#allocation71_spill] sm:$0xff] }
0x13e1   :  { %9781 = vmatpush1.bf16.msra.mxu0 %v16900_v57  ;;  %9845 = vmatpush1.bf16.msra.mxu1 %v16901_v2  ;;  %v16911_v57 = vld [vmem:[#allocation62_spill] sm:$0xff] }
0x13e2   :  { %9783 = vmatprep.subr.bf16.mxu0 %v16902_v38  ;;  %9847 = vmatprep.subr.bf16.mxu1 %v16903_v15 }
0x13e5   :  { %9785 = vmatpush1.bf16.msra.mxu0 %v16904_v19  ;;  %9849 = vmatpush1.bf16.msra.mxu1 %v16905_v23 }
0x13e6   :  { %9787 = vmatprep.subr.bf16.mxu0 %v16906_v34  ;;  %9851 = vmatprep.subr.bf16.mxu1 %v16907_v27 }
0x13e9   :  { %9789 = vmatpush1.bf16.msra.mxu0 %v16908_v25  ;;  %9853 = vmatpush1.bf16.msra.mxu1 %v16909_v16 }
0x13ea   :  { %9855 = vmatprep.subr.bf16.mxu0 %v16910_v55  ;;  %9919 = vmatprep.subr.bf16.mxu1 %v16911_v57 }
0x147f   :  { %v5536_v2 = vpop.f32.mrb[52].mxu0  ;;  %v5607_v38 = vpop.f32.mrb[60].mxu1 }
0x1480   :  { %v5537_v15 = vadd.f32 %v5536_v2, %v16912_v35  ;;  %v5538_v63 = vpop.f32.mrb[53].mxu0  ;;  %v5609_v19 = vpop.f32.mrb[61].mxu1  ;;  %v5608_v16 = vadd.f32 %v5607_v38, %v14449_v37  ;;  %v16919_v38 = vld [vmem:[#allocation74_spill] sm:$0xff] }
0x1481   :  { %v5539_v23 = vadd.f32 %v5538_v63, %v14440_v33  ;;  %v5610_v25 = vadd.f32 %v5609_v19, %v14445_v32 }
0x1482   :  { %v6700_v58 = vmul.f32 -1.442695, %v5537_v15 }
0x1483   :  { %v6701_v34 = vmul.f32 -1.442695, %v5539_v23  ;;  %v6702_v27 = vmul.f32 -1.442695, %v5610_v25 }
0x1484   :  { %10823 = vpow2.f32 %v6700_v58 }
0x1485   :  { %10825 = vpow2.f32 %v6701_v34 }
0x1486   :  { %10827 = vpow2.f32 %v6702_v27 }
0x1487   :  { %10829 = vtanh.f32 %v5608_v16  ;;  %v16917_v16 = vld [vmem:[#allocation72_spill] sm:$0xff] }
0x148e   :  { %v10824_v55 = vpop.eup %10823 }
0x148f   :  { %v10826_v39 = vpop.eup %10825  ;;  %v5615_v57 = vadd.f32 1.0, %v10824_v55 }
0x1490   :  { %v5621_v7 = vadd.f32 1.0, %v10826_v39  ;;  %v10828_v2 = vpop.eup %10827  ;;  %v16915_v39 = vld [vmem:[#allocation58_spill] sm:$0xff] }
0x1491   :  { %10831 = vrcp.f32 %v5615_v57  ;;  %v10830_v35 = vpop.eup %10829  ;;  %v5628_v58 = vadd.f32 1.0, %v10828_v2  ;;  %v16918_v57 = vld [vmem:[#allocation73_spill] sm:$0xff]  ;;  %v16920_v2 = vld [vmem:[#allocation64_spill] sm:$0xff] }
0x1492   :  { %10833 = vrcp.f32 %v5621_v7  ;;  %v16914_v7 = vld [vmem:[#allocation57_spill] sm:$0xff] }
0x1493   :  { %10835 = vrcp.f32 %v5628_v58  ;;  %v16924_v58 = vld [vmem:[#allocation76_spill] sm:$0xff] }
0x149b   :  { %v10832_v63 = vpop.eup %10831 }
0x149c   :  { %v10834_v15 = vpop.eup %10833  ;;  %v5632_v23 = vmul.f32 %v10832_v63, %v10830_v35  ;;  %v16916_v35 = vld [vmem:[#allocation59_spill] sm:$0xff] }
0x149d   :  { %v5631_v34 = vmul.f32 %v10834_v15, %v14921_v46  ;;  %v10836_v25 = vpop.eup %10835  ;;  %v16913_v46 = vld [vmem:[#allocation56_spill] sm:$0xff]  ;;  %v16921_v63 = vld [vmem:[#allocation67_spill] sm:$0xff]  ;;  %v16922_v15 = vld [vmem:[#allocation66_spill] sm:$0xff] }
0x149f   :  { %v15077_v19 = vadd.f32 %v5632_v23, %v5631_v34  ;;  %v16923_v23 = vld [vmem:[#allocation75_spill] sm:$0xff]  ;;  %v16925_v34 = vld [vmem:[#allocation77_spill] sm:$0xff] }
0x14a1   :  { %10837 = vtanh.f32 %v15077_v19 }
0x14ab   :  { %v10838_v55 = vpop.eup %10837 }
0x14ac   :  { %v15080_v27 = vmul.f32 %v10838_v55, %v10836_v25  ;;  %v16926_v25 = vld [vmem:[#allocation78_spill] sm:$0xff]  ;;  %v16927_v55 = vld [vmem:[#allocation79_spill] sm:$0xff] }
0x14ae   :  { %5700 = vmatprep.mubr.f32.mxu0 %v15080_v27  ;;  %5771 = vmatprep.mubr.f32.mxu1 %v15080_v27 }
0x14af   :  { %5701 = vmatmul.mubr.f32.vlgmr.msra.gmra.mrb[54].mxu0 %v15002_v30  ;;  %5772 = vmatmul.mubr.f32.vlgmr.msra.gmra.mrb[62].mxu1 %v15002_v30  ;;  %v16928_v30 = vld [vmem:[#allocation80_spill] sm:$0xff] }
0x14b0   :  { %9857 = vmatpush1.bf16.msra.mxu0 %v13167_v9  ;;  %9921 = vmatpush1.bf16.msra.mxu1 %v13169_v8 }
0x14b1   :  { %9859 = vmatprep.subr.bf16.mxu0 %v13179_v17  ;;  %9923 = vmatprep.subr.bf16.mxu1 %v13181_v22 }
0x14b4   :  { %9861 = vmatpush1.bf16.msra.mxu0 %v13203_v6  ;;  %9925 = vmatpush1.bf16.msra.mxu1 %v13205_v29 }
0x14b5   :  { %9863 = vmatprep.subr.bf16.mxu0 %v13215_v54  ;;  %9927 = vmatprep.subr.bf16.mxu1 %v13217_v61 }
0x14b8   :  { %9865 = vmatpush1.bf16.msra.mxu0 %v13241_v21  ;;  %9929 = vmatpush1.bf16.msra.mxu1 %v13243_v28 }
0x14b9   :  { %9867 = vmatprep.subr.bf16.mxu0 %v13253_v43  ;;  %9931 = vmatprep.subr.bf16.mxu1 %v13255_v50 }
0x14bc   :  { %9869 = vmatpush1.bf16.msra.mxu0 %v13277_v31  ;;  %9933 = vmatpush1.bf16.msra.mxu1 %v13279_v3 }
0x14bd   :  { %9871 = vmatprep.subr.bf16.mxu0 %v13289_v47  ;;  %9935 = vmatprep.subr.bf16.mxu1 %v13291_v51 }
0x14c0   :  { %9873 = vmatpush1.bf16.msra.mxu0 %v13313_v1  ;;  %9937 = vmatpush1.bf16.msra.mxu1 %v13315_v56 }
0x14c1   :  { %9875 = vmatprep.subr.bf16.mxu0 %v13325_v18  ;;  %9939 = vmatprep.subr.bf16.mxu1 %v13327_v45 }
0x14c4   :  { %9877 = vmatpush1.bf16.msra.mxu0 %v13349_v52  ;;  %9941 = vmatpush1.bf16.msra.mxu1 %v13351_v0 }
0x14c5   :  { %9879 = vmatprep.subr.bf16.mxu0 %v13361_v62  ;;  %9943 = vmatprep.subr.bf16.mxu1 %v13363_v4 }
0x14c8   :  { %9881 = vmatpush1.bf16.msra.mxu0 %v13385_v59  ;;  %9945 = vmatpush1.bf16.msra.mxu1 %v13387_v60 }
0x14c9   :  { %9883 = vmatprep.subr.bf16.mxu0 %v13394_v10  ;;  %9947 = vmatprep.subr.bf16.mxu1 %v13396_v14 }
0x14cc   :  { %9885 = vmatpush1.bf16.msra.mxu0 %v13409_v42  ;;  %9949 = vmatpush1.bf16.msra.mxu1 %v13411_v40 }
0x14cd   :  { %9887 = vmatprep.subr.bf16.mxu0 %v14059_v26  ;;  %9951 = vmatprep.subr.bf16.mxu1 %v14070_v24 }
0x14d0   :  { %9889 = vmatpush1.bf16.msra.mxu0 %v14072_v5  ;;  %9953 = vmatpush1.bf16.msra.mxu1 %v16913_v46 }
0x14d1   :  { %9891 = vmatprep.subr.bf16.mxu0 %v16914_v7  ;;  %9955 = vmatprep.subr.bf16.mxu1 %v16915_v39 }
0x14d4   :  { %9893 = vmatpush1.bf16.msra.mxu0 %v16916_v35  ;;  %9957 = vmatpush1.bf16.msra.mxu1 %v16917_v16  ;;  %v16944_v16 = vld [vmem:[#allocation94_spill] sm:$0xff] }
0x14d5   :  { %9895 = vmatprep.subr.bf16.mxu0 %v16918_v57  ;;  %9959 = vmatprep.subr.bf16.mxu1 %v16919_v38  ;;  %v16929_v57 = vld [vmem:[#allocation81_spill] sm:$0xff]  ;;  %v16930_v38 = vld [vmem:[#allocation82_spill] sm:$0xff] }
0x14d8   :  { %9897 = vmatpush1.bf16.msra.mxu0 %v16920_v2  ;;  %9961 = vmatpush1.bf16.msra.mxu1 %v16921_v63  ;;  %v16931_v2 = vld [vmem:[#allocation83_spill] sm:$0xff]  ;;  %v16932_v63 = vld [vmem:[#allocation84_spill] sm:$0xff] }
0x14d9   :  { %9899 = vmatprep.subr.bf16.mxu0 %v16922_v15  ;;  %9963 = vmatprep.subr.bf16.mxu1 %v16923_v23  ;;  %v16933_v15 = vld [vmem:[#allocation85_spill] sm:$0xff]  ;;  %v16934_v23 = vld [vmem:[#allocation86_spill] sm:$0xff] }
0x14dc   :  { %9901 = vmatpush1.bf16.msra.mxu0 %v16924_v58  ;;  %9965 = vmatpush1.bf16.msra.mxu1 %v16925_v34  ;;  %v16935_v58 = vld [vmem:[#allocation87_spill] sm:$0xff]  ;;  %v16936_v34 = vld [vmem:[#allocation88_spill] sm:$0xff] }
0x14dd   :  { %9903 = vmatprep.subr.bf16.mxu0 %v16926_v25  ;;  %9967 = vmatprep.subr.bf16.mxu1 %v16927_v55  ;;  %v16937_v25 = vld [vmem:[#allocation89_spill] sm:$0xff]  ;;  %v16938_v55 = vld [vmem:[#allocation90_spill] sm:$0xff] }
0x14e0   :  { %9905 = vmatpush1.bf16.msra.mxu0 %v16928_v30  ;;  %9969 = vmatpush1.bf16.msra.mxu1 %v16929_v57  ;;  %v16939_v30 = vld [vmem:[#allocation91_spill] sm:$0xff]  ;;  %v16940_v57 = vld [vmem:[#allocation92_spill] sm:$0xff] }
0x14e1   :  { %9907 = vmatprep.subr.bf16.mxu0 %v16930_v38  ;;  %9971 = vmatprep.subr.bf16.mxu1 %v16931_v2  ;;  %v16941_v38 = vld [vmem:[#allocation93_spill] sm:$0xff]  ;;  %v16942_v2 = vld [vmem:[#allocation70_spill] sm:$0xff] }
0x14e4   :  { %9909 = vmatpush1.bf16.msra.mxu0 %v16932_v63  ;;  %9973 = vmatpush1.bf16.msra.mxu1 %v16933_v15  ;;  %v16943_v63 = vld [vmem:[#allocation63_spill] sm:$0xff] }
0x14e5   :  { %9911 = vmatprep.subr.bf16.mxu0 %v16934_v23  ;;  %9975 = vmatprep.subr.bf16.mxu1 %v16935_v58 }
0x14e8   :  { %9913 = vmatpush1.bf16.msra.mxu0 %v16936_v34  ;;  %9977 = vmatpush1.bf16.msra.mxu1 %v16937_v25 }
0x14e9   :  { %9915 = vmatprep.subr.bf16.mxu0 %v16938_v55  ;;  %9979 = vmatprep.subr.bf16.mxu1 %v16939_v30 }
0x14ec   :  { %9917 = vmatpush1.bf16.msra.mxu0 %v16940_v57  ;;  %9981 = vmatpush1.bf16.msra.mxu1 %v16941_v38 }
0x14ed   :  { %9983 = vmatprep.subr.bf16.mxu0 %v16942_v2  ;;  %10047 = vmatprep.subr.bf16.mxu1 %v16943_v63 }
0x1582   :  { %v5702_v15 = vpop.f32.mrb[54].mxu0  ;;  %v5773_v23 = vpop.f32.mrb[62].mxu1 }
0x1583   :  { %v5703_v58 = vadd.f32 %v5702_v15, %v16944_v16  ;;  %v5704_v35 = vpop.f32.mrb[55].mxu0  ;;  %v5775_v34 = vpop.f32.mrb[63].mxu1  ;;  %v5774_v38 = vadd.f32 %v5773_v23, %v14356_v36  ;;  %v16952_v23 = vld [vmem:[#allocation7_spill] sm:$0xff] }
0x1584   :  { %v5705_v25 = vadd.f32 %v5704_v35, %v16575_v49  ;;  %v5776_v57 = vadd.f32 %v5775_v34, %v16576_v53 }
0x1585   :  { %v6703_v39 = vmul.f32 -1.442695, %v5703_v58 }
0x1586   :  { %v6704_v55 = vmul.f32 -1.442695, %v5705_v25  ;;  %v6705_v30 = vmul.f32 -1.442695, %v5776_v57 }
0x1587   :  { %10839 = vpow2.f32 %v6703_v39 }
0x1588   :  { %10841 = vpow2.f32 %v6704_v55 }
0x1589   :  { %10843 = vpow2.f32 %v6705_v30 }
0x158a   :  { %10845 = vtanh.f32 %v5774_v38  ;;  %v16950_v38 = vld [vmem:[#allocation5_spill] sm:$0xff] }
0x1591   :  { %v10840_v2 = vpop.eup %10839 }
0x1592   :  { %v10842_v7 = vpop.eup %10841  ;;  %v5781_v63 = vadd.f32 1.0, %v10840_v2 }
0x1593   :  { %v5787_v46 = vadd.f32 1.0, %v10842_v7  ;;  %v10844_v15 = vpop.eup %10843  ;;  %v16947_v7 = vld [vmem:[#allocation2_spill] sm:$0xff] }
0x1594   :  { %10847 = vrcp.f32 %v5781_v63  ;;  %v10846_v16 = vpop.eup %10845  ;;  %v5794_v39 = vadd.f32 1.0, %v10844_v15  ;;  %v16951_v63 = vld [vmem:[#allocation6_spill] sm:$0xff]  ;;  %v16953_v15 = vld [vmem:[#allocation8_spill] sm:$0xff] }
0x1595   :  { %10849 = vrcp.f32 %v5787_v46  ;;  %v16946_v46 = vld [vmem:[#allocation68_spill] sm:$0xff] }
0x1596   :  { %10851 = vrcp.f32 %v5794_v39  ;;  %v16957_v39 = vld [vmem:[#allocation12_spill] sm:$0xff] }
0x159e   :  { %v10848_v35 = vpop.eup %10847 }
0x159f   :  { %v10850_v58 = vpop.eup %10849  ;;  %v5798_v25 = vmul.f32 %v10848_v35, %v10846_v16  ;;  %v16948_v16 = vld [vmem:[#allocation3_spill] sm:$0xff]  ;;  %v16954_v35 = vld [vmem:[#allocation9_spill] sm:$0xff] }
0x15a0   :  { %v5797_v55 = vmul.f32 %v10850_v58, %v14999_v41  ;;  %v10852_v57 = vpop.eup %10851  ;;  %v16945_v41 = vld [vmem:[#allocation69_spill] sm:$0xff]  ;;  %v16955_v58 = vld [vmem:[#allocation10_spill] sm:$0xff] }
0x15a2   :  { %v15155_v34 = vadd.f32 %v5798_v25, %v5797_v55  ;;  %v16956_v25 = vld [vmem:[#allocation11_spill] sm:$0xff]  ;;  %v16958_v55 = vld [vmem:[#allocation13_spill] sm:$0xff] }
0x15a4   :  { %10853 = vtanh.f32 %v15155_v34 }
0x15ae   :  { %v10854_v2 = vpop.eup %10853 }
0x15af   :  { %v15158_v30 = vmul.f32 %v10854_v2, %v10852_v57  ;;  %v16959_v57 = vld [vmem:[#allocation14_spill] sm:$0xff]  ;;  %v16960_v2 = vld [vmem:[#allocation15_spill] sm:$0xff] }
0x15b1   :  { %5866 = vmatprep.mubr.f32.mxu0 %v15158_v30  ;;  %5937 = vmatprep.mubr.f32.mxu1 %v15158_v30 }
0x15b2   :  { %5867 = vmatmul.mubr.f32.vlgmr.msra.gmra.mrb[56].mxu0 %v15080_v27  ;;  %5938 = vmatmul.mubr.f32.vlgmr.msra.gmra.mrb[64].mxu1 %v15080_v27  ;;  %v16949_v27 = vld [vmem:[#allocation4_spill] sm:$0xff] }
0x15b3   :  { %9985 = vmatpush1.bf16.msra.mxu0 %v13441_v13  ;;  %10049 = vmatpush1.bf16.msra.mxu1 %v13453_v44 }
0x15b4   :  { %9987 = vmatprep.subr.bf16.mxu0 %v13466_v11  ;;  %10051 = vmatprep.subr.bf16.mxu1 %v13468_v12 }
0x15b7   :  { %9989 = vmatpush1.bf16.msra.mxu0 %v13480_v48  ;;  %10053 = vmatpush1.bf16.msra.mxu1 %v16485_v20 }
0x15b8   :  { %9991 = vmatprep.subr.bf16.mxu0 %v16945_v41  ;;  %10055 = vmatprep.subr.bf16.mxu1 %v16946_v46 }
0x15bb   :  { %9993 = vmatpush1.bf16.msra.mxu0 %v16947_v7  ;;  %10057 = vmatpush1.bf16.msra.mxu1 %v16948_v16 }
0x15bc   :  { %9995 = vmatprep.subr.bf16.mxu0 %v16949_v27  ;;  %10059 = vmatprep.subr.bf16.mxu1 %v16950_v38  ;;  %v16961_v38 = vld [vmem:[#allocation16_spill] sm:$0xff]  ;;  %v17003_v27 = vld [vmem:[#allocation65_spill] sm:$0xff] }
0x15bf   :  { %9997 = vmatpush1.bf16.msra.mxu0 %v16951_v63  ;;  %10061 = vmatpush1.bf16.msra.mxu1 %v16952_v23  ;;  %v16962_v63 = vld [vmem:[#allocation17_spill] sm:$0xff]  ;;  %v16963_v23 = vld [vmem:[#allocation18_spill] sm:$0xff] }
0x15c0   :  { %9999 = vmatprep.subr.bf16.mxu0 %v16953_v15  ;;  %10063 = vmatprep.subr.bf16.mxu1 %v16954_v35  ;;  %v16964_v15 = vld [vmem:[#allocation19_spill] sm:$0xff]  ;;  %v16965_v35 = vld [vmem:[#allocation20_spill] sm:$0xff] }
0x15c3   :  { %10001 = vmatpush1.bf16.msra.mxu0 %v16955_v58  ;;  %10065 = vmatpush1.bf16.msra.mxu1 %v16956_v25  ;;  %v16966_v58 = vld [vmem:[#allocation21_spill] sm:$0xff]  ;;  %v16967_v25 = vld [vmem:[#allocation22_spill] sm:$0xff] }
0x15c4   :  { %10003 = vmatprep.subr.bf16.mxu0 %v16957_v39  ;;  %10067 = vmatprep.subr.bf16.mxu1 %v16958_v55  ;;  %v16968_v39 = vld [vmem:[#allocation23_spill] sm:$0xff]  ;;  %v16969_v55 = vld [vmem:[#allocation24_spill] sm:$0xff] }
0x15c7   :  { %10005 = vmatpush1.bf16.msra.mxu0 %v16959_v57  ;;  %10069 = vmatpush1.bf16.msra.mxu1 %v16960_v2  ;;  %v16970_v57 = vld [vmem:[#allocation25_spill] sm:$0xff]  ;;  %v16971_v2 = vld [vmem:[#allocation26_spill] sm:$0xff] }
0x15c8   :  { %10007 = vmatprep.subr.bf16.mxu0 %v16961_v38  ;;  %10071 = vmatprep.subr.bf16.mxu1 %v16962_v63  ;;  %v16972_v38 = vld [vmem:[#allocation27_spill] sm:$0xff]  ;;  %v16973_v63 = vld [vmem:[#allocation28_spill] sm:$0xff] }
0x15cb   :  { %10009 = vmatpush1.bf16.msra.mxu0 %v16963_v23  ;;  %10073 = vmatpush1.bf16.msra.mxu1 %v16964_v15  ;;  %v16974_v23 = vld [vmem:[#allocation29_spill] sm:$0xff]  ;;  %v16975_v15 = vld [vmem:[#allocation30_spill] sm:$0xff] }
0x15cc   :  { %10011 = vmatprep.subr.bf16.mxu0 %v16965_v35  ;;  %10075 = vmatprep.subr.bf16.mxu1 %v16966_v58  ;;  %v16976_v35 = vld [vmem:[#allocation31_spill] sm:$0xff]  ;;  %v16977_v58 = vld [vmem:[#allocation32_spill] sm:$0xff] }
0x15cf   :  { %10013 = vmatpush1.bf16.msra.mxu0 %v16967_v25  ;;  %10077 = vmatpush1.bf16.msra.mxu1 %v16968_v39  ;;  %v16978_v25 = vld [vmem:[#allocation33_spill] sm:$0xff]  ;;  %v16979_v39 = vld [vmem:[#allocation34_spill] sm:$0xff] }
0x15d0   :  { %10015 = vmatprep.subr.bf16.mxu0 %v16969_v55  ;;  %10079 = vmatprep.subr.bf16.mxu1 %v16970_v57  ;;  %v16980_v55 = vld [vmem:[#allocation35_spill] sm:$0xff]  ;;  %v16981_v57 = vld [vmem:[#allocation36_spill] sm:$0xff] }
0x15d3   :  { %10017 = vmatpush1.bf16.msra.mxu0 %v16971_v2  ;;  %10081 = vmatpush1.bf16.msra.mxu1 %v16972_v38  ;;  %v16982_v2 = vld [vmem:[#allocation37_spill] sm:$0xff]  ;;  %v16983_v38 = vld [vmem:[#allocation38_spill] sm:$0xff] }
0x15d4   :  { %10019 = vmatprep.subr.bf16.mxu0 %v16973_v63  ;;  %10083 = vmatprep.subr.bf16.mxu1 %v16974_v23  ;;  %v16984_v63 = vld [vmem:[#allocation39_spill] sm:$0xff]  ;;  %v16985_v23 = vld [vmem:[#allocation40_spill] sm:$0xff] }
0x15d7   :  { %10021 = vmatpush1.bf16.msra.mxu0 %v16975_v15  ;;  %10085 = vmatpush1.bf16.msra.mxu1 %v16976_v35  ;;  %v16986_v15 = vld [vmem:[#allocation41_spill] sm:$0xff]  ;;  %v16987_v35 = vld [vmem:[#allocation42_spill] sm:$0xff] }
0x15d8   :  { %10023 = vmatprep.subr.bf16.mxu0 %v16977_v58  ;;  %10087 = vmatprep.subr.bf16.mxu1 %v16978_v25  ;;  %v16988_v58 = vld [vmem:[#allocation43_spill] sm:$0xff]  ;;  %v16989_v25 = vld [vmem:[#allocation44_spill] sm:$0xff] }
0x15db   :  { %10025 = vmatpush1.bf16.msra.mxu0 %v16979_v39  ;;  %10089 = vmatpush1.bf16.msra.mxu1 %v16980_v55  ;;  %v16990_v39 = vld [vmem:[#allocation45_spill] sm:$0xff]  ;;  %v16991_v55 = vld [vmem:[#allocation46_spill] sm:$0xff] }
0x15dc   :  { %10027 = vmatprep.subr.bf16.mxu0 %v16981_v57  ;;  %10091 = vmatprep.subr.bf16.mxu1 %v16982_v2  ;;  %v16992_v57 = vld [vmem:[#allocation47_spill] sm:$0xff]  ;;  %v16993_v2 = vld [vmem:[#allocation48_spill] sm:$0xff] }
0x15df   :  { %10029 = vmatpush1.bf16.msra.mxu0 %v16983_v38  ;;  %10093 = vmatpush1.bf16.msra.mxu1 %v16984_v63  ;;  %v16994_v38 = vld [vmem:[#allocation49_spill] sm:$0xff]  ;;  %v16995_v63 = vld [vmem:[#allocation50_spill] sm:$0xff] }
0x15e0   :  { %10031 = vmatprep.subr.bf16.mxu0 %v16985_v23  ;;  %10095 = vmatprep.subr.bf16.mxu1 %v16986_v15  ;;  %v16996_v23 = vld [vmem:[#allocation51_spill] sm:$0xff]  ;;  %v16997_v15 = vld [vmem:[#allocation52_spill] sm:$0xff] }
0x15e3   :  { %10033 = vmatpush1.bf16.msra.mxu0 %v16987_v35  ;;  %10097 = vmatpush1.bf16.msra.mxu1 %v16988_v58  ;;  %v16998_v35 = vld [vmem:[#allocation53_spill] sm:$0xff]  ;;  %v16999_v58 = vld [vmem:[#allocation54_spill] sm:$0xff] }
0x15e4   :  { %10035 = vmatprep.subr.bf16.mxu0 %v16989_v25  ;;  %10099 = vmatprep.subr.bf16.mxu1 %v16990_v39  ;;  %v17000_v25 = vld [vmem:[#allocation55_spill] sm:$0xff] }
0x15e5   :  { %v17001_v39 = vld [vmem:[#allocation71_spill] sm:$0xff] }
0x15e7   :  { %10037 = vmatpush1.bf16.msra.mxu0 %v16991_v55  ;;  %10101 = vmatpush1.bf16.msra.mxu1 %v16992_v57  ;;  %v17002_v55 = vld [vmem:[#allocation62_spill] sm:$0xff] }
0x15e8   :  { %10039 = vmatprep.subr.bf16.mxu0 %v16993_v2  ;;  %10103 = vmatprep.subr.bf16.mxu1 %v16994_v38 }
0x15eb   :  { %10041 = vmatpush1.bf16.msra.mxu0 %v16995_v63  ;;  %10105 = vmatpush1.bf16.msra.mxu1 %v16996_v23 }
0x15ec   :  { %10043 = vmatprep.subr.bf16.mxu0 %v16997_v15  ;;  %10107 = vmatprep.subr.bf16.mxu1 %v16998_v35 }
0x15ef   :  { %10045 = vmatpush1.bf16.msra.mxu0 %v16999_v58  ;;  %10109 = vmatpush1.bf16.msra.mxu1 %v17000_v25 }
0x15f0   :  { %10111 = vmatprep.subr.bf16.mxu0 %v17001_v39  ;;  %10175 = vmatprep.subr.bf16.mxu1 %v17002_v55 }
0x1685   :  { %v5868_v57 = vpop.f32.mrb[56].mxu0  ;;  %v5939_v2 = vpop.f32.mrb[64].mxu1 }
0x1686   :  { %v5869_v38 = vadd.f32 %v5868_v57, %v17003_v27  ;;  %v5870_v16 = vpop.f32.mrb[57].mxu0  ;;  %v5941_v63 = vpop.f32.mrb[65].mxu1  ;;  %v5940_v25 = vadd.f32 %v5939_v2, %v14449_v37 }
0x1687   :  { %v5871_v23 = vadd.f32 %v5870_v16, %v14440_v33  ;;  %v5942_v58 = vadd.f32 %v5941_v63, %v14445_v32 }
0x1688   :  { %v6706_v7 = vmul.f32 -1.442695, %v5869_v38 }
0x1689   :  { %v6707_v15 = vmul.f32 -1.442695, %v5871_v23  ;;  %v6708_v35 = vmul.f32 -1.442695, %v5942_v58 }
0x168a   :  { %10855 = vpow2.f32 %v6706_v7 }
0x168b   :  { %10857 = vpow2.f32 %v6707_v15 }
0x168c   :  { %10859 = vpow2.f32 %v6708_v35 }
0x168d   :  { %10861 = vtanh.f32 %v5940_v25 }
0x1694   :  { %v10856_v39 = vpop.eup %10855 }
0x1695   :  { %v10858_v46 = vpop.eup %10857  ;;  %v5947_v55 = vadd.f32 1.0, %v10856_v39 }
0x1696   :  { %v5953_v41 = vadd.f32 1.0, %v10858_v46  ;;  %v10860_v57 = vpop.eup %10859 }
0x1697   :  { %10863 = vrcp.f32 %v5947_v55  ;;  %v10862_v27 = vpop.eup %10861  ;;  %v5960_v7 = vadd.f32 1.0, %v10860_v57 }
0x1698   :  { %10865 = vrcp.f32 %v5953_v41 }
0x1699   :  { %10867 = vrcp.f32 %v5960_v7 }
0x16a1   :  { %v10864_v16 = vpop.eup %10863 }
0x16a2   :  { %v10866_v38 = vpop.eup %10865  ;;  %v5964_v23 = vmul.f32 %v10864_v16, %v10862_v27 }
0x16a3   :  { %v5963_v15 = vmul.f32 %v10866_v38, %v15077_v19  ;;  %v10868_v58 = vpop.eup %10867  ;;  %v17035_v19 = vld [vmem:[#allocation94_spill] sm:$0xff] }
0x16a5   :  { %v15233_v63 = vadd.f32 %v5964_v23, %v5963_v15 }
0x16a7   :  { %10869 = vtanh.f32 %v15233_v63 }
0x16b1   :  { %v10870_v2 = vpop.eup %10869 }
0x16b2   :  { %v15236_v35 = vmul.f32 %v10870_v2, %v10868_v58 }
0x16b4   :  { %6032 = vmatprep.mubr.f32.mxu0 %v15236_v35  ;;  %6103 = vmatprep.mubr.f32.mxu1 %v15236_v35 }
0x16b5   :  { %6033 = vmatmul.mubr.f32.vlgmr.msra.gmra.mrb[58].mxu0 %v15158_v30  ;;  %6104 = vmatmul.mubr.f32.vlgmr.msra.gmra.mrb[66].mxu1 %v15158_v30 }
0x16b6   :  { %10113 = vmatpush1.bf16.msra.mxu0 %v13167_v9  ;;  %10177 = vmatpush1.bf16.msra.mxu1 %v13169_v8  ;;  %v17004_v9 = vld [vmem:[#allocation56_spill] sm:$0xff]  ;;  %v17005_v8 = vld [vmem:[#allocation57_spill] sm:$0xff] }
0x16b7   :  { %10115 = vmatprep.subr.bf16.mxu0 %v13179_v17  ;;  %10179 = vmatprep.subr.bf16.mxu1 %v13181_v22  ;;  %v17006_v17 = vld [vmem:[#allocation58_spill] sm:$0xff]  ;;  %v17007_v22 = vld [vmem:[#allocation59_spill] sm:$0xff] }
0x16ba   :  { %10117 = vmatpush1.bf16.msra.mxu0 %v13203_v6  ;;  %10181 = vmatpush1.bf16.msra.mxu1 %v13205_v29  ;;  %v17008_v6 = vld [vmem:[#allocation72_spill] sm:$0xff]  ;;  %v17009_v29 = vld [vmem:[#allocation73_spill] sm:$0xff] }
0x16bb   :  { %10119 = vmatprep.subr.bf16.mxu0 %v13215_v54  ;;  %10183 = vmatprep.subr.bf16.mxu1 %v13217_v61  ;;  %v17010_v54 = vld [vmem:[#allocation74_spill] sm:$0xff]  ;;  %v17011_v61 = vld [vmem:[#allocation64_spill] sm:$0xff] }
0x16be   :  { %10121 = vmatpush1.bf16.msra.mxu0 %v13241_v21  ;;  %10185 = vmatpush1.bf16.msra.mxu1 %v13243_v28  ;;  %v17012_v21 = vld [vmem:[#allocation67_spill] sm:$0xff]  ;;  %v17013_v28 = vld [vmem:[#allocation66_spill] sm:$0xff] }
0x16bf   :  { %10123 = vmatprep.subr.bf16.mxu0 %v13253_v43  ;;  %10187 = vmatprep.subr.bf16.mxu1 %v13255_v50  ;;  %v17014_v43 = vld [vmem:[#allocation75_spill] sm:$0xff]  ;;  %v17015_v50 = vld [vmem:[#allocation76_spill] sm:$0xff] }
0x16c2   :  { %10125 = vmatpush1.bf16.msra.mxu0 %v13277_v31  ;;  %10189 = vmatpush1.bf16.msra.mxu1 %v13279_v3  ;;  %v17016_v31 = vld [vmem:[#allocation77_spill] sm:$0xff]  ;;  %v17017_v3 = vld [vmem:[#allocation78_spill] sm:$0xff] }
0x16c3   :  { %10127 = vmatprep.subr.bf16.mxu0 %v13289_v47  ;;  %10191 = vmatprep.subr.bf16.mxu1 %v13291_v51  ;;  %v17018_v47 = vld [vmem:[#allocation79_spill] sm:$0xff]  ;;  %v17019_v51 = vld [vmem:[#allocation80_spill] sm:$0xff] }
0x16c6   :  { %10129 = vmatpush1.bf16.msra.mxu0 %v13313_v1  ;;  %10193 = vmatpush1.bf16.msra.mxu1 %v13315_v56  ;;  %v17020_v1 = vld [vmem:[#allocation81_spill] sm:$0xff]  ;;  %v17021_v56 = vld [vmem:[#allocation82_spill] sm:$0xff] }
0x16c7   :  { %10131 = vmatprep.subr.bf16.mxu0 %v13325_v18  ;;  %10195 = vmatprep.subr.bf16.mxu1 %v13327_v45  ;;  %v17022_v18 = vld [vmem:[#allocation83_spill] sm:$0xff]  ;;  %v17023_v45 = vld [vmem:[#allocation84_spill] sm:$0xff] }
0x16ca   :  { %10133 = vmatpush1.bf16.msra.mxu0 %v13349_v52  ;;  %10197 = vmatpush1.bf16.msra.mxu1 %v13351_v0  ;;  %v17024_v52 = vld [vmem:[#allocation85_spill] sm:$0xff]  ;;  %v17025_v0 = vld [vmem:[#allocation86_spill] sm:$0xff] }
0x16cb   :  { %10135 = vmatprep.subr.bf16.mxu0 %v13361_v62  ;;  %10199 = vmatprep.subr.bf16.mxu1 %v13363_v4  ;;  %v17026_v62 = vld [vmem:[#allocation87_spill] sm:$0xff]  ;;  %v17027_v4 = vld [vmem:[#allocation88_spill] sm:$0xff] }
0x16ce   :  { %10137 = vmatpush1.bf16.msra.mxu0 %v13385_v59  ;;  %10201 = vmatpush1.bf16.msra.mxu1 %v13387_v60  ;;  %v17028_v59 = vld [vmem:[#allocation89_spill] sm:$0xff]  ;;  %v17029_v60 = vld [vmem:[#allocation90_spill] sm:$0xff] }
0x16cf   :  { %10139 = vmatprep.subr.bf16.mxu0 %v13394_v10  ;;  %10203 = vmatprep.subr.bf16.mxu1 %v13396_v14  ;;  %v17030_v10 = vld [vmem:[#allocation91_spill] sm:$0xff]  ;;  %v17031_v14 = vld [vmem:[#allocation92_spill] sm:$0xff] }
0x16d2   :  { %10141 = vmatpush1.bf16.msra.mxu0 %v13409_v42  ;;  %10205 = vmatpush1.bf16.msra.mxu1 %v13411_v40  ;;  %v17032_v42 = vld [vmem:[#allocation93_spill] sm:$0xff]  ;;  %v17033_v40 = vld [vmem:[#allocation70_spill] sm:$0xff] }
0x16d3   :  { %10143 = vmatprep.subr.bf16.mxu0 %v14059_v26  ;;  %10207 = vmatprep.subr.bf16.mxu1 %v14070_v24  ;;  %v17034_v26 = vld [vmem:[#allocation63_spill] sm:$0xff] }
0x16d6   :  { %10145 = vmatpush1.bf16.msra.mxu0 %v14072_v5  ;;  %10209 = vmatpush1.bf16.msra.mxu1 %v17004_v9 }
0x16d7   :  { %10147 = vmatprep.subr.bf16.mxu0 %v17005_v8  ;;  %10211 = vmatprep.subr.bf16.mxu1 %v17006_v17 }
0x16da   :  { %10149 = vmatpush1.bf16.msra.mxu0 %v17007_v22  ;;  %10213 = vmatpush1.bf16.msra.mxu1 %v17008_v6 }
0x16db   :  { %10151 = vmatprep.subr.bf16.mxu0 %v17009_v29  ;;  %10215 = vmatprep.subr.bf16.mxu1 %v17010_v54 }
0x16de   :  { %10153 = vmatpush1.bf16.msra.mxu0 %v17011_v61  ;;  %10217 = vmatpush1.bf16.msra.mxu1 %v17012_v21 }
0x16df   :  { %10155 = vmatprep.subr.bf16.mxu0 %v17013_v28  ;;  %10219 = vmatprep.subr.bf16.mxu1 %v17014_v43  ;;  %v17037_v43 = vld [vmem:[#allocation68_spill] sm:$0xff] }
0x16e2   :  { %10157 = vmatpush1.bf16.msra.mxu0 %v17015_v50  ;;  %10221 = vmatpush1.bf16.msra.mxu1 %v17016_v31  ;;  %v17038_v50 = vld [vmem:[#allocation2_spill] sm:$0xff]  ;;  %v17039_v31 = vld [vmem:[#allocation3_spill] sm:$0xff] }
0x16e3   :  { %10159 = vmatprep.subr.bf16.mxu0 %v17017_v3  ;;  %10223 = vmatprep.subr.bf16.mxu1 %v17018_v47  ;;  %v17047_v3 = vld [vmem:[#allocation11_spill] sm:$0xff]  ;;  %v17048_v47 = vld [vmem:[#allocation12_spill] sm:$0xff] }
0x16e6   :  { %10161 = vmatpush1.bf16.msra.mxu0 %v17019_v51  ;;  %10225 = vmatpush1.bf16.msra.mxu1 %v17020_v1  ;;  %v17049_v51 = vld [vmem:[#allocation13_spill] sm:$0xff]  ;;  %v17050_v1 = vld [vmem:[#allocation14_spill] sm:$0xff] }
0x16e7   :  { %10163 = vmatprep.subr.bf16.mxu0 %v17021_v56  ;;  %10227 = vmatprep.subr.bf16.mxu1 %v17022_v18  ;;  %v17051_v56 = vld [vmem:[#allocation15_spill] sm:$0xff]  ;;  %v17052_v18 = vld [vmem:[#allocation16_spill] sm:$0xff] }
0x16ea   :  { %10165 = vmatpush1.bf16.msra.mxu0 %v17023_v45  ;;  %10229 = vmatpush1.bf16.msra.mxu1 %v17024_v52  ;;  %v17053_v45 = vld [vmem:[#allocation17_spill] sm:$0xff]  ;;  %v17054_v52 = vld [vmem:[#allocation18_spill] sm:$0xff] }
0x16eb   :  { %10167 = vmatprep.subr.bf16.mxu0 %v17025_v0  ;;  %10231 = vmatprep.subr.bf16.mxu1 %v17026_v62  ;;  %v17055_v0 = vld [vmem:[#allocation19_spill] sm:$0xff]  ;;  %v17056_v62 = vld [vmem:[#allocation20_spill] sm:$0xff] }
0x16ee   :  { %10169 = vmatpush1.bf16.msra.mxu0 %v17027_v4  ;;  %10233 = vmatpush1.bf16.msra.mxu1 %v17028_v59  ;;  %v17057_v4 = vld [vmem:[#allocation21_spill] sm:$0xff]  ;;  %v17058_v59 = vld [vmem:[#allocation22_spill] sm:$0xff] }
0x16ef   :  { %10171 = vmatprep.subr.bf16.mxu0 %v17029_v60  ;;  %10235 = vmatprep.subr.bf16.mxu1 %v17030_v10  ;;  %v17059_v60 = vld [vmem:[#allocation23_spill] sm:$0xff]  ;;  %v17060_v10 = vld [vmem:[#allocation24_spill] sm:$0xff] }
0x16f2   :  { %10173 = vmatpush1.bf16.msra.mxu0 %v17031_v14  ;;  %10237 = vmatpush1.bf16.msra.mxu1 %v17032_v42  ;;  %v17061_v14 = vld [vmem:[#allocation25_spill] sm:$0xff]  ;;  %v17062_v42 = vld [vmem:[#allocation26_spill] sm:$0xff] }
0x16f3   :  { %10239 = vmatprep.subr.bf16.mxu0 %v17033_v40  ;;  %10303 = vmatprep.subr.bf16.mxu1 %v17034_v26  ;;  %v17063_v40 = vld [vmem:[#allocation27_spill] sm:$0xff]  ;;  %v17064_v26 = vld [vmem:[#allocation28_spill] sm:$0xff] }
0x1788   :  { %v6034_v24 = vpop.f32.mrb[58].mxu0  ;;  %v6105_v5 = vpop.f32.mrb[66].mxu1 }
0x1789   :  { %v6035_v41 = vadd.f32 %v6034_v24, %v17035_v19  ;;  %v6036_v46 = vpop.f32.mrb[59].mxu0  ;;  %v6107_v27 = vpop.f32.mrb[67].mxu1  ;;  %v6106_v38 = vadd.f32 %v6105_v5, %v14356_v36  ;;  %v17065_v24 = vld [vmem:[#allocation29_spill] sm:$0xff]  ;;  %v17066_v5 = vld [vmem:[#allocation30_spill] sm:$0xff] }
0x178a   :  { %v6037_v25 = vadd.f32 %v6036_v46, %v16575_v49  ;;  %v6108_v57 = vadd.f32 %v6107_v27, %v16576_v53  ;;  %v17068_v46 = vld [vmem:[#allocation32_spill] sm:$0xff]  ;;  %v17069_v27 = vld [vmem:[#allocation33_spill] sm:$0xff] }
0x178b   :  { %v6709_v39 = vmul.f32 -1.442695, %v6035_v41  ;;  %v17067_v41 = vld [vmem:[#allocation31_spill] sm:$0xff] }
0x178c   :  { %v6710_v55 = vmul.f32 -1.442695, %v6037_v25  ;;  %v6711_v16 = vmul.f32 -1.442695, %v6108_v57  ;;  %v17070_v25 = vld [vmem:[#allocation34_spill] sm:$0xff]  ;;  %v17073_v57 = vld [vmem:[#allocation37_spill] sm:$0xff] }
0x178d   :  { %10871 = vpow2.f32 %v6709_v39  ;;  %v17071_v39 = vld [vmem:[#allocation35_spill] sm:$0xff] }
0x178e   :  { %10873 = vpow2.f32 %v6710_v55  ;;  %v17072_v55 = vld [vmem:[#allocation36_spill] sm:$0xff] }
0x178f   :  { %10875 = vpow2.f32 %v6711_v16  ;;  %v17074_v16 = vld [vmem:[#allocation38_spill] sm:$0xff] }
0x1790   :  { %10877 = vtanh.f32 %v6106_v38  ;;  %v17075_v38 = vld [vmem:[#allocation39_spill] sm:$0xff] }
0x1797   :  { %v10872_v23 = vpop.eup %10871 }
0x1798   :  { %v10874_v7 = vpop.eup %10873  ;;  %v6113_v15 = vadd.f32 1.0, %v10872_v23  ;;  %v17076_v23 = vld [vmem:[#allocation40_spill] sm:$0xff] }
0x1799   :  { %v6119_v58 = vadd.f32 1.0, %v10874_v7  ;;  %v10876_v2 = vpop.eup %10875  ;;  %v17077_v7 = vld [vmem:[#allocation41_spill] sm:$0xff] }
0x179a   :  { %10879 = vrcp.f32 %v6113_v15  ;;  %v10878_v9 = vpop.eup %10877  ;;  %v6126_v6 = vadd.f32 1.0, %v10876_v2  ;;  %v17078_v15 = vld [vmem:[#allocation42_spill] sm:$0xff]  ;;  %v17080_v2 = vld [vmem:[#allocation44_spill] sm:$0xff] }
0x179b   :  { %10881 = vrcp.f32 %v6119_v58  ;;  %v17079_v58 = vld [vmem:[#allocation43_spill] sm:$0xff] }
0x179c   :  { %10883 = vrcp.f32 %v6126_v6  ;;  %v17085_v6 = vld [vmem:[#allocation49_spill] sm:$0xff] }
0x17a4   :  { %v10880_v8 = vpop.eup %10879 }
0x17a5   :  { %v10882_v17 = vpop.eup %10881  ;;  %v6130_v22 = vmul.f32 %v10880_v8, %v10878_v9  ;;  %v17081_v9 = vld [vmem:[#allocation45_spill] sm:$0xff]  ;;  %v17082_v8 = vld [vmem:[#allocation46_spill] sm:$0xff] }
0x17a6   :  { %v6129_v29 = vmul.f32 %v10882_v17, %v15155_v34  ;;  %v10884_v61 = vpop.eup %10883  ;;  %v17036_v34 = vld [vmem:[#allocation69_spill] sm:$0xff]  ;;  %v17083_v17 = vld [vmem:[#allocation47_spill] sm:$0xff] }
0x17a8   :  { %v15311_v54 = vadd.f32 %v6130_v22, %v6129_v29  ;;  %v17084_v22 = vld [vmem:[#allocation48_spill] sm:$0xff]  ;;  %v17086_v29 = vld [vmem:[#allocation50_spill] sm:$0xff] }
0x17aa   :  { %10885 = vtanh.f32 %v15311_v54 }
0x17b4   :  { %v10886_v21 = vpop.eup %10885 }
0x17b5   :  { %v15314_v28 = vmul.f32 %v10886_v21, %v10884_v61  ;;  %v17087_v61 = vld [vmem:[#allocation51_spill] sm:$0xff]  ;;  %v17088_v21 = vld [vmem:[#allocation52_spill] sm:$0xff] }
0x17b7   :  { %6198 = vmatprep.mubr.f32.mxu0 %v15314_v28  ;;  %6269 = vmatprep.mubr.f32.mxu1 %v15314_v28 }
0x17b8   :  { %6199 = vmatmul.mubr.f32.vlgmr.msra.gmra.mrb[60].mxu0 %v15236_v35  ;;  %6270 = vmatmul.mubr.f32.vlgmr.msra.gmra.mrb[68].mxu1 %v15236_v35  ;;  %v17040_v35 = vld [vmem:[#allocation4_spill] sm:$0xff] }
0x17b9   :  { %10241 = vmatpush1.bf16.msra.mxu0 %v13441_v13  ;;  %10305 = vmatpush1.bf16.msra.mxu1 %v13453_v44  ;;  %v17041_v13 = vld [vmem:[#allocation5_spill] sm:$0xff]  ;;  %v17042_v44 = vld [vmem:[#allocation6_spill] sm:$0xff] }
0x17ba   :  { %10243 = vmatprep.subr.bf16.mxu0 %v13466_v11  ;;  %10307 = vmatprep.subr.bf16.mxu1 %v13468_v12  ;;  %v17043_v11 = vld [vmem:[#allocation7_spill] sm:$0xff]  ;;  %v17044_v12 = vld [vmem:[#allocation8_spill] sm:$0xff] }
0x17bd   :  { %10245 = vmatpush1.bf16.msra.mxu0 %v13480_v48  ;;  %10309 = vmatpush1.bf16.msra.mxu1 %v16485_v20  ;;  %v17045_v48 = vld [vmem:[#allocation9_spill] sm:$0xff]  ;;  %v17046_v20 = vld [vmem:[#allocation10_spill] sm:$0xff] }
0x17be   :  { %10247 = vmatprep.subr.bf16.mxu0 %v17036_v34  ;;  %10311 = vmatprep.subr.bf16.mxu1 %v17037_v43  ;;  %v17089_v34 = vld [vmem:[#allocation53_spill] sm:$0xff]  ;;  %v17090_v43 = vld [vmem:[#allocation54_spill] sm:$0xff] }
0x17c1   :  { %10249 = vmatpush1.bf16.msra.mxu0 %v17038_v50  ;;  %10313 = vmatpush1.bf16.msra.mxu1 %v17039_v31  ;;  %v17091_v50 = vld [vmem:[#allocation55_spill] sm:$0xff] }
0x17c2   :  { %10251 = vmatprep.subr.bf16.mxu0 %v17040_v35  ;;  %10315 = vmatprep.subr.bf16.mxu1 %v17041_v13  ;;  %v6494_v31 = vld [vmem:[%s15534_s12 + $0x8] sm:$0xff]  ;;  %v6496_v35 = vld [vmem:[%s15534_s12 + $0x18] sm:$0xff] }
0x17c3   :  { %v10366_v13 = vpack.c.bf16 %v6496_v35, %v6494_v31  ;;  %v6514_v31 = vld [vmem:[%s15534_s12 + $0xa8] sm:$0xff]  ;;  %v6516_v35 = vld [vmem:[%s15534_s12 + $0xb8] sm:$0xff] }
0x17c5   :  { %10253 = vmatpush1.bf16.msra.mxu0 %v17042_v44  ;;  %10317 = vmatpush1.bf16.msra.mxu1 %v17043_v11 }
0x17c6   :  { %10255 = vmatprep.subr.bf16.mxu0 %v17044_v12  ;;  %10319 = vmatprep.subr.bf16.mxu1 %v17045_v48  ;;  %v17092_v12 = vld [vmem:[#allocation65_spill] sm:$0xff] }
0x17c9   :  { %10257 = vmatpush1.bf16.msra.mxu0 %v17046_v20  ;;  %10321 = vmatpush1.bf16.msra.mxu1 %v17047_v3 }
0x17ca   :  { %10259 = vmatprep.subr.bf16.mxu0 %v17048_v47  ;;  %10323 = vmatprep.subr.bf16.mxu1 %v17049_v51 }
0x17cd   :  { %10261 = vmatpush1.bf16.msra.mxu0 %v17050_v1  ;;  %10325 = vmatpush1.bf16.msra.mxu1 %v17051_v56 }
0x17ce   :  { %10263 = vmatprep.subr.bf16.mxu0 %v17052_v18  ;;  %10327 = vmatprep.subr.bf16.mxu1 %v17053_v45 }
0x17d1   :  { %10265 = vmatpush1.bf16.msra.mxu0 %v17054_v52  ;;  %10329 = vmatpush1.bf16.msra.mxu1 %v17055_v0 }
0x17d2   :  { %10267 = vmatprep.subr.bf16.mxu0 %v17056_v62  ;;  %10331 = vmatprep.subr.bf16.mxu1 %v17057_v4 }
0x17d5   :  { %10269 = vmatpush1.bf16.msra.mxu0 %v17058_v59  ;;  %10333 = vmatpush1.bf16.msra.mxu1 %v17059_v60 }
0x17d6   :  { %10271 = vmatprep.subr.bf16.mxu0 %v17060_v10  ;;  %10335 = vmatprep.subr.bf16.mxu1 %v17061_v14 }
0x17d9   :  { %10273 = vmatpush1.bf16.msra.mxu0 %v17062_v42  ;;  %10337 = vmatpush1.bf16.msra.mxu1 %v17063_v40 }
0x17da   :  { %10275 = vmatprep.subr.bf16.mxu0 %v17064_v26  ;;  %10339 = vmatprep.subr.bf16.mxu1 %v17065_v24  ;;  %v6495_v26 = vld [vmem:[%s15534_s12 + $0x10] sm:$0xff] }
0x17dd   :  { %10277 = vmatpush1.bf16.msra.mxu0 %v17066_v5  ;;  %10341 = vmatpush1.bf16.msra.mxu1 %v17067_v41  ;;  %v6498_v5 = vld [vmem:[%s15534_s12 + $0x28] sm:$0xff] }
0x17de   :  { %10279 = vmatprep.subr.bf16.mxu0 %v17068_v46  ;;  %10343 = vmatprep.subr.bf16.mxu1 %v17069_v27 }
0x17e1   :  { %10281 = vmatpush1.bf16.msra.mxu0 %v17070_v25  ;;  %10345 = vmatpush1.bf16.msra.mxu1 %v17071_v39  ;;  %v6497_v39 = vld [vmem:[%s15534_s12 + $0x20] sm:$0xff] }
0x17e2   :  { %10283 = vmatprep.subr.bf16.mxu0 %v17072_v55  ;;  %10347 = vmatprep.subr.bf16.mxu1 %v17073_v57  ;;  %v6499_v55 = vld [vmem:[%s15534_s12 + $0x30] sm:$0xff]  ;;  %v6502_v57 = vld [vmem:[%s15534_s12 + $0x48] sm:$0xff] }
0x17e5   :  { %10285 = vmatpush1.bf16.msra.mxu0 %v17074_v16  ;;  %10349 = vmatpush1.bf16.msra.mxu1 %v17075_v38  ;;  %v6504_v16 = vld [vmem:[%s15534_s12 + $0x58] sm:$0xff]  ;;  %v10372_v38 = vpack.c.bf16 %v6499_v55, %v6497_v39 }
0x17e6   :  { %10287 = vmatprep.subr.bf16.mxu0 %v17076_v23  ;;  %10351 = vmatprep.subr.bf16.mxu1 %v17077_v7  ;;  %v17093_v23 = vmov 0.0   ;;  %v10374_v7 = vpack.c.bf16 %v6504_v16, %v6502_v57 }
0x17e9   :  { %10289 = vmatpush1.bf16.msra.mxu0 %v17078_v15  ;;  %10353 = vmatpush1.bf16.msra.mxu1 %v17079_v58  ;;  %v6501_v15 = vld [vmem:[%s15534_s12 + $0x40] sm:$0xff]  ;;  %v6503_v58 = vld [vmem:[%s15534_s12 + $0x50] sm:$0xff] }
0x17ea   :  { %10291 = vmatprep.subr.bf16.mxu0 %v17080_v2  ;;  %10355 = vmatprep.subr.bf16.mxu1 %v17081_v9  ;;  %v6506_v2 = vld [vmem:[%s15534_s12 + $0x68] sm:$0xff]  ;;  %v6508_v9 = vld [vmem:[%s15534_s12 + $0x78] sm:$0xff] }
0x17ed   :  { %10293 = vmatpush1.bf16.msra.mxu0 %v17082_v8  ;;  %10357 = vmatpush1.bf16.msra.mxu1 %v17083_v17  ;;  %v10376_v8 = vpack.c.bf16 %v6503_v58, %v6501_v15  ;;  %v10378_v17 = vpack.c.bf16 %v6508_v9, %v6506_v2 }
0x17ee   :  { %10295 = vmatprep.subr.bf16.mxu0 %v17084_v22  ;;  %10359 = vmatprep.subr.bf16.mxu1 %v17085_v6  ;;  %v6505_v22 = vld [vmem:[%s15534_s12 + $0x60] sm:$0xff]  ;;  %v6507_v6 = vld [vmem:[%s15534_s12 + $0x70] sm:$0xff] }
0x17f1   :  { %10297 = vmatpush1.bf16.msra.mxu0 %v17086_v29  ;;  %10361 = vmatpush1.bf16.msra.mxu1 %v17087_v61  ;;  %v6510_v29 = vld [vmem:[%s15534_s12 + $0x88] sm:$0xff]  ;;  %v6512_v61 = vld [vmem:[%s15534_s12 + $0x98] sm:$0xff] }
0x17f2   :  { %10299 = vmatprep.subr.bf16.mxu0 %v17088_v21  ;;  %10363 = vmatprep.subr.bf16.mxu1 %v17089_v34  ;;  %v10380_v21 = vpack.c.bf16 %v6507_v6, %v6505_v22  ;;  %v10382_v34 = vpack.c.bf16 %v6512_v61, %v6510_v29  ;;  %v17099_v6 = vld [vmem:[#allocation61_spill] sm:$0xff] }
0x17f5   :  { %10301 = vmatpush1.bf16.msra.mxu0 %v17090_v43  ;;  %10365 = vmatpush1.bf16.msra.mxu1 %v17091_v50  ;;  %v6509_v43 = vld [vmem:[%s15534_s12 + $0x80] sm:$0xff]  ;;  %v6511_v50 = vld [vmem:[%s15534_s12 + $0x90] sm:$0xff] }
0x17f6   :  { %10367 = vmatprep.subr.bf16.mxu0 %v10366_v13  ;;  %v10384_v13 = vpack.c.bf16 %v6511_v50, %v6509_v43 }
0x188b   :  { %v6200_v44 = vpop.f32.mrb[60].mxu0  ;;  %v6271_v11 = vpop.f32.mrb[68].mxu1 }
0x188c   :  { %v6201_v48 = vadd.f32 %v6200_v44, %v17092_v12  ;;  %v6202_v20 = vpop.f32.mrb[61].mxu0  ;;  %v6273_v3 = vpop.f32.mrb[69].mxu1  ;;  %v6272_v45 = vadd.f32 %v6271_v11, %v14449_v37  ;;  %v6493_v37 = vld [vmem:[%s15534_s12] sm:$0xff]  ;;  %v10386_v44 = vpack.c.bf16 %v6516_v35, %v6514_v31  ;;  %v6515_v12 = vld [vmem:[%s15534_s12 + $0xb0] sm:$0xff] }
0x188d   :  { %v6203_v47 = vadd.f32 %v6202_v20, %v14440_v33  ;;  %v6274_v56 = vadd.f32 %v6273_v3, %v14445_v32  ;;  %v10368_v27 = vpack.c.bf16 %v6495_v26, %v6493_v37  ;;  %v6513_v11 = vld [vmem:[%s15534_s12 + $0xa0] sm:$0xff]  ;;  %v6520_v20 = vld [vmem:[%s15534_s12 + $0xd8] sm:$0xff] }
0x188e   :  { %v6712_v51 = vmul.f32 -1.442695, %v6201_v48  ;;  %v6518_v48 = vld [vmem:[%s15534_s12 + $0xc8] sm:$0xff]  ;;  %v10388_v3 = vpack.c.bf16 %v6515_v12, %v6513_v11 }
0x188f   :  { %v6713_v1 = vmul.f32 -1.442695, %v6203_v47  ;;  %v6714_v18 = vmul.f32 -1.442695, %v6274_v56  ;;  %v10390_v47 = vpack.c.bf16 %v6520_v20, %v6518_v48  ;;  %v6522_v56 = vld [vmem:[%s15534_s12 + $0xe8] sm:$0xff] }
0x1890   :  { %10887 = vpow2.f32 %v6712_v51  ;;  %v6517_v51 = vld [vmem:[%s15534_s12 + $0xc0] sm:$0xff]  ;;  %v17100_v12 = vld [vmem:[#allocation99_spill] sm:$0xff] }
0x1891   :  { %10889 = vpow2.f32 %v6713_v1  ;;  %v6519_v1 = vld [vmem:[%s15534_s12 + $0xd0] sm:$0xff] }
0x1892   :  { %10891 = vpow2.f32 %v6714_v18  ;;  %v6524_v18 = vld [vmem:[%s15534_s12 + $0xf8] sm:$0xff] }
0x1893   :  { %10893 = vtanh.f32 %v6272_v45  ;;  %v10392_v45 = vpack.c.bf16 %v6519_v1, %v6517_v51 }
0x189a   :  { %v10888_v52 = vpop.eup %10887 }
0x189b   :  { %v10890_v0 = vpop.eup %10889  ;;  %v6279_v62 = vadd.f32 1.0, %v10888_v52  ;;  %v10394_v52 = vpack.c.bf16 %v6524_v18, %v6522_v56 }
0x189c   :  { %v6285_v4 = vadd.f32 1.0, %v10890_v0  ;;  %v10892_v59 = vpop.eup %10891  ;;  %v6521_v0 = vld [vmem:[%s15534_s12 + $0xe0] sm:$0xff] }
0x189d   :  { %10895 = vrcp.f32 %v6279_v62  ;;  %v10894_v60 = vpop.eup %10893  ;;  %v6292_v42 = vadd.f32 1.0, %v10892_v59  ;;  %v6523_v62 = vld [vmem:[%s15534_s12 + $0xf0] sm:$0xff]  ;;  %v17094_v59 = vld [vmem:[#allocation95_spill] sm:$0xff] }
0x189e   :  { %10897 = vrcp.f32 %v6285_v4  ;;  %v10396_v4 = vpack.c.bf16 %v6523_v62, %v6521_v0 }
0x189f   :  { %10899 = vrcp.f32 %v6292_v42 }
0x18a7   :  { %v10896_v33 = vpop.eup %10895 }
0x18a8   :  { %v10898_v10 = vpop.eup %10897  ;;  %v6296_v14 = vmul.f32 %v10896_v33, %v10894_v60  ;;  %v6467_v60 = vrot.slane %v17094_v59, 6  ;;  %v17095_v33 = vld [vmem:[#allocation96_spill] sm:$0xff] }
0x18a9   :  { %v6295_v40 = vmul.f32 %v10898_v10, %v15233_v63  ;;  %v10900_v24 = vpop.eup %10899  ;;  %v6500_v63 = vld [vmem:[%s15534_s12 + $0x38] sm:$0xff]  ;;  %v6470_v10 = vrot.slane %v17095_v33, 4 }
0x18aa   :  { %v10370_v25 = vpack.c.bf16 %v6500_v63, %v6498_v5 }
0x18ab   :  { %v6297_v32 = vadd.f32 %v6296_v14, %v6295_v40  ;;  %v17096_v14 = vld [vmem:[#allocation98_spill] sm:$0xff]  ;;  %v17097_v40 = vld [vmem:[#allocation97_spill] sm:$0xff] }
0x18ac   :  { %v6473_v42 = vrot.slane %v17096_v14, 2 }
0x18ad   :  { %10901 = vtanh.f32 %v6297_v32  ;;  %v6485_v32 = vsel %vm6484_vm0, %v17097_v40, %v6467_v60 }
0x18ae   :  { %v6487_v37 = vsel %vm6486_vm1, %v6485_v32, %v6470_v10 }
0x18af   :  { %v6489_v26 = vsel %vm6488_vm2, %v6487_v37, %v6473_v42 }
0x18b7   :  { %v10902_v41 = vpop.eup %10901 }
0x18b8   :  { %v6299_v46 = vmul.f32 %v10902_v41, %v10900_v24 }
0x18ba   :  { %6364 = vmatprep.mubr.f32.mxu0 %v6299_v46  ;;  %6435 = vmatprep.mubr.f32.mxu1 %v6299_v46 }
0x18bb   :  { %6365 = vmatmul.mubr.f32.vlgmr.msra.gmra.mrb[62].mxu0 %v15314_v28  ;;  %6436 = vmatmul.mubr.f32.vlgmr.msra.gmra.mrb[70].mxu1 %v15314_v28 }
0x18bc   :  { %10369 = vmatpush1.bf16.msra.mxu0 %v10368_v27  ;;  %6601 = vmatprep.mubr.f32.mxu0 %v17093_v23 }
0x18bd   :  { %10371 = vmatprep.subr.bf16.mxu0 %v10370_v25 }
0x18c0   :  { %10373 = vmatpush1.bf16.msra.mxu0 %v10372_v38 }
0x18c1   :  { %10375 = vmatprep.subr.bf16.mxu0 %v10374_v7 }
0x18c4   :  { %10377 = vmatpush1.bf16.msra.mxu0 %v10376_v8 }
0x18c5   :  { %10379 = vmatprep.subr.bf16.mxu0 %v10378_v17  ;;  %v17098_v17 = vld [vmem:[#allocation60_spill] sm:$0xff] }
0x18c8   :  { %10381 = vmatpush1.bf16.msra.mxu0 %v10380_v21 }
0x18c9   :  { %10383 = vmatprep.subr.bf16.mxu0 %v10382_v34 }
0x18cc   :  { %10385 = vmatpush1.bf16.msra.mxu0 %v10384_v13  ;;  %v6479_v13 = vrot.slane %v15314_v28, 4 }
0x18cd   :  { %10387 = vmatprep.subr.bf16.mxu0 %v10386_v44 }
0x18d0   :  { %10389 = vmatpush1.bf16.msra.mxu0 %v10388_v3 }
0x18d1   :  { %10391 = vmatprep.subr.bf16.mxu0 %v10390_v47 }
0x18d4   :  { %10393 = vmatpush1.bf16.msra.mxu0 %v10392_v45 }
0x18d5   :  { %10395 = vmatprep.subr.bf16.mxu0 %v10394_v52 }
0x18d8   :  { %10397 = vmatpush1.bf16.msra.mxu0 %v10396_v4 }
0x18db   :  { %6602 = vmatmul.mubr.f32.vlgmr.msra.gmra.mrb[64].mxu0 %v6489_v26 }
0x18dc   :  { %6607 = vmatprep.mubr.f32.mxu0 %v17093_v23 }
0x198e   :  { %v6366_v24 = vpop.f32.mrb[62].mxu0  ;;  %v6437_v5 = vpop.f32.mrb[70].mxu1 }
0x198f   :  { %v6367_v63 = vadd.f32 %v6366_v24, %v17035_v19  ;;  %v6368_v41 = vpop.f32.mrb[63].mxu0  ;;  %v6439_v46 = vpop.f32.mrb[71].mxu1  ;;  %v6438_v16 = vadd.f32 %v6437_v5, %v14356_v36 }
0x1990   :  { %v6369_v27 = vadd.f32 %v6368_v41, %v16575_v49  ;;  %v6440_v55 = vadd.f32 %v6439_v46, %v16576_v53  ;;  %v6525_v49 = vld [vmem:[%s15535_s13] sm:$0x3] }
0x1991   :  { %v6715_v25 = vmul.f32 -1.442695, %v6367_v63  ;;  %v6530_v36 = vrot.slane %v6525_v49, %v17098_v17  ;;  %v6534_v29 = vrot.slane %v6525_v49, %v17099_v6 }
0x1992   :  { %v6716_v39 = vmul.f32 -1.442695, %v6369_v27  ;;  %v6717_v57 = vmul.f32 -1.442695, %v6440_v55 }
0x1993   :  { %10903 = vpow2.f32 %v6715_v25 }
0x1994   :  { %10905 = vpow2.f32 %v6716_v39 }
0x1995   :  { %10907 = vpow2.f32 %v6717_v57 }
0x1996   :  { %10909 = vtanh.f32 %v6438_v16 }
0x199d   :  { %v10904_v38 = vpop.eup %10903 }
0x199e   :  { %v10906_v7 = vpop.eup %10905  ;;  %v6445_v23 = vadd.f32 1.0, %v10904_v38 }
0x199f   :  { %v6451_v15 = vadd.f32 1.0, %v10906_v7  ;;  %v10908_v19 = vpop.eup %10907 }
0x19a0   :  { %10911 = vrcp.f32 %v6445_v23  ;;  %v10910_v58 = vpop.eup %10909  ;;  %v6458_v8 = vadd.f32 1.0, %v10908_v19 }
0x19a1   :  { %10913 = vrcp.f32 %v6451_v15 }
0x19a2   :  { %10915 = vrcp.f32 %v6458_v8 }
0x19aa   :  { %v10912_v2 = vpop.eup %10911 }
0x19ab   :  { %v10914_v9 = vpop.eup %10913  ;;  %v6462_v53 = vmul.f32 %v10912_v2, %v10910_v58 }
0x19ac   :  { %v6461_v22 = vmul.f32 %v10914_v9, %v15311_v54  ;;  %v10916_v31 = vpop.eup %10915  ;;  %v6476_v54 = vrot.slane %v15158_v30, 6 }
0x19ae   :  { %v6463_v61 = vadd.f32 %v6462_v53, %v6461_v22  ;;  %v6603_v21 = vpop.f32.mrb[64].mxu0  ;;  %v6490_v48 = vsel %vm6484_vm0, %v17100_v12, %v6476_v54 }
0x19af   :  { %v6604_v34 = vadd.f32 %v6603_v21, %v6530_v36  ;;  %v6605_v43 = vpop.f32.mrb[65].mxu0  ;;  %v6491_v20 = vsel %vm6486_vm1, %v6490_v48, %v6479_v13 }
0x19b0   :  { %v6606_v50 = vadd.f32 %v6605_v43, %v6534_v29  ;;  %10917 = vtanh.f32 %v6463_v61 }
0x19b1   :  { %6614 = vst [vmem:[%s15536_s14] sm:$0xff] %v6604_v34 }
0x19b2   :  { %6615 = vst [vmem:[%s15536_s14 + $0x8] sm:$0xff] %v6606_v50 }
0x19ba   :  { %v10918_v35 = vpop.eup %10917 }
0x19bb   :  { %v6465_v44 = vmul.f32 %v10918_v35, %v10916_v31 }
0x19bd   :  { %v6482_v11 = vrot.slane %v6465_v44, 2 }
0x19bf   :  { %v6492_v3 = vsel %vm6488_vm2, %v6491_v20, %v6482_v11 }
0x19c0   :  { %6608 = vmatmul.mubr.f32.gmra.mrb[66].mxu0 %v6492_v3 }
0x1a93   :  { %v6609_v47 = vpop.f32.mrb[66].mxu0 }
0x1a94   :  { %v6610_v51 = vadd.f32 %v6609_v47, %v6530_v36  ;;  %v6611_v1 = vpop.f32.mrb[67].mxu0 }
0x1a95   :  { %v6612_v56 = vadd.f32 %v6611_v1, %v6534_v29 }
0x1a96   :  { %6616 = vst [vmem:[%s15536_s14 + $0x10] sm:$0xff] %v6610_v51 }
0x1a97   :  { %6617 = vst [vmem:[%s15536_s14 + $0x18] sm:$0xff] %v6612_v56 }

</bundles_post_ra>
